<compile_context>
chip_gen: v7x
topology: tpu7x:2x2x1
jax: 0.10.0
libtpu: 0.0.40
codegen_flags: <defaults>
</compile_context>

<pallas_src>
import jax
import jax.numpy as jnp
from jax.experimental import pallas as pl
from jax.experimental.pallas import tpu as pltpu

# ---- static network configuration -------------------------------------------
NUM_BLOCKS = 2          # num_resnet_blocks = n_hidden_layers
LAYERS_PER_BLOCK = 3    # DenseResNet num_layers_per_block (fixed to 3 by DNN)
HIDDEN = 128            # n_hidden_features == num_neurons
DIM_IN = 3
DIM_OUT = 1
NUM_RES_LAYERS = NUM_BLOCKS * LAYERS_PER_BLOCK
CHUNKS = 4              # row sub-chunks per tile (MXU/EUP overlap)
MIN_TILE = CHUNKS * 128 # keeps each sub-chunk (>=128, HIDDEN)-aligned


# ---- Pallas kernel: full fused forward pass for one tile of rows ------------
def dnn_kernel(z_ref, fw_ref, fb_ref, rw_ref, rb_ref, lwt_ref, lbias_ref,
               o_ref):
    tile_m = z_ref.shape[0]
    cm = tile_m // CHUNKS                       # rows per sub-chunk

    fw = fw_ref[...]                            # (3, HIDDEN)  f32 (folded scaling)
    fb = fb_ref[...]                            # (1, HIDDEN)  f32
    lwt = lwt_ref[...]                          # (1, HIDDEN)  f32
    lbias = lbias_ref[...]                      # (1, DIM_OUT) f32

    # --- first layer + tanh, per chunk (K=3 dot kept in f32) -----------------
    h = []
    for c in range(CHUNKS):
        zc = z_ref[pl.ds(c * cm, cm), :]        # (cm, 3) f32
        pre = jnp.dot(zc, fw, preferred_element_type=jnp.float32) + fb
        h.append(jnp.tanh(pre))

    # --- ResNet blocks: z = tanh(W z + b) x3, residual add --------------------
    # Weights arrive bf16 (cast once in the wrapper); activations are cast to
    # bf16 immediately before each dot; accumulation / bias / tanh stay f32.
    for i in range(NUM_BLOCKS):
        zlist = h
        for j in range(LAYERS_PER_BLOCK):
            l = i * LAYERS_PER_BLOCK + j
            w = rw_ref[l]                       # (HIDDEN, HIDDEN) bf16
            b = rb_ref[l]                       # (1, HIDDEN) f32
            new = []
            for c in range(CHUNKS):
                acc = jnp.dot(zlist[c].astype(jnp.bfloat16), w,
                              preferred_element_type=jnp.float32)
                new.append(jnp.tanh(acc + b))
            zlist = new
        h = [zlist[c] + h[c] for c in range(CHUNKS)]

    # --- final linear layer (dim_out == 1): VPU/XLU lane reduction -----------
    for c in range(CHUNKS):
        o_ref[pl.ds(c * cm, cm), :] = (
            jnp.sum(h[c] * lwt, axis=-1, keepdims=True) + lbias)


# ---- wrapper -----------------------------------------------------------------
def dnn_forward(g, lb, ub, params, *, tile_m=2048):
    """g: (B, 3, N) float array.  Returns (B*N, 1) float32."""
    B, C, N = g.shape
    assert C == 3, "DNN expects 3 input channels (x, y, t)"
    # Flatten exactly like the PyTorch forward:
    # x = g[:,0,:].flatten(); ...; stack((x,y,t), -1).view(-1, 3)
    z = jnp.stack([g[:, 0, :].reshape(-1),
                   g[:, 1, :].reshape(-1),
                   g[:, 2, :].reshape(-1)], axis=-1).astype(jnp.float32)
    M = z.shape[0]

    # Tile sizing: round to MIN_TILE, and cap at ceil(M/2) rounded up so the
    # grid has >= 2 "parallel" steps whenever M > MIN_TILE (keeps both v7x
    # TensorCores busy).  tile_m=2048 fits every generation's default scoped
    # VMEM; raise vmem_limit_bytes before pushing past ~4096.
    tile_m = max(MIN_TILE, (tile_m // MIN_TILE) * MIN_TILE)
    half_r = -(-(-(-M // 2)) // MIN_TILE) * MIN_TILE     # ceil(ceil(M/2)/MIN)*MIN
    tile_m = max(MIN_TILE, min(tile_m, half_r))

    num_tiles = pl.cdiv(M, tile_m)
    M_pad = num_tiles * tile_m
    if M_pad != M:
        # Padded rows are computed (finite everywhere) and sliced off below.
        z = jnp.pad(z, ((0, M_pad - M), (0, 0)))

    fw, fb, rw, rb, lw, lbias = params

    # Fold the affine input scaling  x_s = z * s + t  with
    #   s = 2/(ub-lb),  t = -2*lb/(ub-lb) - 1
    # into the first linear layer: x_s @ fw + fb = z @ (s[:,None]*fw) + (t@fw + fb).
    # (Changes f32 rounding order vs. the reference; matches to ~1e-5.)
    lb1 = jnp.asarray(lb, jnp.float32).reshape(DIM_IN)
    ub1 = jnp.asarray(ub, jnp.float32).reshape(DIM_IN)
    s = 2.0 / (ub1 - lb1)
    t = (-2.0 * lb1 / (ub1 - lb1)) - 1.0
    fw_eff = (fw * s[:, None]).astype(jnp.float32)       # (3, HIDDEN)
    fb_eff = (fb + t @ fw).reshape(1, HIDDEN)            # (1, HIDDEN)

    rw_bf16 = rw.astype(jnp.bfloat16)                    # MXU-native operands
    lw_t = lw.reshape(HIDDEN, DIM_OUT).T                 # (1, HIDDEN), lane-dense

    out = pl.pallas_call(
        dnn_kernel,
        out_shape=jax.ShapeDtypeStruct((M_pad, DIM_OUT), jnp.float32),
        grid=(num_tiles,),
        in_specs=[
            pl.BlockSpec((tile_m, DIM_IN), lambda i: (i, 0)),        # z rows
            pl.BlockSpec((DIM_IN, HIDDEN), lambda i: (0, 0)),        # first W'
            pl.BlockSpec((1, HIDDEN), lambda i: (0, 0)),             # first b'
            pl.BlockSpec((NUM_RES_LAYERS, HIDDEN, HIDDEN),
                         lambda i: (0, 0, 0)),                       # res Ws (bf16)
            pl.BlockSpec((NUM_RES_LAYERS, 1, HIDDEN),
                         lambda i: (0, 0, 0)),                       # res bs
            pl.BlockSpec((1, HIDDEN), lambda i: (0, 0)),             # last W^T
            pl.BlockSpec((1, DIM_OUT), lambda i: (0, 0)),            # last b
        ],
        out_specs=pl.BlockSpec((tile_m, DIM_OUT), lambda i: (i, 0)),
        compiler_params=pltpu.CompilerParams(
            dimension_semantics=("parallel",)),
    )(z, fw_eff, fb_eff, rw_bf16, rb, lw_t, lbias)
    return out[:M]


# ---- deterministic parameter init (shapes from DenseResNet.__init__) --------
def init_params(key):
    ks = jax.random.split(key, 4)
    fw = jax.random.normal(ks[0], (DIM_IN, HIDDEN), jnp.float32) / jnp.sqrt(DIM_IN)
    fb = jnp.zeros((1, HIDDEN), jnp.float32)
    rw = jax.random.normal(ks[1], (NUM_RES_LAYERS, HIDDEN, HIDDEN),
                           jnp.float32) / jnp.sqrt(HIDDEN)
    rb = 0.01 * jax.random.normal(ks[2], (NUM_RES_LAYERS, 1, HIDDEN), jnp.float32)
    lw = jax.random.normal(ks[3], (HIDDEN, DIM_OUT), jnp.float32) / jnp.sqrt(HIDDEN)
    lbias = jnp.zeros((1, DIM_OUT), jnp.float32)
    return fw, fb, rw, rb, lw, lbias


# ---- pure-JAX references -----------------------------------------------------
def _flatten_input(g):
    return jnp.stack([g[:, 0, :].reshape(-1),
                      g[:, 1, :].reshape(-1),
                      g[:, 2, :].reshape(-1)], axis=-1).astype(jnp.float32)


def dnn_reference_f32(g, lb, ub, params):
    """Exact f32 semantics of the PyTorch module."""
    fw, fb, rw, rb, lw, lbias = params
    z = _flatten_input(g)
    lb = jnp.asarray(lb, jnp.float32).reshape(1, DIM_IN)
    ub = jnp.asarray(ub, jnp.float32).reshape(1, DIM_IN)
    x = 2.0 * (z - lb) / (ub - lb) - 1.0
    h = jnp.tanh(x @ fw + fb)
    for i in range(NUM_BLOCKS):
        zz = h
        for j in range(LAYERS_PER_BLOCK):
            l = i * LAYERS_PER_BLOCK + j
            zz = jnp.tanh(zz @ rw[l] + rb[l])
        h = zz + h
    return h @ lw + lbias


def dnn_reference_mixed(g, lb, ub, params):
    """Mirror of the kernel's dtype/fusion choices (bf16 MXU, f32 accum)."""
    fw, fb, rw, rb, lw, lbias = params
    z = _flatten_input(g)
    lb1 = jnp.asarray(lb, jnp.float32).reshape(DIM_IN)
    ub1 = jnp.asarray(ub, jnp.float32).reshape(DIM_IN)
    s = 2.0 / (ub1 - lb1)
    t = (-2.0 * lb1 / (ub1 - lb1)) - 1.0
    fw_eff = fw * s[:, None]
    fb_eff = (fb + t @ fw).reshape(1, HIDDEN)
    rw_bf = rw.astype(jnp.bfloat16)
    h = jnp.tanh(jnp.dot(z, fw_eff, preferred_element_type=jnp.float32) + fb_eff)
    for i in range(NUM_BLOCKS):
        zz = h
        for j in range(LAYERS_PER_BLOCK):
            l = i * LAYERS_PER_BLOCK + j
            zz = jnp.tanh(jnp.dot(zz.astype(jnp.bfloat16), rw_bf[l],
                                  preferred_element_type=jnp.float32) + rb[l])
        h = zz + h
    lw_t = lw.reshape(HIDDEN, DIM_OUT).T
    return jnp.sum(h * lw_t, axis=-1, keepdims=True) + lbias


if __name__ == "__main__":
    key = jax.random.PRNGKey(0)
    k_g, k_p = jax.random.split(key)

    # M = B*N = 2000 points -> tile_m capped to 1024 -> 2 grid steps (both
    # v7x TensorCores used), also exercises the non-divisible padding path.
    B, N = 2, 1000
    g = jax.random.uniform(k_g, (B, 3, N), jnp.float32, minval=0.0, maxval=1.0)
    lb = jnp.array([0.0, 0.0, 0.0], jnp.float32)
    ub = jnp.array([1.0, 1.0, 1.0], jnp.float32)

    params = init_params(k_p)

    out = dnn_forward(g, lb, ub, params)
    out = jax.block_until_ready(out)
    assert out.shape == (B * N, DIM_OUT)

    # Tight check vs. a reference with identical mixed-precision choices.
    ref_mixed = dnn_reference_mixed(g, lb, ub, params)
    err_mixed = float(jnp.max(jnp.abs(out - ref_mixed)))
    assert jnp.allclose(out, ref_mixed, atol=1e-3, rtol=1e-3), (
        f"mixed-precision mismatch: max abs err {err_mixed}")

    # Loose sanity check vs. the pure-f32 module semantics (bf16 MXU operands
    # introduce ~1e-3-level absolute error on O(1) outputs).
    ref_f32 = dnn_reference_f32(g, lb, ub, params)
    err_f32 = float(jnp.max(jnp.abs(out - ref_f32)))
    assert jnp.allclose(out, ref_f32, atol=5e-2, rtol=5e-2), (
        f"f32-reference mismatch: max abs err {err_f32}")

    print("KERNEL_OK")
</pallas_src>

<mosaic_0001>
module attributes {stable_mosaic.version = 11 : i64} {
  func.func @dnn_kernel(%arg0: i32, %arg1: memref<1024x3xf32, #tpu.memory_space<vmem>>, %arg2: memref<3x128xf32, #tpu.memory_space<vmem>>, %arg3: memref<1x128xf32, #tpu.memory_space<vmem>>, %arg4: memref<6x128x128xbf16, #tpu.memory_space<vmem>>, %arg5: memref<6x1x128xf32, #tpu.memory_space<vmem>>, %arg6: memref<1x128xf32, #tpu.memory_space<vmem>>, %arg7: memref<1x1xf32, #tpu.memory_space<vmem>>, %arg8: memref<1024x1xf32, #tpu.memory_space<vmem>>) attributes {dimension_semantics = [#tpu.dimension_semantics<parallel>], iteration_bounds = array<i64: 2>, scalar_prefetch = 0 : i64, scratch_operands = 0 : i64, tpu.core_type = #tpu.core_type<tc>, window_params = [{transform_indices = @transform_0, window_bounds = array<i64: 1024, 3>}, {pipeline_mode = #tpu.pipeline_mode<synchronous>, transform_indices = @transform_1, window_bounds = array<i64: 3, 128>}, {pipeline_mode = #tpu.pipeline_mode<synchronous>, transform_indices = @transform_2, window_bounds = array<i64: 1, 128>}, {pipeline_mode = #tpu.pipeline_mode<synchronous>, transform_indices = @transform_3, window_bounds = array<i64: 6, 128, 128>}, {pipeline_mode = #tpu.pipeline_mode<synchronous>, transform_indices = @transform_4, window_bounds = array<i64: 6, 1, 128>}, {pipeline_mode = #tpu.pipeline_mode<synchronous>, transform_indices = @transform_5, window_bounds = array<i64: 1, 128>}, {pipeline_mode = #tpu.pipeline_mode<synchronous>, transform_indices = @transform_6, window_bounds = array<i64: 1, 1>}, {transform_indices = @transform_7, window_bounds = array<i64: 1024, 1>}]} {
    %c0 = arith.constant 0 : index
    %c0_0 = arith.constant 0 : index
    %0 = vector.load %arg2[%c0, %c0_0] : memref<3x128xf32, #tpu.memory_space<vmem>>, vector<3x128xf32>
    %c0_1 = arith.constant 0 : index
    %c0_2 = arith.constant 0 : index
    %1 = vector.load %arg3[%c0_1, %c0_2] : memref<1x128xf32, #tpu.memory_space<vmem>>, vector<1x128xf32>
    %c0_3 = arith.constant 0 : index
    %c0_4 = arith.constant 0 : index
    %2 = vector.load %arg6[%c0_3, %c0_4] : memref<1x128xf32, #tpu.memory_space<vmem>>, vector<1x128xf32>
    %c0_5 = arith.constant 0 : index
    %c0_6 = arith.constant 0 : index
    %3 = vector.load %arg7[%c0_5, %c0_6] : memref<1x1xf32, #tpu.memory_space<vmem>>, vector<1x1xf32>
    %c0_7 = arith.constant 0 : index
    %c0_8 = arith.constant 0 : index
    %4 = vector.load %arg1[%c0_7, %c0_8] : memref<1024x3xf32, #tpu.memory_space<vmem>>, vector<256x3xf32>
    %cst = arith.constant dense<0.000000e+00> : vector<256x128xf32>
    %5 = tpu.matmul %4, %0, %cst {dimension_numbers = #tpu.dot_dimension_numbers<[1], [0], [0], [1], [0, 0, 1, 1], [], []>} : vector<256x3xf32>, vector<3x128xf32>, vector<256x128xf32> -> vector<256x128xf32>
    %6 = vector.broadcast %1 : vector<1x128xf32> to vector<256x128xf32>
    %7 = arith.addf %5, %6 : vector<256x128xf32>
    %8 = math.tanh %7 : vector<256x128xf32>
    %c256 = arith.constant 256 : index
    %c0_9 = arith.constant 0 : index
    %9 = vector.load %arg1[%c256, %c0_9] : memref<1024x3xf32, #tpu.memory_space<vmem>>, vector<256x3xf32>
    %cst_10 = arith.constant dense<0.000000e+00> : vector<256x128xf32>
    %10 = tpu.matmul %9, %0, %cst_10 {dimension_numbers = #tpu.dot_dimension_numbers<[1], [0], [0], [1], [0, 0, 1, 1], [], []>} : vector<256x3xf32>, vector<3x128xf32>, vector<256x128xf32> -> vector<256x128xf32>
    %11 = vector.broadcast %1 : vector<1x128xf32> to vector<256x128xf32>
    %12 = arith.addf %10, %11 : vector<256x128xf32>
    %13 = math.tanh %12 : vector<256x128xf32>
    %c512 = arith.constant 512 : index
    %c0_11 = arith.constant 0 : index
    %14 = vector.load %arg1[%c512, %c0_11] : memref<1024x3xf32, #tpu.memory_space<vmem>>, vector<256x3xf32>
    %cst_12 = arith.constant dense<0.000000e+00> : vector<256x128xf32>
    %15 = tpu.matmul %14, %0, %cst_12 {dimension_numbers = #tpu.dot_dimension_numbers<[1], [0], [0], [1], [0, 0, 1, 1], [], []>} : vector<256x3xf32>, vector<3x128xf32>, vector<256x128xf32> -> vector<256x128xf32>
    %16 = vector.broadcast %1 : vector<1x128xf32> to vector<256x128xf32>
    %17 = arith.addf %15, %16 : vector<256x128xf32>
    %18 = math.tanh %17 : vector<256x128xf32>
    %c768 = arith.constant 768 : index
    %c0_13 = arith.constant 0 : index
    %19 = vector.load %arg1[%c768, %c0_13] : memref<1024x3xf32, #tpu.memory_space<vmem>>, vector<256x3xf32>
    %cst_14 = arith.constant dense<0.000000e+00> : vector<256x128xf32>
    %20 = tpu.matmul %19, %0, %cst_14 {dimension_numbers = #tpu.dot_dimension_numbers<[1], [0], [0], [1], [0, 0, 1, 1], [], []>} : vector<256x3xf32>, vector<3x128xf32>, vector<256x128xf32> -> vector<256x128xf32>
    %21 = vector.broadcast %1 : vector<1x128xf32> to vector<256x128xf32>
    %22 = arith.addf %20, %21 : vector<256x128xf32>
    %23 = math.tanh %22 : vector<256x128xf32>
    %c0_15 = arith.constant 0 : index
    %c0_16 = arith.constant 0 : index
    %c0_17 = arith.constant 0 : index
    %24 = vector.load %arg4[%c0_15, %c0_16, %c0_17] : memref<6x128x128xbf16, #tpu.memory_space<vmem>>, vector<1x128x128xbf16>
    %25 = vector.shape_cast %24 : vector<1x128x128xbf16> to vector<128x128xbf16>
    %c0_18 = arith.constant 0 : index
    %c0_19 = arith.constant 0 : index
    %c0_20 = arith.constant 0 : index
    %26 = vector.load %arg5[%c0_18, %c0_19, %c0_20] : memref<6x1x128xf32, #tpu.memory_space<vmem>>, vector<1x1x128xf32>
    %27 = vector.shape_cast %26 : vector<1x1x128xf32> to vector<1x128xf32>
    %28 = arith.truncf %8 : vector<256x128xf32> to vector<256x128xbf16>
    %cst_21 = arith.constant dense<0.000000e+00> : vector<256x128xf32>
    %29 = tpu.matmul %28, %25, %cst_21 {dimension_numbers = #tpu.dot_dimension_numbers<[1], [0], [0], [1], [0, 0, 1, 1], [], []>} : vector<256x128xbf16>, vector<128x128xbf16>, vector<256x128xf32> -> vector<256x128xf32>
    %30 = vector.broadcast %27 : vector<1x128xf32> to vector<256x128xf32>
    %31 = arith.addf %29, %30 : vector<256x128xf32>
    %32 = math.tanh %31 : vector<256x128xf32>
    %33 = arith.truncf %13 : vector<256x128xf32> to vector<256x128xbf16>
    %cst_22 = arith.constant dense<0.000000e+00> : vector<256x128xf32>
    %34 = tpu.matmul %33, %25, %cst_22 {dimension_numbers = #tpu.dot_dimension_numbers<[1], [0], [0], [1], [0, 0, 1, 1], [], []>} : vector<256x128xbf16>, vector<128x128xbf16>, vector<256x128xf32> -> vector<256x128xf32>
    %35 = vector.broadcast %27 : vector<1x128xf32> to vector<256x128xf32>
    %36 = arith.addf %34, %35 : vector<256x128xf32>
    %37 = math.tanh %36 : vector<256x128xf32>
    %38 = arith.truncf %18 : vector<256x128xf32> to vector<256x128xbf16>
    %cst_23 = arith.constant dense<0.000000e+00> : vector<256x128xf32>
    %39 = tpu.matmul %38, %25, %cst_23 {dimension_numbers = #tpu.dot_dimension_numbers<[1], [0], [0], [1], [0, 0, 1, 1], [], []>} : vector<256x128xbf16>, vector<128x128xbf16>, vector<256x128xf32> -> vector<256x128xf32>
    %40 = vector.broadcast %27 : vector<1x128xf32> to vector<256x128xf32>
    %41 = arith.addf %39, %40 : vector<256x128xf32>
    %42 = math.tanh %41 : vector<256x128xf32>
    %43 = arith.truncf %23 : vector<256x128xf32> to vector<256x128xbf16>
    %cst_24 = arith.constant dense<0.000000e+00> : vector<256x128xf32>
    %44 = tpu.matmul %43, %25, %cst_24 {dimension_numbers = #tpu.dot_dimension_numbers<[1], [0], [0], [1], [0, 0, 1, 1], [], []>} : vector<256x128xbf16>, vector<128x128xbf16>, vector<256x128xf32> -> vector<256x128xf32>
    %45 = vector.broadcast %27 : vector<1x128xf32> to vector<256x128xf32>
    %46 = arith.addf %44, %45 : vector<256x128xf32>
    %47 = math.tanh %46 : vector<256x128xf32>
    %c1 = arith.constant 1 : index
    %c0_25 = arith.constant 0 : index
    %c0_26 = arith.constant 0 : index
    %48 = vector.load %arg4[%c1, %c0_25, %c0_26] : memref<6x128x128xbf16, #tpu.memory_space<vmem>>, vector<1x128x128xbf16>
    %49 = vector.shape_cast %48 : vector<1x128x128xbf16> to vector<128x128xbf16>
    %c1_27 = arith.constant 1 : index
    %c0_28 = arith.constant 0 : index
    %c0_29 = arith.constant 0 : index
    %50 = vector.load %arg5[%c1_27, %c0_28, %c0_29] : memref<6x1x128xf32, #tpu.memory_space<vmem>>, vector<1x1x128xf32>
    %51 = vector.shape_cast %50 : vector<1x1x128xf32> to vector<1x128xf32>
    %52 = arith.truncf %32 : vector<256x128xf32> to vector<256x128xbf16>
    %cst_30 = arith.constant dense<0.000000e+00> : vector<256x128xf32>
    %53 = tpu.matmul %52, %49, %cst_30 {dimension_numbers = #tpu.dot_dimension_numbers<[1], [0], [0], [1], [0, 0, 1, 1], [], []>} : vector<256x128xbf16>, vector<128x128xbf16>, vector<256x128xf32> -> vector<256x128xf32>
    %54 = vector.broadcast %51 : vector<1x128xf32> to vector<256x128xf32>
    %55 = arith.addf %53, %54 : vector<256x128xf32>
    %56 = math.tanh %55 : vector<256x128xf32>
    %57 = arith.truncf %37 : vector<256x128xf32> to vector<256x128xbf16>
    %cst_31 = arith.constant dense<0.000000e+00> : vector<256x128xf32>
    %58 = tpu.matmul %57, %49, %cst_31 {dimension_numbers = #tpu.dot_dimension_numbers<[1], [0], [0], [1], [0, 0, 1, 1], [], []>} : vector<256x128xbf16>, vector<128x128xbf16>, vector<256x128xf32> -> vector<256x128xf32>
    %59 = vector.broadcast %51 : vector<1x128xf32> to vector<256x128xf32>
    %60 = arith.addf %58, %59 : vector<256x128xf32>
    %61 = math.tanh %60 : vector<256x128xf32>
    %62 = arith.truncf %42 : vector<256x128xf32> to vector<256x128xbf16>
    %cst_32 = arith.constant dense<0.000000e+00> : vector<256x128xf32>
    %63 = tpu.matmul %62, %49, %cst_32 {dimension_numbers = #tpu.dot_dimension_numbers<[1], [0], [0], [1], [0, 0, 1, 1], [], []>} : vector<256x128xbf16>, vector<128x128xbf16>, vector<256x128xf32> -> vector<256x128xf32>
    %64 = vector.broadcast %51 : vector<1x128xf32> to vector<256x128xf32>
    %65 = arith.addf %63, %64 : vector<256x128xf32>
    %66 = math.tanh %65 : vector<256x128xf32>
    %67 = arith.truncf %47 : vector<256x128xf32> to vector<256x128xbf16>
    %cst_33 = arith.constant dense<0.000000e+00> : vector<256x128xf32>
    %68 = tpu.matmul %67, %49, %cst_33 {dimension_numbers = #tpu.dot_dimension_numbers<[1], [0], [0], [1], [0, 0, 1, 1], [], []>} : vector<256x128xbf16>, vector<128x128xbf16>, vector<256x128xf32> -> vector<256x128xf32>
    %69 = vector.broadcast %51 : vector<1x128xf32> to vector<256x128xf32>
    %70 = arith.addf %68, %69 : vector<256x128xf32>
    %71 = math.tanh %70 : vector<256x128xf32>
    %c2 = arith.constant 2 : index
    %c0_34 = arith.constant 0 : index
    %c0_35 = arith.constant 0 : index
    %72 = vector.load %arg4[%c2, %c0_34, %c0_35] : memref<6x128x128xbf16, #tpu.memory_space<vmem>>, vector<1x128x128xbf16>
    %73 = vector.shape_cast %72 : vector<1x128x128xbf16> to vector<128x128xbf16>
    %c2_36 = arith.constant 2 : index
    %c0_37 = arith.constant 0 : index
    %c0_38 = arith.constant 0 : index
    %74 = vector.load %arg5[%c2_36, %c0_37, %c0_38] : memref<6x1x128xf32, #tpu.memory_space<vmem>>, vector<1x1x128xf32>
    %75 = vector.shape_cast %74 : vector<1x1x128xf32> to vector<1x128xf32>
    %76 = arith.truncf %56 : vector<256x128xf32> to vector<256x128xbf16>
    %cst_39 = arith.constant dense<0.000000e+00> : vector<256x128xf32>
    %77 = tpu.matmul %76, %73, %cst_39 {dimension_numbers = #tpu.dot_dimension_numbers<[1], [0], [0], [1], [0, 0, 1, 1], [], []>} : vector<256x128xbf16>, vector<128x128xbf16>, vector<256x128xf32> -> vector<256x128xf32>
    %78 = vector.broadcast %75 : vector<1x128xf32> to vector<256x128xf32>
    %79 = arith.addf %77, %78 : vector<256x128xf32>
    %80 = math.tanh %79 : vector<256x128xf32>
    %81 = arith.truncf %61 : vector<256x128xf32> to vector<256x128xbf16>
    %cst_40 = arith.constant dense<0.000000e+00> : vector<256x128xf32>
    %82 = tpu.matmul %81, %73, %cst_40 {dimension_numbers = #tpu.dot_dimension_numbers<[1], [0], [0], [1], [0, 0, 1, 1], [], []>} : vector<256x128xbf16>, vector<128x128xbf16>, vector<256x128xf32> -> vector<256x128xf32>
    %83 = vector.broadcast %75 : vector<1x128xf32> to vector<256x128xf32>
    %84 = arith.addf %82, %83 : vector<256x128xf32>
    %85 = math.tanh %84 : vector<256x128xf32>
    %86 = arith.truncf %66 : vector<256x128xf32> to vector<256x128xbf16>
    %cst_41 = arith.constant dense<0.000000e+00> : vector<256x128xf32>
    %87 = tpu.matmul %86, %73, %cst_41 {dimension_numbers = #tpu.dot_dimension_numbers<[1], [0], [0], [1], [0, 0, 1, 1], [], []>} : vector<256x128xbf16>, vector<128x128xbf16>, vector<256x128xf32> -> vector<256x128xf32>
    %88 = vector.broadcast %75 : vector<1x128xf32> to vector<256x128xf32>
    %89 = arith.addf %87, %88 : vector<256x128xf32>
    %90 = math.tanh %89 : vector<256x128xf32>
    %91 = arith.truncf %71 : vector<256x128xf32> to vector<256x128xbf16>
    %cst_42 = arith.constant dense<0.000000e+00> : vector<256x128xf32>
    %92 = tpu.matmul %91, %73, %cst_42 {dimension_numbers = #tpu.dot_dimension_numbers<[1], [0], [0], [1], [0, 0, 1, 1], [], []>} : vector<256x128xbf16>, vector<128x128xbf16>, vector<256x128xf32> -> vector<256x128xf32>
    %93 = vector.broadcast %75 : vector<1x128xf32> to vector<256x128xf32>
    %94 = arith.addf %92, %93 : vector<256x128xf32>
    %95 = math.tanh %94 : vector<256x128xf32>
    %96 = arith.addf %80, %8 : vector<256x128xf32>
    %97 = arith.addf %85, %13 : vector<256x128xf32>
    %98 = arith.addf %90, %18 : vector<256x128xf32>
    %99 = arith.addf %95, %23 : vector<256x128xf32>
    %c3 = arith.constant 3 : index
    %c0_43 = arith.constant 0 : index
    %c0_44 = arith.constant 0 : index
    %100 = vector.load %arg4[%c3, %c0_43, %c0_44] : memref<6x128x128xbf16, #tpu.memory_space<vmem>>, vector<1x128x128xbf16>
    %101 = vector.shape_cast %100 : vector<1x128x128xbf16> to vector<128x128xbf16>
    %c3_45 = arith.constant 3 : index
    %c0_46 = arith.constant 0 : index
    %c0_47 = arith.constant 0 : index
    %102 = vector.load %arg5[%c3_45, %c0_46, %c0_47] : memref<6x1x128xf32, #tpu.memory_space<vmem>>, vector<1x1x128xf32>
    %103 = vector.shape_cast %102 : vector<1x1x128xf32> to vector<1x128xf32>
    %104 = arith.truncf %96 : vector<256x128xf32> to vector<256x128xbf16>
    %cst_48 = arith.constant dense<0.000000e+00> : vector<256x128xf32>
    %105 = tpu.matmul %104, %101, %cst_48 {dimension_numbers = #tpu.dot_dimension_numbers<[1], [0], [0], [1], [0, 0, 1, 1], [], []>} : vector<256x128xbf16>, vector<128x128xbf16>, vector<256x128xf32> -> vector<256x128xf32>
    %106 = vector.broadcast %103 : vector<1x128xf32> to vector<256x128xf32>
    %107 = arith.addf %105, %106 : vector<256x128xf32>
    %108 = math.tanh %107 : vector<256x128xf32>
    %109 = arith.truncf %97 : vector<256x128xf32> to vector<256x128xbf16>
    %cst_49 = arith.constant dense<0.000000e+00> : vector<256x128xf32>
    %110 = tpu.matmul %109, %101, %cst_49 {dimension_numbers = #tpu.dot_dimension_numbers<[1], [0], [0], [1], [0, 0, 1, 1], [], []>} : vector<256x128xbf16>, vector<128x128xbf16>, vector<256x128xf32> -> vector<256x128xf32>
    %111 = vector.broadcast %103 : vector<1x128xf32> to vector<256x128xf32>
    %112 = arith.addf %110, %111 : vector<256x128xf32>
    %113 = math.tanh %112 : vector<256x128xf32>
    %114 = arith.truncf %98 : vector<256x128xf32> to vector<256x128xbf16>
    %cst_50 = arith.constant dense<0.000000e+00> : vector<256x128xf32>
    %115 = tpu.matmul %114, %101, %cst_50 {dimension_numbers = #tpu.dot_dimension_numbers<[1], [0], [0], [1], [0, 0, 1, 1], [], []>} : vector<256x128xbf16>, vector<128x128xbf16>, vector<256x128xf32> -> vector<256x128xf32>
    %116 = vector.broadcast %103 : vector<1x128xf32> to vector<256x128xf32>
    %117 = arith.addf %115, %116 : vector<256x128xf32>
    %118 = math.tanh %117 : vector<256x128xf32>
    %119 = arith.truncf %99 : vector<256x128xf32> to vector<256x128xbf16>
    %cst_51 = arith.constant dense<0.000000e+00> : vector<256x128xf32>
    %120 = tpu.matmul %119, %101, %cst_51 {dimension_numbers = #tpu.dot_dimension_numbers<[1], [0], [0], [1], [0, 0, 1, 1], [], []>} : vector<256x128xbf16>, vector<128x128xbf16>, vector<256x128xf32> -> vector<256x128xf32>
    %121 = vector.broadcast %103 : vector<1x128xf32> to vector<256x128xf32>
    %122 = arith.addf %120, %121 : vector<256x128xf32>
    %123 = math.tanh %122 : vector<256x128xf32>
    %c4 = arith.constant 4 : index
    %c0_52 = arith.constant 0 : index
    %c0_53 = arith.constant 0 : index
    %124 = vector.load %arg4[%c4, %c0_52, %c0_53] : memref<6x128x128xbf16, #tpu.memory_space<vmem>>, vector<1x128x128xbf16>
    %125 = vector.shape_cast %124 : vector<1x128x128xbf16> to vector<128x128xbf16>
    %c4_54 = arith.constant 4 : index
    %c0_55 = arith.constant 0 : index
    %c0_56 = arith.constant 0 : index
    %126 = vector.load %arg5[%c4_54, %c0_55, %c0_56] : memref<6x1x128xf32, #tpu.memory_space<vmem>>, vector<1x1x128xf32>
    %127 = vector.shape_cast %126 : vector<1x1x128xf32> to vector<1x128xf32>
    %128 = arith.truncf %108 : vector<256x128xf32> to vector<256x128xbf16>
    %cst_57 = arith.constant dense<0.000000e+00> : vector<256x128xf32>
    %129 = tpu.matmul %128, %125, %cst_57 {dimension_numbers = #tpu.dot_dimension_numbers<[1], [0], [0], [1], [0, 0, 1, 1], [], []>} : vector<256x128xbf16>, vector<128x128xbf16>, vector<256x128xf32> -> vector<256x128xf32>
    %130 = vector.broadcast %127 : vector<1x128xf32> to vector<256x128xf32>
    %131 = arith.addf %129, %130 : vector<256x128xf32>
    %132 = math.tanh %131 : vector<256x128xf32>
    %133 = arith.truncf %113 : vector<256x128xf32> to vector<256x128xbf16>
    %cst_58 = arith.constant dense<0.000000e+00> : vector<256x128xf32>
    %134 = tpu.matmul %133, %125, %cst_58 {dimension_numbers = #tpu.dot_dimension_numbers<[1], [0], [0], [1], [0, 0, 1, 1], [], []>} : vector<256x128xbf16>, vector<128x128xbf16>, vector<256x128xf32> -> vector<256x128xf32>
    %135 = vector.broadcast %127 : vector<1x128xf32> to vector<256x128xf32>
    %136 = arith.addf %134, %135 : vector<256x128xf32>
    %137 = math.tanh %136 : vector<256x128xf32>
    %138 = arith.truncf %118 : vector<256x128xf32> to vector<256x128xbf16>
    %cst_59 = arith.constant dense<0.000000e+00> : vector<256x128xf32>
    %139 = tpu.matmul %138, %125, %cst_59 {dimension_numbers = #tpu.dot_dimension_numbers<[1], [0], [0], [1], [0, 0, 1, 1], [], []>} : vector<256x128xbf16>, vector<128x128xbf16>, vector<256x128xf32> -> vector<256x128xf32>
    %140 = vector.broadcast %127 : vector<1x128xf32> to vector<256x128xf32>
    %141 = arith.addf %139, %140 : vector<256x128xf32>
    %142 = math.tanh %141 : vector<256x128xf32>
    %143 = arith.truncf %123 : vector<256x128xf32> to vector<256x128xbf16>
    %cst_60 = arith.constant dense<0.000000e+00> : vector<256x128xf32>
    %144 = tpu.matmul %143, %125, %cst_60 {dimension_numbers = #tpu.dot_dimension_numbers<[1], [0], [0], [1], [0, 0, 1, 1], [], []>} : vector<256x128xbf16>, vector<128x128xbf16>, vector<256x128xf32> -> vector<256x128xf32>
    %145 = vector.broadcast %127 : vector<1x128xf32> to vector<256x128xf32>
    %146 = arith.addf %144, %145 : vector<256x128xf32>
    %147 = math.tanh %146 : vector<256x128xf32>
    %c5 = arith.constant 5 : index
    %c0_61 = arith.constant 0 : index
    %c0_62 = arith.constant 0 : index
    %148 = vector.load %arg4[%c5, %c0_61, %c0_62] : memref<6x128x128xbf16, #tpu.memory_space<vmem>>, vector<1x128x128xbf16>
    %149 = vector.shape_cast %148 : vector<1x128x128xbf16> to vector<128x128xbf16>
    %c5_63 = arith.constant 5 : index
    %c0_64 = arith.constant 0 : index
    %c0_65 = arith.constant 0 : index
    %150 = vector.load %arg5[%c5_63, %c0_64, %c0_65] : memref<6x1x128xf32, #tpu.memory_space<vmem>>, vector<1x1x128xf32>
    %151 = vector.shape_cast %150 : vector<1x1x128xf32> to vector<1x128xf32>
    %152 = arith.truncf %132 : vector<256x128xf32> to vector<256x128xbf16>
    %cst_66 = arith.constant dense<0.000000e+00> : vector<256x128xf32>
    %153 = tpu.matmul %152, %149, %cst_66 {dimension_numbers = #tpu.dot_dimension_numbers<[1], [0], [0], [1], [0, 0, 1, 1], [], []>} : vector<256x128xbf16>, vector<128x128xbf16>, vector<256x128xf32> -> vector<256x128xf32>
    %154 = vector.broadcast %151 : vector<1x128xf32> to vector<256x128xf32>
    %155 = arith.addf %153, %154 : vector<256x128xf32>
    %156 = math.tanh %155 : vector<256x128xf32>
    %157 = arith.truncf %137 : vector<256x128xf32> to vector<256x128xbf16>
    %cst_67 = arith.constant dense<0.000000e+00> : vector<256x128xf32>
    %158 = tpu.matmul %157, %149, %cst_67 {dimension_numbers = #tpu.dot_dimension_numbers<[1], [0], [0], [1], [0, 0, 1, 1], [], []>} : vector<256x128xbf16>, vector<128x128xbf16>, vector<256x128xf32> -> vector<256x128xf32>
    %159 = vector.broadcast %151 : vector<1x128xf32> to vector<256x128xf32>
    %160 = arith.addf %158, %159 : vector<256x128xf32>
    %161 = math.tanh %160 : vector<256x128xf32>
    %162 = arith.truncf %142 : vector<256x128xf32> to vector<256x128xbf16>
    %cst_68 = arith.constant dense<0.000000e+00> : vector<256x128xf32>
    %163 = tpu.matmul %162, %149, %cst_68 {dimension_numbers = #tpu.dot_dimension_numbers<[1], [0], [0], [1], [0, 0, 1, 1], [], []>} : vector<256x128xbf16>, vector<128x128xbf16>, vector<256x128xf32> -> vector<256x128xf32>
    %164 = vector.broadcast %151 : vector<1x128xf32> to vector<256x128xf32>
    %165 = arith.addf %163, %164 : vector<256x128xf32>
    %166 = math.tanh %165 : vector<256x128xf32>
    %167 = arith.truncf %147 : vector<256x128xf32> to vector<256x128xbf16>
    %cst_69 = arith.constant dense<0.000000e+00> : vector<256x128xf32>
    %168 = tpu.matmul %167, %149, %cst_69 {dimension_numbers = #tpu.dot_dimension_numbers<[1], [0], [0], [1], [0, 0, 1, 1], [], []>} : vector<256x128xbf16>, vector<128x128xbf16>, vector<256x128xf32> -> vector<256x128xf32>
    %169 = vector.broadcast %151 : vector<1x128xf32> to vector<256x128xf32>
    %170 = arith.addf %168, %169 : vector<256x128xf32>
    %171 = math.tanh %170 : vector<256x128xf32>
    %172 = arith.addf %156, %96 : vector<256x128xf32>
    %173 = arith.addf %161, %97 : vector<256x128xf32>
    %174 = arith.addf %166, %98 : vector<256x128xf32>
    %175 = arith.addf %171, %99 : vector<256x128xf32>
    %176 = vector.broadcast %2 : vector<1x128xf32> to vector<256x128xf32>
    %177 = arith.mulf %172, %176 : vector<256x128xf32>
    %cst_70 = arith.constant dense<0.000000e+00> : vector<256xf32>
    %178 = vector.multi_reduction <add>, %177, %cst_70 [1] : vector<256x128xf32> to vector<256xf32>
    %179 = vector.shape_cast %178 : vector<256xf32> to vector<256x1xf32>
    %180 = vector.broadcast %3 : vector<1x1xf32> to vector<256x1xf32>
    %181 = arith.addf %179, %180 : vector<256x1xf32>
    %c0_71 = arith.constant 0 : index
    %c0_72 = arith.constant 0 : index
    %182 = vector.load %arg8[%c0_71, %c0_72] : memref<1024x1xf32, #tpu.memory_space<vmem>>, vector<256x1xf32>
    tpu.vector_store %arg8[%c0_71, %c0_72], %181 {strides = array<i32>} : memref<1024x1xf32, #tpu.memory_space<vmem>>, vector<256x1xf32>,
    %183 = vector.broadcast %2 : vector<1x128xf32> to vector<256x128xf32>
    %184 = arith.mulf %173, %183 : vector<256x128xf32>
    %cst_73 = arith.constant dense<0.000000e+00> : vector<256xf32>
    %185 = vector.multi_reduction <add>, %184, %cst_73 [1] : vector<256x128xf32> to vector<256xf32>
    %186 = vector.shape_cast %185 : vector<256xf32> to vector<256x1xf32>
    %187 = vector.broadcast %3 : vector<1x1xf32> to vector<256x1xf32>
    %188 = arith.addf %186, %187 : vector<256x1xf32>
    %c256_74 = arith.constant 256 : index
    %c0_75 = arith.constant 0 : index
    %189 = vector.load %arg8[%c256_74, %c0_75] : memref<1024x1xf32, #tpu.memory_space<vmem>>, vector<256x1xf32>
    tpu.vector_store %arg8[%c256_74, %c0_75], %188 {strides = array<i32>} : memref<1024x1xf32, #tpu.memory_space<vmem>>, vector<256x1xf32>,
    %190 = vector.broadcast %2 : vector<1x128xf32> to vector<256x128xf32>
    %191 = arith.mulf %174, %190 : vector<256x128xf32>
    %cst_76 = arith.constant dense<0.000000e+00> : vector<256xf32>
    %192 = vector.multi_reduction <add>, %191, %cst_76 [1] : vector<256x128xf32> to vector<256xf32>
    %193 = vector.shape_cast %192 : vector<256xf32> to vector<256x1xf32>
    %194 = vector.broadcast %3 : vector<1x1xf32> to vector<256x1xf32>
    %195 = arith.addf %193, %194 : vector<256x1xf32>
    %c512_77 = arith.constant 512 : index
    %c0_78 = arith.constant 0 : index
    %196 = vector.load %arg8[%c512_77, %c0_78] : memref<1024x1xf32, #tpu.memory_space<vmem>>, vector<256x1xf32>
    tpu.vector_store %arg8[%c512_77, %c0_78], %195 {strides = array<i32>} : memref<1024x1xf32, #tpu.memory_space<vmem>>, vector<256x1xf32>,
    %197 = vector.broadcast %2 : vector<1x128xf32> to vector<256x128xf32>
    %198 = arith.mulf %175, %197 : vector<256x128xf32>
    %cst_79 = arith.constant dense<0.000000e+00> : vector<256xf32>
    %199 = vector.multi_reduction <add>, %198, %cst_79 [1] : vector<256x128xf32> to vector<256xf32>
    %200 = vector.shape_cast %199 : vector<256xf32> to vector<256x1xf32>
    %201 = vector.broadcast %3 : vector<1x1xf32> to vector<256x1xf32>
    %202 = arith.addf %200, %201 : vector<256x1xf32>
    %c768_80 = arith.constant 768 : index
    %c0_81 = arith.constant 0 : index
    %203 = vector.load %arg8[%c768_80, %c0_81] : memref<1024x1xf32, #tpu.memory_space<vmem>>, vector<256x1xf32>
    tpu.vector_store %arg8[%c768_80, %c0_81], %202 {strides = array<i32>} : memref<1024x1xf32, #tpu.memory_space<vmem>>, vector<256x1xf32>,
    return
  }
  func.func @transform_0(%arg0: i32) -> (i32, i32) {
    %c0_i32 = arith.constant 0 : i32
    %c0_i32_0 = arith.constant 0 : i32
    return %arg0, %c0_i32 : i32, i32
  }
  func.func @transform_1(%arg0: i32) -> (i32, i32) {
    %c0_i32 = arith.constant 0 : i32
    %c0_i32_0 = arith.constant 0 : i32
    %c0_i32_1 = arith.constant 0 : i32
    return %c0_i32, %c0_i32_0 : i32, i32
  }
  func.func @transform_2(%arg0: i32) -> (i32, i32) {
    %c0_i32 = arith.constant 0 : i32
    %c0_i32_0 = arith.constant 0 : i32
    %c0_i32_1 = arith.constant 0 : i32
    return %c0_i32, %c0_i32_0 : i32, i32
  }
  func.func @transform_3(%arg0: i32) -> (i32, i32, i32) {
    %c0_i32 = arith.constant 0 : i32
    %c0_i32_0 = arith.constant 0 : i32
    %c0_i32_1 = arith.constant 0 : i32
    %c0_i32_2 = arith.constant 0 : i32
    return %c0_i32, %c0_i32_0, %c0_i32_1 : i32, i32, i32
  }
  func.func @transform_4(%arg0: i32) -> (i32, i32, i32) {
    %c0_i32 = arith.constant 0 : i32
    %c0_i32_0 = arith.constant 0 : i32
    %c0_i32_1 = arith.constant 0 : i32
    %c0_i32_2 = arith.constant 0 : i32
    return %c0_i32, %c0_i32_0, %c0_i32_1 : i32, i32, i32
  }
  func.func @transform_5(%arg0: i32) -> (i32, i32) {
    %c0_i32 = arith.constant 0 : i32
    %c0_i32_0 = arith.constant 0 : i32
    %c0_i32_1 = arith.constant 0 : i32
    return %c0_i32, %c0_i32_0 : i32, i32
  }
  func.func @transform_6(%arg0: i32) -> (i32, i32) {
    %c0_i32 = arith.constant 0 : i32
    %c0_i32_0 = arith.constant 0 : i32
    %c0_i32_1 = arith.constant 0 : i32
    return %c0_i32, %c0_i32_0 : i32, i32
  }
  func.func @transform_7(%arg0: i32) -> (i32, i32) {
    %c0_i32 = arith.constant 0 : i32
    %c0_i32_0 = arith.constant 0 : i32
    return %arg0, %c0_i32 : i32, i32
  }
}

</mosaic_0001>

<bundles_post_ra>
// kernel: tpu_custom_call.1
= control target key start
LH: loop header
LB: loop body
LE: loop exit
PB: predicated region body
PF: predicated region fallthrough
CT: control target
= control target key end

     0   :  { %s12515_s26 = smov 0   ;;  %s16307_s0 = inlined_call_operand.vmem [shape: f32[2048,3], index: 0, kind: input, shape index: {}]   ;;  %s16308_s1 = inlined_call_operand.vmem [shape: f32[3,128], index: 1, kind: input, shape index: {}]   ;;  %s16309_s2 = inlined_call_operand.vmem [shape: f32[1,128], index: 2, kind: input, shape index: {}]   ;;  %s16310_s3 = inlined_call_operand.vmem [shape: bf16[6,128,128], index: 3, kind: input, shape index: {}]   ;;  %s16311_s4 = inlined_call_operand.vmem [shape: f32[6,1,128], index: 4, kind: input, shape index: {}]   ;;  %s16312_s5 = inlined_call_operand.vmem [shape: f32[1,128], index: 5, kind: input, shape index: {}]   ;;  %s16313_s6 = inlined_call_operand.<no memory space> [shape: f32[1,1], index: 6, kind: input, shape index: {}]   ;;  %s16314_s7 = inlined_call_operand.vmem [shape: f32[2048,1], index: 7, kind: output, shape index: {}]  }
   0x1   :  { %v12_v0 = vstv %s16313_s6 }
   0x2   :  { %13 = vst [vmem:[#allocation2] sm:$0x1] %v12_v0 }
   0x3 LB: > { %s8257_s27 = sadd.s32 4294967295, %s12470_s26   ;;  %p8261_p0 = scmp.ge.s32.totalorder %s12470_s26, 1  ;;  %s12470_s26 = sphi %s12515_s26, %s19_s26  }
   0x4   : > { %p240_p1 = scmp.lt.s32.totalorder %s12470_s26, 3 }
   0x6   : > { %p241_p2 = pnand %p8261_p0, %p240_p1 }
   0x8   : > { %244 = sbr.rel (%p241_p2) target bundleno = 2065 (0x811), region = 48 }
   0xf   : > { %v285_v1 = vld [vmem:[%s16308_s1] sm:$0x7]  ;;  %vm424_vm0 = vcmask 1042432   ;;  %s8262_s6 = sshll.u32 %s8257_s27, 7  ;;  %vm327_vm1 = vcmask 23552   ;;  %vm7688_vm2 = vcmask 7168  }
  0x10   : > { %9250 = vmatprep.subr.msk.mxu0 %vm424_vm0, %v285_v1  ;;  %9300 = vmatprep.subr.msk.mxu1 %vm424_vm0, %v285_v1  ;;  %p273_p3 = scmp.lt.s32.totalorder %s8262_s6, 255  ;;  %v12545_v2 = vld [vmem:[%s16310_s3] sm:$0xff]  }
  0x11   : > { %9251 = vmatpush3.msk.msra.mxu0 %vm424_vm0, %v285_v1  ;;  %9301 = vmatpush3.msk.msra.mxu1 %vm424_vm0, %v285_v1 }
  0x12   : > { %s16937_s6 = smov (!%p273_p3, %s8262_s6), 255  ;;  %9350 = vmatprep.subr.msk.mxu0 %vm424_vm0, %v285_v1  ;;  %9400 = vmatprep.subr.msk.mxu1 %vm424_vm0, %v285_v1 }
  0x13   : > { %s8263_s30 = sshll.u32 %s16937_s6, 3 }
  0x14   : > { %s12540_s10 = scalar_lea.vmem %s16307_s0, %s8263_s30  ;;  %s15714_s25 = scalar_lea.vmem %s16314_s7, %s8263_s30 }
  0x15   : > { %v289_v3 = vld [vmem:[%s12540_s10] sm:$0xff]  ;;  %v290_v5 = vld [vmem:[%s12540_s10 + $0x8] sm:$0xff]  ;;  %v291_v7 = vld [vmem:[%s12540_s10 + $0x10] sm:$0xff] }
  0x16   : > { %v685_v4 = vld [vmem:[%s12540_s10 + $0x100] sm:$0xff]  ;;  %9252 = vmatprep.mubr.msk.f32.mxu0 %vm327_vm1, %v289_v3  ;;  %v686_v6 = vld [vmem:[%s12540_s10 + $0x108] sm:$0xff]  ;;  %v687_v8 = vld [vmem:[%s12540_s10 + $0x110] sm:$0xff] }
  0x17   : > { %9302 = vmatprep.mubr.msk.f32.mxu1 %vm327_vm1, %v685_v4  ;;  %9253 = vmatmul.mubr.msk.f32.vlgmr.msra.gmra.mrb[0].mxu0 %vm327_vm1, %v290_v5  ;;  %v292_v9 = vld [vmem:[%s12540_s10 + $0x18] sm:$0xff]  ;;  %v293_v11 = vld [vmem:[%s12540_s10 + $0x20] sm:$0xff]  ;;  %v294_v13 = vld [vmem:[%s12540_s10 + $0x28] sm:$0xff] }
  0x18   : > { %9303 = vmatmul.mubr.msk.f32.vlgmr.msra.gmra.mrb[0].mxu1 %vm327_vm1, %v686_v6  ;;  %9255 = vmatprep.mubr.msk.f32.mxu0 %vm327_vm1, %v291_v7  ;;  %v688_v10 = vld [vmem:[%s12540_s10 + $0x118] sm:$0xff]  ;;  %v689_v12 = vld [vmem:[%s12540_s10 + $0x120] sm:$0xff]  ;;  %v690_v14 = vld [vmem:[%s12540_s10 + $0x128] sm:$0xff] }
  0x19   : > { %9305 = vmatprep.mubr.msk.f32.mxu1 %vm327_vm1, %v687_v8  ;;  %9351 = vmatpush3.msk.msra.mxu0 %vm424_vm0, %v285_v1  ;;  %v295_v15 = vld [vmem:[%s12540_s10 + $0x30] sm:$0xff]  ;;  %v296_v17 = vld [vmem:[%s12540_s10 + $0x38] sm:$0xff]  ;;  %v297_v19 = vld [vmem:[%s12540_s10 + $0x40] sm:$0xff] }
  0x1a   : > { %9401 = vmatpush3.msk.msra.mxu1 %vm424_vm0, %v285_v1  ;;  %9450 = vmatprep.subr.bf16.mxu0 %v12545_v2  ;;  %v691_v16 = vld [vmem:[%s12540_s10 + $0x130] sm:$0xff]  ;;  %v692_v18 = vld [vmem:[%s12540_s10 + $0x138] sm:$0xff]  ;;  %v693_v20 = vld [vmem:[%s12540_s10 + $0x140] sm:$0xff] }
  0x1b   : > { %9498 = vmatprep.subr.bf16.mxu1 %v12545_v2  ;;  %9256 = vmatmul.mubr.msk.f32.gmra.mrb[2].mxu0 %vm327_vm1, %v292_v9  ;;  %v298_v21 = vld [vmem:[%s12540_s10 + $0x48] sm:$0xff]  ;;  %v299_v23 = vld [vmem:[%s12540_s10 + $0x50] sm:$0xff]  ;;  %v300_v25 = vld [vmem:[%s12540_s10 + $0x58] sm:$0xff] }
  0x1c   : > { %9306 = vmatmul.mubr.msk.f32.gmra.mrb[2].mxu1 %vm327_vm1, %v688_v10  ;;  %9258 = vmatprep.mubr.msk.f32.mxu0 %vm327_vm1, %v293_v11  ;;  %v694_v22 = vld [vmem:[%s12540_s10 + $0x148] sm:$0xff]  ;;  %v695_v24 = vld [vmem:[%s12540_s10 + $0x150] sm:$0xff]  ;;  %v696_v26 = vld [vmem:[%s12540_s10 + $0x158] sm:$0xff] }
  0x1d   : > { %9308 = vmatprep.mubr.msk.f32.mxu1 %vm327_vm1, %v689_v12  ;;  %v301_v27 = vld [vmem:[%s12540_s10 + $0x60] sm:$0xff]  ;;  %v302_v29 = vld [vmem:[%s12540_s10 + $0x68] sm:$0xff]  ;;  %v303_v31 = vld [vmem:[%s12540_s10 + $0x70] sm:$0xff] }
  0x1e   : > { %v697_v28 = vld [vmem:[%s12540_s10 + $0x160] sm:$0xff]  ;;  %v698_v30 = vld [vmem:[%s12540_s10 + $0x168] sm:$0xff]  ;;  %v699_v32 = vld [vmem:[%s12540_s10 + $0x170] sm:$0xff] }
  0x1f   : > { %9259 = vmatmul.mubr.msk.f32.gmra.mrb[4].mxu0 %vm327_vm1, %v294_v13  ;;  %v304_v33 = vld [vmem:[%s12540_s10 + $0x78] sm:$0xff]  ;;  %v305_v35 = vld [vmem:[%s12540_s10 + $0x80] sm:$0xff]  ;;  %v306_v37 = vld [vmem:[%s12540_s10 + $0x88] sm:$0xff] }
  0x20   : > { %9309 = vmatmul.mubr.msk.f32.gmra.mrb[4].mxu1 %vm327_vm1, %v690_v14  ;;  %9261 = vmatprep.mubr.msk.f32.mxu0 %vm327_vm1, %v295_v15  ;;  %v700_v34 = vld [vmem:[%s12540_s10 + $0x178] sm:$0xff]  ;;  %v701_v36 = vld [vmem:[%s12540_s10 + $0x180] sm:$0xff]  ;;  %v702_v38 = vld [vmem:[%s12540_s10 + $0x188] sm:$0xff] }
  0x21   : > { %9311 = vmatprep.mubr.msk.f32.mxu1 %vm327_vm1, %v691_v16  ;;  %v307_v39 = vld [vmem:[%s12540_s10 + $0x90] sm:$0xff]  ;;  %v308_v41 = vld [vmem:[%s12540_s10 + $0x98] sm:$0xff]  ;;  %v309_v43 = vld [vmem:[%s12540_s10 + $0xa0] sm:$0xff] }
  0x22   : > { %v703_v40 = vld [vmem:[%s12540_s10 + $0x190] sm:$0xff]  ;;  %v704_v42 = vld [vmem:[%s12540_s10 + $0x198] sm:$0xff]  ;;  %v705_v44 = vld [vmem:[%s12540_s10 + $0x1a0] sm:$0xff] }
  0x23   : > { %9262 = vmatmul.mubr.msk.f32.gmra.mrb[6].mxu0 %vm327_vm1, %v296_v17  ;;  %v310_v45 = vld [vmem:[%s12540_s10 + $0xa8] sm:$0xff]  ;;  %v311_v47 = vld [vmem:[%s12540_s10 + $0xb0] sm:$0xff]  ;;  %v312_v49 = vld [vmem:[%s12540_s10 + $0xb8] sm:$0xff] }
  0x24   : > { %9312 = vmatmul.mubr.msk.f32.gmra.mrb[6].mxu1 %vm327_vm1, %v692_v18  ;;  %9264 = vmatprep.mubr.msk.f32.mxu0 %vm327_vm1, %v297_v19  ;;  %v706_v46 = vld [vmem:[%s12540_s10 + $0x1a8] sm:$0xff]  ;;  %v707_v48 = vld [vmem:[%s12540_s10 + $0x1b0] sm:$0xff]  ;;  %v708_v50 = vld [vmem:[%s12540_s10 + $0x1b8] sm:$0xff] }
  0x25   : > { %9314 = vmatprep.mubr.msk.f32.mxu1 %vm327_vm1, %v693_v20  ;;  %v313_v51 = vld [vmem:[%s12540_s10 + $0xc0] sm:$0xff]  ;;  %v314_v53 = vld [vmem:[%s12540_s10 + $0xc8] sm:$0xff]  ;;  %v315_v55 = vld [vmem:[%s12540_s10 + $0xd0] sm:$0xff] }
  0x26   : > { %v709_v52 = vld [vmem:[%s12540_s10 + $0x1c0] sm:$0xff]  ;;  %v710_v54 = vld [vmem:[%s12540_s10 + $0x1c8] sm:$0xff]  ;;  %v711_v56 = vld [vmem:[%s12540_s10 + $0x1d0] sm:$0xff] }
  0x27   : > { %9265 = vmatmul.mubr.msk.f32.gmra.mrb[8].mxu0 %vm327_vm1, %v298_v21  ;;  %v316_v57 = vld [vmem:[%s12540_s10 + $0xd8] sm:$0xff]  ;;  %v317_v59 = vld [vmem:[%s12540_s10 + $0xe0] sm:$0xff]  ;;  %v318_v61 = vld [vmem:[%s12540_s10 + $0xe8] sm:$0xff] }
  0x28   : > { %9315 = vmatmul.mubr.msk.f32.gmra.mrb[8].mxu1 %vm327_vm1, %v694_v22  ;;  %9267 = vmatprep.mubr.msk.f32.mxu0 %vm327_vm1, %v299_v23  ;;  %v712_v58 = vld [vmem:[%s12540_s10 + $0x1d8] sm:$0xff]  ;;  %v713_v60 = vld [vmem:[%s12540_s10 + $0x1e0] sm:$0xff]  ;;  %v714_v62 = vld [vmem:[%s12540_s10 + $0x1e8] sm:$0xff] }
  0x29   : > { %9317 = vmatprep.mubr.msk.f32.mxu1 %vm327_vm1, %v695_v24  ;;  %v319_v63 = vld [vmem:[%s12540_s10 + $0xf0] sm:$0xff]  ;;  %v320_v1 = vld [vmem:[%s12540_s10 + $0xf8] sm:$0xff]  ;;  %v1070_v4 = vld [vmem:[%s12540_s10 + $0x200] sm:$0xff] }
  0x2a   : > { %v715_v0 = vld [vmem:[%s12540_s10 + $0x1f0] sm:$0xff]  ;;  %v716_v3 = vld [vmem:[%s12540_s10 + $0x1f8] sm:$0xff]  ;;  %v1455_v5 = vld [vmem:[%s12540_s10 + $0x300] sm:$0xff] }
  0x2b   : > { %9268 = vmatmul.mubr.msk.f32.gmra.mrb[10].mxu0 %vm327_vm1, %v300_v25  ;;  %v1071_v6 = vld [vmem:[%s12540_s10 + $0x208] sm:$0xff]  ;;  %v1072_v8 = vld [vmem:[%s12540_s10 + $0x210] sm:$0xff]  ;;  %v1073_v11 = vld [vmem:[%s12540_s10 + $0x218] sm:$0xff] }
  0x2c   : > { %9318 = vmatmul.mubr.msk.f32.gmra.mrb[10].mxu1 %vm327_vm1, %v696_v26  ;;  %9270 = vmatprep.mubr.msk.f32.mxu0 %vm327_vm1, %v301_v27  ;;  %v1456_v7 = vld [vmem:[%s12540_s10 + $0x308] sm:$0xff]  ;;  %v1457_v9 = vld [vmem:[%s12540_s10 + $0x310] sm:$0xff]  ;;  %v1458_v12 = vld [vmem:[%s12540_s10 + $0x318] sm:$0xff] }
  0x2d   : > { %9320 = vmatprep.mubr.msk.f32.mxu1 %vm327_vm1, %v697_v28  ;;  %v12690_v10 = vld [vmem:[%s16310_s3 + $0x8] sm:$0xff]   ;;  %v1074_v13 = vld [vmem:[%s12540_s10 + $0x220] sm:$0xff]  ;;  %v12703_v15 = vld [vmem:[%s16310_s3 + $0x10] sm:$0xff]  }
  0x2e   : > { %v1459_v14 = vld [vmem:[%s12540_s10 + $0x320] sm:$0xff]  ;;  %v1075_v16 = vld [vmem:[%s12540_s10 + $0x228] sm:$0xff]  ;;  %v1076_v18 = vld [vmem:[%s12540_s10 + $0x230] sm:$0xff] }
  0x2f   : > { %9271 = vmatmul.mubr.msk.f32.gmra.mrb[12].mxu0 %vm327_vm1, %v302_v29  ;;  %v1460_v17 = vld [vmem:[%s12540_s10 + $0x328] sm:$0xff]  ;;  %v1461_v19 = vld [vmem:[%s12540_s10 + $0x330] sm:$0xff]  ;;  %v12724_v20 = vld [vmem:[%s16310_s3 + $0x18] sm:$0xff]  }
  0x30   : > { %9321 = vmatmul.mubr.msk.f32.gmra.mrb[12].mxu1 %vm327_vm1, %v698_v30  ;;  %9273 = vmatprep.mubr.msk.f32.mxu0 %vm327_vm1, %v303_v31  ;;  %v1077_v21 = vld [vmem:[%s12540_s10 + $0x238] sm:$0xff]  ;;  %v1078_v23 = vld [vmem:[%s12540_s10 + $0x240] sm:$0xff]  ;;  %v1079_v26 = vld [vmem:[%s12540_s10 + $0x248] sm:$0xff] }
  0x31   : > { %9323 = vmatprep.mubr.msk.f32.mxu1 %vm327_vm1, %v699_v32  ;;  %v1462_v22 = vld [vmem:[%s12540_s10 + $0x338] sm:$0xff]  ;;  %v1463_v24 = vld [vmem:[%s12540_s10 + $0x340] sm:$0xff]  ;;  %v1464_v27 = vld [vmem:[%s12540_s10 + $0x348] sm:$0xff] }
  0x32   : > { %v12741_v25 = vld [vmem:[%s16310_s3 + $0x20] sm:$0xff]   ;;  %v1080_v28 = vld [vmem:[%s12540_s10 + $0x250] sm:$0xff]  ;;  %v12758_v30 = vld [vmem:[%s16310_s3 + $0x28] sm:$0xff]  }
  0x33   : > { %9274 = vmatmul.mubr.msk.f32.gmra.mrb[14].mxu0 %vm327_vm1, %v304_v33  ;;  %v1465_v29 = vld [vmem:[%s12540_s10 + $0x350] sm:$0xff]  ;;  %v1081_v31 = vld [vmem:[%s12540_s10 + $0x258] sm:$0xff]  ;;  %v1082_v33 = vld [vmem:[%s12540_s10 + $0x260] sm:$0xff] }
  0x34   : > { %9324 = vmatmul.mubr.msk.f32.gmra.mrb[14].mxu1 %vm327_vm1, %v700_v34  ;;  %9276 = vmatprep.mubr.msk.f32.mxu0 %vm327_vm1, %v305_v35  ;;  %v1466_v32 = vld [vmem:[%s12540_s10 + $0x358] sm:$0xff]  ;;  %v1467_v34 = vld [vmem:[%s12540_s10 + $0x360] sm:$0xff]  ;;  %v1083_v35 = vld [vmem:[%s12540_s10 + $0x268] sm:$0xff] }
  0x35   : > { %9326 = vmatprep.mubr.msk.f32.mxu1 %vm327_vm1, %v701_v36  ;;  %v1468_v36 = vld [vmem:[%s12540_s10 + $0x368] sm:$0xff] }
  0x37   : > { %9277 = vmatmul.mubr.msk.f32.gmra.mrb[16].mxu0 %vm327_vm1, %v306_v37  ;;  %v1084_v37 = vld [vmem:[%s12540_s10 + $0x270] sm:$0xff] }
  0x38   : > { %9327 = vmatmul.mubr.msk.f32.gmra.mrb[16].mxu1 %vm327_vm1, %v702_v38  ;;  %9279 = vmatprep.mubr.msk.f32.mxu0 %vm327_vm1, %v307_v39  ;;  %v1469_v38 = vld [vmem:[%s12540_s10 + $0x370] sm:$0xff]  ;;  %v1085_v39 = vld [vmem:[%s12540_s10 + $0x278] sm:$0xff] }
  0x39   : > { %9329 = vmatprep.mubr.msk.f32.mxu1 %vm327_vm1, %v703_v40  ;;  %v1470_v40 = vld [vmem:[%s12540_s10 + $0x378] sm:$0xff] }
  0x3b   : > { %9280 = vmatmul.mubr.msk.f32.gmra.mrb[18].mxu0 %vm327_vm1, %v308_v41  ;;  %v1086_v41 = vld [vmem:[%s12540_s10 + $0x280] sm:$0xff] }
  0x3c   : > { %9330 = vmatmul.mubr.msk.f32.gmra.mrb[18].mxu1 %vm327_vm1, %v704_v42  ;;  %9282 = vmatprep.mubr.msk.f32.mxu0 %vm327_vm1, %v309_v43  ;;  %v1471_v42 = vld [vmem:[%s12540_s10 + $0x380] sm:$0xff]  ;;  %v12793_v43 = vld [vmem:[%s16310_s3 + $0x30] sm:$0xff]  }
  0x3d   : > { %9332 = vmatprep.mubr.msk.f32.mxu1 %vm327_vm1, %v705_v44  ;;  %v1087_v44 = vld [vmem:[%s12540_s10 + $0x288] sm:$0xff] }
  0x3f   : > { %9283 = vmatmul.mubr.msk.f32.gmra.mrb[20].mxu0 %vm327_vm1, %v310_v45  ;;  %v1472_v45 = vld [vmem:[%s12540_s10 + $0x388] sm:$0xff] }
  0x40   : > { %9333 = vmatmul.mubr.msk.f32.gmra.mrb[20].mxu1 %vm327_vm1, %v706_v46  ;;  %9285 = vmatprep.mubr.msk.f32.mxu0 %vm327_vm1, %v311_v47  ;;  %v1088_v46 = vld [vmem:[%s12540_s10 + $0x290] sm:$0xff] }
  0x41   : > { %9335 = vmatprep.mubr.msk.f32.mxu1 %vm327_vm1, %v707_v48  ;;  %v1473_v47 = vld [vmem:[%s12540_s10 + $0x390] sm:$0xff]  ;;  %v1089_v48 = vld [vmem:[%s12540_s10 + $0x298] sm:$0xff] }
  0x43   : > { %9286 = vmatmul.mubr.msk.f32.gmra.mrb[22].mxu0 %vm327_vm1, %v312_v49  ;;  %v1474_v49 = vld [vmem:[%s12540_s10 + $0x398] sm:$0xff] }
  0x44   : > { %9336 = vmatmul.mubr.msk.f32.gmra.mrb[22].mxu1 %vm327_vm1, %v708_v50  ;;  %9288 = vmatprep.mubr.msk.f32.mxu0 %vm327_vm1, %v313_v51  ;;  %v1090_v50 = vld [vmem:[%s12540_s10 + $0x2a0] sm:$0xff] }
  0x45   : > { %9338 = vmatprep.mubr.msk.f32.mxu1 %vm327_vm1, %v709_v52  ;;  %v1475_v51 = vld [vmem:[%s12540_s10 + $0x3a0] sm:$0xff]  ;;  %v12818_v52 = vld [vmem:[%s16310_s3 + $0x38] sm:$0xff]  }
  0x47   : > { %9289 = vmatmul.mubr.msk.f32.gmra.mrb[24].mxu0 %vm327_vm1, %v314_v53  ;;  %v1091_v53 = vld [vmem:[%s12540_s10 + $0x2a8] sm:$0xff] }
  0x48   : > { %9339 = vmatmul.mubr.msk.f32.gmra.mrb[24].mxu1 %vm327_vm1, %v710_v54  ;;  %9291 = vmatprep.mubr.msk.f32.mxu0 %vm327_vm1, %v315_v55  ;;  %v1476_v54 = vld [vmem:[%s12540_s10 + $0x3a8] sm:$0xff]  ;;  %v1092_v55 = vld [vmem:[%s12540_s10 + $0x2b0] sm:$0xff] }
  0x49   : > { %9341 = vmatprep.mubr.msk.f32.mxu1 %vm327_vm1, %v711_v56  ;;  %v1477_v56 = vld [vmem:[%s12540_s10 + $0x3b0] sm:$0xff] }
  0x4b   : > { %9292 = vmatmul.mubr.msk.f32.gmra.mrb[26].mxu0 %vm327_vm1, %v316_v57  ;;  %v1093_v57 = vld [vmem:[%s12540_s10 + $0x2b8] sm:$0xff] }
  0x4c   : > { %9342 = vmatmul.mubr.msk.f32.gmra.mrb[26].mxu1 %vm327_vm1, %v712_v58  ;;  %9294 = vmatprep.mubr.msk.f32.mxu0 %vm327_vm1, %v317_v59  ;;  %v1478_v58 = vld [vmem:[%s12540_s10 + $0x3b8] sm:$0xff]  ;;  %v1094_v59 = vld [vmem:[%s12540_s10 + $0x2c0] sm:$0xff] }
  0x4d   : > { %9344 = vmatprep.mubr.msk.f32.mxu1 %vm327_vm1, %v713_v60  ;;  %v1479_v60 = vld [vmem:[%s12540_s10 + $0x3c0] sm:$0xff] }
  0x4f   : > { %9295 = vmatmul.mubr.msk.f32.gmra.mrb[28].mxu0 %vm327_vm1, %v318_v61  ;;  %v1095_v61 = vld [vmem:[%s12540_s10 + $0x2c8] sm:$0xff] }
  0x50   : > { %9345 = vmatmul.mubr.msk.f32.gmra.mrb[28].mxu1 %vm327_vm1, %v714_v62  ;;  %9297 = vmatprep.mubr.msk.f32.mxu0 %vm327_vm1, %v319_v63  ;;  %v1480_v62 = vld [vmem:[%s12540_s10 + $0x3c8] sm:$0xff]  ;;  %v1096_v63 = vld [vmem:[%s12540_s10 + $0x2d0] sm:$0xff] }
  0x51   : > { %9347 = vmatprep.mubr.msk.f32.mxu1 %vm327_vm1, %v715_v0  ;;  %v1481_v0 = vld [vmem:[%s12540_s10 + $0x3d0] sm:$0xff] }
  0x53   : > { %9298 = vmatmul.mubr.msk.f32.gmra.mrb[30].mxu0 %vm327_vm1, %v320_v1  ;;  %v1097_v1 = vld [vmem:[%s12540_s10 + $0x2d8] sm:$0xff] }
  0x54   : > { %9348 = vmatmul.mubr.msk.f32.gmra.mrb[30].mxu1 %vm327_vm1, %v716_v3  ;;  %9352 = vmatprep.mubr.msk.f32.mxu0 %vm327_vm1, %v1070_v4  ;;  %v1482_v3 = vld [vmem:[%s12540_s10 + $0x3d8] sm:$0xff]  ;;  %v1098_v4 = vld [vmem:[%s12540_s10 + $0x2e0] sm:$0xff] }
  0x55   : > { %9402 = vmatprep.mubr.msk.f32.mxu1 %vm327_vm1, %v1455_v5  ;;  %v1483_v5 = vld [vmem:[%s12540_s10 + $0x3e0] sm:$0xff] }
  0x57   : > { %9353 = vmatmul.mubr.msk.f32.vlgmr.msra.gmra.mrb[32].mxu0 %vm327_vm1, %v1071_v6  ;;  %v1099_v6 = vld [vmem:[%s12540_s10 + $0x2e8] sm:$0xff] }
  0x58   : > { %9403 = vmatmul.mubr.msk.f32.vlgmr.msra.gmra.mrb[32].mxu1 %vm327_vm1, %v1456_v7  ;;  %9355 = vmatprep.mubr.msk.f32.mxu0 %vm327_vm1, %v1072_v8  ;;  %v1484_v7 = vld [vmem:[%s12540_s10 + $0x3e8] sm:$0xff]  ;;  %v1100_v8 = vld [vmem:[%s12540_s10 + $0x2f0] sm:$0xff] }
  0x59   : > { %9405 = vmatprep.mubr.msk.f32.mxu1 %vm327_vm1, %v1457_v9  ;;  %9451 = vmatpush3.bf16.msra.mxu0 %v12545_v2  ;;  %v1485_v9 = vld [vmem:[%s12540_s10 + $0x3f0] sm:$0xff] }
  0x5a   : > { %9499 = vmatpush3.bf16.msra.mxu1 %v12545_v2  ;;  %9452 = vmatprep.subr.bf16.mxu0 %v12690_v10 }
  0x5b   : > { %9500 = vmatprep.subr.bf16.mxu1 %v12690_v10  ;;  %9356 = vmatmul.mubr.msk.f32.gmra.mrb[34].mxu0 %vm327_vm1, %v1073_v11  ;;  %v1101_v11 = vld [vmem:[%s12540_s10 + $0x2f8] sm:$0xff] }
  0x5c   : > { %9406 = vmatmul.mubr.msk.f32.gmra.mrb[34].mxu1 %vm327_vm1, %v1458_v12  ;;  %9358 = vmatprep.mubr.msk.f32.mxu0 %vm327_vm1, %v1074_v13  ;;  %v1486_v12 = vld [vmem:[%s12540_s10 + $0x3f8] sm:$0xff]  ;;  %v12877_v13 = vld [vmem:[%s16309_s2] ss:$0 sm:$0xff] }
  0x5d   : > { %9408 = vmatprep.mubr.msk.f32.mxu1 %vm327_vm1, %v1459_v14  ;;  %9453 = vmatpush3.bf16.msra.mxu0 %v12690_v10 }
  0x5e   : > { %9501 = vmatpush3.bf16.msra.mxu1 %v12690_v10  ;;  %9454 = vmatprep.subr.bf16.mxu0 %v12703_v15 }
  0x5f   : > { %9502 = vmatprep.subr.bf16.mxu1 %v12703_v15  ;;  %9359 = vmatmul.mubr.msk.f32.gmra.mrb[36].mxu0 %vm327_vm1, %v1075_v16 }
  0x60   : > { %9409 = vmatmul.mubr.msk.f32.gmra.mrb[36].mxu1 %vm327_vm1, %v1460_v17  ;;  %9361 = vmatprep.mubr.msk.f32.mxu0 %vm327_vm1, %v1076_v18 }
  0x61   : > { %9411 = vmatprep.mubr.msk.f32.mxu1 %vm327_vm1, %v1461_v19  ;;  %9455 = vmatpush3.bf16.msra.mxu0 %v12703_v15 }
  0x62   : > { %9503 = vmatpush3.bf16.msra.mxu1 %v12703_v15  ;;  %9456 = vmatprep.subr.bf16.mxu0 %v12724_v20 }
  0x63   : > { %9504 = vmatprep.subr.bf16.mxu1 %v12724_v20  ;;  %9362 = vmatmul.mubr.msk.f32.gmra.mrb[38].mxu0 %vm327_vm1, %v1077_v21 }
  0x64   : > { %9412 = vmatmul.mubr.msk.f32.gmra.mrb[38].mxu1 %vm327_vm1, %v1462_v22  ;;  %9364 = vmatprep.mubr.msk.f32.mxu0 %vm327_vm1, %v1078_v23 }
  0x65   : > { %9414 = vmatprep.mubr.msk.f32.mxu1 %vm327_vm1, %v1463_v24  ;;  %9457 = vmatpush3.bf16.msra.mxu0 %v12724_v20 }
  0x66   : > { %9505 = vmatpush3.bf16.msra.mxu1 %v12724_v20  ;;  %9458 = vmatprep.subr.bf16.mxu0 %v12741_v25 }
  0x67   : > { %9506 = vmatprep.subr.bf16.mxu1 %v12741_v25  ;;  %9365 = vmatmul.mubr.msk.f32.gmra.mrb[40].mxu0 %vm327_vm1, %v1079_v26 }
  0x68   : > { %9415 = vmatmul.mubr.msk.f32.gmra.mrb[40].mxu1 %vm327_vm1, %v1464_v27  ;;  %9367 = vmatprep.mubr.msk.f32.mxu0 %vm327_vm1, %v1080_v28 }
  0x69   : > { %9417 = vmatprep.mubr.msk.f32.mxu1 %vm327_vm1, %v1465_v29  ;;  %9459 = vmatpush3.bf16.msra.mxu0 %v12741_v25 }
  0x6a   : > { %9507 = vmatpush3.bf16.msra.mxu1 %v12741_v25  ;;  %9460 = vmatprep.subr.bf16.mxu0 %v12758_v30 }
  0x6b   : > { %9508 = vmatprep.subr.bf16.mxu1 %v12758_v30  ;;  %9368 = vmatmul.mubr.msk.f32.gmra.mrb[42].mxu0 %vm327_vm1, %v1081_v31 }
  0x6c   : > { %9418 = vmatmul.mubr.msk.f32.gmra.mrb[42].mxu1 %vm327_vm1, %v1466_v32  ;;  %9370 = vmatprep.mubr.msk.f32.mxu0 %vm327_vm1, %v1082_v33 }
  0x6d   : > { %9420 = vmatprep.mubr.msk.f32.mxu1 %vm327_vm1, %v1467_v34  ;;  %9461 = vmatpush3.bf16.msra.mxu0 %v12758_v30 }
  0x6e   : > { %9509 = vmatpush3.bf16.msra.mxu1 %v12758_v30  ;;  %9462 = vmatprep.subr.bf16.mxu0 %v12793_v43 }
  0x6f   : > { %9371 = vmatmul.mubr.msk.f32.gmra.mrb[44].mxu0 %vm327_vm1, %v1083_v35  ;;  %9510 = vmatprep.subr.bf16.mxu1 %v12793_v43 }
  0x70   : > { %9421 = vmatmul.mubr.msk.f32.gmra.mrb[44].mxu1 %vm327_vm1, %v1468_v36  ;;  %9373 = vmatprep.mubr.msk.f32.mxu0 %vm327_vm1, %v1084_v37 }
  0x71   : > { %9423 = vmatprep.mubr.msk.f32.mxu1 %vm327_vm1, %v1469_v38  ;;  %9463 = vmatpush3.bf16.msra.mxu0 %v12793_v43 }
  0x72   : > { %9511 = vmatpush3.bf16.msra.mxu1 %v12793_v43  ;;  %9464 = vmatprep.subr.bf16.mxu0 %v12818_v52 }
  0x73   : > { %9374 = vmatmul.mubr.msk.f32.gmra.mrb[46].mxu0 %vm327_vm1, %v1085_v39  ;;  %9512 = vmatprep.subr.bf16.mxu1 %v12818_v52 }
  0x74   : > { %9424 = vmatmul.mubr.msk.f32.gmra.mrb[46].mxu1 %vm327_vm1, %v1470_v40  ;;  %9376 = vmatprep.mubr.msk.f32.mxu0 %vm327_vm1, %v1086_v41 }
  0x75   : > { %9426 = vmatprep.mubr.msk.f32.mxu1 %vm327_vm1, %v1471_v42  ;;  %9465 = vmatpush3.bf16.msra.mxu0 %v12818_v52 }
  0x76   : > { %9513 = vmatpush3.bf16.msra.mxu1 %v12818_v52  ;;  %9546 = vmatprep.subr.bf16.mxu0 %v12545_v2 }
  0x77   : > { %9377 = vmatmul.mubr.msk.f32.gmra.mrb[48].mxu0 %vm327_vm1, %v1087_v44  ;;  %9594 = vmatprep.subr.bf16.mxu1 %v12545_v2 }
  0x78   : > { %9427 = vmatmul.mubr.msk.f32.gmra.mrb[48].mxu1 %vm327_vm1, %v1472_v45  ;;  %9379 = vmatprep.mubr.msk.f32.mxu0 %vm327_vm1, %v1088_v46 }
  0x79   : > { %9429 = vmatprep.mubr.msk.f32.mxu1 %vm327_vm1, %v1473_v47 }
  0x7b   : > { %9380 = vmatmul.mubr.msk.f32.gmra.mrb[50].mxu0 %vm327_vm1, %v1089_v48 }
  0x7c   : > { %9430 = vmatmul.mubr.msk.f32.gmra.mrb[50].mxu1 %vm327_vm1, %v1474_v49  ;;  %9382 = vmatprep.mubr.msk.f32.mxu0 %vm327_vm1, %v1090_v50 }
  0x7d   : > { %9432 = vmatprep.mubr.msk.f32.mxu1 %vm327_vm1, %v1475_v51 }
  0x7f   : > { %9383 = vmatmul.mubr.msk.f32.gmra.mrb[52].mxu0 %vm327_vm1, %v1091_v53 }
  0x80   : > { %9433 = vmatmul.mubr.msk.f32.gmra.mrb[52].mxu1 %vm327_vm1, %v1476_v54  ;;  %9385 = vmatprep.mubr.msk.f32.mxu0 %vm327_vm1, %v1092_v55 }
  0x81   : > { %9435 = vmatprep.mubr.msk.f32.mxu1 %vm327_vm1, %v1477_v56 }
  0x83   : > { %9386 = vmatmul.mubr.msk.f32.gmra.mrb[54].mxu0 %vm327_vm1, %v1093_v57 }
  0x84   : > { %9436 = vmatmul.mubr.msk.f32.gmra.mrb[54].mxu1 %vm327_vm1, %v1478_v58  ;;  %9388 = vmatprep.mubr.msk.f32.mxu0 %vm327_vm1, %v1094_v59 }
  0x85   : > { %9438 = vmatprep.mubr.msk.f32.mxu1 %vm327_vm1, %v1479_v60 }
  0x87   : > { %9389 = vmatmul.mubr.msk.f32.gmra.mrb[56].mxu0 %vm327_vm1, %v1095_v61 }
  0x88   : > { %9439 = vmatmul.mubr.msk.f32.gmra.mrb[56].mxu1 %vm327_vm1, %v1480_v62  ;;  %9391 = vmatprep.mubr.msk.f32.mxu0 %vm327_vm1, %v1096_v63 }
  0x89   : > { %9441 = vmatprep.mubr.msk.f32.mxu1 %vm327_vm1, %v1481_v0 }
  0x8b   : > { %9392 = vmatmul.mubr.msk.f32.gmra.mrb[58].mxu0 %vm327_vm1, %v1097_v1 }
  0x8c   : > { %9442 = vmatmul.mubr.msk.f32.gmra.mrb[58].mxu1 %vm327_vm1, %v1482_v3  ;;  %9394 = vmatprep.mubr.msk.f32.mxu0 %vm327_vm1, %v1098_v4 }
  0x8d   : > { %9444 = vmatprep.mubr.msk.f32.mxu1 %vm327_vm1, %v1483_v5 }
  0x8f   : > { %9395 = vmatmul.mubr.msk.f32.gmra.mrb[60].mxu0 %vm327_vm1, %v1099_v6 }
  0x90   : > { %9445 = vmatmul.mubr.msk.f32.gmra.mrb[60].mxu1 %vm327_vm1, %v1484_v7  ;;  %9397 = vmatprep.mubr.msk.f32.mxu0 %vm327_vm1, %v1100_v8 }
  0x91   : > { %9447 = vmatprep.mubr.msk.f32.mxu1 %vm327_vm1, %v1485_v9 }
  0x93   : > { %9398 = vmatmul.mubr.msk.f32.gmra.mrb[62].mxu0 %vm327_vm1, %v1101_v11 }
  0x94   : > { %9448 = vmatmul.mubr.msk.f32.gmra.mrb[62].mxu1 %vm327_vm1, %v1486_v12 }
  0xea   : > { %v9254_v14 = vpop.f32.mrb[0].mxu0 }
  0xeb   : > { %v9304_v16 = vpop.f32.mrb[0].mxu1  ;;  %v500_v17 = vadd.f32 %v9254_v14, %v12877_v13  ;;  %v494_v19 = vpop.f32.mrb[1].mxu0 }
  0xec   : > { %v885_v18 = vadd.f32 %v9304_v16, %v12877_v13  ;;  %v879_v21 = vpop.f32.mrb[1].mxu1  ;;  %v495_v22 = vadd.f32 %v12877_v13, %v494_v19 }
  0xed   : > { %v880_v23 = vadd.f32 %v12877_v13, %v879_v21  ;;  %10658 = vtanh.f32 %v500_v17 }
  0xee   : > { %10660 = vtanh.f32 %v885_v18  ;;  %v9257_v24 = vpop.f32.mrb[2].mxu0 }
  0xef   : > { %v9307_v26 = vpop.f32.mrb[2].mxu1  ;;  %10662 = vtanh.f32 %v495_v22  ;;  %v510_v27 = vadd.f32 %v9257_v24, %v12877_v13  ;;  %v504_v29 = vpop.f32.mrb[3].mxu0 }
  0xf0   : > { %v895_v28 = vadd.f32 %v9307_v26, %v12877_v13  ;;  %v889_v31 = vpop.f32.mrb[3].mxu1  ;;  %10664 = vtanh.f32 %v880_v23  ;;  %v505_v32 = vadd.f32 %v12877_v13, %v504_v29 }
  0xf1   : > { %v890_v33 = vadd.f32 %v12877_v13, %v889_v31  ;;  %10666 = vtanh.f32 %v510_v27 }
  0xf2   : > { %10668 = vtanh.f32 %v895_v28  ;;  %v9260_v34 = vpop.f32.mrb[4].mxu0 }
  0xf3   : > { %v9310_v35 = vpop.f32.mrb[4].mxu1  ;;  %10670 = vtanh.f32 %v505_v32  ;;  %v520_v36 = vadd.f32 %v9260_v34, %v12877_v13  ;;  %v514_v38 = vpop.f32.mrb[5].mxu0 }
  0xf4   : > { %v905_v37 = vadd.f32 %v9310_v35, %v12877_v13  ;;  %v899_v39 = vpop.f32.mrb[5].mxu1  ;;  %10672 = vtanh.f32 %v890_v33  ;;  %v515_v40 = vadd.f32 %v12877_v13, %v514_v38 }
  0xf5   : > { %v900_v41 = vadd.f32 %v12877_v13, %v899_v39  ;;  %10674 = vtanh.f32 %v520_v36 }
  0xf6   : > { %10676 = vtanh.f32 %v905_v37  ;;  %v9263_v42 = vpop.f32.mrb[6].mxu0 }
  0xf7   : > { %v9313_v44 = vpop.f32.mrb[6].mxu1  ;;  %v12891_v45 = vpop.eup %10658  ;;  %10678 = vtanh.f32 %v515_v40  ;;  %v530_v46 = vadd.f32 %v9263_v42, %v12877_v13 }
  0xf8   : > { %v915_v47 = vadd.f32 %v9313_v44, %v12877_v13  ;;  %v524_v48 = vpop.f32.mrb[7].mxu0  ;;  %v909_v49 = vpop.f32.mrb[7].mxu1  ;;  %10680 = vtanh.f32 %v900_v41 }
  0xf9   : > { %v12895_v50 = vpop.eup %10660  ;;  %v525_v51 = vadd.f32 %v12877_v13, %v524_v48  ;;  %v910_v53 = vadd.f32 %v12877_v13, %v909_v49  ;;  %10682 = vtanh.f32 %v530_v46 }
  0xfa   : > { %v12899_v54 = vpop.eup %10662  ;;  %10684 = vtanh.f32 %v915_v47  ;;  %v9266_v57 = vpop.f32.mrb[8].mxu0 }
  0xfb   : > { %v12901_v55 = vpop.eup %10664  ;;  %v1857_v56 = vpack.c.bf16 %v12891_v45, %v12899_v54  ;;  %v9316_v58 = vpop.f32.mrb[8].mxu1  ;;  %10686 = vtanh.f32 %v525_v51  ;;  %v540_v61 = vadd.f32 %v9266_v57, %v12877_v13 }
  0xfc   : > { %v12905_v59 = vpop.eup %10666  ;;  %v2120_v60 = vpack.c.bf16 %v12895_v50, %v12901_v55  ;;  %v925_v62 = vadd.f32 %v9316_v58, %v12877_v13  ;;  %v534_v63 = vpop.f32.mrb[9].mxu0  ;;  %10688 = vtanh.f32 %v910_v53 }
  0xfd   : > { %v919_v0 = vpop.f32.mrb[9].mxu1  ;;  %v12911_v1 = vpop.eup %10668  ;;  %9466 = vmatprep.mubr.bf16.mxu0 %v1857_v56  ;;  %v535_v3 = vadd.f32 %v12877_v13, %v534_v63  ;;  %10690 = vtanh.f32 %v540_v61 }
  0xfe   : > { %v920_v4 = vadd.f32 %v12877_v13, %v919_v0  ;;  %v12915_v5 = vpop.eup %10670  ;;  %9514 = vmatprep.mubr.bf16.mxu1 %v2120_v60  ;;  %10692 = vtanh.f32 %v925_v62  ;;  %v9269_v7 = vpop.f32.mrb[10].mxu0 }
  0xff   : > { %v12917_v6 = vpop.eup %10672  ;;  %v9319_v8 = vpop.f32.mrb[10].mxu1  ;;  %v1858_v9 = vpack.c.bf16 %v12905_v59, %v12915_v5  ;;  %10694 = vtanh.f32 %v535_v3  ;;  %v550_v12 = vadd.f32 %v9269_v7, %v12877_v13 }
 0x100   : > { %v12921_v11 = vpop.eup %10674  ;;  %v935_v14 = vadd.f32 %v9319_v8, %v12877_v13  ;;  %v544_v16 = vpop.f32.mrb[11].mxu0  ;;  %v2121_v18 = vpack.c.bf16 %v12911_v1, %v12917_v6  ;;  %10696 = vtanh.f32 %v920_v4 }
 0x101   : > { %v929_v17 = vpop.f32.mrb[11].mxu1  ;;  %v12927_v19 = vpop.eup %10676  ;;  %v545_v21 = vadd.f32 %v12877_v13, %v544_v16  ;;  %9467 = vmatmul.mubr.bf16.vlgmr.msra.gmra.mrb[64].mxu0 %v1858_v9  ;;  %10698 = vtanh.f32 %v550_v12 }
 0x102   : > { %v930_v22 = vadd.f32 %v12877_v13, %v929_v17  ;;  %v12931_v23 = vpop.eup %10678  ;;  %9515 = vmatmul.mubr.bf16.vlgmr.msra.gmra.mrb[64].mxu1 %v2121_v18  ;;  %9547 = vmatpush3.bf16.msra.mxu0 %v12545_v2  ;;  %10700 = vtanh.f32 %v935_v14  ;;  %v9272_v26 = vpop.f32.mrb[12].mxu0 }
 0x103   : > { %v12934_v24 = vpop.eup %10680  ;;  %v9322_v27 = vpop.f32.mrb[12].mxu1  ;;  %v1859_v28 = vpack.c.bf16 %v12921_v11, %v12931_v23  ;;  %9595 = vmatpush3.bf16.msra.mxu1 %v12545_v2  ;;  %9548 = vmatprep.subr.bf16.mxu0 %v12690_v10  ;;  %10702 = vtanh.f32 %v545_v21  ;;  %v560_v31 = vadd.f32 %v9272_v26, %v12877_v13 }
 0x104   : > { %v12940_v29 = vpop.eup %10682  ;;  %v945_v32 = vadd.f32 %v9322_v27, %v12877_v13  ;;  %v554_v33 = vpop.f32.mrb[13].mxu0  ;;  %v2122_v35 = vpack.c.bf16 %v12927_v19, %v12934_v24  ;;  %9596 = vmatprep.subr.bf16.mxu1 %v12690_v10  ;;  %10704 = vtanh.f32 %v930_v22 }
 0x105   : > { %v939_v34 = vpop.f32.mrb[13].mxu1  ;;  %v12947_v36 = vpop.eup %10684  ;;  %v555_v2 = vadd.f32 %v12877_v13, %v554_v33  ;;  %9470 = vmatprep.mubr.bf16.mxu0 %v1859_v28  ;;  %10706 = vtanh.f32 %v560_v31 }
 0x106   : > { %v940_v37 = vadd.f32 %v12877_v13, %v939_v34  ;;  %v12951_v38 = vpop.eup %10686  ;;  %9518 = vmatprep.mubr.bf16.mxu1 %v2122_v35  ;;  %9549 = vmatpush3.bf16.msra.mxu0 %v12690_v10  ;;  %10708 = vtanh.f32 %v945_v32  ;;  %v9275_v40 = vpop.f32.mrb[14].mxu0 }
 0x107   : > { %v12954_v39 = vpop.eup %10688  ;;  %v9325_v41 = vpop.f32.mrb[14].mxu1  ;;  %v1860_v42 = vpack.c.bf16 %v12940_v29, %v12951_v38  ;;  %9597 = vmatpush3.bf16.msra.mxu1 %v12690_v10  ;;  %9550 = vmatprep.subr.bf16.mxu0 %v12703_v15  ;;  %10710 = vtanh.f32 %v555_v2  ;;  %v570_v46 = vadd.f32 %v9275_v40, %v12877_v13 }
 0x108   : > { %v12960_v44 = vpop.eup %10690  ;;  %v955_v47 = vadd.f32 %v9325_v41, %v12877_v13  ;;  %v564_v48 = vpop.f32.mrb[15].mxu0  ;;  %v2123_v51 = vpack.c.bf16 %v12947_v36, %v12954_v39  ;;  %9598 = vmatprep.subr.bf16.mxu1 %v12703_v15  ;;  %10712 = vtanh.f32 %v940_v37 }
 0x109   : > { %v949_v49 = vpop.f32.mrb[15].mxu1  ;;  %v12967_v53 = vpop.eup %10692  ;;  %v565_v10 = vadd.f32 %v12877_v13, %v564_v48  ;;  %9471 = vmatmul.mubr.bf16.gmra.mrb[68].mxu0 %v1860_v42  ;;  %10714 = vtanh.f32 %v570_v46 }
 0x10a   : > { %v950_v56 = vadd.f32 %v12877_v13, %v949_v49  ;;  %v12971_v57 = vpop.eup %10694  ;;  %9519 = vmatmul.mubr.bf16.gmra.mrb[68].mxu1 %v2123_v51  ;;  %9551 = vmatpush3.bf16.msra.mxu0 %v12703_v15  ;;  %10716 = vtanh.f32 %v955_v47  ;;  %v9278_v60 = vpop.f32.mrb[16].mxu0 }
 0x10b   : > { %v12974_v58 = vpop.eup %10696  ;;  %v9328_v61 = vpop.f32.mrb[16].mxu1  ;;  %v1861_v62 = vpack.c.bf16 %v12960_v44, %v12971_v57  ;;  %9599 = vmatpush3.bf16.msra.mxu1 %v12703_v15  ;;  %9552 = vmatprep.subr.bf16.mxu0 %v12724_v20  ;;  %10718 = vtanh.f32 %v565_v10  ;;  %v580_v0 = vadd.f32 %v9278_v60, %v12877_v13 }
 0x10c   : > { %v12980_v63 = vpop.eup %10698  ;;  %v965_v3 = vadd.f32 %v9328_v61, %v12877_v13  ;;  %v574_v4 = vpop.f32.mrb[17].mxu0  ;;  %v2124_v8 = vpack.c.bf16 %v12967_v53, %v12974_v58  ;;  %9600 = vmatprep.subr.bf16.mxu1 %v12724_v20  ;;  %10720 = vtanh.f32 %v950_v56 }
 0x10d   : > { %v959_v7 = vpop.f32.mrb[17].mxu1  ;;  %v12987_v9 = vpop.eup %10700  ;;  %v575_v15 = vadd.f32 %v12877_v13, %v574_v4  ;;  %9474 = vmatprep.mubr.bf16.mxu0 %v1861_v62  ;;  %10722 = vtanh.f32 %v580_v0 }
 0x10e   : > { %v960_v12 = vadd.f32 %v12877_v13, %v959_v7  ;;  %v12991_v14 = vpop.eup %10702  ;;  %9522 = vmatprep.mubr.bf16.mxu1 %v2124_v8  ;;  %9553 = vmatpush3.bf16.msra.mxu0 %v12724_v20  ;;  %10724 = vtanh.f32 %v965_v3  ;;  %v9281_v17 = vpop.f32.mrb[18].mxu0 }
 0x10f   : > { %v12994_v16 = vpop.eup %10704  ;;  %v9331_v18 = vpop.f32.mrb[18].mxu1  ;;  %v1862_v21 = vpack.c.bf16 %v12980_v63, %v12991_v14  ;;  %9601 = vmatpush3.bf16.msra.mxu1 %v12724_v20  ;;  %9554 = vmatprep.subr.bf16.mxu0 %v12741_v25  ;;  %10726 = vtanh.f32 %v575_v15  ;;  %v590_v26 = vadd.f32 %v9281_v17, %v12877_v13 }
 0x110   : > { %v13000_v22 = vpop.eup %10706  ;;  %v975_v27 = vadd.f32 %v9331_v18, %v12877_v13  ;;  %v584_v28 = vpop.f32.mrb[19].mxu0  ;;  %v2125_v32 = vpack.c.bf16 %v12987_v9, %v12994_v16  ;;  %9602 = vmatprep.subr.bf16.mxu1 %v12741_v25  ;;  %10728 = vtanh.f32 %v960_v12 }
 0x111   : > { %v969_v31 = vpop.f32.mrb[19].mxu1  ;;  %v13007_v33 = vpop.eup %10708  ;;  %v585_v20 = vadd.f32 %v12877_v13, %v584_v28  ;;  %9475 = vmatmul.mubr.bf16.gmra.mrb[72].mxu0 %v1862_v21  ;;  %10730 = vtanh.f32 %v590_v26 }
 0x112   : > { %v970_v34 = vadd.f32 %v12877_v13, %v969_v31  ;;  %v13011_v35 = vpop.eup %10710  ;;  %9523 = vmatmul.mubr.bf16.gmra.mrb[72].mxu1 %v2125_v32  ;;  %9555 = vmatpush3.bf16.msra.mxu0 %v12741_v25  ;;  %10732 = vtanh.f32 %v975_v27  ;;  %v9284_v37 = vpop.f32.mrb[20].mxu0 }
 0x113   : > { %v13014_v2 = vpop.eup %10712  ;;  %v9334_v40 = vpop.f32.mrb[20].mxu1  ;;  %v1863_v41 = vpack.c.bf16 %v13000_v22, %v13011_v35  ;;  %9603 = vmatpush3.bf16.msra.mxu1 %v12741_v25  ;;  %9556 = vmatprep.subr.bf16.mxu0 %v12758_v30  ;;  %10734 = vtanh.f32 %v585_v20  ;;  %v600_v46 = vadd.f32 %v9284_v37, %v12877_v13  ;;  %v13063_v20 = vld [vmem:[%s16310_s3 + $0x40] sm:$0xff]  }
 0x114   : > { %v13020_v42 = vpop.eup %10714  ;;  %v985_v47 = vadd.f32 %v9334_v40, %v12877_v13  ;;  %v594_v48 = vpop.f32.mrb[21].mxu0  ;;  %v2126_v51 = vpack.c.bf16 %v13007_v33, %v13014_v2  ;;  %9604 = vmatprep.subr.bf16.mxu1 %v12758_v30  ;;  %10736 = vtanh.f32 %v970_v34 }
 0x115   : > { %v979_v49 = vpop.f32.mrb[21].mxu1  ;;  %v13027_v10 = vpop.eup %10716  ;;  %v595_v25 = vadd.f32 %v12877_v13, %v594_v48  ;;  %9478 = vmatprep.mubr.bf16.mxu0 %v1863_v41  ;;  %10738 = vtanh.f32 %v600_v46 }
 0x116   : > { %v980_v56 = vadd.f32 %v12877_v13, %v979_v49  ;;  %v13031_v60 = vpop.eup %10718  ;;  %9526 = vmatprep.mubr.bf16.mxu1 %v2126_v51  ;;  %9557 = vmatpush3.bf16.msra.mxu0 %v12758_v30  ;;  %10740 = vtanh.f32 %v985_v47  ;;  %v9287_v62 = vpop.f32.mrb[22].mxu0 }
 0x117   : > { %v13034_v61 = vpop.eup %10720  ;;  %v9337_v0 = vpop.f32.mrb[22].mxu1  ;;  %v1864_v3 = vpack.c.bf16 %v13020_v42, %v13031_v60  ;;  %9605 = vmatpush3.bf16.msra.mxu1 %v12758_v30  ;;  %9558 = vmatprep.subr.bf16.mxu0 %v12793_v43  ;;  %10742 = vtanh.f32 %v595_v25  ;;  %v610_v7 = vadd.f32 %v9287_v62, %v12877_v13 }
 0x118   : > { %v13040_v4 = vpop.eup %10722  ;;  %v995_v8 = vadd.f32 %v9337_v0, %v12877_v13  ;;  %v604_v15 = vpop.f32.mrb[23].mxu0  ;;  %v2127_v17 = vpack.c.bf16 %v13027_v10, %v13034_v61  ;;  %9606 = vmatprep.subr.bf16.mxu1 %v12793_v43  ;;  %10744 = vtanh.f32 %v980_v56 }
 0x119   : > { %16510 = vst [vmem:[#allocation3_spill] sm:$0xff] %v13040_v4  ;;  %v989_v12 = vpop.f32.mrb[23].mxu1  ;;  %v13047_v18 = vpop.eup %10724  ;;  %v605_v30 = vadd.f32 %v12877_v13, %v604_v15  ;;  %9479 = vmatmul.mubr.bf16.gmra.mrb[76].mxu0 %v1864_v3  ;;  %10746 = vtanh.f32 %v610_v7 }
 0x11a   : > { %16511 = vst [vmem:[#allocation4_spill] sm:$0xff] %v13047_v18  ;;  %v990_v21 = vadd.f32 %v12877_v13, %v989_v12  ;;  %v13051_v26 = vpop.eup %10726  ;;  %9527 = vmatmul.mubr.bf16.gmra.mrb[76].mxu1 %v2127_v17  ;;  %9559 = vmatpush3.bf16.msra.mxu0 %v12793_v43  ;;  %10748 = vtanh.f32 %v995_v8  ;;  %v9290_v28 = vpop.f32.mrb[24].mxu0 }
 0x11b   : > { %16512 = vst [vmem:[#allocation5_spill] sm:$0xff] %v13051_v26  ;;  %v13054_v27 = vpop.eup %10728  ;;  %v9340_v31 = vpop.f32.mrb[24].mxu1  ;;  %v1865_v32 = vpack.c.bf16 %v13040_v4, %v13051_v26  ;;  %9607 = vmatpush3.bf16.msra.mxu1 %v12793_v43  ;;  %9560 = vmatprep.subr.bf16.mxu0 %v12818_v52  ;;  %10750 = vtanh.f32 %v605_v30  ;;  %v620_v37 = vadd.f32 %v9290_v28, %v12877_v13 }
 0x11c   : > { %16513 = vst [vmem:[#allocation6_spill] sm:$0xff] %v13054_v27  ;;  %v13065_v34 = vpop.eup %10730  ;;  %v1005_v40 = vadd.f32 %v9340_v31, %v12877_v13  ;;  %v614_v41 = vpop.f32.mrb[25].mxu0  ;;  %v2128_v47 = vpack.c.bf16 %v13047_v18, %v13054_v27  ;;  %9608 = vmatprep.subr.bf16.mxu1 %v12818_v52  ;;  %10752 = vtanh.f32 %v990_v21 }
 0x11d   : > { %16514 = vst [vmem:[#allocation7_spill] sm:$0xff] %v13065_v34  ;;  %v999_v46 = vpop.f32.mrb[25].mxu1  ;;  %v13072_v43 = vpop.eup %10732  ;;  %v615_v48 = vadd.f32 %v12877_v13, %v614_v41  ;;  %9482 = vmatprep.mubr.bf16.mxu0 %v1865_v32  ;;  %10754 = vtanh.f32 %v620_v37 }
 0x11e   : > { %16515 = vst [vmem:[#allocation8_spill] sm:$0xff] %v13072_v43  ;;  %v1000_v49 = vadd.f32 %v12877_v13, %v999_v46  ;;  %v13076_v51 = vpop.eup %10734  ;;  %9530 = vmatprep.mubr.bf16.mxu1 %v2128_v47  ;;  %9561 = vmatpush3.bf16.msra.mxu0 %v12818_v52  ;;  %10756 = vtanh.f32 %v1005_v40  ;;  %v9293_v56 = vpop.f32.mrb[26].mxu0 }
 0x11f   : > { %16516 = vst [vmem:[#allocation9_spill] sm:$0xff] %v13076_v51  ;;  %v13079_v25 = vpop.eup %10736  ;;  %v9343_v62 = vpop.f32.mrb[26].mxu1  ;;  %v1866_v0 = vpack.c.bf16 %v13065_v34, %v13076_v51  ;;  %9609 = vmatpush3.bf16.msra.mxu1 %v12818_v52  ;;  %9642 = vmatprep.subr.bf16.mxu0 %v13063_v20  ;;  %10758 = vtanh.f32 %v615_v48  ;;  %v630_v7 = vadd.f32 %v9293_v56, %v12877_v13 }
 0x120   : > { %16517 = vst [vmem:[#allocation10_spill] sm:$0xff] %v13079_v25  ;;  %v13085_v3 = vpop.eup %10738  ;;  %v1015_v8 = vadd.f32 %v9343_v62, %v12877_v13  ;;  %v624_v15 = vpop.f32.mrb[27].mxu0  ;;  %v2129_v17 = vpack.c.bf16 %v13072_v43, %v13079_v25  ;;  %9690 = vmatprep.subr.bf16.mxu1 %v13063_v20  ;;  %10760 = vtanh.f32 %v1000_v49 }
 0x121   : > { %16518 = vst [vmem:[#allocation11_spill] sm:$0xff] %v13085_v3  ;;  %v1009_v12 = vpop.f32.mrb[27].mxu1  ;;  %v13092_v30 = vpop.eup %10740  ;;  %v625_v52 = vadd.f32 %v12877_v13, %v624_v15  ;;  %9483 = vmatmul.mubr.bf16.gmra.mrb[80].mxu0 %v1866_v0  ;;  %10762 = vtanh.f32 %v630_v7 }
 0x122   : > { %16519 = vst [vmem:[#allocation12_spill] sm:$0xff] %v13092_v30  ;;  %v1010_v21 = vadd.f32 %v12877_v13, %v1009_v12  ;;  %v13096_v28 = vpop.eup %10742  ;;  %9531 = vmatmul.mubr.bf16.gmra.mrb[80].mxu1 %v2129_v17  ;;  %10764 = vtanh.f32 %v1015_v8  ;;  %v9296_v32 = vpop.f32.mrb[28].mxu0 }
 0x123   : > { %16520 = vst [vmem:[#allocation13_spill] sm:$0xff] %v13096_v28  ;;  %v13098_v31 = vpop.eup %10744  ;;  %v9346_v37 = vpop.f32.mrb[28].mxu1  ;;  %v1867_v40 = vpack.c.bf16 %v13085_v3, %v13096_v28  ;;  %10766 = vtanh.f32 %v625_v52  ;;  %v640_v46 = vadd.f32 %v9296_v32, %v12877_v13 }
 0x124   : > { %16521 = vst [vmem:[#allocation14_spill] sm:$0xff] %v13098_v31  ;;  %v13102_v41 = vpop.eup %10746  ;;  %v1025_v47 = vadd.f32 %v9346_v37, %v12877_v13  ;;  %v634_v48 = vpop.f32.mrb[29].mxu0  ;;  %v2130_v56 = vpack.c.bf16 %v13092_v30, %v13098_v31  ;;  %10768 = vtanh.f32 %v1010_v21 }
 0x125   : > { %16522 = vst [vmem:[#allocation15_spill] sm:$0xff] %v13102_v41  ;;  %v1019_v49 = vpop.f32.mrb[29].mxu1  ;;  %v13108_v62 = vpop.eup %10748  ;;  %v635_v0 = vadd.f32 %v12877_v13, %v634_v48  ;;  %9486 = vmatprep.mubr.bf16.mxu0 %v1867_v40  ;;  %10770 = vtanh.f32 %v640_v46 }
 0x126   : > { %16523 = vst [vmem:[#allocation16_spill] sm:$0xff] %v13108_v62  ;;  %v1020_v7 = vadd.f32 %v12877_v13, %v1019_v49  ;;  %v13112_v8 = vpop.eup %10750  ;;  %9534 = vmatprep.mubr.bf16.mxu1 %v2130_v56  ;;  %10772 = vtanh.f32 %v1025_v47  ;;  %v9299_v12 = vpop.f32.mrb[30].mxu0 }
 0x127   : > { %16524 = vst [vmem:[#allocation17_spill] sm:$0xff] %v13112_v8  ;;  %v13114_v15 = vpop.eup %10752  ;;  %v9349_v17 = vpop.f32.mrb[30].mxu1  ;;  %v1868_v52 = vpack.c.bf16 %v13102_v41, %v13112_v8  ;;  %10774 = vtanh.f32 %v635_v0  ;;  %v650_v21 = vadd.f32 %v9299_v12, %v12877_v13 }
 0x128   : > { %16525 = vst [vmem:[#allocation18_spill] sm:$0xff] %v13114_v15  ;;  %v13118_v32 = vpop.eup %10754  ;;  %v1035_v37 = vadd.f32 %v9349_v17, %v12877_v13  ;;  %v644_v40 = vpop.f32.mrb[31].mxu0  ;;  %v2131_v46 = vpack.c.bf16 %v13108_v62, %v13114_v15  ;;  %10776 = vtanh.f32 %v1020_v7 }
 0x129   : > { %16526 = vst [vmem:[#allocation19_spill] sm:$0xff] %v13118_v32  ;;  %v1029_v48 = vpop.f32.mrb[31].mxu1  ;;  %v13124_v49 = vpop.eup %10756  ;;  %v645_v47 = vadd.f32 %v12877_v13, %v644_v40  ;;  %9487 = vmatmul.mubr.bf16.gmra.mrb[84].mxu0 %v1868_v52  ;;  %10778 = vtanh.f32 %v650_v21 }
 0x12a   : > { %16527 = vst [vmem:[#allocation20_spill] sm:$0xff] %v13124_v49  ;;  %v1030_v56 = vadd.f32 %v12877_v13, %v1029_v48  ;;  %v13128_v30 = vpop.eup %10758  ;;  %9535 = vmatmul.mubr.bf16.gmra.mrb[84].mxu1 %v2131_v46  ;;  %10780 = vtanh.f32 %v1035_v37  ;;  %v9354_v12 = vpop.f32.mrb[32].mxu0 }
 0x12b   : > { %16528 = vst [vmem:[#allocation21_spill] sm:$0xff] %v13128_v30  ;;  %v13130_v0 = vpop.eup %10760  ;;  %v9404_v17 = vpop.f32.mrb[32].mxu1  ;;  %v1869_v15 = vpack.c.bf16 %v13118_v32, %v13128_v30  ;;  %10782 = vtanh.f32 %v645_v47  ;;  %v1270_v7 = vadd.f32 %v9354_v12, %v12877_v13 }
 0x12c   : > { %16529 = vst [vmem:[#allocation22_spill] sm:$0xff] %v13130_v0  ;;  %v13134_v31 = vpop.eup %10762  ;;  %v1655_v40 = vadd.f32 %v9404_v17, %v12877_v13  ;;  %v1264_v52 = vpop.f32.mrb[33].mxu0  ;;  %v2132_v21 = vpack.c.bf16 %v13124_v49, %v13130_v0  ;;  %10784 = vtanh.f32 %v1030_v56 }
 0x12d   : > { %16530 = vst [vmem:[#allocation23_spill] sm:$0xff] %v13134_v31  ;;  %v1649_v48 = vpop.f32.mrb[33].mxu1  ;;  %v13140_v46 = vpop.eup %10764  ;;  %v1265_v37 = vadd.f32 %v12877_v13, %v1264_v52  ;;  %9490 = vmatprep.mubr.bf16.mxu0 %v1869_v15  ;;  %10786 = vtanh.f32 %v1270_v7 }
 0x12e   : > { %16531 = vst [vmem:[#allocation24_spill] sm:$0xff] %v13140_v46  ;;  %v1650_v3 = vadd.f32 %v12877_v13, %v1649_v48  ;;  %v13144_v32 = vpop.eup %10766  ;;  %9538 = vmatprep.mubr.bf16.mxu1 %v2132_v21  ;;  %10788 = vtanh.f32 %v1655_v40  ;;  %v9357_v12 = vpop.f32.mrb[34].mxu0 }
 0x12f   : > { %16532 = vst [vmem:[#allocation25_spill] sm:$0xff] %v13144_v32  ;;  %v13146_v47 = vpop.eup %10768  ;;  %v9407_v17 = vpop.f32.mrb[34].mxu1  ;;  %v1870_v49 = vpack.c.bf16 %v13134_v31, %v13144_v32  ;;  %10790 = vtanh.f32 %v1265_v37  ;;  %v1280_v56 = vadd.f32 %v9357_v12, %v12877_v13 }
 0x130   : > { %16533 = vst [vmem:[#allocation26_spill] sm:$0xff] %v13146_v47  ;;  %v13150_v0 = vpop.eup %10770  ;;  %v1665_v52 = vadd.f32 %v9407_v17, %v12877_v13  ;;  %v1274_v15 = vpop.f32.mrb[35].mxu0  ;;  %v2133_v7 = vpack.c.bf16 %v13140_v46, %v13146_v47  ;;  %10792 = vtanh.f32 %v1650_v3 }
 0x131   : > { %16534 = vst [vmem:[#allocation27_spill] sm:$0xff] %v13150_v0  ;;  %v1659_v48 = vpop.f32.mrb[35].mxu1  ;;  %v13156_v21 = vpop.eup %10772  ;;  %v1275_v40 = vadd.f32 %v12877_v13, %v1274_v15  ;;  %9491 = vmatmul.mubr.bf16.gmra.mrb[88].mxu0 %v1870_v49  ;;  %10794 = vtanh.f32 %v1280_v56 }
 0x132   : > { %16535 = vst [vmem:[#allocation28_spill] sm:$0xff] %v13156_v21  ;;  %v1660_v30 = vadd.f32 %v12877_v13, %v1659_v48  ;;  %v13160_v31 = vpop.eup %10774  ;;  %9539 = vmatmul.mubr.bf16.gmra.mrb[88].mxu1 %v2133_v7  ;;  %10796 = vtanh.f32 %v1665_v52  ;;  %v9360_v12 = vpop.f32.mrb[36].mxu0 }
 0x133   : > { %16536 = vst [vmem:[#allocation29_spill] sm:$0xff] %v13160_v31  ;;  %v13162_v37 = vpop.eup %10776  ;;  %v9410_v17 = vpop.f32.mrb[36].mxu1  ;;  %v1871_v47 = vpack.c.bf16 %v13150_v0, %v13160_v31  ;;  %10798 = vtanh.f32 %v1275_v40  ;;  %v1290_v3 = vadd.f32 %v9360_v12, %v12877_v13 }
 0x134   : > { %16537 = vst [vmem:[#allocation30_spill] sm:$0xff] %v13162_v37  ;;  %v13166_v46 = vpop.eup %10778  ;;  %v1675_v15 = vadd.f32 %v9410_v17, %v12877_v13  ;;  %v1284_v49 = vpop.f32.mrb[37].mxu0  ;;  %v2134_v56 = vpack.c.bf16 %v13156_v21, %v13162_v37  ;;  %10800 = vtanh.f32 %v1660_v30 }
 0x135   : > { %16538 = vst [vmem:[#allocation31_spill] sm:$0xff] %v13166_v46  ;;  %v1669_v48 = vpop.f32.mrb[37].mxu1  ;;  %v13172_v7 = vpop.eup %10780  ;;  %v1285_v52 = vadd.f32 %v12877_v13, %v1284_v49  ;;  %9494 = vmatprep.mubr.bf16.mxu0 %v1871_v47  ;;  %10802 = vtanh.f32 %v1290_v3 }
 0x136   : > { %16539 = vst [vmem:[#allocation32_spill] sm:$0xff] %v13172_v7  ;;  %v1670_v32 = vadd.f32 %v12877_v13, %v1669_v48  ;;  %v13176_v0 = vpop.eup %10782  ;;  %9542 = vmatprep.mubr.bf16.mxu1 %v2134_v56  ;;  %10804 = vtanh.f32 %v1675_v15  ;;  %v9363_v12 = vpop.f32.mrb[38].mxu0 }
 0x137   : > { %16540 = vst [vmem:[#allocation33_spill] sm:$0xff] %v13176_v0  ;;  %v13178_v40 = vpop.eup %10784  ;;  %v9413_v17 = vpop.f32.mrb[38].mxu1  ;;  %v1872_v21 = vpack.c.bf16 %v13166_v46, %v13176_v0  ;;  %10806 = vtanh.f32 %v1285_v52  ;;  %v1300_v30 = vadd.f32 %v9363_v12, %v12877_v13 }
 0x138   : > { %16541 = vst [vmem:[#allocation34_spill] sm:$0xff] %v13178_v40  ;;  %v13182_v37 = vpop.eup %10786  ;;  %v1685_v49 = vadd.f32 %v9413_v17, %v12877_v13  ;;  %v1294_v47 = vpop.f32.mrb[39].mxu0  ;;  %v2135_v3 = vpack.c.bf16 %v13172_v7, %v13178_v40  ;;  %10808 = vtanh.f32 %v1670_v32 }
 0x139   : > { %16542 = vst [vmem:[#allocation35_spill] sm:$0xff] %v13182_v37  ;;  %v1679_v48 = vpop.f32.mrb[39].mxu1  ;;  %v13188_v56 = vpop.eup %10788  ;;  %v1295_v15 = vadd.f32 %v12877_v13, %v1294_v47  ;;  %9495 = vmatmul.mubr.bf16.gmra.mrb[92].mxu0 %v1872_v21  ;;  %10810 = vtanh.f32 %v1300_v30 }
 0x13a   : > { %16543 = vst [vmem:[#allocation36_spill] sm:$0xff] %v13188_v56  ;;  %v1680_v31 = vadd.f32 %v12877_v13, %v1679_v48  ;;  %v13192_v46 = vpop.eup %10790  ;;  %9543 = vmatmul.mubr.bf16.gmra.mrb[92].mxu1 %v2135_v3  ;;  %10812 = vtanh.f32 %v1685_v49  ;;  %v9366_v12 = vpop.f32.mrb[40].mxu0 }
 0x13b   : > { %16544 = vst [vmem:[#allocation37_spill] sm:$0xff] %v13192_v46  ;;  %v13194_v52 = vpop.eup %10792  ;;  %v9416_v17 = vpop.f32.mrb[40].mxu1  ;;  %v2329_v40 = vpack.c.bf16 %v13182_v37, %v13192_v46  ;;  %10814 = vtanh.f32 %v1295_v15  ;;  %v1310_v32 = vadd.f32 %v9366_v12, %v12877_v13 }
 0x13c   : > { %16545 = vst [vmem:[#allocation38_spill] sm:$0xff] %v13194_v52  ;;  %v13198_v7 = vpop.eup %10794  ;;  %v1695_v47 = vadd.f32 %v9416_v17, %v12877_v13  ;;  %v1304_v21 = vpop.f32.mrb[41].mxu0  ;;  %v2538_v30 = vpack.c.bf16 %v13188_v56, %v13194_v52  ;;  %10816 = vtanh.f32 %v1680_v31  ;;  %v13217_v31 = vld [vmem:[%s16310_s3 + $0x48] sm:$0xff]  }
 0x13d   : > { %16546 = vst [vmem:[#allocation39_spill] sm:$0xff] %v13198_v7  ;;  %v1689_v48 = vpop.f32.mrb[41].mxu1  ;;  %v13204_v3 = vpop.eup %10796  ;;  %v1305_v49 = vadd.f32 %v12877_v13, %v1304_v21  ;;  %9562 = vmatprep.mubr.bf16.mxu0 %v2329_v40  ;;  %10818 = vtanh.f32 %v1310_v32 }
 0x13e   : > { %16547 = vst [vmem:[#allocation40_spill] sm:$0xff] %v13204_v3  ;;  %v1690_v0 = vadd.f32 %v12877_v13, %v1689_v48  ;;  %v13208_v37 = vpop.eup %10798  ;;  %9610 = vmatprep.mubr.bf16.mxu1 %v2538_v30  ;;  %10820 = vtanh.f32 %v1695_v47  ;;  %v9369_v12 = vpop.f32.mrb[42].mxu0 }
 0x13f   : > { %16548 = vst [vmem:[#allocation41_spill] sm:$0xff] %v13208_v37  ;;  %v13210_v15 = vpop.eup %10800  ;;  %v9419_v17 = vpop.f32.mrb[42].mxu1  ;;  %v2330_v56 = vpack.c.bf16 %v13198_v7, %v13208_v37  ;;  %10822 = vtanh.f32 %v1305_v49  ;;  %v1320_v40 = vadd.f32 %v9369_v12, %v12877_v13 }
 0x140   : > { %16549 = vst [vmem:[#allocation42_spill] sm:$0xff] %v13210_v15  ;;  %v13219_v21 = vpop.eup %10802  ;;  %v1705_v32 = vadd.f32 %v9419_v17, %v12877_v13  ;;  %v1314_v48 = vpop.f32.mrb[43].mxu0  ;;  %v2539_v47 = vpack.c.bf16 %v13204_v3, %v13210_v15  ;;  %10824 = vtanh.f32 %v1690_v0  ;;  %v13241_v0 = vld [vmem:[%s16310_s3 + $0x50] sm:$0xff]  }
 0x141   : > { %16550 = vst [vmem:[#allocation43_spill] sm:$0xff] %v13219_v21  ;;  %v1699_v30 = vpop.f32.mrb[43].mxu1  ;;  %v13225_v52 = vpop.eup %10804  ;;  %v1315_v46 = vadd.f32 %v12877_v13, %v1314_v48  ;;  %9563 = vmatmul.mubr.bf16.vlgmr.msra.gmra.mrb[96].mxu0 %v2330_v56  ;;  %10826 = vtanh.f32 %v1320_v40 }
 0x142   : > { %16551 = vst [vmem:[#allocation44_spill] sm:$0xff] %v13225_v52  ;;  %v1700_v7 = vadd.f32 %v12877_v13, %v1699_v30  ;;  %v13229_v37 = vpop.eup %10806  ;;  %9611 = vmatmul.mubr.bf16.vlgmr.msra.gmra.mrb[96].mxu1 %v2539_v47  ;;  %9643 = vmatpush3.bf16.msra.mxu0 %v13063_v20  ;;  %10828 = vtanh.f32 %v1705_v32  ;;  %v9372_v12 = vpop.f32.mrb[44].mxu0 }
 0x143   : > { %16552 = vst [vmem:[#allocation45_spill] sm:$0xff] %v13229_v37  ;;  %v13232_v49 = vpop.eup %10808  ;;  %v9422_v17 = vpop.f32.mrb[44].mxu1  ;;  %v2331_v15 = vpack.c.bf16 %v13219_v21, %v13229_v37  ;;  %9691 = vmatpush3.bf16.msra.mxu1 %v13063_v20  ;;  %9644 = vmatprep.subr.bf16.mxu0 %v13217_v31  ;;  %10830 = vtanh.f32 %v1315_v46  ;;  %v1330_v40 = vadd.f32 %v9372_v12, %v12877_v13 }
 0x144   : > { %16553 = vst [vmem:[#allocation46_spill] sm:$0xff] %v13232_v49  ;;  %v13243_v56 = vpop.eup %10810  ;;  %v1715_v32 = vadd.f32 %v9422_v17, %v12877_v13  ;;  %v1324_v48 = vpop.f32.mrb[45].mxu0  ;;  %v2540_v47 = vpack.c.bf16 %v13225_v52, %v13232_v49  ;;  %9692 = vmatprep.subr.bf16.mxu1 %v13217_v31  ;;  %10832 = vtanh.f32 %v1700_v7  ;;  %v13266_v7 = vld [vmem:[%s16310_s3 + $0x58] sm:$0xff]  }
 0x145   : > { %16554 = vst [vmem:[#allocation47_spill] sm:$0xff] %v13243_v56  ;;  %v1709_v30 = vpop.f32.mrb[45].mxu1  ;;  %v13250_v21 = vpop.eup %10812  ;;  %v1325_v37 = vadd.f32 %v12877_v13, %v1324_v48  ;;  %9566 = vmatprep.mubr.bf16.mxu0 %v2331_v15  ;;  %10834 = vtanh.f32 %v1330_v40 }
 0x146   : > { %16555 = vst [vmem:[#allocation48_spill] sm:$0xff] %v13250_v21  ;;  %v1710_v3 = vadd.f32 %v12877_v13, %v1709_v30  ;;  %v13254_v46 = vpop.eup %10814  ;;  %9614 = vmatprep.mubr.bf16.mxu1 %v2540_v47  ;;  %9645 = vmatpush3.bf16.msra.mxu0 %v13217_v31  ;;  %10836 = vtanh.f32 %v1715_v32  ;;  %v9375_v17 = vpop.f32.mrb[46].mxu0 }
 0x147   : > { %16556 = vst [vmem:[#allocation49_spill] sm:$0xff] %v13254_v46  ;;  %v13257_v12 = vpop.eup %10816  ;;  %v9425_v52 = vpop.f32.mrb[46].mxu1  ;;  %v2332_v49 = vpack.c.bf16 %v13243_v56, %v13254_v46  ;;  %9693 = vmatpush3.bf16.msra.mxu1 %v13217_v31  ;;  %9646 = vmatprep.subr.bf16.mxu0 %v13241_v0  ;;  %10838 = vtanh.f32 %v1325_v37  ;;  %v1340_v40 = vadd.f32 %v9375_v17, %v12877_v13 }
 0x148   : > { %16557 = vst [vmem:[#allocation50_spill] sm:$0xff] %v13257_v12  ;;  %v13268_v15 = vpop.eup %10818  ;;  %v1725_v32 = vadd.f32 %v9425_v52, %v12877_v13  ;;  %v1334_v48 = vpop.f32.mrb[47].mxu0  ;;  %v2541_v47 = vpack.c.bf16 %v13250_v21, %v13257_v12  ;;  %9694 = vmatprep.subr.bf16.mxu1 %v13241_v0  ;;  %10840 = vtanh.f32 %v1710_v3  ;;  %v13291_v3 = vld [vmem:[%s16310_s3 + $0x60] sm:$0xff]  }
 0x149   : > { %16558 = vst [vmem:[#allocation51_spill] sm:$0xff] %v13268_v15  ;;  %v1719_v30 = vpop.f32.mrb[47].mxu1  ;;  %v13275_v56 = vpop.eup %10820  ;;  %v1335_v46 = vadd.f32 %v12877_v13, %v1334_v48  ;;  %9567 = vmatmul.mubr.bf16.gmra.mrb[100].mxu0 %v2332_v49  ;;  %10842 = vtanh.f32 %v1340_v40 }
 0x14a   : > { %16559 = vst [vmem:[#allocation52_spill] sm:$0xff] %v13275_v56  ;;  %v1720_v62 = vadd.f32 %v12877_v13, %v1719_v30  ;;  %v13279_v37 = vpop.eup %10822  ;;  %9615 = vmatmul.mubr.bf16.gmra.mrb[100].mxu1 %v2541_v47  ;;  %9647 = vmatpush3.bf16.msra.mxu0 %v13241_v0  ;;  %10844 = vtanh.f32 %v1725_v32  ;;  %v9378_v17 = vpop.f32.mrb[48].mxu0 }
 0x14b   : > { %16560 = vst [vmem:[#allocation53_spill] sm:$0xff] %v13279_v37  ;;  %v13282_v52 = vpop.eup %10824  ;;  %v9428_v12 = vpop.f32.mrb[48].mxu1  ;;  %v2333_v21 = vpack.c.bf16 %v13268_v15, %v13279_v37  ;;  %9695 = vmatpush3.bf16.msra.mxu1 %v13241_v0  ;;  %9648 = vmatprep.subr.bf16.mxu0 %v13266_v7  ;;  %10846 = vtanh.f32 %v1335_v46  ;;  %v1350_v40 = vadd.f32 %v9378_v17, %v12877_v13  ;;  %v13305_v37 = vld [vmem:[%s16309_s2] ss:$0 sm:$0xff] }
 0x14c   : > { %16561 = vst [vmem:[#allocation54_spill] sm:$0xff] %v13282_v52  ;;  %v13293_v49 = vpop.eup %10826  ;;  %v1735_v32 = vadd.f32 %v9428_v12, %v12877_v13  ;;  %v1344_v48 = vpop.f32.mrb[49].mxu0  ;;  %v2542_v47 = vpack.c.bf16 %v13275_v56, %v13282_v52  ;;  %9696 = vmatprep.subr.bf16.mxu1 %v13266_v7  ;;  %10848 = vtanh.f32 %v1720_v62 }
 0x14d   : > { %16562 = vst [vmem:[#allocation55_spill] sm:$0xff] %v13293_v49  ;;  %v1729_v30 = vpop.f32.mrb[49].mxu1  ;;  %v13300_v15 = vpop.eup %10828  ;;  %v1345_v46 = vadd.f32 %v13305_v37, %v1344_v48  ;;  %9570 = vmatprep.mubr.bf16.mxu0 %v2333_v21  ;;  %10850 = vtanh.f32 %v1350_v40  ;;  %v13321_v21 = vld [vmem:[%s16310_s3 + $0x68] sm:$0xff]  }
 0x14e   : > { %16563 = vst [vmem:[#allocation56_spill] sm:$0xff] %v13300_v15  ;;  %v1730_v17 = vadd.f32 %v13305_v37, %v1729_v30  ;;  %v13309_v13 = vpop.eup %10830  ;;  %9618 = vmatprep.mubr.bf16.mxu1 %v2542_v47  ;;  %9649 = vmatpush3.bf16.msra.mxu0 %v13266_v7  ;;  %10852 = vtanh.f32 %v1735_v32  ;;  %v9381_v62 = vpop.f32.mrb[50].mxu0 }
 0x14f   : > { %16564 = vst [vmem:[#allocation57_spill] sm:$0xff] %v13309_v13  ;;  %v13312_v12 = vpop.eup %10832  ;;  %v9431_v56 = vpop.f32.mrb[50].mxu1  ;;  %v2334_v52 = vpack.c.bf16 %v13293_v49, %v13309_v13  ;;  %9697 = vmatpush3.bf16.msra.mxu1 %v13266_v7  ;;  %9650 = vmatprep.subr.bf16.mxu0 %v13291_v3  ;;  %10854 = vtanh.f32 %v1345_v46  ;;  %v1360_v48 = vadd.f32 %v13305_v37, %v9381_v62 }
 0x150   : > { %16565 = vst [vmem:[#allocation58_spill] sm:$0xff] %v13312_v12  ;;  %v13323_v40 = vpop.eup %10834  ;;  %v1745_v32 = vadd.f32 %v13305_v37, %v9431_v56  ;;  %v1354_v30 = vpop.f32.mrb[51].mxu0  ;;  %v2543_v49 = vpack.c.bf16 %v13300_v15, %v13312_v12  ;;  %9698 = vmatprep.subr.bf16.mxu1 %v13291_v3  ;;  %10856 = vtanh.f32 %v1730_v17 }
 0x151   : > { %16566 = vst [vmem:[#allocation59_spill] sm:$0xff] %v13323_v40  ;;  %v1739_v47 = vpop.f32.mrb[51].mxu1  ;;  %v13330_v13 = vpop.eup %10836  ;;  %v1355_v28 = vadd.f32 %v13305_v37, %v1354_v30  ;;  %9571 = vmatmul.mubr.bf16.gmra.mrb[104].mxu0 %v2334_v52  ;;  %10858 = vtanh.f32 %v1360_v48 }
 0x152   : > { %16567 = vst [vmem:[#allocation60_spill] sm:$0xff] %v13330_v13  ;;  %v1740_v41 = vadd.f32 %v13305_v37, %v1739_v47  ;;  %v13334_v46 = vpop.eup %10838  ;;  %9619 = vmatmul.mubr.bf16.gmra.mrb[104].mxu1 %v2543_v49  ;;  %9651 = vmatpush3.bf16.msra.mxu0 %v13291_v3  ;;  %10860 = vtanh.f32 %v1745_v32  ;;  %v9384_v62 = vpop.f32.mrb[52].mxu0 }
 0x153   : > { %16568 = vst [vmem:[#allocation61_spill] sm:$0xff] %v13334_v46  ;;  %v13337_v56 = vpop.eup %10840  ;;  %v9434_v12 = vpop.f32.mrb[52].mxu1  ;;  %v2335_v15 = vpack.c.bf16 %v13323_v40, %v13334_v46  ;;  %9699 = vmatpush3.bf16.msra.mxu1 %v13291_v3  ;;  %9652 = vmatprep.subr.bf16.mxu0 %v13321_v21  ;;  %10862 = vtanh.f32 %v1355_v28  ;;  %v1370_v52 = vadd.f32 %v13305_v37, %v9384_v62 }
 0x154   : > { %16569 = vst [vmem:[#allocation62_spill] sm:$0xff] %v13337_v56  ;;  %v13343_v17 = vpop.eup %10842  ;;  %v1755_v49 = vadd.f32 %v13305_v37, %v9434_v12  ;;  %v1364_v48 = vpop.f32.mrb[53].mxu0  ;;  %v2544_v32 = vpack.c.bf16 %v13330_v13, %v13337_v56  ;;  %9700 = vmatprep.subr.bf16.mxu1 %v13321_v21  ;;  %10864 = vtanh.f32 %v1740_v41 }
 0x155   : > { %16570 = vst [vmem:[#allocation63_spill] sm:$0xff] %v13343_v17  ;;  %v1749_v30 = vpop.f32.mrb[53].mxu1  ;;  %v13350_v47 = vpop.eup %10844  ;;  %v1365_v40 = vadd.f32 %v13305_v37, %v1364_v48  ;;  %9574 = vmatprep.mubr.bf16.mxu0 %v2335_v15  ;;  %10866 = vtanh.f32 %v1370_v52 }
 0x156   : > { %16571 = vst [vmem:[#allocation64_spill] sm:$0xff] %v13350_v47  ;;  %v1750_v46 = vadd.f32 %v13305_v37, %v1749_v30  ;;  %v13354_v28 = vpop.eup %10846  ;;  %9622 = vmatprep.mubr.bf16.mxu1 %v2544_v32  ;;  %9653 = vmatpush3.bf16.msra.mxu0 %v13321_v21  ;;  %10868 = vtanh.f32 %v1755_v49  ;;  %v9387_v62 = vpop.f32.mrb[54].mxu0 }
 0x157   : > { %16572 = vst [vmem:[#allocation65_spill] sm:$0xff] %v13354_v28  ;;  %v13357_v12 = vpop.eup %10848  ;;  %v9437_v13 = vpop.f32.mrb[54].mxu1  ;;  %v2336_v56 = vpack.c.bf16 %v13343_v17, %v13354_v28  ;;  %9701 = vmatpush3.bf16.msra.mxu1 %v13321_v21  ;;  %10870 = vtanh.f32 %v1365_v40  ;;  %v1380_v15 = vadd.f32 %v13305_v37, %v9387_v62 }
 0x158   : > { %16573 = vst [vmem:[#allocation66_spill] sm:$0xff] %v13357_v12  ;;  %v13362_v41 = vpop.eup %10850  ;;  %v1765_v52 = vadd.f32 %v13305_v37, %v9437_v13  ;;  %v1374_v48 = vpop.f32.mrb[55].mxu0  ;;  %v2545_v32 = vpack.c.bf16 %v13350_v47, %v13357_v12  ;;  %10872 = vtanh.f32 %v1750_v46 }
 0x159   : > { %16574 = vst [vmem:[#allocation67_spill] sm:$0xff] %v13362_v41  ;;  %v1759_v30 = vpop.f32.mrb[55].mxu1  ;;  %v13368_v49 = vpop.eup %10852  ;;  %v1375_v8 = vadd.f32 %v13305_v37, %v1374_v48  ;;  %9575 = vmatmul.mubr.bf16.gmra.mrb[108].mxu0 %v2336_v56  ;;  %10874 = vtanh.f32 %v1380_v15 }
 0x15a   : > { %16575 = vst [vmem:[#allocation68_spill] sm:$0xff] %v13368_v49  ;;  %v1760_v17 = vadd.f32 %v13305_v37, %v1759_v30  ;;  %v13372_v28 = vpop.eup %10854  ;;  %9623 = vmatmul.mubr.bf16.gmra.mrb[108].mxu1 %v2545_v32  ;;  %10876 = vtanh.f32 %v1765_v52  ;;  %v9390_v13 = vpop.f32.mrb[56].mxu0 }
 0x15b   : > { %16576 = vst [vmem:[#allocation69_spill] sm:$0xff] %v13372_v28  ;;  %v13374_v40 = vpop.eup %10856  ;;  %v9440_v62 = vpop.f32.mrb[56].mxu1  ;;  %v2337_v12 = vpack.c.bf16 %v13362_v41, %v13372_v28  ;;  %10878 = vtanh.f32 %v1375_v8  ;;  %v1390_v46 = vadd.f32 %v13305_v37, %v9390_v13  ;;  %v13393_v8 = vld [vmem:[%s16310_s3 + $0x70] sm:$0xff]  }
 0x15c   : > { %16577 = vst [vmem:[#allocation70_spill] sm:$0xff] %v13374_v40  ;;  %v13378_v47 = vpop.eup %10858  ;;  %v1775_v48 = vadd.f32 %v13305_v37, %v9440_v62  ;;  %v1384_v56 = vpop.f32.mrb[57].mxu0  ;;  %v2546_v15 = vpack.c.bf16 %v13368_v49, %v13374_v40  ;;  %10880 = vtanh.f32 %v1760_v17  ;;  %9654 = vmatprep.subr.bf16.mxu0 %v13393_v8  ;;  %9702 = vmatprep.subr.bf16.mxu1 %v13393_v8 }
 0x15d   : > { %16578 = vst [vmem:[#allocation71_spill] sm:$0xff] %v13378_v47  ;;  %v1769_v30 = vpop.f32.mrb[57].mxu1  ;;  %v13384_v32 = vpop.eup %10860  ;;  %v1385_v52 = vadd.f32 %v13305_v37, %v1384_v56  ;;  %9578 = vmatprep.mubr.bf16.mxu0 %v2337_v12  ;;  %10882 = vtanh.f32 %v1390_v46  ;;  %9703 = vmatpush3.bf16.msra.mxu1 %v13393_v8 }
 0x15e   : > { %16579 = vst [vmem:[#allocation72_spill] sm:$0xff] %v13384_v32  ;;  %v1770_v25 = vadd.f32 %v13305_v37, %v1769_v30  ;;  %v13388_v41 = vpop.eup %10862  ;;  %9626 = vmatprep.mubr.bf16.mxu1 %v2546_v15  ;;  %10884 = vtanh.f32 %v1775_v48  ;;  %v9393_v62 = vpop.f32.mrb[58].mxu0  ;;  %9655 = vmatpush3.bf16.msra.mxu0 %v13393_v8 }
 0x15f   : > { %16580 = vst [vmem:[#allocation73_spill] sm:$0xff] %v13388_v41  ;;  %v13395_v13 = vpop.eup %10864  ;;  %v9443_v49 = vpop.f32.mrb[58].mxu1  ;;  %v2338_v17 = vpack.c.bf16 %v13378_v47, %v13388_v41  ;;  %10886 = vtanh.f32 %v1385_v52  ;;  %v1400_v12 = vadd.f32 %v13305_v37, %v9393_v62 }
 0x160   : > { %16581 = vst [vmem:[#allocation74_spill] sm:$0xff] %v13395_v13  ;;  %v13399_v56 = vpop.eup %10866  ;;  %v1785_v46 = vadd.f32 %v13305_v37, %v9443_v49  ;;  %v1394_v30 = vpop.f32.mrb[59].mxu0  ;;  %v2547_v40 = vpack.c.bf16 %v13384_v32, %v13395_v13  ;;  %10888 = vtanh.f32 %v1770_v25 }
 0x161   : > { %16582 = vst [vmem:[#allocation75_spill] sm:$0xff] %v13399_v56  ;;  %v1779_v15 = vpop.f32.mrb[59].mxu1  ;;  %v13407_v48 = vpop.eup %10868  ;;  %v1395_v28 = vadd.f32 %v13305_v37, %v1394_v30  ;;  %9579 = vmatmul.mubr.bf16.gmra.mrb[112].mxu0 %v2338_v17  ;;  %10890 = vtanh.f32 %v1400_v12 }
 0x162   : > { %16583 = vst [vmem:[#allocation76_spill] sm:$0xff] %v13407_v48  ;;  %v1780_v52 = vadd.f32 %v13305_v37, %v1779_v15  ;;  %v13412_v49 = vpop.eup %10870  ;;  %9627 = vmatmul.mubr.bf16.gmra.mrb[112].mxu1 %v2547_v40  ;;  %10892 = vtanh.f32 %v1785_v46  ;;  %v9396_v13 = vpop.f32.mrb[60].mxu0 }
 0x163   : > { %16584 = vst [vmem:[#allocation77_spill] sm:$0xff] %v13412_v49  ;;  %v13415_v62 = vpop.eup %10872  ;;  %v9446_v32 = vpop.f32.mrb[60].mxu1  ;;  %v2339_v25 = vpack.c.bf16 %v13399_v56, %v13412_v49  ;;  %10894 = vtanh.f32 %v1395_v28  ;;  %v1410_v17 = vadd.f32 %v13305_v37, %v9396_v13  ;;  %v13434_v28 = vld [vmem:[%s16310_s3 + $0x78] sm:$0xff]  }
 0x164   : > { %16585 = vst [vmem:[#allocation78_spill] sm:$0xff] %v13415_v62  ;;  %v13419_v30 = vpop.eup %10874  ;;  %v1795_v15 = vadd.f32 %v13305_v37, %v9446_v32  ;;  %v1404_v47 = vpop.f32.mrb[61].mxu0  ;;  %v2548_v40 = vpack.c.bf16 %v13407_v48, %v13415_v62  ;;  %10896 = vtanh.f32 %v1780_v52  ;;  %9656 = vmatprep.subr.bf16.mxu0 %v13434_v28  ;;  %9704 = vmatprep.subr.bf16.mxu1 %v13434_v28 }
 0x165   : > { %16586 = vst [vmem:[#allocation79_spill] sm:$0xff] %v13419_v30  ;;  %v1789_v12 = vpop.f32.mrb[61].mxu1  ;;  %v13425_v41 = vpop.eup %10876  ;;  %v1405_v46 = vadd.f32 %v13305_v37, %v1404_v47  ;;  %9582 = vmatprep.mubr.bf16.mxu0 %v2339_v25  ;;  %10898 = vtanh.f32 %v1410_v17  ;;  %9705 = vmatpush3.bf16.msra.mxu1 %v13434_v28 }
 0x166   : > { %16587 = vst [vmem:[#allocation80_spill] sm:$0xff] %v13425_v41  ;;  %v1790_v18 = vadd.f32 %v13305_v37, %v1789_v12  ;;  %v13429_v56 = vpop.eup %10878  ;;  %9630 = vmatprep.mubr.bf16.mxu1 %v2548_v40  ;;  %10900 = vtanh.f32 %v1795_v15  ;;  %v9399_v13 = vpop.f32.mrb[62].mxu0  ;;  %9657 = vmatpush3.bf16.msra.mxu0 %v13434_v28 }
 0x167   : > { %16588 = vst [vmem:[#allocation81_spill] sm:$0xff] %v13429_v56  ;;  %v13436_v32 = vpop.eup %10880  ;;  %v9449_v48 = vpop.f32.mrb[62].mxu1  ;;  %v2340_v47 = vpack.c.bf16 %v13419_v30, %v13429_v56  ;;  %10902 = vtanh.f32 %v1405_v46  ;;  %v1420_v25 = vadd.f32 %v13305_v37, %v9399_v13  ;;  %9738 = vmatprep.subr.bf16.mxu0 %v13063_v20  ;;  %9786 = vmatprep.subr.bf16.mxu1 %v13063_v20 }
 0x168   : > { %16589 = vst [vmem:[#allocation82_spill] sm:$0xff] %v13436_v32  ;;  %v13440_v52 = vpop.eup %10882  ;;  %v1805_v17 = vadd.f32 %v13305_v37, %v9449_v48  ;;  %v1414_v12 = vpop.f32.mrb[63].mxu0  ;;  %v2549_v62 = vpack.c.bf16 %v13425_v41, %v13436_v32  ;;  %10904 = vtanh.f32 %v1790_v18 }
 0x169   : > { %16590 = vst [vmem:[#allocation83_spill] sm:$0xff] %v13440_v52  ;;  %v1799_v40 = vpop.f32.mrb[63].mxu1  ;;  %v13448_v15 = vpop.eup %10884  ;;  %v1415_v49 = vadd.f32 %v13305_v37, %v1414_v12  ;;  %9583 = vmatmul.mubr.bf16.gmra.mrb[116].mxu0 %v2340_v47  ;;  %10906 = vtanh.f32 %v1420_v25 }
 0x16a   : > { %16591 = vst [vmem:[#allocation84_spill] sm:$0xff] %v13448_v15  ;;  %v1800_v46 = vadd.f32 %v13305_v37, %v1799_v40  ;;  %v13453_v48 = vpop.eup %10886  ;;  %9631 = vmatmul.mubr.bf16.gmra.mrb[116].mxu1 %v2549_v62  ;;  %10908 = vtanh.f32 %v1805_v17 }
 0x16b   : > { %16592 = vst [vmem:[#allocation85_spill] sm:$0xff] %v13453_v48  ;;  %v13456_v13 = vpop.eup %10888  ;;  %v2341_v32 = vpack.c.bf16 %v13440_v52, %v13453_v48  ;;  %10910 = vtanh.f32 %v1415_v49 }
 0x16c   : > { %16593 = vst [vmem:[#allocation86_spill] sm:$0xff] %v13456_v13  ;;  %v13462_v18 = vpop.eup %10890  ;;  %v2550_v37 = vpack.c.bf16 %v13448_v15, %v13456_v13  ;;  %10912 = vtanh.f32 %v1800_v46 }
 0x16d   : > { %16594 = vst [vmem:[#allocation87_spill] sm:$0xff] %v13462_v18  ;;  %v13466_v47 = vpop.eup %10892  ;;  %9586 = vmatprep.mubr.bf16.mxu0 %v2341_v32 }
 0x16e   : > { %16595 = vst [vmem:[#allocation88_spill] sm:$0xff] %v13466_v47  ;;  %v13468_v62 = vpop.eup %10894  ;;  %9634 = vmatprep.mubr.bf16.mxu1 %v2550_v37 }
 0x16f   : > { %16596 = vst [vmem:[#allocation89_spill] sm:$0xff] %v13468_v62  ;;  %v13470_v25 = vpop.eup %10896  ;;  %v2342_v17 = vpack.c.bf16 %v13462_v18, %v13468_v62 }
 0x170   : > { %16597 = vst [vmem:[#allocation90_spill] sm:$0xff] %v13470_v25  ;;  %v13474_v12 = vpop.eup %10898  ;;  %v2551_v20 = vpack.c.bf16 %v13466_v47, %v13470_v25 }
 0x171   : > { %16598 = vst [vmem:[#allocation91_spill] sm:$0xff] %v13474_v12  ;;  %v13478_v49 = vpop.eup %10900  ;;  %9587 = vmatmul.mubr.bf16.gmra.mrb[120].mxu0 %v2342_v17 }
 0x172   : > { %16599 = vst [vmem:[#allocation92_spill] sm:$0xff] %v13478_v49  ;;  %v13480_v40 = vpop.eup %10902  ;;  %9635 = vmatmul.mubr.bf16.gmra.mrb[120].mxu1 %v2551_v20 }
 0x173   : > { %16600 = vst [vmem:[#allocation93_spill] sm:$0xff] %v13480_v40  ;;  %v13482_v32 = vpop.eup %10904  ;;  %v2343_v46 = vpack.c.bf16 %v13474_v12, %v13480_v40 }
 0x174   : > { %16601 = vst [vmem:[#allocation94_spill] sm:$0xff] %v13482_v32  ;;  %v13486_v37 = vpop.eup %10906  ;;  %v2552_v62 = vpack.c.bf16 %v13478_v49, %v13482_v32  ;;  %v13503_v49 = vld [vmem:[%s16311_s4] ss:$0 sm:$0xff] }
 0x175   : > { %16602 = vst [vmem:[#allocation95_spill] sm:$0xff] %v13486_v37  ;;  %v13490_v15 = vpop.eup %10908  ;;  %9590 = vmatprep.mubr.bf16.mxu0 %v2343_v46 }
 0x176   : > { %16603 = vst [vmem:[#allocation96_spill] sm:$0xff] %v13490_v15  ;;  %v13492_v25 = vpop.eup %10910  ;;  %9638 = vmatprep.mubr.bf16.mxu1 %v2552_v62 }
 0x177   : > { %16604 = vst [vmem:[#allocation97_spill] sm:$0xff] %v13492_v25  ;;  %v13494_v17 = vpop.eup %10912  ;;  %v2344_v20 = vpack.c.bf16 %v13486_v37, %v13492_v25 }
 0x178   : > { %16605 = vst [vmem:[#allocation98_spill] sm:$0xff] %v13494_v17  ;;  %v2553_v13 = vpack.c.bf16 %v13490_v15, %v13494_v17 }
 0x179   : > { %9591 = vmatmul.mubr.bf16.gmra.mrb[124].mxu0 %v2344_v20 }
 0x17a   : > { %9639 = vmatmul.mubr.bf16.gmra.mrb[124].mxu1 %v2553_v13 }
 0x1d4   : > { %v9468_v32 = vpop.f32.mrb[64].mxu0 }
 0x1d5   : > { %v1970_v46 = vadd.f32 %v9468_v32, %v13503_v49  ;;  %v9516_v12 = vpop.f32.mrb[64].mxu1  ;;  %v1961_v62 = vpop.f32.mrb[65].mxu0 }
 0x1d6   : > { %v2179_v40 = vadd.f32 %v9516_v12, %v13503_v49  ;;  %v1962_v47 = vadd.f32 %v13503_v49, %v1961_v62  ;;  %v2170_v25 = vpop.f32.mrb[65].mxu1  ;;  %v9469_v37 = vpop.f32.mrb[66].mxu0 }
 0x1d7   : > { %10914 = vtanh.f32 %v1970_v46  ;;  %v2171_v20 = vadd.f32 %v13503_v49, %v2170_v25  ;;  %v1973_v13 = vadd.f32 %v9469_v37, %v13503_v49  ;;  %v9517_v17 = vpop.f32.mrb[66].mxu1  ;;  %v1964_v15 = vpop.f32.mrb[67].mxu0 }
 0x1d8   : > { %10916 = vtanh.f32 %v2179_v40  ;;  %v2182_v52 = vadd.f32 %v9517_v17, %v13503_v49  ;;  %v2173_v48 = vpop.f32.mrb[67].mxu1  ;;  %v1965_v32 = vadd.f32 %v13503_v49, %v1964_v15 }
 0x1d9   : > { %10918 = vtanh.f32 %v1962_v47  ;;  %v2174_v12 = vadd.f32 %v13503_v49, %v2173_v48 }
 0x1da   : > { %10920 = vtanh.f32 %v2171_v20 }
 0x1db   : > { %10922 = vtanh.f32 %v1973_v13 }
 0x1dc   : > { %10924 = vtanh.f32 %v2182_v52  ;;  %v9472_v62 = vpop.f32.mrb[68].mxu0 }
 0x1dd   : > { %10926 = vtanh.f32 %v1965_v32  ;;  %v1986_v25 = vadd.f32 %v9472_v62, %v13503_v49  ;;  %v9520_v46 = vpop.f32.mrb[68].mxu1  ;;  %v1977_v37 = vpop.f32.mrb[69].mxu0 }
 0x1de   : > { %10928 = vtanh.f32 %v2174_v12  ;;  %v2195_v40 = vadd.f32 %v9520_v46, %v13503_v49  ;;  %v1978_v17 = vadd.f32 %v13503_v49, %v1977_v37  ;;  %v2186_v18 = vpop.f32.mrb[69].mxu1  ;;  %v9473_v47 = vpop.f32.mrb[70].mxu0 }
 0x1df   : > { %10930 = vtanh.f32 %v1986_v25  ;;  %v2187_v15 = vadd.f32 %v13503_v49, %v2186_v18  ;;  %v1989_v48 = vadd.f32 %v9473_v47, %v13503_v49  ;;  %v9521_v20 = vpop.f32.mrb[70].mxu1  ;;  %v1980_v52 = vpop.f32.mrb[71].mxu0 }
 0x1e0   : > { %10932 = vtanh.f32 %v2195_v40  ;;  %v2198_v13 = vadd.f32 %v9521_v20, %v13503_v49  ;;  %v2189_v32 = vpop.f32.mrb[71].mxu1  ;;  %v1981_v12 = vadd.f32 %v13503_v49, %v1980_v52 }
 0x1e1   : > { %v10915_v62 = vpop.eup %10914  ;;  %10934 = vtanh.f32 %v1978_v17  ;;  %v2190_v37 = vadd.f32 %v13503_v49, %v2189_v32 }
 0x1e2   : > { %v10917_v46 = vpop.eup %10916  ;;  %10936 = vtanh.f32 %v2187_v15 }
 0x1e3   : > { %v10919_v41 = vpop.eup %10918  ;;  %10938 = vtanh.f32 %v1989_v48 }
 0x1e4   : > { %v10921_v25 = vpop.eup %10920  ;;  %10940 = vtanh.f32 %v2198_v13  ;;  %v9476_v18 = vpop.f32.mrb[72].mxu0 }
 0x1e5   : > { %v10923_v47 = vpop.eup %10922  ;;  %10942 = vtanh.f32 %v1981_v12  ;;  %v2002_v40 = vadd.f32 %v9476_v18, %v13503_v49  ;;  %v9524_v30 = vpop.f32.mrb[72].mxu1 }
 0x1e6   : > { %v1993_v20 = vpop.f32.mrb[73].mxu0  ;;  %v10925_v56 = vpop.eup %10924  ;;  %10944 = vtanh.f32 %v2190_v37  ;;  %v2211_v17 = vadd.f32 %v9524_v30, %v13503_v49  ;;  %v2767_v32 = vpack.c.bf16 %v10923_v47, %v10915_v62 }
 0x1e7   : > { %v1994_v52 = vadd.f32 %v13503_v49, %v1993_v20  ;;  %v2202_v15 = vpop.f32.mrb[73].mxu1  ;;  %v9477_v27 = vpop.f32.mrb[74].mxu0  ;;  %10946 = vtanh.f32 %v2002_v40  ;;  %v3030_v18 = vpack.c.bf16 %v10925_v56, %v10917_v46 }
 0x1e8   : > { %v10927_v4 = vpop.eup %10926  ;;  %v2203_v48 = vadd.f32 %v13503_v49, %v2202_v15  ;;  %v2005_v13 = vadd.f32 %v9477_v27, %v13503_v49  ;;  %v9525_v12 = vpop.f32.mrb[74].mxu1  ;;  %10948 = vtanh.f32 %v2211_v17 }
 0x1e9   : > { %v1996_v43 = vpop.f32.mrb[75].mxu0  ;;  %v10929_v26 = vpop.eup %10928  ;;  %v2214_v37 = vadd.f32 %v9525_v12, %v13503_v49  ;;  %v2766_v30 = vpack.c.bf16 %v10927_v4, %v10919_v41  ;;  %10950 = vtanh.f32 %v1994_v52  ;;  %v12451_v4 = vld [vmem:[%s16310_s3 + $0x40] sm:$0xff]  }
 0x1ea   : > { %v2205_v34 = vpop.f32.mrb[75].mxu1  ;;  %v10931_v51 = vpop.eup %10930  ;;  %v1997_v20 = vadd.f32 %v13503_v49, %v1996_v43  ;;  %v3029_v62 = vpack.c.bf16 %v10929_v26, %v10921_v25  ;;  %10952 = vtanh.f32 %v2203_v48 }
 0x1eb   : > { %v10933_v47 = vpop.eup %10932  ;;  %v2206_v40 = vadd.f32 %v13503_v49, %v2205_v34  ;;  %9658 = vmatprep.mubr.bf16.mxu0 %v2766_v30  ;;  %10954 = vtanh.f32 %v2005_v13 }
 0x1ec   : > { %v10935_v27 = vpop.eup %10934  ;;  %9706 = vmatprep.mubr.bf16.mxu1 %v3029_v62  ;;  %9659 = vmatmul.mubr.bf16.vlgmr.msra.gmra.mrb[128].mxu0 %v2767_v32  ;;  %10956 = vtanh.f32 %v2214_v37  ;;  %v9480_v46 = vpop.f32.mrb[76].mxu0 }
 0x1ed   : > { %v10937_v56 = vpop.eup %10936  ;;  %9707 = vmatmul.mubr.bf16.vlgmr.msra.gmra.mrb[128].mxu1 %v3030_v18  ;;  %9739 = vmatpush3.bf16.msra.mxu0 %v12451_v4  ;;  %10958 = vtanh.f32 %v1997_v20  ;;  %v2018_v26 = vadd.f32 %v9480_v46, %v13503_v49  ;;  %v9528_v41 = vpop.f32.mrb[76].mxu1 }
 0x1ee   : > { %v10939_v43 = vpop.eup %10938  ;;  %v2009_v34 = vpop.f32.mrb[77].mxu0  ;;  %9787 = vmatpush3.bf16.msra.mxu1 %v12451_v4  ;;  %9740 = vmatprep.subr.bf16.mxu0 %v13217_v31  ;;  %10960 = vtanh.f32 %v2206_v40  ;;  %v2227_v17 = vadd.f32 %v9528_v41, %v13503_v49 }
 0x1ef   : > { %v10941_v25 = vpop.eup %10940  ;;  %v2010_v52 = vadd.f32 %v13503_v49, %v2009_v34  ;;  %v2218_v15 = vpop.f32.mrb[77].mxu1  ;;  %v2769_v48 = vpack.c.bf16 %v10939_v43, %v10931_v51  ;;  %9788 = vmatprep.subr.bf16.mxu1 %v13217_v31  ;;  %10962 = vtanh.f32 %v2018_v26 }
 0x1f0   : > { %v9481_v32 = vpop.f32.mrb[78].mxu0  ;;  %v10943_v13 = vpop.eup %10942  ;;  %v2219_v12 = vadd.f32 %v13503_v49, %v2218_v15  ;;  %v3032_v20 = vpack.c.bf16 %v10941_v25, %v10933_v47  ;;  %10964 = vtanh.f32 %v2227_v17 }
 0x1f1   : > { %v2021_v18 = vadd.f32 %v9481_v32, %v13503_v49  ;;  %v9529_v37 = vpop.f32.mrb[78].mxu1  ;;  %v2012_v30 = vpop.f32.mrb[79].mxu0  ;;  %v2768_v4 = vpack.c.bf16 %v10943_v13, %v10935_v27  ;;  %9741 = vmatpush3.bf16.msra.mxu0 %v13217_v31  ;;  %10966 = vtanh.f32 %v2010_v52 }
 0x1f2   : > { %v10945_v62 = vpop.eup %10944  ;;  %v2230_v40 = vadd.f32 %v9529_v37, %v13503_v49  ;;  %v2221_v46 = vpop.f32.mrb[79].mxu1  ;;  %v2013_v43 = vadd.f32 %v13503_v49, %v2012_v30  ;;  %9789 = vmatpush3.bf16.msra.mxu1 %v13217_v31  ;;  %9742 = vmatprep.subr.bf16.mxu0 %v13241_v0  ;;  %10968 = vtanh.f32 %v2219_v12 }
 0x1f3   : > { %v10947_v51 = vpop.eup %10946  ;;  %v3031_v26 = vpack.c.bf16 %v10945_v62, %v10937_v56  ;;  %v2222_v47 = vadd.f32 %v13503_v49, %v2221_v46  ;;  %9662 = vmatprep.mubr.bf16.mxu0 %v2768_v4  ;;  %9790 = vmatprep.subr.bf16.mxu1 %v13241_v0  ;;  %10970 = vtanh.f32 %v2021_v18 }
 0x1f4   : > { %v10949_v41 = vpop.eup %10948  ;;  %9663 = vmatmul.mubr.bf16.gmra.mrb[132].mxu0 %v2769_v48  ;;  %10972 = vtanh.f32 %v2230_v40  ;;  %v9484_v25 = vpop.f32.mrb[80].mxu0 }
 0x1f5   : > { %v10951_v34 = vpop.eup %10950  ;;  %9710 = vmatprep.mubr.bf16.mxu1 %v3031_v26  ;;  %9743 = vmatpush3.bf16.msra.mxu0 %v13241_v0  ;;  %10974 = vtanh.f32 %v2013_v43  ;;  %v2034_v56 = vadd.f32 %v9484_v25, %v13503_v49  ;;  %v9532_v17 = vpop.f32.mrb[80].mxu1 }
 0x1f6   : > { %v10953_v27 = vpop.eup %10952  ;;  %9711 = vmatmul.mubr.bf16.gmra.mrb[132].mxu1 %v3032_v20  ;;  %v2025_v52 = vpop.f32.mrb[81].mxu0  ;;  %9744 = vmatprep.subr.bf16.mxu0 %v13266_v7  ;;  %10976 = vtanh.f32 %v2222_v47  ;;  %v2243_v32 = vadd.f32 %v9532_v17, %v13503_v49 }
 0x1f7   : > { %v10955_v31 = vpop.eup %10954  ;;  %9791 = vmatpush3.bf16.msra.mxu1 %v13241_v0  ;;  %v2026_v48 = vadd.f32 %v13503_v49, %v2025_v52  ;;  %v2234_v13 = vpop.f32.mrb[81].mxu1  ;;  %10978 = vtanh.f32 %v2034_v56 }
 0x1f8   : > { %v10957_v15 = vpop.eup %10956  ;;  %v9485_v12 = vpop.f32.mrb[82].mxu0  ;;  %v2771_v18 = vpack.c.bf16 %v10955_v31, %v10947_v51  ;;  %9792 = vmatprep.subr.bf16.mxu1 %v13266_v7  ;;  %v2235_v30 = vadd.f32 %v13503_v49, %v2234_v13  ;;  %10980 = vtanh.f32 %v2243_v32 }
 0x1f9   : > { %v10959_v37 = vpop.eup %10958  ;;  %v2037_v20 = vadd.f32 %v9485_v12, %v13503_v49  ;;  %v9533_v0 = vpop.f32.mrb[82].mxu1  ;;  %v3034_v40 = vpack.c.bf16 %v10957_v15, %v10949_v41  ;;  %9745 = vmatpush3.bf16.msra.mxu0 %v13266_v7  ;;  %10982 = vtanh.f32 %v2026_v48 }
 0x1fa   : > { %v2028_v62 = vpop.f32.mrb[83].mxu0  ;;  %v10961_v46 = vpop.eup %10960  ;;  %v2246_v4 = vadd.f32 %v9533_v0, %v13503_v49  ;;  %v2770_v26 = vpack.c.bf16 %v10959_v37, %v10951_v34  ;;  %9746 = vmatprep.subr.bf16.mxu0 %v13291_v3  ;;  %10984 = vtanh.f32 %v2235_v30 }
 0x1fb   : > { %v2237_v43 = vpop.f32.mrb[83].mxu1  ;;  %v10963_v51 = vpop.eup %10962  ;;  %v2029_v47 = vadd.f32 %v13503_v49, %v2028_v62  ;;  %v3033_v25 = vpack.c.bf16 %v10961_v46, %v10953_v27  ;;  %9793 = vmatpush3.bf16.msra.mxu1 %v13266_v7  ;;  %10986 = vtanh.f32 %v2037_v20 }
 0x1fc   : > { %v10965_v31 = vpop.eup %10964  ;;  %v2238_v41 = vadd.f32 %v13503_v49, %v2237_v43  ;;  %9666 = vmatprep.mubr.bf16.mxu0 %v2770_v26  ;;  %9794 = vmatprep.subr.bf16.mxu1 %v13291_v3  ;;  %10988 = vtanh.f32 %v2246_v4  ;;  %v9488_v17 = vpop.f32.mrb[84].mxu0 }
 0x1fd   : > { %v10967_v56 = vpop.eup %10966  ;;  %9714 = vmatprep.mubr.bf16.mxu1 %v3033_v25  ;;  %9667 = vmatmul.mubr.bf16.gmra.mrb[136].mxu0 %v2771_v18  ;;  %10990 = vtanh.f32 %v2029_v47  ;;  %v2050_v27 = vadd.f32 %v9488_v17, %v13503_v49  ;;  %v9536_v52 = vpop.f32.mrb[84].mxu1 }
 0x1fe   : > { %v10969_v34 = vpop.eup %10968  ;;  %9715 = vmatmul.mubr.bf16.gmra.mrb[136].mxu1 %v3034_v40  ;;  %9747 = vmatpush3.bf16.msra.mxu0 %v13291_v3  ;;  %v2041_v15 = vpop.f32.mrb[85].mxu0  ;;  %10992 = vtanh.f32 %v2238_v41  ;;  %v2259_v48 = vadd.f32 %v9536_v52, %v13503_v49 }
 0x1ff   : > { %v10971_v7 = vpop.eup %10970  ;;  %9795 = vmatpush3.bf16.msra.mxu1 %v13291_v3  ;;  %9748 = vmatprep.subr.bf16.mxu0 %v13321_v21  ;;  %v2042_v13 = vadd.f32 %v13503_v49, %v2041_v15  ;;  %v2250_v12 = vpop.f32.mrb[85].mxu1  ;;  %10994 = vtanh.f32 %v2050_v27  ;;  %v13587_v15 = vld [vmem:[%s16310_s3 + $0x80] sm:$0xff]  }
 0x200   : > { %v10973_v32 = vpop.eup %10972  ;;  %v9489_v18 = vpop.f32.mrb[86].mxu0  ;;  %v2773_v37 = vpack.c.bf16 %v10971_v7, %v10963_v51  ;;  %9796 = vmatprep.subr.bf16.mxu1 %v13321_v21  ;;  %v2251_v20 = vadd.f32 %v13503_v49, %v2250_v12  ;;  %10996 = vtanh.f32 %v2259_v48 }
 0x201   : > { %v10975_v30 = vpop.eup %10974  ;;  %v2053_v0 = vadd.f32 %v9489_v18, %v13503_v49  ;;  %v9537_v3 = vpop.f32.mrb[86].mxu1  ;;  %v3036_v40 = vpack.c.bf16 %v10973_v32, %v10965_v31  ;;  %10998 = vtanh.f32 %v2042_v13 }
 0x202   : > { %v2044_v62 = vpop.f32.mrb[87].mxu0  ;;  %v10977_v46 = vpop.eup %10976  ;;  %v2262_v4 = vadd.f32 %v9537_v3, %v13503_v49  ;;  %v2772_v26 = vpack.c.bf16 %v10975_v30, %v10967_v56  ;;  %9749 = vmatpush3.bf16.msra.mxu0 %v13321_v21  ;;  %11000 = vtanh.f32 %v2251_v20 }
 0x203   : > { %v2253_v43 = vpop.f32.mrb[87].mxu1  ;;  %v13573_v51 = vpop.eup %10978  ;;  %v2045_v47 = vadd.f32 %v13503_v49, %v2044_v62  ;;  %v3035_v25 = vpack.c.bf16 %v10977_v46, %v10969_v34  ;;  %9797 = vmatpush3.bf16.msra.mxu1 %v13321_v21  ;;  %9750 = vmatprep.subr.bf16.mxu0 %v13393_v8  ;;  %11002 = vtanh.f32 %v2053_v0 }
 0x204   : > { %v10981_v41 = vpop.eup %10980  ;;  %v2254_v31 = vadd.f32 %v13503_v49, %v2253_v43  ;;  %9670 = vmatprep.mubr.bf16.mxu0 %v2772_v26  ;;  %9798 = vmatprep.subr.bf16.mxu1 %v13393_v8  ;;  %11004 = vtanh.f32 %v2262_v4  ;;  %v9492_v7 = vpop.f32.mrb[88].mxu0 }
 0x205   : > { %v10983_v56 = vpop.eup %10982  ;;  %9718 = vmatprep.mubr.bf16.mxu1 %v3035_v25  ;;  %9671 = vmatmul.mubr.bf16.gmra.mrb[140].mxu0 %v2773_v37  ;;  %11006 = vtanh.f32 %v2045_v47  ;;  %v2066_v34 = vadd.f32 %v9492_v7, %v13503_v49  ;;  %v9540_v27 = vpop.f32.mrb[88].mxu1 }
 0x206   : > { %v10985_v17 = vpop.eup %10984  ;;  %9719 = vmatmul.mubr.bf16.gmra.mrb[140].mxu1 %v3036_v40  ;;  %9751 = vmatpush3.bf16.msra.mxu0 %v13393_v8  ;;  %v2057_v52 = vpop.f32.mrb[89].mxu0  ;;  %11008 = vtanh.f32 %v2254_v31  ;;  %v2275_v48 = vadd.f32 %v9540_v27, %v13503_v49 }
 0x207   : > { %v10987_v21 = vpop.eup %10986  ;;  %9799 = vmatpush3.bf16.msra.mxu1 %v13393_v8  ;;  %9752 = vmatprep.subr.bf16.mxu0 %v13434_v28  ;;  %v2058_v13 = vadd.f32 %v13503_v49, %v2057_v52  ;;  %v2266_v12 = vpop.f32.mrb[89].mxu1  ;;  %11010 = vtanh.f32 %v2066_v34 }
 0x208   : > { %v10989_v32 = vpop.eup %10988  ;;  %v9493_v18 = vpop.f32.mrb[90].mxu0  ;;  %v2775_v37 = vpack.c.bf16 %v10987_v21, %v13573_v51  ;;  %9800 = vmatprep.subr.bf16.mxu1 %v13434_v28  ;;  %v2267_v30 = vadd.f32 %v13503_v49, %v2266_v12  ;;  %11012 = vtanh.f32 %v2275_v48 }
 0x209   : > { %v10991_v8 = vpop.eup %10990  ;;  %v2069_v20 = vadd.f32 %v9493_v18, %v13503_v49  ;;  %v9541_v0 = vpop.f32.mrb[90].mxu1  ;;  %v3038_v62 = vpack.c.bf16 %v10989_v32, %v10981_v41  ;;  %11014 = vtanh.f32 %v2058_v13 }
 0x20a   : > { %v2060_v3 = vpop.f32.mrb[91].mxu0  ;;  %v10993_v40 = vpop.eup %10992  ;;  %v2278_v46 = vadd.f32 %v9541_v0, %v13503_v49  ;;  %v2774_v43 = vpack.c.bf16 %v10991_v8, %v10983_v56  ;;  %9753 = vmatpush3.bf16.msra.mxu0 %v13434_v28  ;;  %11016 = vtanh.f32 %v2267_v30 }
 0x20b   : > { %v2269_v4 = vpop.f32.mrb[91].mxu1  ;;  %v10995_v26 = vpop.eup %10994  ;;  %v2061_v51 = vadd.f32 %v13503_v49, %v2060_v3  ;;  %v3037_v47 = vpack.c.bf16 %v10993_v40, %v10985_v17  ;;  %9801 = vmatpush3.bf16.msra.mxu1 %v13434_v28  ;;  %9834 = vmatprep.subr.bf16.mxu0 %v13587_v15  ;;  %11018 = vtanh.f32 %v2069_v20 }
 0x20c   : > { %v10997_v25 = vpop.eup %10996  ;;  %v2270_v41 = vadd.f32 %v13503_v49, %v2269_v4  ;;  %9674 = vmatprep.mubr.bf16.mxu0 %v2774_v43  ;;  %9882 = vmatprep.subr.bf16.mxu1 %v13587_v15  ;;  %11020 = vtanh.f32 %v2278_v46  ;;  %v9496_v7 = vpop.f32.mrb[92].mxu0 }
 0x20d   : > { %v10999_v31 = vpop.eup %10998  ;;  %9722 = vmatprep.mubr.bf16.mxu1 %v3037_v47  ;;  %9675 = vmatmul.mubr.bf16.gmra.mrb[144].mxu0 %v2775_v37  ;;  %11022 = vtanh.f32 %v2061_v51  ;;  %v2082_v28 = vadd.f32 %v9496_v7, %v13503_v49  ;;  %v9544_v21 = vpop.f32.mrb[92].mxu1 }
 0x20e   : > { %v11001_v56 = vpop.eup %11000  ;;  %9723 = vmatmul.mubr.bf16.gmra.mrb[144].mxu1 %v3038_v62  ;;  %v2073_v34 = vpop.f32.mrb[93].mxu0  ;;  %11024 = vtanh.f32 %v2270_v41  ;;  %v2291_v52 = vadd.f32 %v9544_v21, %v13503_v49 }
 0x20f   : > { %v11003_v17 = vpop.eup %11002  ;;  %v2074_v32 = vadd.f32 %v13503_v49, %v2073_v34  ;;  %v2282_v48 = vpop.f32.mrb[93].mxu1  ;;  %11026 = vtanh.f32 %v2082_v28 }
 0x210   : > { %v11005_v27 = vpop.eup %11004  ;;  %v9497_v13 = vpop.f32.mrb[94].mxu0  ;;  %v2777_v12 = vpack.c.bf16 %v11003_v17, %v10995_v26  ;;  %v2283_v37 = vadd.f32 %v13503_v49, %v2282_v48  ;;  %11028 = vtanh.f32 %v2291_v52 }
 0x211   : > { %v11007_v18 = vpop.eup %11006  ;;  %v2085_v8 = vadd.f32 %v9497_v13, %v13503_v49  ;;  %v9545_v30 = vpop.f32.mrb[94].mxu1  ;;  %v3040_v0 = vpack.c.bf16 %v11005_v27, %v10997_v25  ;;  %11030 = vtanh.f32 %v2074_v32 }
 0x212   : > { %v2076_v20 = vpop.f32.mrb[95].mxu0  ;;  %v11009_v3 = vpop.eup %11008  ;;  %v2294_v62 = vadd.f32 %v9545_v30, %v13503_v49  ;;  %v2776_v46 = vpack.c.bf16 %v11007_v18, %v10999_v31  ;;  %11032 = vtanh.f32 %v2283_v37 }
 0x213   : > { %v2285_v40 = vpop.f32.mrb[95].mxu1  ;;  %v11011_v4 = vpop.eup %11010  ;;  %v2077_v43 = vadd.f32 %v13503_v49, %v2076_v20  ;;  %v3039_v26 = vpack.c.bf16 %v11009_v3, %v11001_v56  ;;  %11034 = vtanh.f32 %v2085_v8 }
 0x214   : > { %v11013_v51 = vpop.eup %11012  ;;  %v2286_v47 = vadd.f32 %v13503_v49, %v2285_v40  ;;  %9678 = vmatprep.mubr.bf16.mxu0 %v2776_v46  ;;  %11036 = vtanh.f32 %v2294_v62  ;;  %v9564_v7 = vpop.f32.mrb[96].mxu0 }
 0x215   : > { %v11015_v41 = vpop.eup %11014  ;;  %9726 = vmatprep.mubr.bf16.mxu1 %v3039_v26  ;;  %9679 = vmatmul.mubr.bf16.gmra.mrb[148].mxu0 %v2777_v12  ;;  %11038 = vtanh.f32 %v2077_v43  ;;  %v2388_v31 = vadd.f32 %v9564_v7, %v13503_v49  ;;  %v9612_v28 = vpop.f32.mrb[96].mxu1 }
 0x216   : > { %v11017_v25 = vpop.eup %11016  ;;  %9727 = vmatmul.mubr.bf16.gmra.mrb[148].mxu1 %v3040_v0  ;;  %v2379_v21 = vpop.f32.mrb[97].mxu0  ;;  %11040 = vtanh.f32 %v2286_v47  ;;  %v2597_v34 = vadd.f32 %v9612_v28, %v13503_v49 }
 0x217   : > { %v11019_v17 = vpop.eup %11018  ;;  %v2380_v27 = vadd.f32 %v13503_v49, %v2379_v21  ;;  %v2588_v52 = vpop.f32.mrb[97].mxu1  ;;  %11042 = vtanh.f32 %v2388_v31 }
 0x218   : > { %v11021_v56 = vpop.eup %11020  ;;  %v9565_v32 = vpop.f32.mrb[98].mxu0  ;;  %v2779_v48 = vpack.c.bf16 %v11019_v17, %v11011_v4  ;;  %v2589_v12 = vadd.f32 %v13503_v49, %v2588_v52  ;;  %11044 = vtanh.f32 %v2597_v34 }
 0x219   : > { %v11023_v13 = vpop.eup %11022  ;;  %v2391_v18 = vadd.f32 %v9565_v32, %v13503_v49  ;;  %v9613_v37 = vpop.f32.mrb[98].mxu1  ;;  %v3042_v30 = vpack.c.bf16 %v11021_v56, %v11013_v51  ;;  %11046 = vtanh.f32 %v2380_v27 }
 0x21a   : > { %v2382_v8 = vpop.f32.mrb[99].mxu0  ;;  %v11025_v20 = vpop.eup %11024  ;;  %v2600_v0 = vadd.f32 %v9613_v37, %v13503_v49  ;;  %v2778_v62 = vpack.c.bf16 %v11023_v13, %v11015_v41  ;;  %11048 = vtanh.f32 %v2589_v12 }
 0x21b   : > { %v2591_v3 = vpop.f32.mrb[99].mxu1  ;;  %v11027_v40 = vpop.eup %11026  ;;  %v2383_v46 = vadd.f32 %v13503_v49, %v2382_v8  ;;  %v3041_v4 = vpack.c.bf16 %v11025_v20, %v11017_v25  ;;  %11050 = vtanh.f32 %v2391_v18 }
 0x21c   : > { %v11029_v43 = vpop.eup %11028  ;;  %v2592_v26 = vadd.f32 %v13503_v49, %v2591_v3  ;;  %9682 = vmatprep.mubr.bf16.mxu0 %v2778_v62  ;;  %11052 = vtanh.f32 %v2600_v0  ;;  %v9568_v7 = vpop.f32.mrb[100].mxu0 }
 0x21d   : > { %v11031_v47 = vpop.eup %11030  ;;  %9730 = vmatprep.mubr.bf16.mxu1 %v3041_v4  ;;  %9683 = vmatmul.mubr.bf16.gmra.mrb[152].mxu0 %v2779_v48  ;;  %11054 = vtanh.f32 %v2383_v46  ;;  %v2404_v41 = vadd.f32 %v9568_v7, %v13503_v49  ;;  %v9616_v31 = vpop.f32.mrb[100].mxu1 }
 0x21e   : > { %v11033_v51 = vpop.eup %11032  ;;  %9731 = vmatmul.mubr.bf16.gmra.mrb[152].mxu1 %v3042_v30  ;;  %v2395_v28 = vpop.f32.mrb[101].mxu0  ;;  %11056 = vtanh.f32 %v2592_v26  ;;  %v2613_v21 = vadd.f32 %v9616_v31, %v13503_v49 }
 0x21f   : > { %v11035_v17 = vpop.eup %11034  ;;  %v2396_v56 = vadd.f32 %v13503_v49, %v2395_v28  ;;  %v2604_v34 = vpop.f32.mrb[101].mxu1  ;;  %11058 = vtanh.f32 %v2404_v41 }
 0x220   : > { %v11037_v25 = vpop.eup %11036  ;;  %v9569_v27 = vpop.f32.mrb[102].mxu0  ;;  %v2781_v52 = vpack.c.bf16 %v11035_v17, %v11027_v40  ;;  %v2605_v48 = vadd.f32 %v13503_v49, %v2604_v34  ;;  %11060 = vtanh.f32 %v2613_v21 }
 0x221   : > { %v11039_v32 = vpop.eup %11038  ;;  %v2407_v13 = vadd.f32 %v9569_v27, %v13503_v49  ;;  %v9617_v12 = vpop.f32.mrb[102].mxu1  ;;  %v3044_v37 = vpack.c.bf16 %v11037_v25, %v11029_v43  ;;  %11062 = vtanh.f32 %v2396_v56 }
 0x222   : > { %v2398_v18 = vpop.f32.mrb[103].mxu0  ;;  %v11041_v8 = vpop.eup %11040  ;;  %v2616_v30 = vadd.f32 %v9617_v12, %v13503_v49  ;;  %v2780_v0 = vpack.c.bf16 %v11039_v32, %v11031_v47  ;;  %11064 = vtanh.f32 %v2605_v48 }
 0x223   : > { %v2607_v20 = vpop.f32.mrb[103].mxu1  ;;  %v11043_v3 = vpop.eup %11042  ;;  %v2399_v62 = vadd.f32 %v13503_v49, %v2398_v18  ;;  %v3043_v40 = vpack.c.bf16 %v11041_v8, %v11033_v51  ;;  %11066 = vtanh.f32 %v2407_v13 }
 0x224   : > { %v11045_v46 = vpop.eup %11044  ;;  %v2608_v4 = vadd.f32 %v13503_v49, %v2607_v20  ;;  %9686 = vmatprep.mubr.bf16.mxu0 %v2780_v0  ;;  %11068 = vtanh.f32 %v2616_v30  ;;  %v9572_v7 = vpop.f32.mrb[104].mxu0 }
 0x225   : > { %v11047_v26 = vpop.eup %11046  ;;  %9734 = vmatprep.mubr.bf16.mxu1 %v3043_v40  ;;  %9687 = vmatmul.mubr.bf16.gmra.mrb[156].mxu0 %v2781_v52  ;;  %11070 = vtanh.f32 %v2399_v62  ;;  %v2420_v47 = vadd.f32 %v9572_v7, %v13503_v49  ;;  %v9620_v41 = vpop.f32.mrb[104].mxu1  ;;  %v13636_v62 = vld [vmem:[%s16310_s3 + $0x88] sm:$0xff]  }
 0x226   : > { %v11049_v43 = vpop.eup %11048  ;;  %9735 = vmatmul.mubr.bf16.gmra.mrb[156].mxu1 %v3044_v37  ;;  %v2411_v31 = vpop.f32.mrb[105].mxu0  ;;  %11072 = vtanh.f32 %v2608_v4  ;;  %v2629_v28 = vadd.f32 %v9620_v41, %v13503_v49 }
 0x227   : > { %v11051_v17 = vpop.eup %11050  ;;  %v2412_v25 = vadd.f32 %v13503_v49, %v2411_v31  ;;  %v2620_v21 = vpop.f32.mrb[105].mxu1  ;;  %11074 = vtanh.f32 %v2420_v47  ;;  %v13646_v31 = vld [vmem:[%s16310_s3 + $0x90] sm:$0xff]  }
 0x228   : > { %v11053_v51 = vpop.eup %11052  ;;  %v9573_v56 = vpop.f32.mrb[106].mxu0  ;;  %v3239_v34 = vpack.c.bf16 %v11051_v17, %v11043_v3  ;;  %v2621_v52 = vadd.f32 %v13503_v49, %v2620_v21  ;;  %11076 = vtanh.f32 %v2629_v28 }
 0x229   : > { %v11055_v27 = vpop.eup %11054  ;;  %v2423_v32 = vadd.f32 %v9573_v56, %v13503_v49  ;;  %v9621_v48 = vpop.f32.mrb[106].mxu1  ;;  %v3448_v12 = vpack.c.bf16 %v11053_v51, %v11045_v46  ;;  %11078 = vtanh.f32 %v2412_v25 }
 0x22a   : > { %v2414_v13 = vpop.f32.mrb[107].mxu0  ;;  %v11057_v18 = vpop.eup %11056  ;;  %v2632_v37 = vadd.f32 %v9621_v48, %v13503_v49  ;;  %v3238_v30 = vpack.c.bf16 %v11055_v27, %v11047_v26  ;;  %11080 = vtanh.f32 %v2621_v52 }
 0x22b   : > { %v2623_v8 = vpop.f32.mrb[107].mxu1  ;;  %v11059_v20 = vpop.eup %11058  ;;  %v2415_v0 = vadd.f32 %v13503_v49, %v2414_v13  ;;  %v3447_v3 = vpack.c.bf16 %v11057_v18, %v11049_v43  ;;  %11082 = vtanh.f32 %v2423_v32 }
 0x22c   : > { %v11061_v40 = vpop.eup %11060  ;;  %v2624_v46 = vadd.f32 %v13503_v49, %v2623_v8  ;;  %9754 = vmatprep.mubr.bf16.mxu0 %v3238_v30  ;;  %11084 = vtanh.f32 %v2632_v37  ;;  %v9576_v7 = vpop.f32.mrb[108].mxu0 }
 0x22d   : > { %v11063_v4 = vpop.eup %11062  ;;  %9802 = vmatprep.mubr.bf16.mxu1 %v3447_v3  ;;  %9755 = vmatmul.mubr.bf16.vlgmr.msra.gmra.mrb[160].mxu0 %v3239_v34  ;;  %11086 = vtanh.f32 %v2415_v0  ;;  %v2436_v17 = vadd.f32 %v9576_v7, %v13503_v49  ;;  %v9624_v47 = vpop.f32.mrb[108].mxu1 }
 0x22e   : > { %v11065_v26 = vpop.eup %11064  ;;  %9803 = vmatmul.mubr.bf16.vlgmr.msra.gmra.mrb[160].mxu1 %v3448_v12  ;;  %9835 = vmatpush3.bf16.msra.mxu0 %v13587_v15  ;;  %v2427_v41 = vpop.f32.mrb[109].mxu0  ;;  %11088 = vtanh.f32 %v2624_v46  ;;  %v2645_v28 = vadd.f32 %v9624_v47, %v13503_v49 }
 0x22f   : > { %v11067_v43 = vpop.eup %11066  ;;  %9883 = vmatpush3.bf16.msra.mxu1 %v13587_v15  ;;  %9836 = vmatprep.subr.bf16.mxu0 %v13636_v62  ;;  %v2428_v25 = vadd.f32 %v13503_v49, %v2427_v41  ;;  %v2636_v21 = vpop.f32.mrb[109].mxu1  ;;  %11090 = vtanh.f32 %v2436_v17 }
 0x230   : > { %v11069_v51 = vpop.eup %11068  ;;  %v9577_v56 = vpop.f32.mrb[110].mxu0  ;;  %v3241_v34 = vpack.c.bf16 %v11067_v43, %v11059_v20  ;;  %9884 = vmatprep.subr.bf16.mxu1 %v13636_v62  ;;  %v2637_v52 = vadd.f32 %v13503_v49, %v2636_v21  ;;  %11092 = vtanh.f32 %v2645_v28  ;;  %v13674_v28 = vld [vmem:[%s16310_s3 + $0xa0] sm:$0xff]  }
 0x231   : > { %v11071_v27 = vpop.eup %11070  ;;  %v2439_v32 = vadd.f32 %v9577_v56, %v13503_v49  ;;  %v9625_v48 = vpop.f32.mrb[110].mxu1  ;;  %v3450_v12 = vpack.c.bf16 %v11069_v51, %v11061_v40  ;;  %11094 = vtanh.f32 %v2428_v25  ;;  %v13663_v40 = vld [vmem:[%s16310_s3 + $0x98] sm:$0xff]  }
 0x232   : > { %v2430_v13 = vpop.f32.mrb[111].mxu0  ;;  %v11073_v18 = vpop.eup %11072  ;;  %v2648_v37 = vadd.f32 %v9625_v48, %v13503_v49  ;;  %v3240_v30 = vpack.c.bf16 %v11071_v27, %v11063_v4  ;;  %9837 = vmatpush3.bf16.msra.mxu0 %v13636_v62  ;;  %11096 = vtanh.f32 %v2637_v52  ;;  %v13683_v48 = vld [vmem:[%s16311_s4] ss:$0 sm:$0xff] }
 0x233   : > { %v2639_v8 = vpop.f32.mrb[111].mxu1  ;;  %v13655_v20 = vpop.eup %11074  ;;  %v2431_v0 = vadd.f32 %v13503_v49, %v2430_v13  ;;  %v3449_v3 = vpack.c.bf16 %v11073_v18, %v11065_v26  ;;  %9885 = vmatpush3.bf16.msra.mxu1 %v13636_v62  ;;  %9838 = vmatprep.subr.bf16.mxu0 %v13646_v31  ;;  %11098 = vtanh.f32 %v2439_v32 }
 0x234   : > { %v11077_v46 = vpop.eup %11076  ;;  %v2640_v4 = vadd.f32 %v13503_v49, %v2639_v8  ;;  %9758 = vmatprep.mubr.bf16.mxu0 %v3240_v30  ;;  %9886 = vmatprep.subr.bf16.mxu1 %v13646_v31  ;;  %11100 = vtanh.f32 %v2648_v37  ;;  %v9580_v43 = vpop.f32.mrb[112].mxu0 }
 0x235   : > { %v11079_v7 = vpop.eup %11078  ;;  %9806 = vmatprep.mubr.bf16.mxu1 %v3449_v3  ;;  %9759 = vmatmul.mubr.bf16.gmra.mrb[164].mxu0 %v3241_v34  ;;  %11102 = vtanh.f32 %v2431_v0  ;;  %v2452_v47 = vadd.f32 %v9580_v43, %v13503_v49  ;;  %v9628_v41 = vpop.f32.mrb[112].mxu1 }
 0x236   : > { %v11081_v26 = vpop.eup %11080  ;;  %9807 = vmatmul.mubr.bf16.gmra.mrb[164].mxu1 %v3450_v12  ;;  %9839 = vmatpush3.bf16.msra.mxu0 %v13646_v31  ;;  %v2443_v51 = vpop.f32.mrb[113].mxu0  ;;  %11104 = vtanh.f32 %v2640_v4  ;;  %v2661_v21 = vadd.f32 %v9628_v41, %v13503_v49 }
 0x237   : > { %v11083_v17 = vpop.eup %11082  ;;  %9887 = vmatpush3.bf16.msra.mxu1 %v13646_v31  ;;  %9840 = vmatprep.subr.bf16.mxu0 %v13663_v40  ;;  %v2444_v56 = vadd.f32 %v13503_v49, %v2443_v51  ;;  %v2652_v34 = vpop.f32.mrb[113].mxu1  ;;  %11106 = vtanh.f32 %v2452_v47 }
 0x238   : > { %v11085_v25 = vpop.eup %11084  ;;  %v9581_v27 = vpop.f32.mrb[114].mxu0  ;;  %v3243_v52 = vpack.c.bf16 %v11083_v17, %v13655_v20  ;;  %9888 = vmatprep.subr.bf16.mxu1 %v13663_v40  ;;  %v2653_v13 = vadd.f32 %v13683_v48, %v2652_v34  ;;  %11108 = vtanh.f32 %v2661_v21 }
 0x239   : > { %v11087_v32 = vpop.eup %11086  ;;  %v2455_v12 = vadd.f32 %v13683_v48, %v9581_v27  ;;  %v9629_v18 = vpop.f32.mrb[114].mxu1  ;;  %v3452_v49 = vpack.c.bf16 %v11085_v25, %v11077_v46  ;;  %11110 = vtanh.f32 %v2444_v56  ;;  %v13695_v46 = vld [vmem:[%s16310_s3 + $0xa8] sm:$0xff]  }
 0x23a   : > { %v2446_v37 = vpop.f32.mrb[115].mxu0  ;;  %v11089_v8 = vpop.eup %11088  ;;  %v2664_v30 = vadd.f32 %v13683_v48, %v9629_v18  ;;  %v3242_v0 = vpack.c.bf16 %v11087_v32, %v11079_v7  ;;  %9841 = vmatpush3.bf16.msra.mxu0 %v13663_v40  ;;  %11112 = vtanh.f32 %v2653_v13 }
 0x23b   : > { %v2655_v20 = vpop.f32.mrb[115].mxu1  ;;  %v11091_v3 = vpop.eup %11090  ;;  %v2447_v4 = vadd.f32 %v13683_v48, %v2446_v37  ;;  %v3451_v43 = vpack.c.bf16 %v11089_v8, %v11081_v26  ;;  %9889 = vmatpush3.bf16.msra.mxu1 %v13663_v40  ;;  %9842 = vmatprep.subr.bf16.mxu0 %v13674_v28  ;;  %11114 = vtanh.f32 %v2455_v12 }
 0x23c   : > { %v11093_v17 = vpop.eup %11092  ;;  %v2656_v7 = vadd.f32 %v13683_v48, %v2655_v20  ;;  %9762 = vmatprep.mubr.bf16.mxu0 %v3242_v0  ;;  %9890 = vmatprep.subr.bf16.mxu1 %v13674_v28  ;;  %11116 = vtanh.f32 %v2664_v30  ;;  %v9584_v41 = vpop.f32.mrb[116].mxu0 }
 0x23d   : > { %v11095_v47 = vpop.eup %11094  ;;  %9810 = vmatprep.mubr.bf16.mxu1 %v3451_v43  ;;  %9763 = vmatmul.mubr.bf16.gmra.mrb[168].mxu0 %v3243_v52  ;;  %11118 = vtanh.f32 %v2447_v4  ;;  %v2468_v25 = vadd.f32 %v13683_v48, %v9584_v41  ;;  %v9632_v21 = vpop.f32.mrb[116].mxu1 }
 0x23e   : > { %v11097_v26 = vpop.eup %11096  ;;  %9811 = vmatmul.mubr.bf16.gmra.mrb[168].mxu1 %v3452_v49  ;;  %9843 = vmatpush3.bf16.msra.mxu0 %v13674_v28  ;;  %v2459_v56 = vpop.f32.mrb[117].mxu0  ;;  %11120 = vtanh.f32 %v2656_v7  ;;  %v2677_v27 = vadd.f32 %v13683_v48, %v9632_v21 }
 0x23f   : > { %v11099_v51 = vpop.eup %11098  ;;  %9891 = vmatpush3.bf16.msra.mxu1 %v13674_v28  ;;  %9844 = vmatprep.subr.bf16.mxu0 %v13695_v46  ;;  %v2460_v52 = vadd.f32 %v13683_v48, %v2459_v56  ;;  %v2668_v32 = vpop.f32.mrb[117].mxu1  ;;  %11122 = vtanh.f32 %v2468_v25 }
 0x240   : > { %v11101_v34 = vpop.eup %11100  ;;  %v9585_v13 = vpop.f32.mrb[118].mxu0  ;;  %v3245_v12 = vpack.c.bf16 %v11099_v51, %v11091_v3  ;;  %9892 = vmatprep.subr.bf16.mxu1 %v13695_v46  ;;  %v2669_v37 = vadd.f32 %v13683_v48, %v2668_v32  ;;  %11124 = vtanh.f32 %v2677_v27 }
 0x241   : > { %v11103_v18 = vpop.eup %11102  ;;  %v2471_v49 = vadd.f32 %v13683_v48, %v9585_v13  ;;  %v9633_v8 = vpop.f32.mrb[118].mxu1  ;;  %v3454_v20 = vpack.c.bf16 %v11101_v34, %v11093_v17  ;;  %11126 = vtanh.f32 %v2460_v52 }
 0x242   : > { %v2462_v30 = vpop.f32.mrb[119].mxu0  ;;  %v11105_v0 = vpop.eup %11104  ;;  %v2680_v4 = vadd.f32 %v13683_v48, %v9633_v8  ;;  %v3244_v7 = vpack.c.bf16 %v11103_v18, %v11095_v47  ;;  %9845 = vmatpush3.bf16.msra.mxu0 %v13695_v46  ;;  %11128 = vtanh.f32 %v2669_v37 }
 0x243   : > { %v2671_v43 = vpop.f32.mrb[119].mxu1  ;;  %v11107_v3 = vpop.eup %11106  ;;  %v2463_v41 = vadd.f32 %v13683_v48, %v2462_v30  ;;  %v3453_v51 = vpack.c.bf16 %v11105_v0, %v11097_v26  ;;  %9893 = vmatpush3.bf16.msra.mxu1 %v13695_v46  ;;  %11130 = vtanh.f32 %v2471_v49 }
 0x244   : > { %v11109_v25 = vpop.eup %11108  ;;  %v2672_v21 = vadd.f32 %v13683_v48, %v2671_v43  ;;  %9766 = vmatprep.mubr.bf16.mxu0 %v3244_v7  ;;  %11132 = vtanh.f32 %v2680_v4  ;;  %v9588_v47 = vpop.f32.mrb[120].mxu0 }
 0x245   : > { %v11111_v17 = vpop.eup %11110  ;;  %9814 = vmatprep.mubr.bf16.mxu1 %v3453_v51  ;;  %9767 = vmatmul.mubr.bf16.gmra.mrb[172].mxu0 %v3245_v12  ;;  %11134 = vtanh.f32 %v2463_v41  ;;  %v2484_v27 = vadd.f32 %v13683_v48, %v9588_v47  ;;  %v9636_v26 = vpop.f32.mrb[120].mxu1  ;;  %v13722_v47 = vld [vmem:[%s16310_s3 + $0xb0] sm:$0xff]  }
 0x246   : > { %v11113_v56 = vpop.eup %11112  ;;  %9815 = vmatmul.mubr.bf16.gmra.mrb[172].mxu1 %v3454_v20  ;;  %v2475_v52 = vpop.f32.mrb[121].mxu0  ;;  %11136 = vtanh.f32 %v2672_v21  ;;  %v2693_v13 = vadd.f32 %v13683_v48, %v9636_v26  ;;  %9846 = vmatprep.subr.bf16.mxu0 %v13722_v47 }
 0x247   : > { %v11115_v34 = vpop.eup %11114  ;;  %v2476_v18 = vadd.f32 %v13683_v48, %v2475_v52  ;;  %v2684_v37 = vpop.f32.mrb[121].mxu1  ;;  %11138 = vtanh.f32 %v2484_v27  ;;  %9894 = vmatprep.subr.bf16.mxu1 %v13722_v47  ;;  %9847 = vmatpush3.bf16.msra.mxu0 %v13722_v47 }
 0x248   : > { %v11117_v32 = vpop.eup %11116  ;;  %v9589_v49 = vpop.f32.mrb[122].mxu0  ;;  %v3247_v8 = vpack.c.bf16 %v11115_v34, %v11107_v3  ;;  %v2685_v30 = vadd.f32 %v13683_v48, %v2684_v37  ;;  %11140 = vtanh.f32 %v2693_v13  ;;  %9895 = vmatpush3.bf16.msra.mxu1 %v13722_v47 }
 0x249   : > { %v11119_v12 = vpop.eup %11118  ;;  %v2487_v20 = vadd.f32 %v13683_v48, %v9589_v49  ;;  %v9637_v0 = vpop.f32.mrb[122].mxu1  ;;  %v3456_v43 = vpack.c.bf16 %v11117_v32, %v11109_v25  ;;  %11142 = vtanh.f32 %v2476_v18 }
 0x24a   : > { %v2478_v4 = vpop.f32.mrb[123].mxu0  ;;  %v11121_v7 = vpop.eup %11120  ;;  %v2696_v41 = vadd.f32 %v13683_v48, %v9637_v0  ;;  %v3246_v21 = vpack.c.bf16 %v11119_v12, %v11111_v17  ;;  %11144 = vtanh.f32 %v2685_v30 }
 0x24b   : > { %v2687_v51 = vpop.f32.mrb[123].mxu1  ;;  %v11123_v3 = vpop.eup %11122  ;;  %v2479_v34 = vadd.f32 %v13683_v48, %v2478_v4  ;;  %v3455_v27 = vpack.c.bf16 %v11121_v7, %v11113_v56  ;;  %11146 = vtanh.f32 %v2487_v20 }
 0x24c   : > { %v11125_v26 = vpop.eup %11124  ;;  %v2688_v25 = vadd.f32 %v13683_v48, %v2687_v51  ;;  %9770 = vmatprep.mubr.bf16.mxu0 %v3246_v21  ;;  %11148 = vtanh.f32 %v2696_v41  ;;  %v9592_v32 = vpop.f32.mrb[124].mxu0 }
 0x24d   : > { %v11127_v52 = vpop.eup %11126  ;;  %9818 = vmatprep.mubr.bf16.mxu1 %v3455_v27  ;;  %9771 = vmatmul.mubr.bf16.gmra.mrb[176].mxu0 %v3247_v8  ;;  %11150 = vtanh.f32 %v2479_v34  ;;  %v2500_v56 = vadd.f32 %v13683_v48, %v9592_v32  ;;  %v9640_v18 = vpop.f32.mrb[124].mxu1 }
 0x24e   : > { %v11129_v17 = vpop.eup %11128  ;;  %9819 = vmatmul.mubr.bf16.gmra.mrb[176].mxu1 %v3456_v43  ;;  %v2491_v37 = vpop.f32.mrb[125].mxu0  ;;  %11152 = vtanh.f32 %v2688_v25  ;;  %v2709_v8 = vadd.f32 %v13683_v48, %v9640_v18  ;;  %v13739_v18 = vld [vmem:[%s16310_s3 + $0xb8] sm:$0xff]  }
 0x24f   : > { %v11131_v13 = vpop.eup %11130  ;;  %v2492_v12 = vadd.f32 %v13683_v48, %v2491_v37  ;;  %v2700_v30 = vpop.f32.mrb[125].mxu1  ;;  %11154 = vtanh.f32 %v2500_v56  ;;  %9848 = vmatprep.subr.bf16.mxu0 %v13739_v18  ;;  %9896 = vmatprep.subr.bf16.mxu1 %v13739_v18 }
 0x250   : > { %v11133_v49 = vpop.eup %11132  ;;  %v9593_v20 = vpop.f32.mrb[126].mxu0  ;;  %v3249_v0 = vpack.c.bf16 %v11131_v13, %v11123_v3  ;;  %v2701_v43 = vadd.f32 %v13683_v48, %v2700_v30  ;;  %11156 = vtanh.f32 %v2709_v8  ;;  %9849 = vmatpush3.bf16.msra.mxu0 %v13739_v18  ;;  %9897 = vmatpush3.bf16.msra.mxu1 %v13739_v18 }
 0x251   : > { %v11135_v4 = vpop.eup %11134  ;;  %v2503_v7 = vadd.f32 %v13683_v48, %v9593_v20  ;;  %v9641_v41 = vpop.f32.mrb[126].mxu1  ;;  %v3458_v21 = vpack.c.bf16 %v11133_v49, %v11125_v26  ;;  %11158 = vtanh.f32 %v2492_v12  ;;  %9930 = vmatprep.subr.bf16.mxu0 %v13587_v15  ;;  %9978 = vmatprep.subr.bf16.mxu1 %v13587_v15 }
 0x252   : > { %v2494_v51 = vpop.f32.mrb[127].mxu0  ;;  %v11137_v34 = vpop.eup %11136  ;;  %v2712_v27 = vadd.f32 %v13683_v48, %v9641_v41  ;;  %v3248_v32 = vpack.c.bf16 %v11135_v4, %v11127_v52  ;;  %11160 = vtanh.f32 %v2701_v43 }
 0x253   : > { %v2703_v25 = vpop.f32.mrb[127].mxu1  ;;  %v11139_v3 = vpop.eup %11138  ;;  %v2495_v13 = vadd.f32 %v13683_v48, %v2494_v51  ;;  %v3457_v56 = vpack.c.bf16 %v11137_v34, %v11129_v17  ;;  %11162 = vtanh.f32 %v2503_v7 }
 0x254   : > { %v11141_v37 = vpop.eup %11140  ;;  %v2704_v26 = vadd.f32 %v13683_v48, %v2703_v25  ;;  %9774 = vmatprep.mubr.bf16.mxu0 %v3248_v32  ;;  %11164 = vtanh.f32 %v2712_v27 }
 0x255   : > { %v11143_v49 = vpop.eup %11142  ;;  %9822 = vmatprep.mubr.bf16.mxu1 %v3457_v56  ;;  %9775 = vmatmul.mubr.bf16.gmra.mrb[180].mxu0 %v3249_v0  ;;  %11166 = vtanh.f32 %v2495_v13  ;;  %v13752_v56 = vld [vmem:[%s16311_s4 + $0x1] ss:$0 sm:$0xff] }
 0x256   : > { %v11145_v52 = vpop.eup %11144  ;;  %9823 = vmatmul.mubr.bf16.gmra.mrb[180].mxu1 %v3458_v21  ;;  %11168 = vtanh.f32 %v2704_v26 }
 0x257   : > { %v11147_v8 = vpop.eup %11146 }
 0x258   : > { %v11149_v17 = vpop.eup %11148  ;;  %v3251_v48 = vpack.c.bf16 %v11147_v8, %v11139_v3 }
 0x259   : > { %v11151_v12 = vpop.eup %11150  ;;  %v3460_v30 = vpack.c.bf16 %v11149_v17, %v11141_v37 }
 0x25a   : > { %v11153_v20 = vpop.eup %11152  ;;  %v3250_v0 = vpack.c.bf16 %v11151_v12, %v11143_v49 }
 0x25b   : > { %v11155_v4 = vpop.eup %11154  ;;  %v3459_v43 = vpack.c.bf16 %v11153_v20, %v11145_v52 }
 0x25c   : > { %v11157_v7 = vpop.eup %11156  ;;  %9778 = vmatprep.mubr.bf16.mxu0 %v3250_v0 }
 0x25d   : > { %v11159_v41 = vpop.eup %11158  ;;  %9826 = vmatprep.mubr.bf16.mxu1 %v3459_v43  ;;  %9779 = vmatmul.mubr.bf16.gmra.mrb[184].mxu0 %v3251_v48 }
 0x25e   : > { %v11161_v51 = vpop.eup %11160  ;;  %9827 = vmatmul.mubr.bf16.gmra.mrb[184].mxu1 %v3460_v30 }
 0x25f   : > { %v11163_v21 = vpop.eup %11162 }
 0x260   : > { %v11165_v34 = vpop.eup %11164  ;;  %v3253_v27 = vpack.c.bf16 %v11163_v21, %v11155_v4 }
 0x261   : > { %v11167_v25 = vpop.eup %11166  ;;  %v3462_v32 = vpack.c.bf16 %v11165_v34, %v11157_v7 }
 0x262   : > { %v11169_v3 = vpop.eup %11168  ;;  %v3252_v15 = vpack.c.bf16 %v11167_v25, %v11159_v41 }
 0x263   : > { %v3461_v13 = vpack.c.bf16 %v11169_v3, %v11161_v51 }
 0x264   : > { %9782 = vmatprep.mubr.bf16.mxu0 %v3252_v15 }
 0x265   : > { %9830 = vmatprep.mubr.bf16.mxu1 %v3461_v13  ;;  %9783 = vmatmul.mubr.bf16.gmra.mrb[188].mxu0 %v3253_v27 }
 0x266   : > { %9831 = vmatmul.mubr.bf16.gmra.mrb[188].mxu1 %v3462_v32 }
 0x2bf   : > { %v9660_v37 = vpop.f32.mrb[128].mxu0 }
 0x2c0   : > { %v2879_v26 = vadd.f32 %v9660_v37, %v13752_v56  ;;  %v9708_v49 = vpop.f32.mrb[128].mxu1  ;;  %v2870_v52 = vpop.f32.mrb[129].mxu0 }
 0x2c1   : > { %v3088_v8 = vadd.f32 %v9708_v49, %v13752_v56  ;;  %v2871_v17 = vadd.f32 %v13752_v56, %v2870_v52  ;;  %v3079_v48 = vpop.f32.mrb[129].mxu1  ;;  %v9661_v12 = vpop.f32.mrb[130].mxu0 }
 0x2c2   : > { %11170 = vtanh.f32 %v2879_v26  ;;  %v3080_v30 = vadd.f32 %v13752_v56, %v3079_v48  ;;  %v2882_v20 = vadd.f32 %v9661_v12, %v13752_v56  ;;  %v9709_v0 = vpop.f32.mrb[130].mxu1  ;;  %v2873_v4 = vpop.f32.mrb[131].mxu0 }
 0x2c3   : > { %11172 = vtanh.f32 %v3088_v8  ;;  %v3091_v43 = vadd.f32 %v9709_v0, %v13752_v56  ;;  %v3082_v7 = vpop.f32.mrb[131].mxu1  ;;  %v2874_v41 = vadd.f32 %v13752_v56, %v2873_v4 }
 0x2c4   : > { %11174 = vtanh.f32 %v2871_v17  ;;  %v3083_v51 = vadd.f32 %v13752_v56, %v3082_v7 }
 0x2c5   : > { %11176 = vtanh.f32 %v3080_v30 }
 0x2c6   : > { %11178 = vtanh.f32 %v2882_v20 }
 0x2c7   : > { %11180 = vtanh.f32 %v3091_v43  ;;  %v9664_v21 = vpop.f32.mrb[132].mxu0 }
 0x2c8   : > { %11182 = vtanh.f32 %v2874_v41  ;;  %v2895_v34 = vadd.f32 %v9664_v21, %v13752_v56  ;;  %v2886_v25 = vpop.f32.mrb[133].mxu0 }
 0x2c9   : > { %v9712_v27 = vpop.f32.mrb[132].mxu1  ;;  %11184 = vtanh.f32 %v3083_v51  ;;  %v2887_v3 = vadd.f32 %v13752_v56, %v2886_v25  ;;  %v9665_v13 = vpop.f32.mrb[134].mxu0 }
 0x2ca   : > { %v3104_v32 = vadd.f32 %v9712_v27, %v13752_v56  ;;  %v3095_v15 = vpop.f32.mrb[133].mxu1  ;;  %11186 = vtanh.f32 %v2895_v34  ;;  %v2898_v26 = vadd.f32 %v9665_v13, %v13752_v56  ;;  %v2889_v52 = vpop.f32.mrb[135].mxu0 }
 0x2cb   : > { %v3096_v37 = vadd.f32 %v13752_v56, %v3095_v15  ;;  %v9713_v49 = vpop.f32.mrb[134].mxu1  ;;  %v2890_v12 = vadd.f32 %v13752_v56, %v2889_v52 }
 0x2cc   : > { %11188 = vtanh.f32 %v3104_v32  ;;  %v3107_v8 = vadd.f32 %v9713_v49, %v13752_v56  ;;  %v3098_v17 = vpop.f32.mrb[135].mxu1  ;;  %v11171_v48 = vpop.eup %11170 }
 0x2cd   : > { %11190 = vtanh.f32 %v2887_v3  ;;  %v11173_v30 = vpop.eup %11172  ;;  %v3099_v20 = vadd.f32 %v13752_v56, %v3098_v17 }
 0x2ce   : > { %11192 = vtanh.f32 %v3096_v37  ;;  %v11175_v0 = vpop.eup %11174 }
 0x2cf   : > { %11194 = vtanh.f32 %v2898_v26  ;;  %v11177_v4 = vpop.eup %11176 }
 0x2d0   : > { %11196 = vtanh.f32 %v3107_v8  ;;  %v9668_v43 = vpop.f32.mrb[136].mxu0  ;;  %v11179_v7 = vpop.eup %11178 }
 0x2d1   : > { %11198 = vtanh.f32 %v2890_v12  ;;  %v2911_v41 = vadd.f32 %v9668_v43, %v13752_v56  ;;  %v9716_v51 = vpop.f32.mrb[136].mxu1  ;;  %v2902_v21 = vpop.f32.mrb[137].mxu0  ;;  %v3676_v15 = vpack.c.bf16 %v11179_v7, %v11171_v48 }
 0x2d2   : > { %v11181_v34 = vpop.eup %11180  ;;  %11200 = vtanh.f32 %v3099_v20  ;;  %v3120_v27 = vadd.f32 %v9716_v51, %v13752_v56  ;;  %v2903_v25 = vadd.f32 %v13752_v56, %v2902_v21  ;;  %v3111_v32 = vpop.f32.mrb[137].mxu1 }
 0x2d3   : > { %v9669_v3 = vpop.f32.mrb[138].mxu0  ;;  %v11183_v13 = vpop.eup %11182  ;;  %11202 = vtanh.f32 %v2911_v41  ;;  %v3112_v37 = vadd.f32 %v13752_v56, %v3111_v32  ;;  %v3939_v8 = vpack.c.bf16 %v11181_v34, %v11173_v30 }
 0x2d4   : > { %v2914_v26 = vadd.f32 %v9669_v3, %v13752_v56  ;;  %v9717_v49 = vpop.f32.mrb[138].mxu1  ;;  %v2905_v52 = vpop.f32.mrb[139].mxu0  ;;  %11204 = vtanh.f32 %v3120_v27  ;;  %v3675_v43 = vpack.c.bf16 %v11183_v13, %v11175_v0  ;;  %v12453_v0 = vld [vmem:[%s16310_s3 + $0x80] sm:$0xff]  }
 0x2d5   : > { %v11185_v17 = vpop.eup %11184  ;;  %v3123_v12 = vadd.f32 %v9717_v49, %v13752_v56  ;;  %v3114_v20 = vpop.f32.mrb[139].mxu1  ;;  %11206 = vtanh.f32 %v2903_v25  ;;  %v2906_v21 = vadd.f32 %v13752_v56, %v2905_v52 }
 0x2d6   : > { %v11187_v51 = vpop.eup %11186  ;;  %v3938_v48 = vpack.c.bf16 %v11185_v17, %v11177_v4  ;;  %11208 = vtanh.f32 %v3112_v37  ;;  %v3115_v41 = vadd.f32 %v13752_v56, %v3114_v20  ;;  %9850 = vmatprep.mubr.bf16.mxu0 %v3675_v43 }
 0x2d7   : > { %v11189_v7 = vpop.eup %11188  ;;  %11210 = vtanh.f32 %v2914_v26  ;;  %9851 = vmatmul.mubr.bf16.vlgmr.msra.gmra.mrb[192].mxu0 %v3676_v15 }
 0x2d8   : > { %v11191_v32 = vpop.eup %11190  ;;  %9898 = vmatprep.mubr.bf16.mxu1 %v3938_v48  ;;  %11212 = vtanh.f32 %v3123_v12  ;;  %v9672_v34 = vpop.f32.mrb[140].mxu0  ;;  %9931 = vmatpush3.bf16.msra.mxu0 %v12453_v0 }
 0x2d9   : > { %v11193_v30 = vpop.eup %11192  ;;  %9899 = vmatmul.mubr.bf16.vlgmr.msra.gmra.mrb[192].mxu1 %v3939_v8  ;;  %11214 = vtanh.f32 %v2906_v21  ;;  %v2927_v4 = vadd.f32 %v9672_v34, %v13752_v56  ;;  %v9720_v25 = vpop.f32.mrb[140].mxu1  ;;  %9932 = vmatprep.subr.bf16.mxu0 %v13636_v62 }
 0x2da   : > { %v11195_v27 = vpop.eup %11194  ;;  %v2918_v3 = vpop.f32.mrb[141].mxu0  ;;  %9979 = vmatpush3.bf16.msra.mxu1 %v12453_v0  ;;  %11216 = vtanh.f32 %v3115_v41  ;;  %v3136_v15 = vadd.f32 %v9720_v25, %v13752_v56 }
 0x2db   : > { %v11197_v13 = vpop.eup %11196  ;;  %v2919_v37 = vadd.f32 %v13752_v56, %v2918_v3  ;;  %v3127_v26 = vpop.f32.mrb[141].mxu1  ;;  %v3678_v52 = vpack.c.bf16 %v11195_v27, %v11187_v51  ;;  %9980 = vmatprep.subr.bf16.mxu1 %v13636_v62  ;;  %11218 = vtanh.f32 %v2927_v4 }
 0x2dc   : > { %v9673_v49 = vpop.f32.mrb[142].mxu0  ;;  %v11199_v8 = vpop.eup %11198  ;;  %v3128_v17 = vadd.f32 %v13752_v56, %v3127_v26  ;;  %v3941_v21 = vpack.c.bf16 %v11197_v13, %v11189_v7  ;;  %11220 = vtanh.f32 %v3136_v15  ;;  %9933 = vmatpush3.bf16.msra.mxu0 %v13636_v62 }
 0x2dd   : > { %v2930_v12 = vadd.f32 %v9673_v49, %v13752_v56  ;;  %v9721_v20 = vpop.f32.mrb[142].mxu1  ;;  %v2921_v43 = vpop.f32.mrb[143].mxu0  ;;  %v3677_v0 = vpack.c.bf16 %v11199_v8, %v11191_v32  ;;  %11222 = vtanh.f32 %v2919_v37  ;;  %9934 = vmatprep.subr.bf16.mxu0 %v13646_v31 }
 0x2de   : > { %v11201_v48 = vpop.eup %11200  ;;  %v3139_v41 = vadd.f32 %v9721_v20, %v13752_v56  ;;  %v3130_v34 = vpop.f32.mrb[143].mxu1  ;;  %v2922_v27 = vadd.f32 %v13752_v56, %v2921_v43  ;;  %9981 = vmatpush3.bf16.msra.mxu1 %v13636_v62  ;;  %11224 = vtanh.f32 %v3128_v17 }
 0x2df   : > { %v11203_v51 = vpop.eup %11202  ;;  %v3940_v4 = vpack.c.bf16 %v11201_v48, %v11193_v30  ;;  %v3131_v7 = vadd.f32 %v13752_v56, %v3130_v34  ;;  %9854 = vmatprep.mubr.bf16.mxu0 %v3677_v0  ;;  %9982 = vmatprep.subr.bf16.mxu1 %v13646_v31  ;;  %11226 = vtanh.f32 %v2930_v12 }
 0x2e0   : > { %v11205_v25 = vpop.eup %11204  ;;  %9855 = vmatmul.mubr.bf16.gmra.mrb[196].mxu0 %v3678_v52  ;;  %11228 = vtanh.f32 %v3139_v41  ;;  %v9676_v13 = vpop.f32.mrb[144].mxu0 }
 0x2e1   : > { %v11207_v3 = vpop.eup %11206  ;;  %9902 = vmatprep.mubr.bf16.mxu1 %v3940_v4  ;;  %9935 = vmatpush3.bf16.msra.mxu0 %v13646_v31  ;;  %11230 = vtanh.f32 %v2922_v27  ;;  %v2943_v30 = vadd.f32 %v9676_v13, %v13752_v56  ;;  %v9724_v15 = vpop.f32.mrb[144].mxu1 }
 0x2e2   : > { %v11209_v32 = vpop.eup %11208  ;;  %9903 = vmatmul.mubr.bf16.gmra.mrb[196].mxu1 %v3941_v21  ;;  %v2934_v37 = vpop.f32.mrb[145].mxu0  ;;  %9936 = vmatprep.subr.bf16.mxu0 %v13663_v40  ;;  %11232 = vtanh.f32 %v3131_v7  ;;  %v3152_v49 = vadd.f32 %v9724_v15, %v13752_v56 }
 0x2e3   : > { %v11211_v62 = vpop.eup %11210  ;;  %9983 = vmatpush3.bf16.msra.mxu1 %v13646_v31  ;;  %v2935_v52 = vadd.f32 %v13752_v56, %v2934_v37  ;;  %v3143_v8 = vpop.f32.mrb[145].mxu1  ;;  %11234 = vtanh.f32 %v2943_v30 }
 0x2e4   : > { %v11213_v26 = vpop.eup %11212  ;;  %v9677_v17 = vpop.f32.mrb[146].mxu0  ;;  %v3680_v12 = vpack.c.bf16 %v11211_v62, %v11203_v51  ;;  %9984 = vmatprep.subr.bf16.mxu1 %v13663_v40  ;;  %v3144_v43 = vadd.f32 %v13752_v56, %v3143_v8  ;;  %11236 = vtanh.f32 %v3152_v49 }
 0x2e5   : > { %v11215_v20 = vpop.eup %11214  ;;  %v2946_v21 = vadd.f32 %v9677_v17, %v13752_v56  ;;  %v9725_v31 = vpop.f32.mrb[146].mxu1  ;;  %v3943_v41 = vpack.c.bf16 %v11213_v26, %v11205_v25  ;;  %9937 = vmatpush3.bf16.msra.mxu0 %v13663_v40  ;;  %11238 = vtanh.f32 %v2935_v52 }
 0x2e6   : > { %v2937_v48 = vpop.f32.mrb[147].mxu0  ;;  %v11217_v34 = vpop.eup %11216  ;;  %v3155_v0 = vadd.f32 %v9725_v31, %v13752_v56  ;;  %v3679_v4 = vpack.c.bf16 %v11215_v20, %v11207_v3  ;;  %9938 = vmatprep.subr.bf16.mxu0 %v13674_v28  ;;  %11240 = vtanh.f32 %v3144_v43 }
 0x2e7   : > { %v3146_v27 = vpop.f32.mrb[147].mxu1  ;;  %v11219_v51 = vpop.eup %11218  ;;  %v2938_v7 = vadd.f32 %v13752_v56, %v2937_v48  ;;  %v3942_v13 = vpack.c.bf16 %v11217_v34, %v11209_v32  ;;  %9985 = vmatpush3.bf16.msra.mxu1 %v13663_v40  ;;  %11242 = vtanh.f32 %v2946_v21 }
 0x2e8   : > { %v11221_v62 = vpop.eup %11220  ;;  %v3147_v25 = vadd.f32 %v13752_v56, %v3146_v27  ;;  %9858 = vmatprep.mubr.bf16.mxu0 %v3679_v4  ;;  %9986 = vmatprep.subr.bf16.mxu1 %v13674_v28  ;;  %11244 = vtanh.f32 %v3155_v0  ;;  %v9680_v15 = vpop.f32.mrb[148].mxu0 }
 0x2e9   : > { %v11223_v30 = vpop.eup %11222  ;;  %9906 = vmatprep.mubr.bf16.mxu1 %v3942_v13  ;;  %9859 = vmatmul.mubr.bf16.gmra.mrb[200].mxu0 %v3680_v12  ;;  %11246 = vtanh.f32 %v2938_v7  ;;  %v2959_v32 = vadd.f32 %v9680_v15, %v13752_v56  ;;  %v9728_v37 = vpop.f32.mrb[148].mxu1 }
 0x2ea   : > { %v11225_v3 = vpop.eup %11224  ;;  %9907 = vmatmul.mubr.bf16.gmra.mrb[200].mxu1 %v3943_v41  ;;  %9939 = vmatpush3.bf16.msra.mxu0 %v13674_v28  ;;  %v2950_v26 = vpop.f32.mrb[149].mxu0  ;;  %11248 = vtanh.f32 %v3147_v25  ;;  %v3168_v52 = vadd.f32 %v9728_v37, %v13752_v56 }
 0x2eb   : > { %v11227_v40 = vpop.eup %11226  ;;  %9987 = vmatpush3.bf16.msra.mxu1 %v13674_v28  ;;  %9940 = vmatprep.subr.bf16.mxu0 %v13695_v46  ;;  %v2951_v8 = vadd.f32 %v13752_v56, %v2950_v26  ;;  %v3159_v17 = vpop.f32.mrb[149].mxu1  ;;  %11250 = vtanh.f32 %v2959_v32  ;;  %v13836_v26 = vld [vmem:[%s16310_s3 + $0xc0] sm:$0xff]  }
 0x2ec   : > { %v11229_v49 = vpop.eup %11228  ;;  %v9681_v12 = vpop.f32.mrb[150].mxu0  ;;  %v3682_v20 = vpack.c.bf16 %v11227_v40, %v11219_v51  ;;  %9988 = vmatprep.subr.bf16.mxu1 %v13695_v46  ;;  %v3160_v21 = vadd.f32 %v13752_v56, %v3159_v17  ;;  %11252 = vtanh.f32 %v3168_v52 }
 0x2ed   : > { %v11231_v43 = vpop.eup %11230  ;;  %v2962_v31 = vadd.f32 %v9681_v12, %v13752_v56  ;;  %v9729_v28 = vpop.f32.mrb[150].mxu1  ;;  %v3945_v41 = vpack.c.bf16 %v11229_v49, %v11221_v62  ;;  %11254 = vtanh.f32 %v2951_v8 }
 0x2ee   : > { %v2953_v48 = vpop.f32.mrb[151].mxu0  ;;  %v11233_v34 = vpop.eup %11232  ;;  %v3171_v0 = vadd.f32 %v9729_v28, %v13752_v56  ;;  %v3681_v4 = vpack.c.bf16 %v11231_v43, %v11223_v30  ;;  %9941 = vmatpush3.bf16.msra.mxu0 %v13695_v46  ;;  %11256 = vtanh.f32 %v3160_v21 }
 0x2ef   : > { %v3162_v27 = vpop.f32.mrb[151].mxu1  ;;  %v13822_v51 = vpop.eup %11234  ;;  %v2954_v7 = vadd.f32 %v13752_v56, %v2953_v48  ;;  %v3944_v13 = vpack.c.bf16 %v11233_v34, %v11225_v3  ;;  %9989 = vmatpush3.bf16.msra.mxu1 %v13695_v46  ;;  %9942 = vmatprep.subr.bf16.mxu0 %v13722_v47  ;;  %11258 = vtanh.f32 %v2962_v31 }
 0x2f0   : > { %v11237_v25 = vpop.eup %11236  ;;  %v3163_v62 = vadd.f32 %v13752_v56, %v3162_v27  ;;  %9862 = vmatprep.mubr.bf16.mxu0 %v3681_v4  ;;  %9990 = vmatprep.subr.bf16.mxu1 %v13722_v47  ;;  %11260 = vtanh.f32 %v3171_v0  ;;  %v9684_v40 = vpop.f32.mrb[152].mxu0 }
 0x2f1   : > { %v11239_v30 = vpop.eup %11238  ;;  %9910 = vmatprep.mubr.bf16.mxu1 %v3944_v13  ;;  %9863 = vmatmul.mubr.bf16.gmra.mrb[204].mxu0 %v3682_v20  ;;  %11262 = vtanh.f32 %v2954_v7  ;;  %v2975_v3 = vadd.f32 %v9684_v40, %v13752_v56  ;;  %v9732_v32 = vpop.f32.mrb[152].mxu1 }
 0x2f2   : > { %v11241_v15 = vpop.eup %11240  ;;  %9911 = vmatmul.mubr.bf16.gmra.mrb[204].mxu1 %v3945_v41  ;;  %9943 = vmatpush3.bf16.msra.mxu0 %v13722_v47  ;;  %v2966_v37 = vpop.f32.mrb[153].mxu0  ;;  %11264 = vtanh.f32 %v3163_v62  ;;  %v3184_v52 = vadd.f32 %v9732_v32, %v13752_v56 }
 0x2f3   : > { %v11243_v46 = vpop.eup %11242  ;;  %9991 = vmatpush3.bf16.msra.mxu1 %v13722_v47  ;;  %9944 = vmatprep.subr.bf16.mxu0 %v13739_v18  ;;  %v2967_v8 = vadd.f32 %v13752_v56, %v2966_v37  ;;  %v3175_v17 = vpop.f32.mrb[153].mxu1  ;;  %11266 = vtanh.f32 %v2975_v3 }
 0x2f4   : > { %v11245_v49 = vpop.eup %11244  ;;  %v9685_v12 = vpop.f32.mrb[154].mxu0  ;;  %v3684_v20 = vpack.c.bf16 %v11243_v46, %v13822_v51  ;;  %9992 = vmatprep.subr.bf16.mxu1 %v13739_v18  ;;  %v3176_v43 = vadd.f32 %v13752_v56, %v3175_v17  ;;  %11268 = vtanh.f32 %v3184_v52 }
 0x2f5   : > { %v11247_v47 = vpop.eup %11246  ;;  %v2978_v21 = vadd.f32 %v9685_v12, %v13752_v56  ;;  %v9733_v31 = vpop.f32.mrb[154].mxu1  ;;  %v3947_v48 = vpack.c.bf16 %v11245_v49, %v11237_v25  ;;  %11270 = vtanh.f32 %v2967_v8 }
 0x2f6   : > { %v2969_v28 = vpop.f32.mrb[155].mxu0  ;;  %v11249_v41 = vpop.eup %11248  ;;  %v3187_v34 = vadd.f32 %v9733_v31, %v13752_v56  ;;  %v3683_v27 = vpack.c.bf16 %v11247_v47, %v11239_v30  ;;  %9945 = vmatpush3.bf16.msra.mxu0 %v13739_v18  ;;  %11272 = vtanh.f32 %v3176_v43 }
 0x2f7   : > { %v3178_v0 = vpop.f32.mrb[155].mxu1  ;;  %v11251_v4 = vpop.eup %11250  ;;  %v2970_v51 = vadd.f32 %v13752_v56, %v2969_v28  ;;  %v3946_v7 = vpack.c.bf16 %v11249_v41, %v11241_v15  ;;  %9993 = vmatpush3.bf16.msra.mxu1 %v13739_v18  ;;  %10026 = vmatprep.subr.bf16.mxu0 %v13836_v26  ;;  %11274 = vtanh.f32 %v2978_v21 }
 0x2f8   : > { %v11253_v13 = vpop.eup %11252  ;;  %v3179_v25 = vadd.f32 %v13752_v56, %v3178_v0  ;;  %9866 = vmatprep.mubr.bf16.mxu0 %v3683_v27  ;;  %10074 = vmatprep.subr.bf16.mxu1 %v13836_v26  ;;  %11276 = vtanh.f32 %v3187_v34  ;;  %v9688_v40 = vpop.f32.mrb[156].mxu0 }
 0x2f9   : > { %v11255_v62 = vpop.eup %11254  ;;  %9914 = vmatprep.mubr.bf16.mxu1 %v3946_v7  ;;  %9867 = vmatmul.mubr.bf16.gmra.mrb[208].mxu0 %v3684_v20  ;;  %11278 = vtanh.f32 %v2970_v51  ;;  %v2991_v18 = vadd.f32 %v9688_v40, %v13752_v56  ;;  %v9736_v46 = vpop.f32.mrb[156].mxu1 }
 0x2fa   : > { %v11257_v30 = vpop.eup %11256  ;;  %9915 = vmatmul.mubr.bf16.gmra.mrb[208].mxu1 %v3947_v48  ;;  %v2982_v3 = vpop.f32.mrb[157].mxu0  ;;  %11280 = vtanh.f32 %v3179_v25  ;;  %v3200_v37 = vadd.f32 %v9736_v46, %v13752_v56 }
 0x2fb   : > { %v11259_v15 = vpop.eup %11258  ;;  %v2983_v49 = vadd.f32 %v13752_v56, %v2982_v3  ;;  %v3191_v52 = vpop.f32.mrb[157].mxu1  ;;  %11282 = vtanh.f32 %v2991_v18 }
 0x2fc   : > { %v11261_v32 = vpop.eup %11260  ;;  %v9689_v8 = vpop.f32.mrb[158].mxu0  ;;  %v3686_v17 = vpack.c.bf16 %v11259_v15, %v11251_v4  ;;  %v3192_v20 = vadd.f32 %v13752_v56, %v3191_v52  ;;  %11284 = vtanh.f32 %v3200_v37 }
 0x2fd   : > { %v11263_v12 = vpop.eup %11262  ;;  %v2994_v47 = vadd.f32 %v9689_v8, %v13752_v56  ;;  %v9737_v43 = vpop.f32.mrb[158].mxu1  ;;  %v3949_v31 = vpack.c.bf16 %v11261_v32, %v11253_v13  ;;  %11286 = vtanh.f32 %v2983_v49 }
 0x2fe   : > { %v2985_v21 = vpop.f32.mrb[159].mxu0  ;;  %v11265_v28 = vpop.eup %11264  ;;  %v3203_v48 = vadd.f32 %v9737_v43, %v13752_v56  ;;  %v3685_v34 = vpack.c.bf16 %v11263_v12, %v11255_v62  ;;  %11288 = vtanh.f32 %v3192_v20 }
 0x2ff   : > { %v3194_v41 = vpop.f32.mrb[159].mxu1  ;;  %v11267_v0 = vpop.eup %11266  ;;  %v2986_v27 = vadd.f32 %v13752_v56, %v2985_v21  ;;  %v3948_v4 = vpack.c.bf16 %v11265_v28, %v11257_v30  ;;  %11290 = vtanh.f32 %v2994_v47 }
 0x300   : > { %v11269_v51 = vpop.eup %11268  ;;  %v3195_v7 = vadd.f32 %v13752_v56, %v3194_v41  ;;  %9870 = vmatprep.mubr.bf16.mxu0 %v3685_v34  ;;  %11292 = vtanh.f32 %v3203_v48  ;;  %v9756_v40 = vpop.f32.mrb[160].mxu0 }
 0x301   : > { %v11271_v25 = vpop.eup %11270  ;;  %9918 = vmatprep.mubr.bf16.mxu1 %v3948_v4  ;;  %9871 = vmatmul.mubr.bf16.gmra.mrb[212].mxu0 %v3686_v17  ;;  %11294 = vtanh.f32 %v2986_v27  ;;  %v3297_v62 = vadd.f32 %v9756_v40, %v13752_v56  ;;  %v9804_v18 = vpop.f32.mrb[160].mxu1 }
 0x302   : > { %v11273_v13 = vpop.eup %11272  ;;  %9919 = vmatmul.mubr.bf16.gmra.mrb[212].mxu1 %v3949_v31  ;;  %v3288_v46 = vpop.f32.mrb[161].mxu0  ;;  %11296 = vtanh.f32 %v3195_v7  ;;  %v3506_v3 = vadd.f32 %v9804_v18, %v13752_v56 }
 0x303   : > { %v11275_v15 = vpop.eup %11274  ;;  %v3289_v32 = vadd.f32 %v13752_v56, %v3288_v46  ;;  %v3497_v37 = vpop.f32.mrb[161].mxu1  ;;  %11298 = vtanh.f32 %v3297_v62 }
 0x304   : > { %v11277_v30 = vpop.eup %11276  ;;  %v9757_v49 = vpop.f32.mrb[162].mxu0  ;;  %v3688_v52 = vpack.c.bf16 %v11275_v15, %v11267_v0  ;;  %v3498_v17 = vadd.f32 %v13752_v56, %v3497_v37  ;;  %11300 = vtanh.f32 %v3506_v3 }
 0x305   : > { %v11279_v8 = vpop.eup %11278  ;;  %v3300_v12 = vadd.f32 %v9757_v49, %v13752_v56  ;;  %v9805_v20 = vpop.f32.mrb[162].mxu1  ;;  %v3951_v43 = vpack.c.bf16 %v11277_v30, %v11269_v51  ;;  %11302 = vtanh.f32 %v3289_v32 }
 0x306   : > { %v3291_v47 = vpop.f32.mrb[163].mxu0  ;;  %v11281_v21 = vpop.eup %11280  ;;  %v3509_v31 = vadd.f32 %v9805_v20, %v13752_v56  ;;  %v3687_v48 = vpack.c.bf16 %v11279_v8, %v11271_v25  ;;  %11304 = vtanh.f32 %v3498_v17 }
 0x307   : > { %v3500_v28 = vpop.f32.mrb[163].mxu1  ;;  %v11283_v41 = vpop.eup %11282  ;;  %v3292_v34 = vadd.f32 %v13752_v56, %v3291_v47  ;;  %v3950_v0 = vpack.c.bf16 %v11281_v21, %v11273_v13  ;;  %11306 = vtanh.f32 %v3300_v12 }
 0x308   : > { %v11285_v27 = vpop.eup %11284  ;;  %v3501_v4 = vadd.f32 %v13752_v56, %v3500_v28  ;;  %9874 = vmatprep.mubr.bf16.mxu0 %v3687_v48  ;;  %11308 = vtanh.f32 %v3509_v31  ;;  %v9760_v40 = vpop.f32.mrb[164].mxu0 }
 0x309   : > { %v11287_v7 = vpop.eup %11286  ;;  %9922 = vmatprep.mubr.bf16.mxu1 %v3950_v0  ;;  %9875 = vmatmul.mubr.bf16.gmra.mrb[216].mxu0 %v3688_v52  ;;  %11310 = vtanh.f32 %v3292_v34  ;;  %v3313_v25 = vadd.f32 %v9760_v40, %v13752_v56  ;;  %v9808_v62 = vpop.f32.mrb[164].mxu1 }
 0x30a   : > { %v11289_v51 = vpop.eup %11288  ;;  %9923 = vmatmul.mubr.bf16.gmra.mrb[216].mxu1 %v3951_v43  ;;  %v3304_v18 = vpop.f32.mrb[165].mxu0  ;;  %11312 = vtanh.f32 %v3501_v4  ;;  %v3522_v46 = vadd.f32 %v9808_v62, %v13752_v56 }
 0x30b   : > { %v11291_v15 = vpop.eup %11290  ;;  %v3305_v30 = vadd.f32 %v13752_v56, %v3304_v18  ;;  %v3513_v3 = vpop.f32.mrb[165].mxu1  ;;  %11314 = vtanh.f32 %v3313_v25 }
 0x30c   : > { %v11293_v13 = vpop.eup %11292  ;;  %v9761_v32 = vpop.f32.mrb[166].mxu0  ;;  %v3690_v37 = vpack.c.bf16 %v11291_v15, %v11283_v41  ;;  %v3514_v52 = vadd.f32 %v13752_v56, %v3513_v3  ;;  %11316 = vtanh.f32 %v3522_v46 }
 0x30d   : > { %v11295_v49 = vpop.eup %11294  ;;  %v3316_v8 = vadd.f32 %v9761_v32, %v13752_v56  ;;  %v9809_v17 = vpop.f32.mrb[166].mxu1  ;;  %v3953_v20 = vpack.c.bf16 %v11293_v13, %v11285_v27  ;;  %11318 = vtanh.f32 %v3305_v30 }
 0x30e   : > { %v3307_v12 = vpop.f32.mrb[167].mxu0  ;;  %v11297_v47 = vpop.eup %11296  ;;  %v3525_v43 = vadd.f32 %v9809_v17, %v13752_v56  ;;  %v3689_v31 = vpack.c.bf16 %v11295_v49, %v11287_v7  ;;  %11320 = vtanh.f32 %v3514_v52 }
 0x30f   : > { %v3516_v21 = vpop.f32.mrb[167].mxu1  ;;  %v11299_v28 = vpop.eup %11298  ;;  %v3308_v48 = vadd.f32 %v13752_v56, %v3307_v12  ;;  %v3952_v41 = vpack.c.bf16 %v11297_v47, %v11289_v51  ;;  %11322 = vtanh.f32 %v3316_v8 }
 0x310   : > { %v11301_v34 = vpop.eup %11300  ;;  %v3517_v0 = vadd.f32 %v13752_v56, %v3516_v21  ;;  %9878 = vmatprep.mubr.bf16.mxu0 %v3689_v31  ;;  %11324 = vtanh.f32 %v3525_v43  ;;  %v9764_v40 = vpop.f32.mrb[168].mxu0 }
 0x311   : > { %v11303_v4 = vpop.eup %11302  ;;  %9926 = vmatprep.mubr.bf16.mxu1 %v3952_v41  ;;  %9879 = vmatmul.mubr.bf16.gmra.mrb[220].mxu0 %v3690_v37  ;;  %11326 = vtanh.f32 %v3308_v48  ;;  %v3329_v7 = vadd.f32 %v9764_v40, %v13752_v56  ;;  %v9812_v25 = vpop.f32.mrb[168].mxu1  ;;  %v13885_v48 = vld [vmem:[%s16310_s3 + $0xc8] sm:$0xff]  }
 0x312   : > { %v11305_v27 = vpop.eup %11304  ;;  %9927 = vmatmul.mubr.bf16.gmra.mrb[220].mxu1 %v3953_v20  ;;  %v3320_v62 = vpop.f32.mrb[169].mxu0  ;;  %11328 = vtanh.f32 %v3517_v0  ;;  %v3538_v18 = vadd.f32 %v9812_v25, %v13752_v56 }
 0x313   : > { %v11307_v15 = vpop.eup %11306  ;;  %v3321_v13 = vadd.f32 %v13752_v56, %v3320_v62  ;;  %v3529_v46 = vpop.f32.mrb[169].mxu1  ;;  %11330 = vtanh.f32 %v3329_v7  ;;  %v13895_v62 = vld [vmem:[%s16310_s3 + $0xd0] sm:$0xff]  }
 0x314   : > { %v11309_v51 = vpop.eup %11308  ;;  %v9765_v30 = vpop.f32.mrb[170].mxu0  ;;  %v4148_v3 = vpack.c.bf16 %v11307_v15, %v11299_v28  ;;  %v3530_v37 = vadd.f32 %v13752_v56, %v3529_v46  ;;  %11332 = vtanh.f32 %v3538_v18 }
 0x315   : > { %v11311_v32 = vpop.eup %11310  ;;  %v3332_v49 = vadd.f32 %v9765_v30, %v13752_v56  ;;  %v9813_v52 = vpop.f32.mrb[170].mxu1  ;;  %v4357_v17 = vpack.c.bf16 %v11309_v51, %v11301_v34  ;;  %11334 = vtanh.f32 %v3321_v13 }
 0x316   : > { %v3323_v8 = vpop.f32.mrb[171].mxu0  ;;  %v11313_v12 = vpop.eup %11312  ;;  %v3541_v20 = vadd.f32 %v9813_v52, %v13752_v56  ;;  %v4147_v43 = vpack.c.bf16 %v11311_v32, %v11303_v4  ;;  %11336 = vtanh.f32 %v3530_v37 }
 0x317   : > { %v3532_v47 = vpop.f32.mrb[171].mxu1  ;;  %v11315_v21 = vpop.eup %11314  ;;  %v3324_v31 = vadd.f32 %v13752_v56, %v3323_v8  ;;  %v4356_v28 = vpack.c.bf16 %v11313_v12, %v11305_v27  ;;  %11338 = vtanh.f32 %v3332_v49 }
 0x318   : > { %v11317_v41 = vpop.eup %11316  ;;  %v3533_v34 = vadd.f32 %v13752_v56, %v3532_v47  ;;  %9946 = vmatprep.mubr.bf16.mxu0 %v4147_v43  ;;  %11340 = vtanh.f32 %v3541_v20  ;;  %v9768_v40 = vpop.f32.mrb[172].mxu0 }
 0x319   : > { %v11319_v0 = vpop.eup %11318  ;;  %9994 = vmatprep.mubr.bf16.mxu1 %v4356_v28  ;;  %9947 = vmatmul.mubr.bf16.vlgmr.msra.gmra.mrb[224].mxu0 %v4148_v3  ;;  %11342 = vtanh.f32 %v3324_v31  ;;  %v3345_v15 = vadd.f32 %v9768_v40, %v13752_v56  ;;  %v9816_v7 = vpop.f32.mrb[172].mxu1 }
 0x31a   : > { %v11321_v4 = vpop.eup %11320  ;;  %9995 = vmatmul.mubr.bf16.vlgmr.msra.gmra.mrb[224].mxu1 %v4357_v17  ;;  %10027 = vmatpush3.bf16.msra.mxu0 %v13836_v26  ;;  %v3336_v25 = vpop.f32.mrb[173].mxu0  ;;  %11344 = vtanh.f32 %v3533_v34  ;;  %v3554_v18 = vadd.f32 %v9816_v7, %v13752_v56 }
 0x31b   : > { %v11323_v27 = vpop.eup %11322  ;;  %10075 = vmatpush3.bf16.msra.mxu1 %v13836_v26  ;;  %10028 = vmatprep.subr.bf16.mxu0 %v13885_v48  ;;  %v3337_v13 = vadd.f32 %v13752_v56, %v3336_v25  ;;  %v3545_v46 = vpop.f32.mrb[173].mxu1  ;;  %11346 = vtanh.f32 %v3345_v15 }
 0x31c   : > { %v11325_v51 = vpop.eup %11324  ;;  %v9769_v30 = vpop.f32.mrb[174].mxu0  ;;  %v4150_v3 = vpack.c.bf16 %v11323_v27, %v11315_v21  ;;  %10076 = vmatprep.subr.bf16.mxu1 %v13885_v48  ;;  %v3546_v37 = vadd.f32 %v13752_v56, %v3545_v46  ;;  %11348 = vtanh.f32 %v3554_v18  ;;  %v13923_v18 = vld [vmem:[%s16310_s3 + $0xe0] sm:$0xff]  }
 0x31d   : > { %v11327_v32 = vpop.eup %11326  ;;  %v3348_v49 = vadd.f32 %v9769_v30, %v13752_v56  ;;  %v9817_v52 = vpop.f32.mrb[174].mxu1  ;;  %v4359_v17 = vpack.c.bf16 %v11325_v51, %v11317_v41  ;;  %11350 = vtanh.f32 %v3337_v13  ;;  %v13912_v41 = vld [vmem:[%s16310_s3 + $0xd8] sm:$0xff]  }
 0x31e   : > { %v3339_v8 = vpop.f32.mrb[175].mxu0  ;;  %v11329_v12 = vpop.eup %11328  ;;  %v3557_v20 = vadd.f32 %v9817_v52, %v13752_v56  ;;  %v4149_v43 = vpack.c.bf16 %v11327_v32, %v11319_v0  ;;  %10029 = vmatpush3.bf16.msra.mxu0 %v13885_v48  ;;  %11352 = vtanh.f32 %v3546_v37  ;;  %v13932_v52 = vld [vmem:[%s16311_s4 + $0x1] ss:$0 sm:$0xff] }
 0x31f   : > { %v3548_v47 = vpop.f32.mrb[175].mxu1  ;;  %v13904_v21 = vpop.eup %11330  ;;  %v3340_v31 = vadd.f32 %v13752_v56, %v3339_v8  ;;  %v4358_v28 = vpack.c.bf16 %v11329_v12, %v11321_v4  ;;  %10077 = vmatpush3.bf16.msra.mxu1 %v13885_v48  ;;  %10030 = vmatprep.subr.bf16.mxu0 %v13895_v62  ;;  %11354 = vtanh.f32 %v3348_v49 }
 0x320   : > { %v11333_v34 = vpop.eup %11332  ;;  %v3549_v0 = vadd.f32 %v13752_v56, %v3548_v47  ;;  %9950 = vmatprep.mubr.bf16.mxu0 %v4149_v43  ;;  %10078 = vmatprep.subr.bf16.mxu1 %v13895_v62  ;;  %11356 = vtanh.f32 %v3557_v20  ;;  %v9772_v27 = vpop.f32.mrb[176].mxu0 }
 0x321   : > { %v11335_v40 = vpop.eup %11334  ;;  %9998 = vmatprep.mubr.bf16.mxu1 %v4358_v28  ;;  %9951 = vmatmul.mubr.bf16.gmra.mrb[228].mxu0 %v4150_v3  ;;  %11358 = vtanh.f32 %v3340_v31  ;;  %v3361_v7 = vadd.f32 %v9772_v27, %v13752_v56  ;;  %v9820_v25 = vpop.f32.mrb[176].mxu1 }
 0x322   : > { %v11337_v4 = vpop.eup %11336  ;;  %9999 = vmatmul.mubr.bf16.gmra.mrb[228].mxu1 %v4359_v17  ;;  %10031 = vmatpush3.bf16.msra.mxu0 %v13895_v62  ;;  %v3352_v51 = vpop.f32.mrb[177].mxu0  ;;  %11360 = vtanh.f32 %v3549_v0  ;;  %v3570_v46 = vadd.f32 %v9820_v25, %v13752_v56 }
 0x323   : > { %v11339_v15 = vpop.eup %11338  ;;  %10079 = vmatpush3.bf16.msra.mxu1 %v13895_v62  ;;  %10032 = vmatprep.subr.bf16.mxu0 %v13912_v41  ;;  %v3353_v30 = vadd.f32 %v13752_v56, %v3352_v51  ;;  %v3561_v3 = vpop.f32.mrb[177].mxu1  ;;  %11362 = vtanh.f32 %v3361_v7 }
 0x324   : > { %v11341_v13 = vpop.eup %11340  ;;  %v9773_v32 = vpop.f32.mrb[178].mxu0  ;;  %v4152_v37 = vpack.c.bf16 %v11339_v15, %v13904_v21  ;;  %10080 = vmatprep.subr.bf16.mxu1 %v13912_v41  ;;  %v3562_v8 = vadd.f32 %v13932_v52, %v3561_v3  ;;  %11364 = vtanh.f32 %v3570_v46 }
 0x325   : > { %v11343_v49 = vpop.eup %11342  ;;  %v3364_v17 = vadd.f32 %v13932_v52, %v9773_v32  ;;  %v9821_v12 = vpop.f32.mrb[178].mxu1  ;;  %v4361_v56 = vpack.c.bf16 %v11341_v13, %v11333_v34  ;;  %11366 = vtanh.f32 %v3353_v30  ;;  %v13944_v34 = vld [vmem:[%s16310_s3 + $0xe8] sm:$0xff]  }
 0x326   : > { %v3355_v20 = vpop.f32.mrb[179].mxu0  ;;  %v11345_v47 = vpop.eup %11344  ;;  %v3573_v43 = vadd.f32 %v13932_v52, %v9821_v12  ;;  %v4151_v31 = vpack.c.bf16 %v11343_v49, %v11335_v40  ;;  %10033 = vmatpush3.bf16.msra.mxu0 %v13912_v41  ;;  %11368 = vtanh.f32 %v3562_v8 }
 0x327   : > { %v3564_v21 = vpop.f32.mrb[179].mxu1  ;;  %v11347_v28 = vpop.eup %11346  ;;  %v3356_v0 = vadd.f32 %v13932_v52, %v3355_v20  ;;  %v4360_v27 = vpack.c.bf16 %v11345_v47, %v11337_v4  ;;  %10081 = vmatpush3.bf16.msra.mxu1 %v13912_v41  ;;  %10034 = vmatprep.subr.bf16.mxu0 %v13923_v18  ;;  %11370 = vtanh.f32 %v3364_v17 }
 0x328   : > { %v11349_v15 = vpop.eup %11348  ;;  %v3565_v40 = vadd.f32 %v13932_v52, %v3564_v21  ;;  %9954 = vmatprep.mubr.bf16.mxu0 %v4151_v31  ;;  %10082 = vmatprep.subr.bf16.mxu1 %v13923_v18  ;;  %11372 = vtanh.f32 %v3573_v43  ;;  %v9776_v25 = vpop.f32.mrb[180].mxu0 }
 0x329   : > { %v11351_v7 = vpop.eup %11350  ;;  %10002 = vmatprep.mubr.bf16.mxu1 %v4360_v27  ;;  %9955 = vmatmul.mubr.bf16.gmra.mrb[232].mxu0 %v4152_v37  ;;  %11374 = vtanh.f32 %v3356_v0  ;;  %v3377_v13 = vadd.f32 %v13932_v52, %v9776_v25  ;;  %v9824_v46 = vpop.f32.mrb[180].mxu1 }
 0x32a   : > { %v11353_v4 = vpop.eup %11352  ;;  %10003 = vmatmul.mubr.bf16.gmra.mrb[232].mxu1 %v4361_v56  ;;  %10035 = vmatpush3.bf16.msra.mxu0 %v13923_v18  ;;  %v3368_v30 = vpop.f32.mrb[181].mxu0  ;;  %11376 = vtanh.f32 %v3565_v40  ;;  %v3586_v32 = vadd.f32 %v13932_v52, %v9824_v46 }
 0x32b   : > { %v11355_v51 = vpop.eup %11354  ;;  %10083 = vmatpush3.bf16.msra.mxu1 %v13923_v18  ;;  %10036 = vmatprep.subr.bf16.mxu0 %v13944_v34  ;;  %v3369_v37 = vadd.f32 %v13932_v52, %v3368_v30  ;;  %v3577_v49 = vpop.f32.mrb[181].mxu1  ;;  %11378 = vtanh.f32 %v3377_v13 }
 0x32c   : > { %v11357_v3 = vpop.eup %11356  ;;  %v9777_v8 = vpop.f32.mrb[182].mxu0  ;;  %v4154_v17 = vpack.c.bf16 %v11355_v51, %v11347_v28  ;;  %10084 = vmatprep.subr.bf16.mxu1 %v13944_v34  ;;  %v3578_v20 = vadd.f32 %v13932_v52, %v3577_v49  ;;  %11380 = vtanh.f32 %v3586_v32 }
 0x32d   : > { %v11359_v12 = vpop.eup %11358  ;;  %v3380_v56 = vadd.f32 %v13932_v52, %v9777_v8  ;;  %v9825_v47 = vpop.f32.mrb[182].mxu1  ;;  %v4363_v21 = vpack.c.bf16 %v11357_v3, %v11349_v15  ;;  %11382 = vtanh.f32 %v3369_v37 }
 0x32e   : > { %v3371_v43 = vpop.f32.mrb[183].mxu0  ;;  %v11361_v31 = vpop.eup %11360  ;;  %v3589_v0 = vadd.f32 %v13932_v52, %v9825_v47  ;;  %v4153_v40 = vpack.c.bf16 %v11359_v12, %v11351_v7  ;;  %10037 = vmatpush3.bf16.msra.mxu0 %v13944_v34  ;;  %11384 = vtanh.f32 %v3578_v20 }
 0x32f   : > { %v3580_v27 = vpop.f32.mrb[183].mxu1  ;;  %v11363_v28 = vpop.eup %11362  ;;  %v3372_v25 = vadd.f32 %v13932_v52, %v3371_v43  ;;  %v4362_v51 = vpack.c.bf16 %v11361_v31, %v11353_v4  ;;  %10085 = vmatpush3.bf16.msra.mxu1 %v13944_v34  ;;  %11386 = vtanh.f32 %v3380_v56 }
 0x330   : > { %v11365_v13 = vpop.eup %11364  ;;  %v3581_v46 = vadd.f32 %v13932_v52, %v3580_v27  ;;  %9958 = vmatprep.mubr.bf16.mxu0 %v4153_v40  ;;  %11388 = vtanh.f32 %v3589_v0  ;;  %v9780_v7 = vpop.f32.mrb[184].mxu0 }
 0x331   : > { %v11367_v15 = vpop.eup %11366  ;;  %10006 = vmatprep.mubr.bf16.mxu1 %v4362_v51  ;;  %9959 = vmatmul.mubr.bf16.gmra.mrb[236].mxu0 %v4154_v17  ;;  %11390 = vtanh.f32 %v3372_v25  ;;  %v3393_v32 = vadd.f32 %v13932_v52, %v9780_v7  ;;  %v9828_v4 = vpop.f32.mrb[184].mxu1 }
 0x332   : > { %v11369_v30 = vpop.eup %11368  ;;  %10007 = vmatmul.mubr.bf16.gmra.mrb[236].mxu1 %v4363_v21  ;;  %v3384_v37 = vpop.f32.mrb[185].mxu0  ;;  %11392 = vtanh.f32 %v3581_v46  ;;  %v3602_v8 = vadd.f32 %v13932_v52, %v9828_v4 }
 0x333   : > { %v11371_v3 = vpop.eup %11370  ;;  %v3385_v12 = vadd.f32 %v13932_v52, %v3384_v37  ;;  %v3593_v20 = vpop.f32.mrb[185].mxu1  ;;  %11394 = vtanh.f32 %v3393_v32 }
 0x334   : > { %v11373_v49 = vpop.eup %11372  ;;  %v9781_v56 = vpop.f32.mrb[186].mxu0  ;;  %v4156_v47 = vpack.c.bf16 %v11371_v3, %v11363_v28  ;;  %v3594_v43 = vadd.f32 %v13932_v52, %v3593_v20  ;;  %11396 = vtanh.f32 %v3602_v8 }
 0x335   : > { %v11375_v17 = vpop.eup %11374  ;;  %v3396_v21 = vadd.f32 %v13932_v52, %v9781_v56  ;;  %v9829_v31 = vpop.f32.mrb[186].mxu1  ;;  %v4365_v27 = vpack.c.bf16 %v11373_v49, %v11365_v13  ;;  %11398 = vtanh.f32 %v3385_v12 }
 0x336   : > { %v3387_v0 = vpop.f32.mrb[187].mxu0  ;;  %v11377_v40 = vpop.eup %11376  ;;  %v3605_v25 = vadd.f32 %v13932_v52, %v9829_v31  ;;  %v4155_v46 = vpack.c.bf16 %v11375_v17, %v11367_v15  ;;  %11400 = vtanh.f32 %v3594_v43 }
 0x337   : > { %v3596_v51 = vpop.f32.mrb[187].mxu1  ;;  %v11379_v7 = vpop.eup %11378  ;;  %v3388_v4 = vadd.f32 %v13932_v52, %v3387_v0  ;;  %v4364_v28 = vpack.c.bf16 %v11377_v40, %v11369_v30  ;;  %11402 = vtanh.f32 %v3396_v21 }
 0x338   : > { %v11381_v3 = vpop.eup %11380  ;;  %v3597_v32 = vadd.f32 %v13932_v52, %v3596_v51  ;;  %9962 = vmatprep.mubr.bf16.mxu0 %v4155_v46  ;;  %11404 = vtanh.f32 %v3605_v25  ;;  %v9784_v49 = vpop.f32.mrb[188].mxu0 }
 0x339   : > { %v11383_v37 = vpop.eup %11382  ;;  %10010 = vmatprep.mubr.bf16.mxu1 %v4364_v28  ;;  %9963 = vmatmul.mubr.bf16.gmra.mrb[240].mxu0 %v4156_v47  ;;  %11406 = vtanh.f32 %v3388_v4  ;;  %v3409_v15 = vadd.f32 %v13932_v52, %v9784_v49  ;;  %v9832_v12 = vpop.f32.mrb[188].mxu1  ;;  %v13976_v47 = vld [vmem:[%s16310_s3 + $0xf0] sm:$0xff]  }
 0x33a   : > { %v11385_v13 = vpop.eup %11384  ;;  %10011 = vmatmul.mubr.bf16.gmra.mrb[240].mxu1 %v4365_v27  ;;  %v3400_v20 = vpop.f32.mrb[189].mxu0  ;;  %11408 = vtanh.f32 %v3597_v32  ;;  %v3618_v56 = vadd.f32 %v13932_v52, %v9832_v12  ;;  %10038 = vmatprep.subr.bf16.mxu0 %v13976_v47 }
 0x33b   : > { %v11387_v8 = vpop.eup %11386  ;;  %v3401_v17 = vadd.f32 %v13932_v52, %v3400_v20  ;;  %v3609_v43 = vpop.f32.mrb[189].mxu1  ;;  %11410 = vtanh.f32 %v3409_v15  ;;  %10086 = vmatprep.subr.bf16.mxu1 %v13976_v47  ;;  %10039 = vmatpush3.bf16.msra.mxu0 %v13976_v47 }
 0x33c   : > { %v11389_v30 = vpop.eup %11388  ;;  %v9785_v21 = vpop.f32.mrb[190].mxu0  ;;  %v4158_v31 = vpack.c.bf16 %v11387_v8, %v11379_v7  ;;  %v3610_v27 = vadd.f32 %v13932_v52, %v3609_v43  ;;  %11412 = vtanh.f32 %v3618_v56  ;;  %10087 = vmatpush3.bf16.msra.mxu1 %v13976_v47 }
 0x33d   : > { %v11391_v0 = vpop.eup %11390  ;;  %v3412_v40 = vadd.f32 %v13932_v52, %v9785_v21  ;;  %v9833_v25 = vpop.f32.mrb[190].mxu1  ;;  %v4367_v46 = vpack.c.bf16 %v11389_v30, %v11381_v3  ;;  %11414 = vtanh.f32 %v3401_v17 }
 0x33e   : > { %v3403_v51 = vpop.f32.mrb[191].mxu0  ;;  %v11393_v4 = vpop.eup %11392  ;;  %v3621_v28 = vadd.f32 %v13932_v52, %v9833_v25  ;;  %v4157_v7 = vpack.c.bf16 %v11391_v0, %v11383_v37  ;;  %11416 = vtanh.f32 %v3610_v27  ;;  %v13990_v37 = vld [vmem:[%s16310_s3 + $0xf8] sm:$0xff]  }
 0x33f   : > { %v3612_v32 = vpop.f32.mrb[191].mxu1  ;;  %v11395_v49 = vpop.eup %11394  ;;  %v3404_v8 = vadd.f32 %v13932_v52, %v3403_v51  ;;  %v4366_v15 = vpack.c.bf16 %v11393_v4, %v11385_v13  ;;  %11418 = vtanh.f32 %v3412_v40  ;;  %10040 = vmatprep.subr.bf16.mxu0 %v13990_v37  ;;  %10088 = vmatprep.subr.bf16.mxu1 %v13990_v37 }
 0x340   : > { %v11397_v3 = vpop.eup %11396  ;;  %v3613_v12 = vadd.f32 %v13932_v52, %v3612_v32  ;;  %9966 = vmatprep.mubr.bf16.mxu0 %v4157_v7  ;;  %11420 = vtanh.f32 %v3621_v28  ;;  %10041 = vmatpush3.bf16.msra.mxu0 %v13990_v37 }
 0x341   : > { %v11399_v20 = vpop.eup %11398  ;;  %10014 = vmatprep.mubr.bf16.mxu1 %v4366_v15  ;;  %9967 = vmatmul.mubr.bf16.gmra.mrb[244].mxu0 %v4158_v31  ;;  %11422 = vtanh.f32 %v3404_v8 }
 0x342   : > { %v11401_v30 = vpop.eup %11400  ;;  %10015 = vmatmul.mubr.bf16.gmra.mrb[244].mxu1 %v4367_v46  ;;  %11424 = vtanh.f32 %v3613_v12  ;;  %10122 = vmatprep.subr.bf16.mxu0 %v13836_v26 }
 0x343   : > { %v11403_v13 = vpop.eup %11402  ;;  %10089 = vmatpush3.bf16.msra.mxu1 %v13990_v37 }
 0x344   : > { %v11405_v52 = vpop.eup %11404  ;;  %v4160_v56 = vpack.c.bf16 %v11403_v13, %v11395_v49  ;;  %10170 = vmatprep.subr.bf16.mxu1 %v13836_v26  ;;  %v14001_v26 = vld [vmem:[%s16311_s4 + $0x2] ss:$0 sm:$0xff] }
 0x345   : > { %v11407_v17 = vpop.eup %11406  ;;  %v4369_v43 = vpack.c.bf16 %v11405_v52, %v11397_v3 }
 0x346   : > { %v11409_v21 = vpop.eup %11408  ;;  %v4159_v31 = vpack.c.bf16 %v11407_v17, %v11399_v20 }
 0x347   : > { %v11411_v0 = vpop.eup %11410  ;;  %v4368_v27 = vpack.c.bf16 %v11409_v21, %v11401_v30 }
 0x348   : > { %v11413_v40 = vpop.eup %11412  ;;  %9970 = vmatprep.mubr.bf16.mxu0 %v4159_v31 }
 0x349   : > { %v11415_v25 = vpop.eup %11414  ;;  %10018 = vmatprep.mubr.bf16.mxu1 %v4368_v27  ;;  %9971 = vmatmul.mubr.bf16.gmra.mrb[248].mxu0 %v4160_v56 }
 0x34a   : > { %v11417_v51 = vpop.eup %11416  ;;  %10019 = vmatmul.mubr.bf16.gmra.mrb[248].mxu1 %v4369_v43 }
 0x34b   : > { %v11419_v46 = vpop.eup %11418 }
 0x34c   : > { %v11421_v4 = vpop.eup %11420  ;;  %v4162_v28 = vpack.c.bf16 %v11419_v46, %v11411_v0 }
 0x34d   : > { %v11423_v32 = vpop.eup %11422  ;;  %v4371_v7 = vpack.c.bf16 %v11421_v4, %v11413_v40 }
 0x34e   : > { %v11425_v49 = vpop.eup %11424  ;;  %v4161_v8 = vpack.c.bf16 %v11423_v32, %v11415_v25 }
 0x34f   : > { %v4370_v15 = vpack.c.bf16 %v11425_v49, %v11417_v51 }
 0x350   : > { %9974 = vmatprep.mubr.bf16.mxu0 %v4161_v8 }
 0x351   : > { %10022 = vmatprep.mubr.bf16.mxu1 %v4370_v15  ;;  %9975 = vmatmul.mubr.bf16.gmra.mrb[252].mxu0 %v4162_v28 }
 0x352   : > { %10023 = vmatmul.mubr.bf16.gmra.mrb[252].mxu1 %v4371_v7 }
 0x3aa   : > { %v9852_v3 = vpop.f32.mrb[192].mxu0 }
 0x3ab   : > { %v3788_v12 = vadd.f32 %v9852_v3, %v14001_v26  ;;  %v3779_v30 = vpop.f32.mrb[193].mxu0 }
 0x3ac   : > { %v9900_v20 = vpop.f32.mrb[192].mxu1  ;;  %v3780_v52 = vadd.f32 %v14001_v26, %v3779_v30  ;;  %v9853_v17 = vpop.f32.mrb[194].mxu0 }
 0x3ad   : > { %v3997_v13 = vadd.f32 %v9900_v20, %v14001_v26  ;;  %v3988_v56 = vpop.f32.mrb[193].mxu1  ;;  %11426 = vtanh.f32 %v3788_v12  ;;  %v3791_v21 = vadd.f32 %v9853_v17, %v14001_v26  ;;  %v3782_v0 = vpop.f32.mrb[195].mxu0 }
 0x3ae   : > { %v3989_v43 = vadd.f32 %v14001_v26, %v3988_v56  ;;  %v9901_v31 = vpop.f32.mrb[194].mxu1  ;;  %v3783_v25 = vadd.f32 %v14001_v26, %v3782_v0 }
 0x3af   : > { %11428 = vtanh.f32 %v3997_v13  ;;  %v4000_v27 = vadd.f32 %v9901_v31, %v14001_v26  ;;  %v3991_v40 = vpop.f32.mrb[195].mxu1 }
 0x3b0   : > { %11430 = vtanh.f32 %v3780_v52  ;;  %v3992_v51 = vadd.f32 %v14001_v26, %v3991_v40 }
 0x3b1   : > { %11432 = vtanh.f32 %v3989_v43 }
 0x3b2   : > { %11434 = vtanh.f32 %v3791_v21 }
 0x3b3   : > { %11436 = vtanh.f32 %v4000_v27  ;;  %v9856_v46 = vpop.f32.mrb[196].mxu0 }
 0x3b4   : > { %11438 = vtanh.f32 %v3783_v25  ;;  %v3804_v4 = vadd.f32 %v9856_v46, %v14001_v26  ;;  %v3795_v32 = vpop.f32.mrb[197].mxu0 }
 0x3b5   : > { %v9904_v28 = vpop.f32.mrb[196].mxu1  ;;  %11440 = vtanh.f32 %v3992_v51  ;;  %v3796_v49 = vadd.f32 %v14001_v26, %v3795_v32  ;;  %v9857_v15 = vpop.f32.mrb[198].mxu0 }
 0x3b6   : > { %v4013_v7 = vadd.f32 %v9904_v28, %v14001_v26  ;;  %v4004_v8 = vpop.f32.mrb[197].mxu1  ;;  %11442 = vtanh.f32 %v3804_v4  ;;  %v3807_v12 = vadd.f32 %v9857_v15, %v14001_v26  ;;  %v3798_v30 = vpop.f32.mrb[199].mxu0 }
 0x3b7   : > { %v4005_v3 = vadd.f32 %v14001_v26, %v4004_v8  ;;  %v9905_v20 = vpop.f32.mrb[198].mxu1  ;;  %v11427_v56 = vpop.eup %11426  ;;  %v3799_v17 = vadd.f32 %v14001_v26, %v3798_v30 }
 0x3b8   : > { %11444 = vtanh.f32 %v4013_v7  ;;  %v4016_v13 = vadd.f32 %v9905_v20, %v14001_v26  ;;  %v4007_v52 = vpop.f32.mrb[199].mxu1  ;;  %v14023_v15 = vadd.f32 %v11427_v56, %v12915_v5 }
 0x3b9   : > { %11446 = vtanh.f32 %v3796_v49  ;;  %v11429_v43 = vpop.eup %11428  ;;  %v4008_v21 = vadd.f32 %v14001_v26, %v4007_v52 }
 0x3ba   : > { %11448 = vtanh.f32 %v4005_v3  ;;  %v11431_v31 = vpop.eup %11430 }
 0x3bb   : > { %11450 = vtanh.f32 %v3807_v12  ;;  %v11433_v0 = vpop.eup %11432 }
 0x3bc   : > { %11452 = vtanh.f32 %v4016_v13  ;;  %v9860_v27 = vpop.f32.mrb[200].mxu0  ;;  %v11435_v40 = vpop.eup %11434 }
 0x3bd   : > { %11454 = vtanh.f32 %v3799_v17  ;;  %v3820_v25 = vadd.f32 %v9860_v27, %v14001_v26  ;;  %v9908_v51 = vpop.f32.mrb[200].mxu1  ;;  %v3811_v46 = vpop.f32.mrb[201].mxu0  ;;  %v14028_v52 = vadd.f32 %v11435_v40, %v12905_v59  ;;  %v14032_v27 = vadd.f32 %v11431_v31, %v12899_v54 }
 0x3be   : > { %v11437_v4 = vpop.eup %11436  ;;  %11456 = vtanh.f32 %v4008_v21  ;;  %v4029_v28 = vadd.f32 %v9908_v51, %v14001_v26  ;;  %v3812_v32 = vadd.f32 %v14001_v26, %v3811_v46  ;;  %v4020_v7 = vpop.f32.mrb[201].mxu1  ;;  %v14043_v40 = vadd.f32 %v11433_v0, %v12901_v55 }
 0x3bf   : > { %v9861_v49 = vpop.f32.mrb[202].mxu0  ;;  %v11439_v8 = vpop.eup %11438  ;;  %11458 = vtanh.f32 %v3820_v25  ;;  %v4021_v3 = vadd.f32 %v14001_v26, %v4020_v7  ;;  %v14035_v56 = vadd.f32 %v11437_v4, %v12911_v1  ;;  %v14049_v1 = vadd.f32 %v11429_v43, %v12917_v6 }
 0x3c0   : > { %v3823_v12 = vadd.f32 %v9861_v49, %v14001_v26  ;;  %v9909_v20 = vpop.f32.mrb[202].mxu1  ;;  %v3814_v30 = vpop.f32.mrb[203].mxu0  ;;  %11460 = vtanh.f32 %v4029_v28  ;;  %v14039_v51 = vadd.f32 %v11439_v8, %v12891_v45  ;;  %v4713_v28 = vpack.c.bf16 %v14028_v52, %v14023_v15 }
 0x3c1   : > { %v11441_v13 = vpop.eup %11440  ;;  %v4032_v17 = vadd.f32 %v9909_v20, %v14001_v26  ;;  %v4023_v21 = vpop.f32.mrb[203].mxu1  ;;  %11462 = vtanh.f32 %v3812_v32  ;;  %v3815_v25 = vadd.f32 %v14001_v26, %v3814_v30 }
 0x3c2   : > { %v11443_v5 = vpop.eup %11442  ;;  %11464 = vtanh.f32 %v4021_v3  ;;  %v4024_v59 = vadd.f32 %v14001_v26, %v4023_v21  ;;  %v14046_v54 = vadd.f32 %v11441_v13, %v12895_v50  ;;  %v4712_v4 = vpack.c.bf16 %v14039_v51, %v14032_v27 }
 0x3c3   : > { %v11445_v46 = vpop.eup %11444  ;;  %11466 = vtanh.f32 %v3823_v12  ;;  %v4976_v50 = vpack.c.bf16 %v14035_v56, %v14049_v1  ;;  %v14063_v13 = vadd.f32 %v11443_v5, %v12951_v38 }
 0x3c4   : > { %v11447_v31 = vpop.eup %11446  ;;  %11468 = vtanh.f32 %v4032_v17  ;;  %v4975_v55 = vpack.c.bf16 %v14046_v54, %v14043_v40  ;;  %v9864_v0 = vpop.f32.mrb[204].mxu0  ;;  %10042 = vmatprep.mubr.bf16.mxu0 %v4712_v4  ;;  %v12455_v4 = vld [vmem:[%s16310_s3 + $0xc0] sm:$0xff]  }
 0x3c5   : > { %v11449_v45 = vpop.eup %11448  ;;  %11470 = vtanh.f32 %v3815_v25  ;;  %v3836_v6 = vadd.f32 %v9864_v0, %v14001_v26  ;;  %v9912_v43 = vpop.f32.mrb[204].mxu1  ;;  %10043 = vmatmul.mubr.bf16.vlgmr.msra.gmra.mrb[0].mxu0 %v4713_v28  ;;  %v14075_v0 = vadd.f32 %v11447_v31, %v12931_v23 }
 0x3c6   : > { %v11451_v32 = vpop.eup %11450  ;;  %v3827_v7 = vpop.f32.mrb[205].mxu0  ;;  %11472 = vtanh.f32 %v4024_v59  ;;  %10090 = vmatprep.mubr.bf16.mxu1 %v4975_v55  ;;  %v4045_v8 = vadd.f32 %v9912_v43, %v14001_v26  ;;  %10123 = vmatpush3.bf16.msra.mxu0 %v12455_v4  ;;  %v14088_v31 = vadd.f32 %v11449_v45, %v12934_v24 }
 0x3c7   : > { %v11453_v49 = vpop.eup %11452  ;;  %v3828_v3 = vadd.f32 %v14001_v26, %v3827_v7  ;;  %v4036_v12 = vpop.f32.mrb[205].mxu1  ;;  %10091 = vmatmul.mubr.bf16.vlgmr.msra.gmra.mrb[0].mxu1 %v4976_v50  ;;  %11474 = vtanh.f32 %v3836_v6  ;;  %v14071_v55 = vadd.f32 %v11451_v32, %v12940_v29  ;;  %10124 = vmatprep.subr.bf16.mxu0 %v13885_v48 }
 0x3c8   : > { %v9865_v20 = vpop.f32.mrb[206].mxu0  ;;  %v11455_v30 = vpop.eup %11454  ;;  %v4037_v17 = vadd.f32 %v14001_v26, %v4036_v12  ;;  %11476 = vtanh.f32 %v4045_v8  ;;  %10171 = vmatpush3.bf16.msra.mxu1 %v12455_v4  ;;  %v14079_v6 = vadd.f32 %v11453_v49, %v12947_v36  ;;  %v14094_v49 = vadd.f32 %v11445_v46, %v12954_v39 }
 0x3c9   : > { %v3839_v21 = vadd.f32 %v9865_v20, %v14001_v26  ;;  %v9913_v25 = vpop.f32.mrb[206].mxu1  ;;  %v3830_v59 = vpop.f32.mrb[207].mxu0  ;;  %11478 = vtanh.f32 %v3828_v3  ;;  %v14083_v29 = vadd.f32 %v11455_v30, %v12921_v11  ;;  %10172 = vmatprep.subr.bf16.mxu1 %v13885_v48  ;;  %v4715_v3 = vpack.c.bf16 %v14071_v55, %v14063_v13 }
 0x3ca   : > { %v11457_v28 = vpop.eup %11456  ;;  %v4048_v38 = vadd.f32 %v9913_v25, %v14001_v26  ;;  %v4039_v5 = vpop.f32.mrb[207].mxu1  ;;  %v3831_v43 = vadd.f32 %v14001_v26, %v3830_v59  ;;  %11480 = vtanh.f32 %v4037_v17  ;;  %10125 = vmatpush3.bf16.msra.mxu0 %v13885_v48  ;;  %v4978_v46 = vpack.c.bf16 %v14079_v6, %v14094_v49 }
 0x3cb   : > { %v11459_v50 = vpop.eup %11458  ;;  %v4040_v23 = vadd.f32 %v14001_v26, %v4039_v5  ;;  %v14091_v7 = vadd.f32 %v11457_v28, %v12927_v19  ;;  %11482 = vtanh.f32 %v3839_v21  ;;  %v4714_v11 = vpack.c.bf16 %v14083_v29, %v14075_v0  ;;  %10126 = vmatprep.subr.bf16.mxu0 %v13895_v62 }
 0x3cc   : > { %v11461_v32 = vpop.eup %11460  ;;  %11484 = vtanh.f32 %v4048_v38  ;;  %v9868_v19 = vpop.f32.mrb[208].mxu0  ;;  %10173 = vmatpush3.bf16.msra.mxu1 %v13885_v48  ;;  %v14112_v4 = vadd.f32 %v11459_v50, %v12991_v14 }
 0x3cd   : > { %v11463_v36 = vpop.eup %11462  ;;  %v4977_v24 = vpack.c.bf16 %v14091_v7, %v14088_v31  ;;  %11486 = vtanh.f32 %v3831_v43  ;;  %10046 = vmatprep.mubr.bf16.mxu0 %v4714_v11  ;;  %v3852_v45 = vadd.f32 %v9868_v19, %v14001_v26  ;;  %v9916_v12 = vpop.f32.mrb[208].mxu1  ;;  %10174 = vmatprep.subr.bf16.mxu1 %v13895_v62 }
 0x3ce   : > { %v11465_v8 = vpop.eup %11464  ;;  %v3843_v20 = vpop.f32.mrb[209].mxu0  ;;  %11488 = vtanh.f32 %v4040_v23  ;;  %10047 = vmatmul.mubr.bf16.gmra.mrb[4].mxu0 %v4715_v3  ;;  %v4061_v48 = vadd.f32 %v9916_v12, %v14001_v26  ;;  %v14122_v14 = vadd.f32 %v11463_v36, %v12971_v57 }
 0x3cf   : > { %v11467_v39 = vpop.eup %11466  ;;  %10094 = vmatprep.mubr.bf16.mxu1 %v4977_v24  ;;  %v3844_v17 = vadd.f32 %v14001_v26, %v3843_v20  ;;  %v4052_v21 = vpop.f32.mrb[209].mxu1  ;;  %11490 = vtanh.f32 %v3852_v45  ;;  %10127 = vmatpush3.bf16.msra.mxu0 %v13895_v62  ;;  %v14142_v45 = vadd.f32 %v11461_v32, %v12994_v16 }
 0x3d0   : > { %v11469_v30 = vpop.eup %11468  ;;  %v9869_v25 = vpop.f32.mrb[210].mxu0  ;;  %10095 = vmatmul.mubr.bf16.gmra.mrb[4].mxu1 %v4978_v46  ;;  %v4053_v28 = vadd.f32 %v14001_v26, %v4052_v21  ;;  %v14118_v11 = vadd.f32 %v11467_v39, %v12980_v63  ;;  %11492 = vtanh.f32 %v4061_v48  ;;  %10128 = vmatprep.subr.bf16.mxu0 %v13912_v41 }
 0x3d1   : > { %v11471_v59 = vpop.eup %11470  ;;  %v3855_v38 = vadd.f32 %v9869_v25, %v14001_v26  ;;  %v9917_v5 = vpop.f32.mrb[210].mxu1  ;;  %10175 = vmatpush3.bf16.msra.mxu1 %v13895_v62  ;;  %v14127_v19 = vadd.f32 %v11469_v30, %v12987_v9  ;;  %11494 = vtanh.f32 %v3844_v17  ;;  %v14136_v62 = vadd.f32 %v11465_v8, %v12974_v58 }
 0x3d2   : > { %v3846_v43 = vpop.f32.mrb[211].mxu0  ;;  %v11473_v23 = vpop.eup %11472  ;;  %v4064_v3 = vadd.f32 %v9917_v5, %v14001_v26  ;;  %v14131_v63 = vadd.f32 %v11471_v59, %v12960_v44  ;;  %10176 = vmatprep.subr.bf16.mxu1 %v13912_v41  ;;  %11496 = vtanh.f32 %v4053_v28  ;;  %v4717_v20 = vpack.c.bf16 %v14118_v11, %v14112_v4 }
 0x3d3   : > { %v4055_v24 = vpop.f32.mrb[211].mxu1  ;;  %v11475_v50 = vpop.eup %11474  ;;  %v3847_v46 = vadd.f32 %v14001_v26, %v3846_v43  ;;  %v14139_v36 = vadd.f32 %v11473_v23, %v12967_v53  ;;  %11498 = vtanh.f32 %v3855_v38  ;;  %10129 = vmatpush3.bf16.msra.mxu0 %v13912_v41  ;;  %v4980_v32 = vpack.c.bf16 %v14127_v19, %v14142_v45 }
 0x3d4   : > { %v11477_v39 = vpop.eup %11476  ;;  %v4056_v57 = vadd.f32 %v14001_v26, %v4055_v24  ;;  %v4716_v44 = vpack.c.bf16 %v14131_v63, %v14122_v14  ;;  %11500 = vtanh.f32 %v4064_v3  ;;  %v9872_v53 = vpop.f32.mrb[212].mxu0  ;;  %10130 = vmatprep.subr.bf16.mxu0 %v13923_v18  ;;  %v14160_v38 = vadd.f32 %v11475_v50, %v13031_v60 }
 0x3d5   : > { %v11479_v9 = vpop.eup %11478  ;;  %v4979_v58 = vpack.c.bf16 %v14139_v36, %v14136_v62  ;;  %10177 = vmatpush3.bf16.msra.mxu1 %v13912_v41  ;;  %11502 = vtanh.f32 %v3847_v46  ;;  %v3868_v8 = vadd.f32 %v9872_v53, %v14001_v26  ;;  %v9920_v30 = vpop.f32.mrb[212].mxu1 }
 0x3d6   : > { %v11481_v12 = vpop.eup %11480  ;;  %10050 = vmatprep.mubr.bf16.mxu0 %v4716_v44  ;;  %v3859_v48 = vpop.f32.mrb[213].mxu0  ;;  %10178 = vmatprep.subr.bf16.mxu1 %v13923_v18  ;;  %11504 = vtanh.f32 %v4056_v57  ;;  %v4077_v41 = vadd.f32 %v9920_v30, %v14001_v26  ;;  %v14170_v60 = vadd.f32 %v11479_v9, %v13011_v35 }
 0x3d7   : > { %v11483_v16 = vpop.eup %11482  ;;  %10098 = vmatprep.mubr.bf16.mxu1 %v4979_v58  ;;  %10051 = vmatmul.mubr.bf16.gmra.mrb[8].mxu0 %v4717_v20  ;;  %v3860_v21 = vadd.f32 %v14001_v26, %v3859_v48  ;;  %v4068_v25 = vpop.f32.mrb[213].mxu1  ;;  %11506 = vtanh.f32 %v3868_v8 }
 0x3d8   : > { %v11485_v17 = vpop.eup %11484  ;;  %v9873_v59 = vpop.f32.mrb[214].mxu0  ;;  %10099 = vmatmul.mubr.bf16.gmra.mrb[8].mxu1 %v4980_v32  ;;  %v4069_v5 = vadd.f32 %v14001_v26, %v4068_v25  ;;  %10131 = vmatpush3.bf16.msra.mxu0 %v13923_v18  ;;  %v14166_v46 = vadd.f32 %v11483_v16, %v13020_v42  ;;  %11508 = vtanh.f32 %v4077_v41  ;;  %16606 = vst [vmem:[#allocation99_spill] sm:$0xff] %v14170_v60 }
 0x3d9   : > { %v11487_v28 = vpop.eup %11486  ;;  %v3871_v43 = vadd.f32 %v9873_v59, %v14001_v26  ;;  %v9921_v23 = vpop.f32.mrb[214].mxu1  ;;  %10179 = vmatpush3.bf16.msra.mxu1 %v13923_v18  ;;  %10132 = vmatprep.subr.bf16.mxu0 %v13944_v34  ;;  %v14175_v20 = vadd.f32 %v11485_v17, %v13027_v10  ;;  %11510 = vtanh.f32 %v3860_v21  ;;  %v14186_v18 = vadd.f32 %v11481_v12, %v13014_v2 }
 0x3da   : > { %v3862_v3 = vpop.f32.mrb[215].mxu0  ;;  %v11489_v24 = vpop.eup %11488  ;;  %v4080_v57 = vadd.f32 %v9921_v23, %v14001_v26  ;;  %v14179_v42 = vadd.f32 %v11487_v28, %v13000_v22  ;;  %10180 = vmatprep.subr.bf16.mxu1 %v13944_v34  ;;  %11512 = vtanh.f32 %v4069_v5  ;;  %v14192_v16 = vadd.f32 %v11477_v39, %v13034_v61  ;;  %v16609_v28 = vld [vmem:[#allocation9_spill] sm:$0xff] }
 0x3db   : > { %v4071_v44 = vpop.f32.mrb[215].mxu1  ;;  %v11491_v50 = vpop.eup %11490  ;;  %v3863_v58 = vadd.f32 %v14001_v26, %v3862_v3  ;;  %16607 = vst [vmem:[#allocation100_spill] sm:$0xff] %v14186_v18  ;;  %v14189_v9 = vadd.f32 %v11489_v24, %v13007_v33  ;;  %11514 = vtanh.f32 %v3871_v43  ;;  %v4719_v8 = vpack.c.bf16 %v14166_v46, %v14160_v38 }
 0x3dc   : > { %v14182_v53 = vpop.eup %11492  ;;  %v4072_v35 = vadd.f32 %v14001_v26, %v4071_v44  ;;  %v4718_v22 = vpack.c.bf16 %v14179_v42, %v14170_v60  ;;  %10133 = vmatpush3.bf16.msra.mxu0 %v13944_v34  ;;  %11516 = vtanh.f32 %v4080_v57  ;;  %v9876_v33 = vpop.f32.mrb[216].mxu0  ;;  %v4982_v39 = vpack.c.bf16 %v14175_v20, %v14192_v16  ;;  %v16611_v44 = vld [vmem:[#allocation7_spill] sm:$0xff]  ;;  %v16751_v60 = vld [vmem:[#allocation74_spill] sm:$0xff] }
 0x3dd   : > { %16608 = vst [vmem:[#allocation101_spill] sm:$0xff] %v14189_v9  ;;  %v11495_v10 = vpop.eup %11494  ;;  %v4981_v2 = vpack.c.bf16 %v14189_v9, %v14186_v18  ;;  %10181 = vmatpush3.bf16.msra.mxu1 %v13944_v34  ;;  %10134 = vmatprep.subr.bf16.mxu0 %v13976_v47  ;;  %11518 = vtanh.f32 %v3863_v58  ;;  %v3884_v12 = vadd.f32 %v9876_v33, %v14001_v26  ;;  %v9924_v30 = vpop.f32.mrb[216].mxu1 }
 0x3de   : > { %v11497_v32 = vpop.eup %11496  ;;  %10054 = vmatprep.mubr.bf16.mxu0 %v4718_v22  ;;  %v3875_v48 = vpop.f32.mrb[217].mxu0  ;;  %10182 = vmatprep.subr.bf16.mxu1 %v13976_v47  ;;  %11520 = vtanh.f32 %v4072_v35  ;;  %v4093_v34 = vadd.f32 %v9924_v30, %v14001_v26  ;;  %v14210_v5 = vadd.f32 %v11491_v50, %v16609_v28  ;;  %v16613_v50 = vld [vmem:[#allocation5_spill] sm:$0xff]  ;;  %v16617_v30 = vld [vmem:[#allocation3_spill] sm:$0xff] }
 0x3df   : > { %v11499_v61 = vpop.eup %11498  ;;  %10102 = vmatprep.mubr.bf16.mxu1 %v4981_v2  ;;  %10055 = vmatmul.mubr.bf16.gmra.mrb[12].mxu0 %v4719_v8  ;;  %v3876_v41 = vadd.f32 %v14001_v26, %v3875_v48  ;;  %v4084_v21 = vpop.f32.mrb[217].mxu1  ;;  %11522 = vtanh.f32 %v3884_v12  ;;  %v14220_v8 = vadd.f32 %v11495_v10, %v16613_v50  ;;  %v14227_v2 = vld [vmem:[%s16310_s3 + $0x100] sm:$0xff]  }
 0x3e0   : > { %v11501_v17 = vpop.eup %11500  ;;  %v9877_v25 = vpop.f32.mrb[218].mxu0  ;;  %16610 = vst [vmem:[#allocation9_spill] sm:$0xff] %v14210_v5  ;;  %10103 = vmatmul.mubr.bf16.gmra.mrb[12].mxu1 %v4982_v39  ;;  %v4085_v43 = vadd.f32 %v14001_v26, %v4084_v21  ;;  %10135 = vmatpush3.bf16.msra.mxu0 %v13976_v47  ;;  %v14216_v58 = vadd.f32 %v11499_v61, %v16611_v44  ;;  %11524 = vtanh.f32 %v4093_v34  ;;  %v16615_v39 = vld [vmem:[#allocation8_spill] sm:$0xff]  ;;  %v16619_v34 = vld [vmem:[#allocation6_spill] sm:$0xff] }
 0x3e1   : > { %v11503_v59 = vpop.eup %11502  ;;  %v3887_v23 = vadd.f32 %v9877_v25, %v14001_v26  ;;  %v9925_v3 = vpop.f32.mrb[218].mxu1  ;;  %16614 = vst [vmem:[#allocation5_spill] sm:$0xff] %v14220_v8  ;;  %10183 = vmatpush3.bf16.msra.mxu1 %v13976_v47  ;;  %10136 = vmatprep.subr.bf16.mxu0 %v13990_v37  ;;  %v14230_v61 = vadd.f32 %v11501_v17, %v16615_v39  ;;  %11526 = vtanh.f32 %v3876_v41  ;;  %v16621_v25 = vld [vmem:[#allocation4_spill] sm:$0xff] }
 0x3e2   : > { %v3878_v24 = vpop.f32.mrb[219].mxu0  ;;  %v11505_v57 = vpop.eup %11504  ;;  %16612 = vst [vmem:[#allocation7_spill] sm:$0xff] %v14216_v58  ;;  %v4096_v35 = vadd.f32 %v9925_v3, %v14001_v26  ;;  %v14234_v48 = vadd.f32 %v11503_v59, %v16617_v30  ;;  %10184 = vmatprep.subr.bf16.mxu1 %v13990_v37  ;;  %11528 = vtanh.f32 %v4085_v43  ;;  %v14239_v21 = vadd.f32 %v11497_v32, %v16619_v34  ;;  %v16623_v3 = vld [vmem:[#allocation10_spill] sm:$0xff] }
 0x3e3   : > { %v4087_v22 = vpop.f32.mrb[219].mxu1  ;;  %v11507_v33 = vpop.eup %11506  ;;  %16616 = vst [vmem:[#allocation8_spill] sm:$0xff] %v14230_v61  ;;  %v3879_v12 = vadd.f32 %v14001_v26, %v3878_v24  ;;  %v14242_v28 = vadd.f32 %v11505_v57, %v16621_v25  ;;  %v14246_v41 = vadd.f32 %v14182_v53, %v16623_v3  ;;  %11530 = vtanh.f32 %v3887_v23  ;;  %v16625_v3 = vld [vmem:[#allocation17_spill] sm:$0xff] }
 0x3e4   : > { %16618 = vst [vmem:[#allocation3_spill] sm:$0xff] %v14234_v48  ;;  %v11509_v47 = vpop.eup %11508  ;;  %v4088_v10 = vadd.f32 %v14001_v26, %v4087_v22  ;;  %16620 = vst [vmem:[#allocation6_spill] sm:$0xff] %v14239_v21  ;;  %v4720_v59 = vpack.c.bf16 %v14234_v48, %v14220_v8  ;;  %10137 = vmatpush3.bf16.msra.mxu0 %v13990_v37  ;;  %v4721_v24 = vpack.c.bf16 %v14216_v58, %v14210_v5  ;;  %v9880_v57 = vpop.f32.mrb[220].mxu0  ;;  %v16629_v8 = vld [vmem:[#allocation13_spill] sm:$0xff]  ;;  %v16717_v5 = vld [vmem:[#allocation52_spill] sm:$0xff] }
 0x3e5   : > { %16622 = vst [vmem:[#allocation4_spill] sm:$0xff] %v14242_v28  ;;  %v11511_v17 = vpop.eup %11510  ;;  %16624 = vst [vmem:[#allocation10_spill] sm:$0xff] %v14246_v41  ;;  %11532 = vtanh.f32 %v4096_v35  ;;  %v4983_v32 = vpack.c.bf16 %v14242_v28, %v14239_v21  ;;  %10185 = vmatpush3.bf16.msra.mxu1 %v13990_v37  ;;  %10218 = vmatprep.subr.bf16.mxu0 %v14227_v2  ;;  %v4984_v23 = vpack.c.bf16 %v14230_v61, %v14246_v41  ;;  %v9928_v22 = vpop.f32.mrb[220].mxu1  ;;  %v16639_v61 = vld [vmem:[#allocation18_spill] sm:$0xff] }
 0x3e6   : > { %v11513_v43 = vpop.eup %11512  ;;  %11534 = vtanh.f32 %v3879_v12  ;;  %10058 = vmatprep.mubr.bf16.mxu0 %v4720_v59  ;;  %v3900_v44 = vadd.f32 %v9880_v57, %v14001_v26  ;;  %v3891_v50 = vpop.f32.mrb[221].mxu0  ;;  %10266 = vmatprep.subr.bf16.mxu1 %v14227_v2  ;;  %v4109_v37 = vadd.f32 %v9928_v22, %v14001_v26  ;;  %v14264_v12 = vadd.f32 %v11507_v33, %v16625_v3 }
 0x3e7   : > { %v11515_v53 = vpop.eup %11514  ;;  %11536 = vtanh.f32 %v4088_v10  ;;  %10106 = vmatprep.mubr.bf16.mxu1 %v4983_v32  ;;  %10059 = vmatmul.mubr.bf16.gmra.mrb[16].mxu0 %v4721_v24  ;;  %v3892_v39 = vadd.f32 %v14001_v26, %v3891_v50  ;;  %v4100_v30 = vpop.f32.mrb[221].mxu1  ;;  %v16627_v24 = vld [vmem:[#allocation15_spill] sm:$0xff]  ;;  %v14273_v48 = vadd.f32 %v11511_v17, %v16629_v8 }
 0x3e8   : > { %v11517_v35 = vpop.eup %11516  ;;  %v9881_v34 = vpop.f32.mrb[222].mxu0  ;;  %16626 = vst [vmem:[#allocation17_spill] sm:$0xff] %v14264_v12  ;;  %10107 = vmatmul.mubr.bf16.gmra.mrb[16].mxu1 %v4984_v23  ;;  %11538 = vtanh.f32 %v3900_v44  ;;  %v4101_v59 = vadd.f32 %v14001_v26, %v4100_v30  ;;  %v14269_v28 = vadd.f32 %v11515_v53, %v16627_v24  ;;  %v16631_v23 = vld [vmem:[#allocation16_spill] sm:$0xff] }
 0x3e9   : > { %v11519_v25 = vpop.eup %11518  ;;  %v3903_v57 = vadd.f32 %v9881_v34, %v14001_v26  ;;  %v9929_v21 = vpop.f32.mrb[222].mxu1  ;;  %11540 = vtanh.f32 %v4109_v37  ;;  %16630 = vst [vmem:[#allocation13_spill] sm:$0xff] %v14273_v48  ;;  %v14276_v44 = vadd.f32 %v11517_v35, %v16631_v23  ;;  %v16633_v34 = vld [vmem:[#allocation11_spill] sm:$0xff]  ;;  %v16635_v37 = vld [vmem:[#allocation14_spill] sm:$0xff]  ;;  %v16637_v24 = vld [vmem:[#allocation12_spill] sm:$0xff]  ;;  %v14290_v35 = vadd.f32 %v11509_v47, %v16639_v61 }
 0x3ea   : > { %v3894_v10 = vpop.f32.mrb[223].mxu0  ;;  %v11521_v32 = vpop.eup %11520  ;;  %16628 = vst [vmem:[#allocation15_spill] sm:$0xff] %v14269_v28  ;;  %v4112_v22 = vadd.f32 %v9929_v21, %v14001_v26  ;;  %11542 = vtanh.f32 %v3892_v39  ;;  %v14280_v3 = vadd.f32 %v11519_v25, %v16633_v34  ;;  %v14284_v21 = vadd.f32 %v11513_v43, %v16635_v37 }
 0x3eb   : > { %v4103_v50 = vpop.f32.mrb[223].mxu1  ;;  %v11523_v33 = vpop.eup %11522  ;;  %16632 = vst [vmem:[#allocation16_spill] sm:$0xff] %v14276_v44  ;;  %v3895_v30 = vadd.f32 %v14001_v26, %v3894_v10  ;;  %11544 = vtanh.f32 %v4101_v59  ;;  %v14287_v8 = vadd.f32 %v11521_v32, %v16637_v24  ;;  %16640 = vst [vmem:[#allocation18_spill] sm:$0xff] %v14290_v35  ;;  %v4723_v59 = vpack.c.bf16 %v14269_v28, %v14264_v12  ;;  %v16655_v28 = vld [vmem:[#allocation26_spill] sm:$0xff] }
 0x3ec   : > { %16634 = vst [vmem:[#allocation11_spill] sm:$0xff] %v14280_v3  ;;  %v11525_v41 = vpop.eup %11524  ;;  %v4104_v53 = vadd.f32 %v14001_v26, %v4103_v50  ;;  %16636 = vst [vmem:[#allocation14_spill] sm:$0xff] %v14284_v21  ;;  %11546 = vtanh.f32 %v3903_v57  ;;  %v4722_v39 = vpack.c.bf16 %v14280_v3, %v14273_v48  ;;  %v9948_v10 = vpop.f32.mrb[224].mxu0  ;;  %v4986_v32 = vpack.c.bf16 %v14276_v44, %v14290_v35  ;;  %v16645_v35 = vld [vmem:[#allocation21_spill] sm:$0xff] }
 0x3ed   : > { %16638 = vst [vmem:[#allocation12_spill] sm:$0xff] %v14287_v8  ;;  %v11527_v17 = vpop.eup %11526  ;;  %11548 = vtanh.f32 %v4112_v22  ;;  %v4985_v43 = vpack.c.bf16 %v14287_v8, %v14284_v21  ;;  %v4206_v61 = vadd.f32 %v9948_v10, %v14001_v26  ;;  %v9996_v47 = vpop.f32.mrb[224].mxu1  ;;  %v16641_v8 = vld [vmem:[#allocation25_spill] sm:$0xff] }
 0x3ee   : > { %v11529_v25 = vpop.eup %11528  ;;  %11550 = vtanh.f32 %v3895_v30  ;;  %10062 = vmatprep.mubr.bf16.mxu0 %v4722_v39  ;;  %v4197_v57 = vpop.f32.mrb[225].mxu0  ;;  %v4415_v22 = vadd.f32 %v9996_v47, %v14001_v26  ;;  %v14304_v48 = vadd.f32 %v11523_v33, %v16641_v8  ;;  %v14313_v44 = vadd.f32 %v11527_v17, %v16645_v35  ;;  %v16647_v8 = vld [vmem:[#allocation24_spill] sm:$0xff] }
 0x3ef   : > { %v11531_v50 = vpop.eup %11530  ;;  %11552 = vtanh.f32 %v4104_v53  ;;  %10110 = vmatprep.mubr.bf16.mxu1 %v4985_v43  ;;  %10063 = vmatmul.mubr.bf16.gmra.mrb[20].mxu0 %v4723_v59  ;;  %v4198_v34 = vadd.f32 %v14001_v26, %v4197_v57  ;;  %v4406_v37 = vpop.f32.mrb[225].mxu1  ;;  %v16643_v59 = vld [vmem:[#allocation23_spill] sm:$0xff] }
 0x3f0   : > { %v11533_v23 = vpop.eup %11532  ;;  %v9949_v24 = vpop.f32.mrb[226].mxu0  ;;  %16642 = vst [vmem:[#allocation25_spill] sm:$0xff] %v14304_v48  ;;  %10111 = vmatmul.mubr.bf16.gmra.mrb[20].mxu1 %v4986_v32  ;;  %11554 = vtanh.f32 %v4206_v61  ;;  %v4407_v30 = vadd.f32 %v14001_v26, %v4406_v37  ;;  %v14309_v3 = vadd.f32 %v11531_v50, %v16643_v59  ;;  %16646 = vst [vmem:[#allocation21_spill] sm:$0xff] %v14313_v44  ;;  %v16649_v37 = vld [vmem:[#allocation19_spill] sm:$0xff]  ;;  %v16653_v59 = vld [vmem:[#allocation20_spill] sm:$0xff] }
 0x3f1   : > { %v11535_v21 = vpop.eup %11534  ;;  %v4209_v39 = vadd.f32 %v9949_v24, %v14001_v26  ;;  %v9997_v10 = vpop.f32.mrb[226].mxu1  ;;  %11556 = vtanh.f32 %v4415_v22  ;;  %v14316_v32 = vadd.f32 %v11533_v23, %v16647_v8  ;;  %v16651_v22 = vld [vmem:[#allocation22_spill] sm:$0xff]  ;;  %v14330_v23 = vadd.f32 %v11525_v41, %v16655_v28 }
 0x3f2   : > { %v4200_v53 = vpop.f32.mrb[227].mxu0  ;;  %v11537_v43 = vpop.eup %11536  ;;  %16644 = vst [vmem:[#allocation23_spill] sm:$0xff] %v14309_v3  ;;  %v4418_v47 = vadd.f32 %v9997_v10, %v14001_v26  ;;  %11558 = vtanh.f32 %v4198_v34  ;;  %v14320_v24 = vadd.f32 %v11535_v21, %v16649_v37  ;;  %v14324_v10 = vadd.f32 %v11529_v25, %v16651_v22 }
 0x3f3   : > { %v4409_v57 = vpop.f32.mrb[227].mxu1  ;;  %v11539_v33 = vpop.eup %11538  ;;  %16648 = vst [vmem:[#allocation24_spill] sm:$0xff] %v14316_v32  ;;  %v4201_v61 = vadd.f32 %v14001_v26, %v4200_v53  ;;  %11560 = vtanh.f32 %v4407_v30  ;;  %v14327_v17 = vadd.f32 %v11537_v43, %v16653_v59  ;;  %16656 = vst [vmem:[#allocation26_spill] sm:$0xff] %v14330_v23  ;;  %v4725_v30 = vpack.c.bf16 %v14309_v3, %v14304_v48  ;;  %v16671_v3 = vld [vmem:[#allocation34_spill] sm:$0xff] }
 0x3f4   : > { %16650 = vst [vmem:[#allocation19_spill] sm:$0xff] %v14320_v24  ;;  %v11541_v12 = vpop.eup %11540  ;;  %v4410_v50 = vadd.f32 %v14001_v26, %v4409_v57  ;;  %16652 = vst [vmem:[#allocation22_spill] sm:$0xff] %v14324_v10  ;;  %11562 = vtanh.f32 %v4209_v39  ;;  %v4724_v34 = vpack.c.bf16 %v14320_v24, %v14313_v44  ;;  %v9952_v53 = vpop.f32.mrb[228].mxu0  ;;  %v4988_v43 = vpack.c.bf16 %v14316_v32, %v14330_v23  ;;  %v16661_v23 = vld [vmem:[#allocation29_spill] sm:$0xff] }
 0x3f5   : > { %16654 = vst [vmem:[#allocation20_spill] sm:$0xff] %v14327_v17  ;;  %v11543_v35 = vpop.eup %11542  ;;  %11564 = vtanh.f32 %v4418_v47  ;;  %v4987_v25 = vpack.c.bf16 %v14327_v17, %v14324_v10  ;;  %v4222_v28 = vadd.f32 %v9952_v53, %v14001_v26  ;;  %v10000_v41 = vpop.f32.mrb[228].mxu1  ;;  %v16657_v17 = vld [vmem:[#allocation33_spill] sm:$0xff] }
 0x3f6   : > { %v11545_v21 = vpop.eup %11544  ;;  %11566 = vtanh.f32 %v4201_v61  ;;  %10066 = vmatprep.mubr.bf16.mxu0 %v4724_v34  ;;  %v4213_v39 = vpop.f32.mrb[229].mxu0  ;;  %v4431_v47 = vadd.f32 %v10000_v41, %v14001_v26  ;;  %v14344_v44 = vadd.f32 %v11539_v33, %v16657_v17  ;;  %v14353_v32 = vadd.f32 %v11543_v35, %v16661_v23  ;;  %v16663_v17 = vld [vmem:[#allocation32_spill] sm:$0xff] }
 0x3f7   : > { %v11547_v57 = vpop.eup %11546  ;;  %11568 = vtanh.f32 %v4410_v50  ;;  %10114 = vmatprep.mubr.bf16.mxu1 %v4987_v25  ;;  %10067 = vmatmul.mubr.bf16.gmra.mrb[24].mxu0 %v4725_v30  ;;  %v4214_v37 = vadd.f32 %v14001_v26, %v4213_v39  ;;  %v4422_v22 = vpop.f32.mrb[229].mxu1  ;;  %v16659_v30 = vld [vmem:[#allocation31_spill] sm:$0xff] }
 0x3f8   : > { %v11549_v8 = vpop.eup %11548  ;;  %v9953_v59 = vpop.f32.mrb[230].mxu0  ;;  %16658 = vst [vmem:[#allocation33_spill] sm:$0xff] %v14344_v44  ;;  %10115 = vmatmul.mubr.bf16.gmra.mrb[24].mxu1 %v4988_v43  ;;  %11570 = vtanh.f32 %v4222_v28  ;;  %v4423_v61 = vadd.f32 %v14001_v26, %v4422_v22  ;;  %v14349_v24 = vadd.f32 %v11547_v57, %v16659_v30  ;;  %16662 = vst [vmem:[#allocation29_spill] sm:$0xff] %v14353_v32  ;;  %v16665_v22 = vld [vmem:[#allocation27_spill] sm:$0xff]  ;;  %v16669_v30 = vld [vmem:[#allocation28_spill] sm:$0xff] }
 0x3f9   : > { %v11551_v10 = vpop.eup %11550  ;;  %v4225_v34 = vadd.f32 %v9953_v59, %v14001_v26  ;;  %v10001_v53 = vpop.f32.mrb[230].mxu1  ;;  %11572 = vtanh.f32 %v4431_v47  ;;  %v14356_v43 = vadd.f32 %v11549_v8, %v16663_v17  ;;  %v16667_v47 = vld [vmem:[#allocation30_spill] sm:$0xff]  ;;  %v14370_v8 = vadd.f32 %v11541_v12, %v16671_v3 }
 0x3fa   : > { %v4216_v50 = vpop.f32.mrb[231].mxu0  ;;  %v11553_v25 = vpop.eup %11552  ;;  %16660 = vst [vmem:[#allocation31_spill] sm:$0xff] %v14349_v24  ;;  %v4434_v41 = vadd.f32 %v10001_v53, %v14001_v26  ;;  %11574 = vtanh.f32 %v4214_v37  ;;  %v14360_v59 = vadd.f32 %v11551_v10, %v16665_v22  ;;  %v14364_v53 = vadd.f32 %v11545_v21, %v16667_v47 }
 0x3fb   : > { %v4425_v39 = vpop.f32.mrb[231].mxu1  ;;  %v11555_v33 = vpop.eup %11554  ;;  %16664 = vst [vmem:[#allocation32_spill] sm:$0xff] %v14356_v43  ;;  %v4217_v28 = vadd.f32 %v14001_v26, %v4216_v50  ;;  %11576 = vtanh.f32 %v4423_v61  ;;  %v14367_v35 = vadd.f32 %v11553_v25, %v16669_v30  ;;  %16672 = vst [vmem:[#allocation34_spill] sm:$0xff] %v14370_v8  ;;  %v4727_v61 = vpack.c.bf16 %v14349_v24, %v14344_v44  ;;  %v16687_v24 = vld [vmem:[#allocation42_spill] sm:$0xff] }
 0x3fc   : > { %16666 = vst [vmem:[#allocation27_spill] sm:$0xff] %v14360_v59  ;;  %v11557_v48 = vpop.eup %11556  ;;  %v4426_v57 = vadd.f32 %v14001_v26, %v4425_v39  ;;  %16668 = vst [vmem:[#allocation30_spill] sm:$0xff] %v14364_v53  ;;  %11578 = vtanh.f32 %v4225_v34  ;;  %v4726_v37 = vpack.c.bf16 %v14360_v59, %v14353_v32  ;;  %v9956_v50 = vpop.f32.mrb[232].mxu0  ;;  %v4990_v25 = vpack.c.bf16 %v14356_v43, %v14370_v8  ;;  %v16677_v8 = vld [vmem:[#allocation37_spill] sm:$0xff] }
 0x3fd   : > { %16670 = vst [vmem:[#allocation28_spill] sm:$0xff] %v14367_v35  ;;  %v11559_v23 = vpop.eup %11558  ;;  %11580 = vtanh.f32 %v4434_v41  ;;  %v4989_v21 = vpack.c.bf16 %v14367_v35, %v14364_v53  ;;  %v4238_v12 = vadd.f32 %v9956_v50, %v14001_v26  ;;  %v10004_v3 = vpop.f32.mrb[232].mxu1  ;;  %v16673_v35 = vld [vmem:[#allocation41_spill] sm:$0xff] }
 0x3fe   : > { %v11561_v10 = vpop.eup %11560  ;;  %11582 = vtanh.f32 %v4217_v28  ;;  %10070 = vmatprep.mubr.bf16.mxu0 %v4726_v37  ;;  %v4229_v34 = vpop.f32.mrb[233].mxu0  ;;  %v4447_v41 = vadd.f32 %v10004_v3, %v14001_v26  ;;  %v14384_v32 = vadd.f32 %v11555_v33, %v16673_v35  ;;  %v14393_v43 = vadd.f32 %v11559_v23, %v16677_v8  ;;  %v16679_v35 = vld [vmem:[#allocation40_spill] sm:$0xff] }
 0x3ff   : > { %v11563_v39 = vpop.eup %11562  ;;  %11584 = vtanh.f32 %v4426_v57  ;;  %10118 = vmatprep.mubr.bf16.mxu1 %v4989_v21  ;;  %10071 = vmatmul.mubr.bf16.gmra.mrb[28].mxu0 %v4727_v61  ;;  %v4230_v22 = vadd.f32 %v14001_v26, %v4229_v34  ;;  %v4438_v47 = vpop.f32.mrb[233].mxu1  ;;  %v16675_v61 = vld [vmem:[#allocation39_spill] sm:$0xff] }
 0x400   : > { %v11565_v17 = vpop.eup %11564  ;;  %v9957_v30 = vpop.f32.mrb[234].mxu0  ;;  %16674 = vst [vmem:[#allocation41_spill] sm:$0xff] %v14384_v32  ;;  %10119 = vmatmul.mubr.bf16.gmra.mrb[28].mxu1 %v4990_v25  ;;  %11586 = vtanh.f32 %v4238_v12  ;;  %v4439_v28 = vadd.f32 %v14001_v26, %v4438_v47  ;;  %v14389_v59 = vadd.f32 %v11563_v39, %v16675_v61  ;;  %16678 = vst [vmem:[#allocation37_spill] sm:$0xff] %v14393_v43  ;;  %v16681_v47 = vld [vmem:[#allocation35_spill] sm:$0xff]  ;;  %v16685_v61 = vld [vmem:[#allocation36_spill] sm:$0xff] }
 0x401   : > { %v11567_v53 = vpop.eup %11566  ;;  %v4241_v37 = vadd.f32 %v9957_v30, %v14001_v26  ;;  %v10005_v50 = vpop.f32.mrb[234].mxu1  ;;  %11588 = vtanh.f32 %v4447_v41  ;;  %v14396_v25 = vadd.f32 %v11565_v17, %v16679_v35  ;;  %v16683_v41 = vld [vmem:[#allocation38_spill] sm:$0xff]  ;;  %v14410_v17 = vadd.f32 %v11557_v48, %v16687_v24 }
 0x402   : > { %v4232_v57 = vpop.f32.mrb[235].mxu0  ;;  %v11569_v21 = vpop.eup %11568  ;;  %16676 = vst [vmem:[#allocation39_spill] sm:$0xff] %v14389_v59  ;;  %v4450_v3 = vadd.f32 %v10005_v50, %v14001_v26  ;;  %11590 = vtanh.f32 %v4230_v22  ;;  %v14400_v30 = vadd.f32 %v11567_v53, %v16681_v47  ;;  %v14404_v50 = vadd.f32 %v11561_v10, %v16683_v41 }
 0x403   : > { %v4441_v34 = vpop.f32.mrb[235].mxu1  ;;  %v11571_v33 = vpop.eup %11570  ;;  %16680 = vst [vmem:[#allocation40_spill] sm:$0xff] %v14396_v25  ;;  %v4233_v12 = vadd.f32 %v14001_v26, %v4232_v57  ;;  %11592 = vtanh.f32 %v4439_v28  ;;  %v14407_v23 = vadd.f32 %v11569_v21, %v16685_v61  ;;  %16688 = vst [vmem:[#allocation42_spill] sm:$0xff] %v14410_v17  ;;  %v5185_v28 = vpack.c.bf16 %v14389_v59, %v14384_v32  ;;  %v14421_v57 = vld [vmem:[%s16310_s3 + $0x108] sm:$0xff]  }
 0x404   : > { %16682 = vst [vmem:[#allocation35_spill] sm:$0xff] %v14400_v30  ;;  %v11573_v44 = vpop.eup %11572  ;;  %v4442_v39 = vadd.f32 %v14001_v26, %v4441_v34  ;;  %16684 = vst [vmem:[#allocation38_spill] sm:$0xff] %v14404_v50  ;;  %11594 = vtanh.f32 %v4241_v37  ;;  %v5184_v22 = vpack.c.bf16 %v14400_v30, %v14393_v43  ;;  %v9960_v10 = vpop.f32.mrb[236].mxu0  ;;  %v5394_v24 = vpack.c.bf16 %v14396_v25, %v14410_v17  ;;  %v14428_v37 = vld [vmem:[%s16311_s4 + $0x2] ss:$0 sm:$0xff]  ;;  %v16701_v32 = vld [vmem:[#allocation44_spill] sm:$0xff] }
 0x405   : > { %16686 = vst [vmem:[#allocation36_spill] sm:$0xff] %v14407_v23  ;;  %v11575_v8 = vpop.eup %11574  ;;  %11596 = vtanh.f32 %v4450_v3  ;;  %v5393_v26 = vpack.c.bf16 %v14407_v23, %v14404_v50  ;;  %v4254_v21 = vadd.f32 %v14428_v37, %v9960_v10  ;;  %v10008_v3 = vpop.f32.mrb[236].mxu1  ;;  %v16689_v50 = vld [vmem:[#allocation49_spill] sm:$0xff] }
 0x406   : > { %v11577_v53 = vpop.eup %11576  ;;  %11598 = vtanh.f32 %v4233_v12  ;;  %10138 = vmatprep.mubr.bf16.mxu0 %v5184_v22  ;;  %v4245_v34 = vpop.f32.mrb[237].mxu0  ;;  %v4463_v47 = vadd.f32 %v14428_v37, %v10008_v3  ;;  %v14434_v23 = vadd.f32 %v11571_v33, %v16689_v50  ;;  %v16693_v33 = vld [vmem:[#allocation45_spill] sm:$0xff] }
 0x407   : > { %v11579_v48 = vpop.eup %11578  ;;  %11600 = vtanh.f32 %v4442_v39  ;;  %10186 = vmatprep.mubr.bf16.mxu1 %v5393_v26  ;;  %10139 = vmatmul.mubr.bf16.vlgmr.msra.gmra.mrb[32].mxu0 %v5185_v28  ;;  %v4246_v41 = vadd.f32 %v14428_v37, %v4245_v34  ;;  %v4454_v61 = vpop.f32.mrb[237].mxu1  ;;  %v16691_v26 = vld [vmem:[#allocation47_spill] sm:$0xff]  ;;  %v14444_v50 = vadd.f32 %v11575_v8, %v16693_v33  ;;  %v16699_v33 = vld [vmem:[#allocation46_spill] sm:$0xff] }
 0x408   : > { %v11581_v35 = vpop.eup %11580  ;;  %v9961_v12 = vpop.f32.mrb[238].mxu0  ;;  %16690 = vst [vmem:[#allocation49_spill] sm:$0xff] %v14434_v23  ;;  %10187 = vmatmul.mubr.bf16.vlgmr.msra.gmra.mrb[32].mxu1 %v5394_v24  ;;  %11602 = vtanh.f32 %v4254_v21  ;;  %v4455_v10 = vadd.f32 %v14428_v37, %v4454_v61  ;;  %10219 = vmatpush3.bf16.msra.mxu0 %v14227_v2  ;;  %v14440_v3 = vadd.f32 %v11579_v48, %v16691_v26  ;;  %v14451_v24 = vld [vmem:[%s16310_s3 + $0x110] sm:$0xff]  }
 0x409   : > { %v11583_v22 = vpop.eup %11582  ;;  %v4257_v43 = vadd.f32 %v14428_v37, %v9961_v12  ;;  %v10009_v30 = vpop.f32.mrb[238].mxu1  ;;  %11604 = vtanh.f32 %v4463_v47  ;;  %16694 = vst [vmem:[#allocation45_spill] sm:$0xff] %v14444_v50  ;;  %10267 = vmatpush3.bf16.msra.mxu1 %v14227_v2  ;;  %10220 = vmatprep.subr.bf16.mxu0 %v14421_v57  ;;  %v16695_v61 = vld [vmem:[#allocation48_spill] sm:$0xff]  ;;  %v16697_v47 = vld [vmem:[#allocation43_spill] sm:$0xff]  ;;  %v14465_v25 = vadd.f32 %v11577_v53, %v16699_v33 }
 0x40a   : > { %v4248_v39 = vpop.f32.mrb[239].mxu0  ;;  %v11585_v28 = vpop.eup %11584  ;;  %16692 = vst [vmem:[#allocation47_spill] sm:$0xff] %v14440_v3  ;;  %v4466_v34 = vadd.f32 %v14428_v37, %v10009_v30  ;;  %v14454_v48 = vadd.f32 %v11581_v35, %v16695_v61  ;;  %11606 = vtanh.f32 %v4246_v41  ;;  %v14458_v12 = vadd.f32 %v11583_v22, %v16697_v47  ;;  %10268 = vmatprep.subr.bf16.mxu1 %v14421_v57  ;;  %v16703_v41 = vld [vmem:[#allocation50_spill] sm:$0xff] }
 0x40b   : > { %v4457_v17 = vpop.f32.mrb[239].mxu1  ;;  %v11587_v21 = vpop.eup %11586  ;;  %v4249_v30 = vadd.f32 %v14428_v37, %v4248_v39  ;;  %11608 = vtanh.f32 %v4455_v10  ;;  %16700 = vst [vmem:[#allocation46_spill] sm:$0xff] %v14465_v25  ;;  %v14468_v59 = vadd.f32 %v11585_v28, %v16701_v32  ;;  %v14471_v61 = vadd.f32 %v11573_v44, %v16703_v41  ;;  %v14485_v44 = vld [vmem:[%s16310_s3 + $0x118] sm:$0xff]  }
 0x40c   : > { %16696 = vst [vmem:[#allocation48_spill] sm:$0xff] %v14454_v48  ;;  %16698 = vst [vmem:[#allocation43_spill] sm:$0xff] %v14458_v12  ;;  %v14461_v8 = vpop.eup %11588  ;;  %v4458_v26 = vadd.f32 %v14428_v37, %v4457_v17  ;;  %11610 = vtanh.f32 %v4257_v43  ;;  %v5186_v22 = vpack.c.bf16 %v14458_v12, %v14444_v50  ;;  %10221 = vmatpush3.bf16.msra.mxu0 %v14421_v57  ;;  %v9964_v32 = vpop.f32.mrb[240].mxu0 }
 0x40d   : > { %16702 = vst [vmem:[#allocation44_spill] sm:$0xff] %v14468_v59  ;;  %v11591_v35 = vpop.eup %11590  ;;  %16704 = vst [vmem:[#allocation50_spill] sm:$0xff] %v14471_v61  ;;  %v5187_v17 = vpack.c.bf16 %v14440_v3, %v14434_v23  ;;  %11612 = vtanh.f32 %v4466_v34  ;;  %v5395_v53 = vpack.c.bf16 %v14468_v59, %v14465_v25  ;;  %10269 = vmatpush3.bf16.msra.mxu1 %v14421_v57  ;;  %10222 = vmatprep.subr.bf16.mxu0 %v14451_v24  ;;  %v10012_v34 = vpop.f32.mrb[240].mxu1 }
 0x40e   : > { %v11593_v39 = vpop.eup %11592  ;;  %v5396_v10 = vpack.c.bf16 %v14454_v48, %v14471_v61  ;;  %11614 = vtanh.f32 %v4249_v30  ;;  %10142 = vmatprep.mubr.bf16.mxu0 %v5186_v22  ;;  %v4270_v28 = vadd.f32 %v14428_v37, %v9964_v32  ;;  %v4261_v47 = vpop.f32.mrb[241].mxu0  ;;  %10270 = vmatprep.subr.bf16.mxu1 %v14451_v24  ;;  %v4479_v41 = vadd.f32 %v14428_v37, %v10012_v34  ;;  %v16705_v61 = vld [vmem:[#allocation57_spill] sm:$0xff] }
 0x40f   : > { %v11595_v43 = vpop.eup %11594  ;;  %11616 = vtanh.f32 %v4458_v26  ;;  %10190 = vmatprep.mubr.bf16.mxu1 %v5395_v53  ;;  %10143 = vmatmul.mubr.bf16.gmra.mrb[36].mxu0 %v5187_v17  ;;  %v4262_v25 = vadd.f32 %v14428_v37, %v4261_v47  ;;  %v4470_v59 = vpop.f32.mrb[241].mxu1  ;;  %v14494_v30 = vadd.f32 %v11587_v21, %v16705_v61  ;;  %v16707_v53 = vld [vmem:[#allocation55_spill] sm:$0xff]  ;;  %v16709_v21 = vld [vmem:[#allocation53_spill] sm:$0xff] }
 0x410   : > { %v11597_v33 = vpop.eup %11596  ;;  %v9965_v50 = vpop.f32.mrb[242].mxu0  ;;  %10191 = vmatmul.mubr.bf16.gmra.mrb[36].mxu1 %v5396_v10  ;;  %11618 = vtanh.f32 %v4270_v28  ;;  %v4471_v22 = vadd.f32 %v14428_v37, %v4470_v59  ;;  %10223 = vmatpush3.bf16.msra.mxu0 %v14451_v24  ;;  %v14500_v34 = vadd.f32 %v11595_v43, %v16707_v53  ;;  %v14504_v61 = vadd.f32 %v11591_v35, %v16709_v21  ;;  %v14511_v59 = vld [vmem:[%s16310_s3 + $0x120] sm:$0xff]   ;;  %v16711_v10 = vld [vmem:[#allocation56_spill] sm:$0xff] }
 0x411   : > { %v11599_v12 = vpop.eup %11598  ;;  %16706 = vst [vmem:[#allocation57_spill] sm:$0xff] %v14494_v30  ;;  %v4273_v32 = vadd.f32 %v14428_v37, %v9965_v50  ;;  %v10013_v48 = vpop.f32.mrb[242].mxu1  ;;  %11620 = vtanh.f32 %v4479_v41  ;;  %10271 = vmatpush3.bf16.msra.mxu1 %v14451_v24  ;;  %10224 = vmatprep.subr.bf16.mxu0 %v14485_v44  ;;  %v14514_v43 = vadd.f32 %v11597_v33, %v16711_v10  ;;  %v16713_v28 = vld [vmem:[#allocation51_spill] sm:$0xff]  ;;  %v16715_v21 = vld [vmem:[#allocation54_spill] sm:$0xff] }
 0x412   : > { %v4264_v26 = vpop.f32.mrb[243].mxu0  ;;  %v11601_v17 = vpop.eup %11600  ;;  %16708 = vst [vmem:[#allocation55_spill] sm:$0xff] %v14500_v34  ;;  %v4482_v47 = vadd.f32 %v14428_v37, %v10013_v48  ;;  %16710 = vst [vmem:[#allocation53_spill] sm:$0xff] %v14504_v61  ;;  %11622 = vtanh.f32 %v4262_v25  ;;  %v14518_v41 = vadd.f32 %v11599_v12, %v16713_v28  ;;  %10272 = vmatprep.subr.bf16.mxu1 %v14485_v44  ;;  %v16719_v25 = vld [vmem:[#allocation58_spill] sm:$0xff] }
 0x413   : > { %v4473_v23 = vpop.f32.mrb[243].mxu1  ;;  %v11603_v50 = vpop.eup %11602  ;;  %16712 = vst [vmem:[#allocation56_spill] sm:$0xff] %v14514_v43  ;;  %v4265_v48 = vadd.f32 %v14428_v37, %v4264_v26  ;;  %11624 = vtanh.f32 %v4471_v22  ;;  %v14525_v3 = vadd.f32 %v11593_v39, %v16715_v21  ;;  %v14528_v58 = vadd.f32 %v11601_v17, %v16717_v5 }
 0x414   : > { %16714 = vst [vmem:[#allocation51_spill] sm:$0xff] %v14518_v41  ;;  %v14521_v35 = vpop.eup %11604  ;;  %v4474_v53 = vadd.f32 %v14428_v37, %v4473_v23  ;;  %v14532_v26 = vadd.f32 %v14461_v8, %v16719_v25  ;;  %11626 = vtanh.f32 %v4273_v32  ;;  %v5188_v12 = vpack.c.bf16 %v14518_v41, %v14504_v61  ;;  %10225 = vmatpush3.bf16.msra.mxu0 %v14485_v44  ;;  %v9968_v39 = vpop.f32.mrb[244].mxu0  ;;  %v14546_v8 = vld [vmem:[%s16310_s3 + $0x128] sm:$0xff]  }
 0x415   : > { %16716 = vst [vmem:[#allocation54_spill] sm:$0xff] %v14525_v3  ;;  %16718 = vst [vmem:[#allocation52_spill] sm:$0xff] %v14528_v58  ;;  %v11607_v33 = vpop.eup %11606  ;;  %v5189_v23 = vpack.c.bf16 %v14500_v34, %v14494_v30  ;;  %11628 = vtanh.f32 %v4482_v47  ;;  %v5397_v5 = vpack.c.bf16 %v14528_v58, %v14525_v3  ;;  %10273 = vmatpush3.bf16.msra.mxu1 %v14485_v44  ;;  %10226 = vmatprep.subr.bf16.mxu0 %v14511_v59  ;;  %v10016_v10 = vpop.f32.mrb[244].mxu1  ;;  %v16733_v34 = vld [vmem:[#allocation60_spill] sm:$0xff] }
 0x416   : > { %16720 = vst [vmem:[#allocation58_spill] sm:$0xff] %v14532_v26  ;;  %v11609_v22 = vpop.eup %11608  ;;  %v5398_v17 = vpack.c.bf16 %v14514_v43, %v14532_v26  ;;  %11630 = vtanh.f32 %v4265_v48  ;;  %10146 = vmatprep.mubr.bf16.mxu0 %v5188_v12  ;;  %v4286_v47 = vadd.f32 %v14428_v37, %v9968_v39  ;;  %v4277_v28 = vpop.f32.mrb[245].mxu0  ;;  %10274 = vmatprep.subr.bf16.mxu1 %v14511_v59  ;;  %v16721_v26 = vld [vmem:[#allocation65_spill] sm:$0xff] }
 0x417   : > { %v11611_v32 = vpop.eup %11610  ;;  %11632 = vtanh.f32 %v4474_v53  ;;  %10194 = vmatprep.mubr.bf16.mxu1 %v5397_v5  ;;  %10147 = vmatmul.mubr.bf16.gmra.mrb[40].mxu0 %v5189_v23  ;;  %v4495_v25 = vadd.f32 %v14428_v37, %v10016_v10  ;;  %v4278_v3 = vadd.f32 %v14428_v37, %v4277_v28  ;;  %v4486_v58 = vpop.f32.mrb[245].mxu1  ;;  %v14555_v48 = vadd.f32 %v11603_v50, %v16721_v26  ;;  %v16723_v5 = vld [vmem:[#allocation63_spill] sm:$0xff]  ;;  %v16725_v50 = vld [vmem:[#allocation61_spill] sm:$0xff] }
 0x418   : > { %v11613_v21 = vpop.eup %11612  ;;  %v9969_v61 = vpop.f32.mrb[246].mxu0  ;;  %10195 = vmatmul.mubr.bf16.gmra.mrb[40].mxu1 %v5398_v17  ;;  %11634 = vtanh.f32 %v4286_v47  ;;  %v4487_v12 = vadd.f32 %v14428_v37, %v4486_v58  ;;  %10227 = vmatpush3.bf16.msra.mxu0 %v14511_v59  ;;  %v14561_v10 = vadd.f32 %v11611_v32, %v16723_v5  ;;  %v14565_v26 = vadd.f32 %v11607_v33, %v16725_v50  ;;  %v16729_v32 = vld [vmem:[#allocation59_spill] sm:$0xff] }
 0x419   : > { %v11615_v41 = vpop.eup %11614  ;;  %16722 = vst [vmem:[#allocation65_spill] sm:$0xff] %v14555_v48  ;;  %v4289_v39 = vadd.f32 %v14428_v37, %v9969_v61  ;;  %v10017_v43 = vpop.f32.mrb[246].mxu1  ;;  %11636 = vtanh.f32 %v4495_v25  ;;  %10275 = vmatpush3.bf16.msra.mxu1 %v14511_v59  ;;  %10228 = vmatprep.subr.bf16.mxu0 %v14546_v8  ;;  %v16727_v61 = vld [vmem:[#allocation64_spill] sm:$0xff]  ;;  %v16731_v25 = vld [vmem:[#allocation62_spill] sm:$0xff] }
 0x41a   : > { %v4280_v53 = vpop.f32.mrb[247].mxu0  ;;  %v11617_v23 = vpop.eup %11616  ;;  %16724 = vst [vmem:[#allocation63_spill] sm:$0xff] %v14561_v10  ;;  %v4498_v28 = vadd.f32 %v14428_v37, %v10017_v43  ;;  %16726 = vst [vmem:[#allocation61_spill] sm:$0xff] %v14565_v26  ;;  %v14570_v17 = vadd.f32 %v11613_v21, %v16727_v61  ;;  %11638 = vtanh.f32 %v4278_v3  ;;  %v14574_v5 = vadd.f32 %v11615_v41, %v16729_v32  ;;  %v16735_v61 = vld [vmem:[#allocation66_spill] sm:$0xff] }
 0x41b   : > { %v4489_v30 = vpop.f32.mrb[247].mxu1  ;;  %v11619_v58 = vpop.eup %11618  ;;  %v4281_v47 = vadd.f32 %v14428_v37, %v4280_v53  ;;  %10276 = vmatprep.subr.bf16.mxu1 %v14546_v8  ;;  %11640 = vtanh.f32 %v4487_v12  ;;  %v14579_v50 = vadd.f32 %v11609_v22, %v16731_v25  ;;  %v14582_v18 = vadd.f32 %v11617_v23, %v16733_v34 }
 0x41c   : > { %16728 = vst [vmem:[#allocation64_spill] sm:$0xff] %v14570_v17  ;;  %16730 = vst [vmem:[#allocation59_spill] sm:$0xff] %v14574_v5  ;;  %v11621_v43 = vpop.eup %11620  ;;  %v4490_v33 = vadd.f32 %v14428_v37, %v4489_v30  ;;  %v14586_v3 = vadd.f32 %v14521_v35, %v16735_v61  ;;  %11642 = vtanh.f32 %v4289_v39  ;;  %v5190_v41 = vpack.c.bf16 %v14574_v5, %v14565_v26  ;;  %v9972_v22 = vpop.f32.mrb[248].mxu0  ;;  %v16737_v5 = vld [vmem:[#allocation73_spill] sm:$0xff] }
 0x41d   : > { %16732 = vst [vmem:[#allocation62_spill] sm:$0xff] %v14579_v50  ;;  %16734 = vst [vmem:[#allocation60_spill] sm:$0xff] %v14582_v18  ;;  %v11623_v21 = vpop.eup %11622  ;;  %10229 = vmatpush3.bf16.msra.mxu0 %v14546_v8  ;;  %v5191_v30 = vpack.c.bf16 %v14561_v10, %v14555_v48  ;;  %11644 = vtanh.f32 %v4498_v28  ;;  %v5399_v34 = vpack.c.bf16 %v14582_v18, %v14579_v50  ;;  %10277 = vmatpush3.bf16.msra.mxu1 %v14546_v8  ;;  %v10020_v23 = vpop.f32.mrb[248].mxu1 }
 0x41e   : > { %16736 = vst [vmem:[#allocation66_spill] sm:$0xff] %v14586_v3  ;;  %v11625_v12 = vpop.eup %11624  ;;  %v5400_v35 = vpack.c.bf16 %v14570_v17, %v14586_v3  ;;  %11646 = vtanh.f32 %v4281_v47  ;;  %10150 = vmatprep.mubr.bf16.mxu0 %v5190_v41  ;;  %v4302_v39 = vadd.f32 %v14428_v37, %v9972_v22  ;;  %v4293_v32 = vpop.f32.mrb[249].mxu0  ;;  %v4511_v28 = vadd.f32 %v14428_v37, %v10020_v23  ;;  %v16741_v17 = vld [vmem:[#allocation69_spill] sm:$0xff] }
 0x41f   : > { %v11627_v53 = vpop.eup %11626  ;;  %11648 = vtanh.f32 %v4490_v33  ;;  %10198 = vmatprep.mubr.bf16.mxu1 %v5399_v34  ;;  %10151 = vmatmul.mubr.bf16.gmra.mrb[44].mxu0 %v5191_v30  ;;  %v4294_v61 = vadd.f32 %v14428_v37, %v4293_v32  ;;  %v4502_v50 = vpop.f32.mrb[249].mxu1  ;;  %v14602_v48 = vadd.f32 %v11619_v58, %v16737_v5  ;;  %v16739_v30 = vld [vmem:[#allocation71_spill] sm:$0xff]  ;;  %v14611_v10 = vadd.f32 %v11623_v21, %v16741_v17  ;;  %v16743_v5 = vld [vmem:[#allocation72_spill] sm:$0xff] }
 0x420   : > { %v11629_v25 = vpop.eup %11628  ;;  %v9973_v18 = vpop.f32.mrb[250].mxu0  ;;  %10199 = vmatmul.mubr.bf16.gmra.mrb[44].mxu1 %v5400_v35  ;;  %11650 = vtanh.f32 %v4302_v39  ;;  %v4503_v47 = vadd.f32 %v14428_v37, %v4502_v50  ;;  %v14607_v3 = vadd.f32 %v11627_v53, %v16739_v30  ;;  %v16745_v50 = vld [vmem:[#allocation67_spill] sm:$0xff]  ;;  %v16749_v30 = vld [vmem:[#allocation68_spill] sm:$0xff] }
 0x421   : > { %v11631_v26 = vpop.eup %11630  ;;  %16738 = vst [vmem:[#allocation73_spill] sm:$0xff] %v14602_v48  ;;  %v4305_v41 = vadd.f32 %v14428_v37, %v9973_v18  ;;  %v10021_v22 = vpop.f32.mrb[250].mxu1  ;;  %11652 = vtanh.f32 %v4511_v28  ;;  %16742 = vst [vmem:[#allocation69_spill] sm:$0xff] %v14611_v10  ;;  %v14614_v35 = vadd.f32 %v11629_v25, %v16743_v5  ;;  %v16747_v28 = vld [vmem:[#allocation70_spill] sm:$0xff]  ;;  %v14628_v25 = vadd.f32 %v11621_v43, %v16751_v60 }
 0x422   : > { %v4296_v33 = vpop.f32.mrb[251].mxu0  ;;  %v11633_v34 = vpop.eup %11632  ;;  %16740 = vst [vmem:[#allocation71_spill] sm:$0xff] %v14607_v3  ;;  %v4514_v23 = vadd.f32 %v14428_v37, %v10021_v22  ;;  %11654 = vtanh.f32 %v4294_v61  ;;  %v14618_v39 = vadd.f32 %v11631_v26, %v16745_v50  ;;  %v14622_v22 = vadd.f32 %v11625_v12, %v16747_v28 }
 0x423   : > { %v4505_v32 = vpop.f32.mrb[251].mxu1  ;;  %v11635_v58 = vpop.eup %11634  ;;  %16744 = vst [vmem:[#allocation72_spill] sm:$0xff] %v14614_v35  ;;  %v4297_v18 = vadd.f32 %v14428_v37, %v4296_v33  ;;  %11656 = vtanh.f32 %v4503_v47  ;;  %v14625_v17 = vadd.f32 %v11633_v34, %v16749_v30  ;;  %16752 = vst [vmem:[#allocation74_spill] sm:$0xff] %v14628_v25  ;;  %v5193_v47 = vpack.c.bf16 %v14607_v3, %v14602_v48  ;;  %v16815_v3 = vld [vmem:[#allocation17_spill] sm:$0xff] }
 0x424   : > { %16746 = vst [vmem:[#allocation67_spill] sm:$0xff] %v14618_v39  ;;  %v11637_v9 = vpop.eup %11636  ;;  %v4506_v53 = vadd.f32 %v14428_v37, %v4505_v32  ;;  %16748 = vst [vmem:[#allocation70_spill] sm:$0xff] %v14622_v22  ;;  %11658 = vtanh.f32 %v4305_v41  ;;  %v5192_v61 = vpack.c.bf16 %v14618_v39, %v14611_v10  ;;  %v9976_v33 = vpop.f32.mrb[252].mxu0  ;;  %v5402_v34 = vpack.c.bf16 %v14614_v35, %v14628_v25  ;;  %v16761_v35 = vld [vmem:[#allocation75_spill] sm:$0xff] }
 0x425   : > { %16750 = vst [vmem:[#allocation68_spill] sm:$0xff] %v14625_v17  ;;  %v11639_v21 = vpop.eup %11638  ;;  %11660 = vtanh.f32 %v4514_v23  ;;  %v5401_v12 = vpack.c.bf16 %v14625_v17, %v14622_v22  ;;  %v4318_v60 = vadd.f32 %v14428_v37, %v9976_v33  ;;  %v10024_v43 = vpop.f32.mrb[252].mxu1  ;;  %v16753_v17 = vld [vmem:[#allocation81_spill] sm:$0xff] }
 0x426   : > { %v11641_v26 = vpop.eup %11640  ;;  %11662 = vtanh.f32 %v4297_v18  ;;  %10154 = vmatprep.mubr.bf16.mxu0 %v5192_v61  ;;  %v4309_v41 = vpop.f32.mrb[253].mxu0  ;;  %v4527_v23 = vadd.f32 %v14428_v37, %v10024_v43  ;;  %v14642_v10 = vadd.f32 %v11635_v58, %v16753_v17  ;;  %v16755_v43 = vld [vmem:[#allocation79_spill] sm:$0xff] }
 0x427   : > { %v11643_v32 = vpop.eup %11642  ;;  %11664 = vtanh.f32 %v4506_v53  ;;  %10202 = vmatprep.mubr.bf16.mxu1 %v5401_v12  ;;  %10155 = vmatmul.mubr.bf16.gmra.mrb[48].mxu0 %v5193_v47  ;;  %v4310_v50 = vadd.f32 %v14428_v37, %v4309_v41  ;;  %v4518_v28 = vpop.f32.mrb[253].mxu1  ;;  %v14649_v47 = vld [vmem:[%s16310_s3 + $0x130] sm:$0xff]  }
 0x428   : > { %v11645_v5 = vpop.eup %11644  ;;  %v9977_v30 = vpop.f32.mrb[254].mxu0  ;;  %16754 = vst [vmem:[#allocation81_spill] sm:$0xff] %v14642_v10  ;;  %10203 = vmatmul.mubr.bf16.gmra.mrb[48].mxu1 %v5402_v34  ;;  %11666 = vtanh.f32 %v4318_v60  ;;  %v4519_v18 = vadd.f32 %v14428_v37, %v4518_v28  ;;  %v14652_v41 = vadd.f32 %v11643_v32, %v16755_v43  ;;  %v16757_v34 = vld [vmem:[#allocation77_spill] sm:$0xff]  ;;  %10230 = vmatprep.subr.bf16.mxu0 %v14649_v47  ;;  %v16765_v43 = vld [vmem:[#allocation76_spill] sm:$0xff] }
 0x429   : > { %v11647_v22 = vpop.eup %11646  ;;  %v4321_v61 = vadd.f32 %v14428_v37, %v9977_v30  ;;  %v10025_v33 = vpop.f32.mrb[254].mxu1  ;;  %11668 = vtanh.f32 %v4527_v23  ;;  %v14656_v60 = vadd.f32 %v11639_v21, %v16757_v34  ;;  %v16759_v30 = vld [vmem:[#allocation80_spill] sm:$0xff]  ;;  %10278 = vmatprep.subr.bf16.mxu1 %v14649_v47  ;;  %v16763_v21 = vld [vmem:[#allocation78_spill] sm:$0xff]  ;;  %10231 = vmatpush3.bf16.msra.mxu0 %v14649_v47 }
 0x42a   : > { %v4312_v53 = vpop.f32.mrb[255].mxu0  ;;  %v11649_v12 = vpop.eup %11648  ;;  %16756 = vst [vmem:[#allocation79_spill] sm:$0xff] %v14652_v41  ;;  %v4530_v58 = vadd.f32 %v14428_v37, %v10025_v33  ;;  %v14659_v39 = vadd.f32 %v11645_v5, %v16759_v30  ;;  %11670 = vtanh.f32 %v4310_v50  ;;  %v14663_v48 = vadd.f32 %v11647_v22, %v16761_v35  ;;  %10279 = vmatpush3.bf16.msra.mxu1 %v14649_v47  ;;  %v16767_v22 = vld [vmem:[#allocation82_spill] sm:$0xff]  ;;  %v16769_v30 = vld [vmem:[#allocation87_spill] sm:$0xff] }
 0x42b   : > { %v4521_v17 = vpop.f32.mrb[255].mxu1  ;;  %16758 = vst [vmem:[#allocation77_spill] sm:$0xff] %v14656_v60  ;;  %v11651_v28 = vpop.eup %11650  ;;  %v4313_v25 = vadd.f32 %v14428_v37, %v4312_v53  ;;  %11672 = vtanh.f32 %v4519_v18  ;;  %v14669_v33 = vadd.f32 %v11641_v26, %v16763_v21  ;;  %v14672_v5 = vadd.f32 %v11649_v12, %v16765_v43  ;;  %v16771_v43 = vld [vmem:[#allocation85_spill] sm:$0xff] }
 0x42c   : > { %16760 = vst [vmem:[#allocation80_spill] sm:$0xff] %v14659_v39  ;;  %16762 = vst [vmem:[#allocation75_spill] sm:$0xff] %v14663_v48  ;;  %v11653_v32 = vpop.eup %11652  ;;  %v4522_v23 = vadd.f32 %v14428_v37, %v4521_v17  ;;  %v14677_v50 = vadd.f32 %v11637_v9, %v16767_v22  ;;  %11674 = vtanh.f32 %v4321_v61  ;;  %v5194_v18 = vpack.c.bf16 %v14663_v48, %v14656_v60  ;;  %v14684_v37 = vld [vmem:[%s16310_s3 + $0x138] sm:$0xff]  }
 0x42d   : > { %16764 = vst [vmem:[#allocation78_spill] sm:$0xff] %v14669_v33  ;;  %16766 = vst [vmem:[#allocation76_spill] sm:$0xff] %v14672_v5  ;;  %v11655_v35 = vpop.eup %11654  ;;  %v5195_v53 = vpack.c.bf16 %v14652_v41, %v14642_v10  ;;  %11676 = vtanh.f32 %v4530_v58  ;;  %v5403_v12 = vpack.c.bf16 %v14672_v5, %v14669_v33  ;;  %10232 = vmatprep.subr.bf16.mxu0 %v14684_v37  ;;  %10280 = vmatprep.subr.bf16.mxu1 %v14684_v37  ;;  %v16773_v33 = vld [vmem:[#allocation83_spill] sm:$0xff]  ;;  %v16779_v5 = vld [vmem:[#allocation84_spill] sm:$0xff] }
 0x42e   : > { %16768 = vst [vmem:[#allocation82_spill] sm:$0xff] %v14677_v50  ;;  %v11657_v26 = vpop.eup %11656  ;;  %v5404_v9 = vpack.c.bf16 %v14659_v39, %v14677_v50  ;;  %11678 = vtanh.f32 %v4313_v25  ;;  %10158 = vmatprep.mubr.bf16.mxu0 %v5194_v18  ;;  %v14698_v22 = vadd.f32 %v11655_v35, %v16771_v43  ;;  %10233 = vmatpush3.bf16.msra.mxu0 %v14684_v37  ;;  %v16775_v18 = vld [vmem:[#allocation88_spill] sm:$0xff]  ;;  %v16783_v43 = vld [vmem:[#allocation90_spill] sm:$0xff]  ;;  %v16787_v60 = vld [vmem:[#allocation93_spill] sm:$0xff] }
 0x42f   : > { %v11659_v17 = vpop.eup %11658  ;;  %11680 = vtanh.f32 %v4522_v23  ;;  %10206 = vmatprep.mubr.bf16.mxu1 %v5403_v12  ;;  %10159 = vmatmul.mubr.bf16.gmra.mrb[52].mxu0 %v5195_v53  ;;  %v16777_v12 = vld [vmem:[#allocation86_spill] sm:$0xff] }
 0x430   : > { %v11661_v61 = vpop.eup %11660  ;;  %10207 = vmatmul.mubr.bf16.gmra.mrb[52].mxu1 %v5404_v9  ;;  %v14695_v21 = vadd.f32 %v11659_v17, %v16769_v30  ;;  %16772 = vst [vmem:[#allocation85_spill] sm:$0xff] %v14698_v22  ;;  %v14709_v9 = vadd.f32 %v11657_v26, %v16777_v12  ;;  %10314 = vmatprep.subr.bf16.mxu0 %v14227_v2 }
 0x431   : > { %v11663_v34 = vpop.eup %11662  ;;  %10281 = vmatpush3.bf16.msra.mxu1 %v14684_v37  ;;  %v14706_v53 = vadd.f32 %v11661_v61, %v16775_v18 }
 0x432   : > { %v11665_v58 = vpop.eup %11664  ;;  %16770 = vst [vmem:[#allocation87_spill] sm:$0xff] %v14695_v21  ;;  %v14701_v25 = vadd.f32 %v11663_v34, %v16773_v33  ;;  %16778 = vst [vmem:[#allocation86_spill] sm:$0xff] %v14709_v9  ;;  %v14718_v33 = vld [vmem:[%s16310_s3 + $0x100] sm:$0xff]   ;;  %v16781_v34 = vld [vmem:[#allocation89_spill] sm:$0xff] }
 0x433   : > { %v11667_v23 = vpop.eup %11666  ;;  %16776 = vst [vmem:[#allocation88_spill] sm:$0xff] %v14706_v53  ;;  %v14712_v17 = vadd.f32 %v11665_v58, %v16779_v5  ;;  %10362 = vmatprep.subr.bf16.mxu1 %v14718_v33  ;;  %v14722_v30 = vadd.f32 %v11651_v28, %v16781_v34  ;;  %v14727_v5 = vadd.f32 %v11653_v32, %v16783_v43  ;;  %v16785_v32 = vld [vmem:[#allocation95_spill] sm:$0xff] }
 0x434   : > { %16774 = vst [vmem:[#allocation83_spill] sm:$0xff] %v14701_v25  ;;  %v11669_v35 = vpop.eup %11668  ;;  %v5196_v26 = vpack.c.bf16 %v14701_v25, %v14698_v22 }
 0x435   : > { %16780 = vst [vmem:[#allocation84_spill] sm:$0xff] %v14712_v17  ;;  %16782 = vst [vmem:[#allocation89_spill] sm:$0xff] %v14722_v30  ;;  %v11671_v61 = vpop.eup %11670  ;;  %v5405_v2 = vpack.c.bf16 %v14712_v17, %v14709_v9  ;;  %v5197_v18 = vpack.c.bf16 %v14695_v21, %v14722_v30  ;;  %v5406_v28 = vpack.c.bf16 %v14706_v53, %v14727_v5  ;;  %v16789_v17 = vld [vmem:[#allocation91_spill] sm:$0xff]  ;;  %v16793_v21 = vld [vmem:[#allocation94_spill] sm:$0xff] }
 0x436   : > { %16784 = vst [vmem:[#allocation90_spill] sm:$0xff] %v14727_v5  ;;  %v11673_v58 = vpop.eup %11672  ;;  %10162 = vmatprep.mubr.bf16.mxu0 %v5196_v26  ;;  %v14739_v9 = vadd.f32 %v11671_v61, %v16787_v60  ;;  %v16791_v26 = vld [vmem:[#allocation96_spill] sm:$0xff]  ;;  %v16799_v60 = vld [vmem:[#allocation98_spill] sm:$0xff] }
 0x437   : > { %v11675_v12 = vpop.eup %11674  ;;  %10210 = vmatprep.mubr.bf16.mxu1 %v5405_v2  ;;  %10163 = vmatmul.mubr.bf16.gmra.mrb[56].mxu0 %v5197_v18  ;;  %v14748_v5 = vadd.f32 %v11673_v58, %v16793_v21  ;;  %v16795_v2 = vld [vmem:[#allocation92_spill] sm:$0xff]  ;;  %v14759_v61 = vadd.f32 %v11669_v35, %v16799_v60 }
 0x438   : > { %v11677_v34 = vpop.eup %11676  ;;  %10211 = vmatmul.mubr.bf16.gmra.mrb[56].mxu1 %v5406_v28  ;;  %v14736_v43 = vadd.f32 %v11675_v12, %v16785_v32  ;;  %16788 = vst [vmem:[#allocation93_spill] sm:$0xff] %v14739_v9  ;;  %v16797_v28 = vld [vmem:[#allocation97_spill] sm:$0xff] }
 0x439   : > { %v11679_v22 = vpop.eup %11678  ;;  %v14745_v30 = vadd.f32 %v11677_v34, %v16791_v26  ;;  %16794 = vst [vmem:[#allocation94_spill] sm:$0xff] %v14748_v5  ;;  %v14754_v53 = vadd.f32 %v11667_v23, %v16797_v28  ;;  %16800 = vst [vmem:[#allocation98_spill] sm:$0xff] %v14759_v61 }
 0x43a   : > { %v11681_v25 = vpop.eup %11680  ;;  %16786 = vst [vmem:[#allocation95_spill] sm:$0xff] %v14736_v43  ;;  %v14742_v48 = vadd.f32 %v11679_v22, %v16789_v17 }
 0x43b   : > { %16792 = vst [vmem:[#allocation96_spill] sm:$0xff] %v14745_v30  ;;  %v14751_v18 = vadd.f32 %v11681_v25, %v16795_v2  ;;  %16798 = vst [vmem:[#allocation97_spill] sm:$0xff] %v14754_v53  ;;  %v5199_v17 = vpack.c.bf16 %v14736_v43, %v14754_v53  ;;  %v5408_v21 = vpack.c.bf16 %v14745_v30, %v14759_v61  ;;  %v14770_v25 = vld [vmem:[%s16311_s4 + $0x3] ss:$0 sm:$0xff] }
 0x43c   : > { %16790 = vst [vmem:[#allocation91_spill] sm:$0xff] %v14742_v48  ;;  %v5198_v12 = vpack.c.bf16 %v14742_v48, %v14739_v9 }
 0x43d   : > { %16796 = vst [vmem:[#allocation92_spill] sm:$0xff] %v14751_v18  ;;  %v5407_v22 = vpack.c.bf16 %v14751_v18, %v14748_v5 }
 0x43e   : > { %10166 = vmatprep.mubr.bf16.mxu0 %v5198_v12 }
 0x43f   : > { %10214 = vmatprep.mubr.bf16.mxu1 %v5407_v22  ;;  %10167 = vmatmul.mubr.bf16.gmra.mrb[60].mxu0 %v5199_v17 }
 0x440   : > { %10215 = vmatmul.mubr.bf16.gmra.mrb[60].mxu1 %v5408_v21 }
 0x498   : > { %v10044_v23 = vpop.f32.mrb[0].mxu0 }
 0x499   : > { %v4825_v35 = vadd.f32 %v10044_v23, %v14770_v25  ;;  %v4816_v34 = vpop.f32.mrb[1].mxu0 }
 0x49a   : > { %v10092_v58 = vpop.f32.mrb[0].mxu1  ;;  %v4817_v26 = vadd.f32 %v14770_v25, %v4816_v34  ;;  %v10045_v28 = vpop.f32.mrb[2].mxu0 }
 0x49b   : > { %v5034_v32 = vadd.f32 %v10092_v58, %v14770_v25  ;;  %v5025_v2 = vpop.f32.mrb[1].mxu1  ;;  %11682 = vtanh.f32 %v4825_v35  ;;  %v4828_v60 = vadd.f32 %v10045_v28, %v14770_v25  ;;  %v4819_v17 = vpop.f32.mrb[3].mxu0 }
 0x49c   : > { %v5026_v12 = vadd.f32 %v14770_v25, %v5025_v2  ;;  %v10093_v22 = vpop.f32.mrb[2].mxu1  ;;  %v4820_v23 = vadd.f32 %v14770_v25, %v4819_v17 }
 0x49d   : > { %11684 = vtanh.f32 %v5034_v32  ;;  %v5037_v21 = vadd.f32 %v10093_v22, %v14770_v25  ;;  %v5028_v61 = vpop.f32.mrb[3].mxu1 }
 0x49e   : > { %11686 = vtanh.f32 %v4817_v26  ;;  %v5029_v58 = vadd.f32 %v14770_v25, %v5028_v61 }
 0x49f   : > { %11688 = vtanh.f32 %v5026_v12 }
 0x4a0   : > { %11690 = vtanh.f32 %v4828_v60 }
 0x4a1   : > { %11692 = vtanh.f32 %v5037_v21  ;;  %v10048_v34 = vpop.f32.mrb[4].mxu0 }
 0x4a2   : > { %11694 = vtanh.f32 %v4820_v23  ;;  %v4841_v35 = vadd.f32 %v10048_v34, %v14770_v25  ;;  %v4832_v28 = vpop.f32.mrb[5].mxu0 }
 0x4a3   : > { %v10096_v2 = vpop.f32.mrb[4].mxu1  ;;  %11696 = vtanh.f32 %v5029_v58  ;;  %v4833_v22 = vadd.f32 %v14770_v25, %v4832_v28  ;;  %v10049_v26 = vpop.f32.mrb[6].mxu0 }
 0x4a4   : > { %v5050_v32 = vadd.f32 %v10096_v2, %v14770_v25  ;;  %v5041_v30 = vpop.f32.mrb[5].mxu1  ;;  %11698 = vtanh.f32 %v4841_v35  ;;  %v4844_v61 = vadd.f32 %v10049_v26, %v14770_v25  ;;  %v4835_v17 = vpop.f32.mrb[7].mxu0 }
 0x4a5   : > { %v5042_v12 = vadd.f32 %v14770_v25, %v5041_v30  ;;  %v10097_v60 = vpop.f32.mrb[6].mxu1  ;;  %v11683_v34 = vpop.eup %11682  ;;  %v4836_v58 = vadd.f32 %v14770_v25, %v4835_v17 }
 0x4a6   : > { %11700 = vtanh.f32 %v5050_v32  ;;  %v5053_v21 = vadd.f32 %v10097_v60, %v14770_v25  ;;  %v5044_v23 = vpop.f32.mrb[7].mxu1 }
 0x4a7   : > { %11702 = vtanh.f32 %v4833_v22  ;;  %v11685_v2 = vpop.eup %11684  ;;  %v5045_v28 = vadd.f32 %v14770_v25, %v5044_v23 }
 0x4a8   : > { %11704 = vtanh.f32 %v5042_v12  ;;  %v11687_v5 = vpop.eup %11686 }
 0x4a9   : > { %11706 = vtanh.f32 %v4844_v61  ;;  %v11689_v35 = vpop.eup %11688 }
 0x4aa   : > { %11708 = vtanh.f32 %v5053_v21  ;;  %v10052_v30 = vpop.f32.mrb[8].mxu0  ;;  %v11691_v26 = vpop.eup %11690 }
 0x4ab   : > { %11710 = vtanh.f32 %v4836_v58  ;;  %v4857_v32 = vadd.f32 %v10052_v30, %v14770_v25  ;;  %v10100_v18 = vpop.f32.mrb[8].mxu1  ;;  %v4848_v60 = vpop.f32.mrb[9].mxu0  ;;  %v5622_v48 = vpack.c.bf16 %v11691_v26, %v11683_v34 }
 0x4ac   : > { %v11693_v9 = vpop.eup %11692  ;;  %11712 = vtanh.f32 %v5045_v28  ;;  %v5066_v22 = vadd.f32 %v10100_v18, %v14770_v25  ;;  %v4849_v12 = vadd.f32 %v14770_v25, %v4848_v60  ;;  %v5057_v17 = vpop.f32.mrb[9].mxu1 }
 0x4ad   : > { %v10053_v23 = vpop.f32.mrb[10].mxu0  ;;  %v11695_v53 = vpop.eup %11694  ;;  %v5885_v61 = vpack.c.bf16 %v11693_v9, %v11685_v2  ;;  %11714 = vtanh.f32 %v4857_v32  ;;  %v5058_v21 = vadd.f32 %v14770_v25, %v5057_v17 }
 0x4ae   : > { %v4860_v58 = vadd.f32 %v10053_v23, %v14770_v25  ;;  %v10101_v43 = vpop.f32.mrb[10].mxu1  ;;  %v4851_v30 = vpop.f32.mrb[11].mxu0  ;;  %11716 = vtanh.f32 %v5066_v22  ;;  %v5621_v26 = vpack.c.bf16 %v11695_v53, %v11687_v5 }
 0x4af   : > { %v11697_v50 = vpop.eup %11696  ;;  %v5069_v34 = vadd.f32 %v10101_v43, %v14770_v25  ;;  %v5060_v28 = vpop.f32.mrb[11].mxu1  ;;  %11718 = vtanh.f32 %v4849_v12  ;;  %v4852_v60 = vadd.f32 %v14770_v25, %v4851_v30 }
 0x4b0   : > { %v11699_v18 = vpop.eup %11698  ;;  %v5884_v39 = vpack.c.bf16 %v11697_v50, %v11689_v35  ;;  %11720 = vtanh.f32 %v5058_v21  ;;  %v5061_v9 = vadd.f32 %v14770_v25, %v5060_v28  ;;  %10234 = vmatprep.mubr.bf16.mxu0 %v5621_v26 }
 0x4b1   : > { %v11701_v10 = vpop.eup %11700  ;;  %11722 = vtanh.f32 %v4860_v58  ;;  %10235 = vmatmul.mubr.bf16.vlgmr.msra.gmra.mrb[64].mxu0 %v5622_v48 }
 0x4b2   : > { %v11703_v2 = vpop.eup %11702  ;;  %10282 = vmatprep.mubr.bf16.mxu1 %v5884_v39  ;;  %11724 = vtanh.f32 %v5069_v34  ;;  %v10056_v43 = vpop.f32.mrb[12].mxu0  ;;  %10315 = vmatpush3.bf16.msra.mxu0 %v14718_v33 }
 0x4b3   : > { %v11705_v32 = vpop.eup %11704  ;;  %10283 = vmatmul.mubr.bf16.vlgmr.msra.gmra.mrb[64].mxu1 %v5885_v61  ;;  %11726 = vtanh.f32 %v4852_v60  ;;  %v4873_v5 = vadd.f32 %v10056_v43, %v14770_v25  ;;  %v10104_v50 = vpop.f32.mrb[12].mxu1  ;;  %10316 = vmatprep.subr.bf16.mxu0 %v14421_v57 }
 0x4b4   : > { %v11707_v53 = vpop.eup %11706  ;;  %v4864_v35 = vpop.f32.mrb[13].mxu0  ;;  %10363 = vmatpush3.bf16.msra.mxu1 %v14718_v33  ;;  %11728 = vtanh.f32 %v5061_v9  ;;  %v5082_v48 = vadd.f32 %v10104_v50, %v14770_v25 }
 0x4b5   : > { %v11709_v22 = vpop.eup %11708  ;;  %v5624_v12 = vpack.c.bf16 %v11707_v53, %v11699_v18  ;;  %v4865_v39 = vadd.f32 %v14770_v25, %v4864_v35  ;;  %v5073_v17 = vpop.f32.mrb[13].mxu1  ;;  %10364 = vmatprep.subr.bf16.mxu1 %v14421_v57  ;;  %11730 = vtanh.f32 %v4873_v5 }
 0x4b6   : > { %v10057_v23 = vpop.f32.mrb[14].mxu0  ;;  %v11711_v61 = vpop.eup %11710  ;;  %v5887_v21 = vpack.c.bf16 %v11709_v22, %v11701_v10  ;;  %v5074_v58 = vadd.f32 %v14770_v25, %v5073_v17  ;;  %11732 = vtanh.f32 %v5082_v48  ;;  %10317 = vmatpush3.bf16.msra.mxu0 %v14421_v57 }
 0x4b7   : > { %v4876_v33 = vadd.f32 %v10057_v23, %v14770_v25  ;;  %v10105_v30 = vpop.f32.mrb[14].mxu1  ;;  %v4867_v34 = vpop.f32.mrb[15].mxu0  ;;  %v5623_v60 = vpack.c.bf16 %v11711_v61, %v11703_v2  ;;  %11734 = vtanh.f32 %v4865_v39  ;;  %10318 = vmatprep.subr.bf16.mxu0 %v14451_v24 }
 0x4b8   : > { %v11713_v28 = vpop.eup %11712  ;;  %v5085_v26 = vadd.f32 %v10105_v30, %v14770_v25  ;;  %v5076_v18 = vpop.f32.mrb[15].mxu1  ;;  %v4868_v43 = vadd.f32 %v14770_v25, %v4867_v34  ;;  %10365 = vmatpush3.bf16.msra.mxu1 %v14421_v57  ;;  %11736 = vtanh.f32 %v5074_v58 }
 0x4b9   : > { %v11715_v9 = vpop.eup %11714  ;;  %v5886_v10 = vpack.c.bf16 %v11713_v28, %v11705_v32  ;;  %v5077_v5 = vadd.f32 %v14770_v25, %v5076_v18  ;;  %10238 = vmatprep.mubr.bf16.mxu0 %v5623_v60  ;;  %10366 = vmatprep.subr.bf16.mxu1 %v14451_v24  ;;  %11738 = vtanh.f32 %v4876_v33 }
 0x4ba   : > { %v11717_v53 = vpop.eup %11716  ;;  %10239 = vmatmul.mubr.bf16.gmra.mrb[68].mxu0 %v5624_v12  ;;  %11740 = vtanh.f32 %v5085_v26  ;;  %v10060_v35 = vpop.f32.mrb[16].mxu0 }
 0x4bb   : > { %v11719_v50 = vpop.eup %11718  ;;  %10286 = vmatprep.mubr.bf16.mxu1 %v5886_v10  ;;  %10319 = vmatpush3.bf16.msra.mxu0 %v14451_v24  ;;  %11742 = vtanh.f32 %v4868_v43  ;;  %v4889_v32 = vadd.f32 %v10060_v35, %v14770_v25  ;;  %v10108_v22 = vpop.f32.mrb[16].mxu1 }
 0x4bc   : > { %v11721_v2 = vpop.eup %11720  ;;  %10287 = vmatmul.mubr.bf16.gmra.mrb[68].mxu1 %v5887_v21  ;;  %v4880_v48 = vpop.f32.mrb[17].mxu0  ;;  %10320 = vmatprep.subr.bf16.mxu0 %v14485_v44  ;;  %11744 = vtanh.f32 %v5077_v5  ;;  %v5098_v12 = vadd.f32 %v10108_v22, %v14770_v25 }
 0x4bd   : > { %v11723_v57 = vpop.eup %11722  ;;  %10367 = vmatpush3.bf16.msra.mxu1 %v14451_v24  ;;  %v4881_v23 = vadd.f32 %v14770_v25, %v4880_v48  ;;  %v5089_v61 = vpop.f32.mrb[17].mxu1  ;;  %11746 = vtanh.f32 %v4889_v32 }
 0x4be   : > { %v11725_v39 = vpop.eup %11724  ;;  %v5626_v17 = vpack.c.bf16 %v11723_v57, %v11715_v9  ;;  %v10061_v21 = vpop.f32.mrb[18].mxu0  ;;  %10368 = vmatprep.subr.bf16.mxu1 %v14485_v44  ;;  %v5090_v30 = vadd.f32 %v14770_v25, %v5089_v61  ;;  %11748 = vtanh.f32 %v5098_v12 }
 0x4bf   : > { %v11727_v58 = vpop.eup %11726  ;;  %v5889_v33 = vpack.c.bf16 %v11725_v39, %v11717_v53  ;;  %v4892_v24 = vadd.f32 %v10061_v21, %v14770_v25  ;;  %v10109_v34 = vpop.f32.mrb[18].mxu1  ;;  %10321 = vmatpush3.bf16.msra.mxu0 %v14485_v44  ;;  %11750 = vtanh.f32 %v4881_v23 }
 0x4c0   : > { %v4883_v28 = vpop.f32.mrb[19].mxu0  ;;  %v11729_v26 = vpop.eup %11728  ;;  %v5101_v18 = vadd.f32 %v10109_v34, %v14770_v25  ;;  %v5625_v9 = vpack.c.bf16 %v11727_v58, %v11719_v50  ;;  %10322 = vmatprep.subr.bf16.mxu0 %v14511_v59  ;;  %11752 = vtanh.f32 %v5090_v30 }
 0x4c1   : > { %v5092_v60 = vpop.f32.mrb[19].mxu1  ;;  %v11731_v43 = vpop.eup %11730  ;;  %v4884_v10 = vadd.f32 %v14770_v25, %v4883_v28  ;;  %v5888_v53 = vpack.c.bf16 %v11729_v26, %v11721_v2  ;;  %10369 = vmatpush3.bf16.msra.mxu1 %v14485_v44  ;;  %11754 = vtanh.f32 %v4892_v24 }
 0x4c2   : > { %v11733_v5 = vpop.eup %11732  ;;  %v5093_v35 = vadd.f32 %v14770_v25, %v5092_v60  ;;  %10242 = vmatprep.mubr.bf16.mxu0 %v5625_v9  ;;  %10370 = vmatprep.subr.bf16.mxu1 %v14511_v59  ;;  %11756 = vtanh.f32 %v5101_v18  ;;  %v10064_v32 = vpop.f32.mrb[20].mxu0 }
 0x4c3   : > { %v11735_v57 = vpop.eup %11734  ;;  %10290 = vmatprep.mubr.bf16.mxu1 %v5888_v53  ;;  %10243 = vmatmul.mubr.bf16.gmra.mrb[72].mxu0 %v5626_v17  ;;  %11758 = vtanh.f32 %v4884_v10  ;;  %v4905_v2 = vadd.f32 %v10064_v32, %v14770_v25  ;;  %v10112_v22 = vpop.f32.mrb[20].mxu1 }
 0x4c4   : > { %v11737_v50 = vpop.eup %11736  ;;  %10291 = vmatmul.mubr.bf16.gmra.mrb[72].mxu1 %v5889_v33  ;;  %10323 = vmatpush3.bf16.msra.mxu0 %v14511_v59  ;;  %v4896_v48 = vpop.f32.mrb[21].mxu0  ;;  %11760 = vtanh.f32 %v5093_v35  ;;  %v5114_v17 = vadd.f32 %v10112_v22, %v14770_v25  ;;  %v14853_v22 = vld [vmem:[%s16310_s3 + $0x140] sm:$0xff]  }
 0x4c5   : > { %v11739_v44 = vpop.eup %11738  ;;  %10371 = vmatpush3.bf16.msra.mxu1 %v14511_v59  ;;  %10324 = vmatprep.subr.bf16.mxu0 %v14546_v8  ;;  %v4897_v23 = vadd.f32 %v14770_v25, %v4896_v48  ;;  %v5105_v61 = vpop.f32.mrb[21].mxu1  ;;  %11762 = vtanh.f32 %v4905_v2 }
 0x4c6   : > { %v11741_v39 = vpop.eup %11740  ;;  %v5628_v12 = vpack.c.bf16 %v11739_v44, %v11731_v43  ;;  %v10065_v21 = vpop.f32.mrb[22].mxu0  ;;  %10372 = vmatprep.subr.bf16.mxu1 %v14546_v8  ;;  %v5106_v30 = vadd.f32 %v14770_v25, %v5105_v61  ;;  %11764 = vtanh.f32 %v5114_v17 }
 0x4c7   : > { %v11743_v58 = vpop.eup %11742  ;;  %v5891_v33 = vpack.c.bf16 %v11741_v39, %v11733_v5  ;;  %v4908_v59 = vadd.f32 %v10065_v21, %v14770_v25  ;;  %v10113_v24 = vpop.f32.mrb[22].mxu1  ;;  %11766 = vtanh.f32 %v4897_v23 }
 0x4c8   : > { %v4899_v34 = vpop.f32.mrb[23].mxu0  ;;  %v11745_v28 = vpop.eup %11744  ;;  %v5117_v26 = vadd.f32 %v10113_v24, %v14770_v25  ;;  %v5627_v60 = vpack.c.bf16 %v11743_v58, %v11735_v57  ;;  %10325 = vmatpush3.bf16.msra.mxu0 %v14546_v8  ;;  %11768 = vtanh.f32 %v5106_v30 }
 0x4c9   : > { %v5108_v18 = vpop.f32.mrb[23].mxu1  ;;  %v14839_v9 = vpop.eup %11746  ;;  %v4900_v43 = vadd.f32 %v14770_v25, %v4899_v34  ;;  %v5890_v10 = vpack.c.bf16 %v11745_v28, %v11737_v50  ;;  %10373 = vmatpush3.bf16.msra.mxu1 %v14546_v8  ;;  %10326 = vmatprep.subr.bf16.mxu0 %v14649_v47  ;;  %11770 = vtanh.f32 %v4908_v59 }
 0x4ca   : > { %v11749_v53 = vpop.eup %11748  ;;  %v5109_v5 = vadd.f32 %v14770_v25, %v5108_v18  ;;  %10246 = vmatprep.mubr.bf16.mxu0 %v5627_v60  ;;  %10374 = vmatprep.subr.bf16.mxu1 %v14649_v47  ;;  %11772 = vtanh.f32 %v5117_v26  ;;  %v10068_v32 = vpop.f32.mrb[24].mxu0 }
 0x4cb   : > { %v11751_v35 = vpop.eup %11750  ;;  %10294 = vmatprep.mubr.bf16.mxu1 %v5890_v10  ;;  %10247 = vmatmul.mubr.bf16.gmra.mrb[76].mxu0 %v5628_v12  ;;  %11774 = vtanh.f32 %v4900_v43  ;;  %v4921_v50 = vadd.f32 %v10068_v32, %v14770_v25  ;;  %v10116_v44 = vpop.f32.mrb[24].mxu1 }
 0x4cc   : > { %v11753_v57 = vpop.eup %11752  ;;  %10295 = vmatmul.mubr.bf16.gmra.mrb[76].mxu1 %v5891_v33  ;;  %10327 = vmatpush3.bf16.msra.mxu0 %v14649_v47  ;;  %v4912_v2 = vpop.f32.mrb[25].mxu0  ;;  %11776 = vtanh.f32 %v5109_v5  ;;  %v5130_v12 = vadd.f32 %v10116_v44, %v14770_v25 }
 0x4cd   : > { %v11755_v8 = vpop.eup %11754  ;;  %10375 = vmatpush3.bf16.msra.mxu1 %v14649_v47  ;;  %10328 = vmatprep.subr.bf16.mxu0 %v14684_v37  ;;  %v4913_v17 = vadd.f32 %v14770_v25, %v4912_v2  ;;  %v5121_v23 = vpop.f32.mrb[25].mxu1  ;;  %11778 = vtanh.f32 %v4921_v50 }
 0x4ce   : > { %v11757_v48 = vpop.eup %11756  ;;  %v5630_v39 = vpack.c.bf16 %v11755_v8, %v14839_v9  ;;  %v10069_v61 = vpop.f32.mrb[26].mxu0  ;;  %10376 = vmatprep.subr.bf16.mxu1 %v14684_v37  ;;  %v5122_v58 = vadd.f32 %v14770_v25, %v5121_v23  ;;  %11780 = vtanh.f32 %v5130_v12 }
 0x4cf   : > { %v11759_v47 = vpop.eup %11758  ;;  %v5893_v21 = vpack.c.bf16 %v11757_v48, %v11749_v53  ;;  %v4924_v33 = vadd.f32 %v10069_v61, %v14770_v25  ;;  %v10117_v30 = vpop.f32.mrb[26].mxu1  ;;  %11782 = vtanh.f32 %v4913_v17 }
 0x4d0   : > { %v4915_v59 = vpop.f32.mrb[27].mxu0  ;;  %v11761_v24 = vpop.eup %11760  ;;  %v5133_v34 = vadd.f32 %v10117_v30, %v14770_v25  ;;  %v5629_v26 = vpack.c.bf16 %v11759_v47, %v11751_v35  ;;  %10329 = vmatpush3.bf16.msra.mxu0 %v14684_v37  ;;  %11784 = vtanh.f32 %v5122_v58 }
 0x4d1   : > { %v5124_v28 = vpop.f32.mrb[27].mxu1  ;;  %v11763_v18 = vpop.eup %11762  ;;  %v4916_v60 = vadd.f32 %v14770_v25, %v4915_v59  ;;  %v5892_v9 = vpack.c.bf16 %v11761_v24, %v11753_v57  ;;  %10377 = vmatpush3.bf16.msra.mxu1 %v14684_v37  ;;  %10410 = vmatprep.subr.bf16.mxu0 %v14853_v22  ;;  %11786 = vtanh.f32 %v4924_v33 }
 0x4d2   : > { %v11765_v43 = vpop.eup %11764  ;;  %v5125_v10 = vadd.f32 %v14770_v25, %v5124_v28  ;;  %10250 = vmatprep.mubr.bf16.mxu0 %v5629_v26  ;;  %10458 = vmatprep.subr.bf16.mxu1 %v14853_v22  ;;  %11788 = vtanh.f32 %v5133_v34  ;;  %v10072_v35 = vpop.f32.mrb[28].mxu0 }
 0x4d3   : > { %v11767_v53 = vpop.eup %11766  ;;  %10298 = vmatprep.mubr.bf16.mxu1 %v5892_v9  ;;  %10251 = vmatmul.mubr.bf16.gmra.mrb[80].mxu0 %v5630_v39  ;;  %11790 = vtanh.f32 %v4916_v60  ;;  %v4937_v37 = vadd.f32 %v10072_v35, %v14770_v25  ;;  %v10120_v32 = vpop.f32.mrb[28].mxu1 }
 0x4d4   : > { %v11769_v5 = vpop.eup %11768  ;;  %10299 = vmatmul.mubr.bf16.gmra.mrb[80].mxu1 %v5893_v21  ;;  %v4928_v8 = vpop.f32.mrb[29].mxu0  ;;  %11792 = vtanh.f32 %v5125_v10  ;;  %v5146_v2 = vadd.f32 %v10120_v32, %v14770_v25 }
 0x4d5   : > { %v11771_v57 = vpop.eup %11770  ;;  %v4929_v48 = vadd.f32 %v14770_v25, %v4928_v8  ;;  %v5137_v12 = vpop.f32.mrb[29].mxu1  ;;  %11794 = vtanh.f32 %v4937_v37 }
 0x4d6   : > { %v11773_v50 = vpop.eup %11772  ;;  %v5632_v44 = vpack.c.bf16 %v11771_v57, %v11763_v18  ;;  %v10073_v17 = vpop.f32.mrb[30].mxu0  ;;  %v5138_v61 = vadd.f32 %v14770_v25, %v5137_v12  ;;  %11796 = vtanh.f32 %v5146_v2 }
 0x4d7   : > { %v11775_v39 = vpop.eup %11774  ;;  %v5895_v23 = vpack.c.bf16 %v11773_v50, %v11765_v43  ;;  %v4940_v47 = vadd.f32 %v10073_v17, %v14770_v25  ;;  %v10121_v21 = vpop.f32.mrb[30].mxu1  ;;  %11798 = vtanh.f32 %v4929_v48 }
 0x4d8   : > { %v4931_v58 = vpop.f32.mrb[31].mxu0  ;;  %v11777_v33 = vpop.eup %11776  ;;  %v5149_v30 = vadd.f32 %v10121_v21, %v14770_v25  ;;  %v5631_v24 = vpack.c.bf16 %v11775_v39, %v11767_v53  ;;  %11800 = vtanh.f32 %v5138_v61 }
 0x4d9   : > { %v5140_v59 = vpop.f32.mrb[31].mxu1  ;;  %v11779_v34 = vpop.eup %11778  ;;  %v4932_v28 = vadd.f32 %v14770_v25, %v4931_v58  ;;  %v5894_v26 = vpack.c.bf16 %v11777_v33, %v11769_v5  ;;  %11802 = vtanh.f32 %v4940_v47 }
 0x4da   : > { %v11781_v18 = vpop.eup %11780  ;;  %v5141_v60 = vadd.f32 %v14770_v25, %v5140_v59  ;;  %10254 = vmatprep.mubr.bf16.mxu0 %v5631_v24  ;;  %11804 = vtanh.f32 %v5149_v30  ;;  %v10140_v10 = vpop.f32.mrb[32].mxu0 }
 0x4db   : > { %v11783_v9 = vpop.eup %11782  ;;  %10302 = vmatprep.mubr.bf16.mxu1 %v5894_v26  ;;  %10255 = vmatmul.mubr.bf16.gmra.mrb[84].mxu0 %v5632_v44  ;;  %11806 = vtanh.f32 %v4932_v28  ;;  %v5243_v53 = vadd.f32 %v10140_v10, %v14770_v25  ;;  %v10188_v57 = vpop.f32.mrb[32].mxu1 }
 0x4dc   : > { %v11785_v43 = vpop.eup %11784  ;;  %10303 = vmatmul.mubr.bf16.gmra.mrb[84].mxu1 %v5895_v23  ;;  %v5234_v37 = vpop.f32.mrb[33].mxu0  ;;  %11808 = vtanh.f32 %v5141_v60  ;;  %v5452_v8 = vadd.f32 %v10188_v57, %v14770_v25 }
 0x4dd   : > { %v11787_v35 = vpop.eup %11786  ;;  %v5235_v50 = vadd.f32 %v14770_v25, %v5234_v37  ;;  %v5443_v2 = vpop.f32.mrb[33].mxu1  ;;  %11810 = vtanh.f32 %v5243_v53 }
 0x4de   : > { %v11789_v5 = vpop.eup %11788  ;;  %v5634_v32 = vpack.c.bf16 %v11787_v35, %v11779_v34  ;;  %v10141_v48 = vpop.f32.mrb[34].mxu0  ;;  %v5444_v17 = vadd.f32 %v14770_v25, %v5443_v2  ;;  %11812 = vtanh.f32 %v5452_v8 }
 0x4df   : > { %v11791_v44 = vpop.eup %11790  ;;  %v5897_v12 = vpack.c.bf16 %v11789_v5, %v11781_v18  ;;  %v5246_v39 = vadd.f32 %v10141_v48, %v14770_v25  ;;  %v10189_v23 = vpop.f32.mrb[34].mxu1  ;;  %11814 = vtanh.f32 %v5235_v50 }
 0x4e0   : > { %v5237_v61 = vpop.f32.mrb[35].mxu0  ;;  %v11793_v47 = vpop.eup %11792  ;;  %v5455_v21 = vadd.f32 %v10189_v23, %v14770_v25  ;;  %v5633_v33 = vpack.c.bf16 %v11791_v44, %v11783_v9  ;;  %11816 = vtanh.f32 %v5444_v17 }
 0x4e1   : > { %v5446_v58 = vpop.f32.mrb[35].mxu1  ;;  %v11795_v30 = vpop.eup %11794  ;;  %v5238_v59 = vadd.f32 %v14770_v25, %v5237_v61  ;;  %v5896_v24 = vpack.c.bf16 %v11793_v47, %v11785_v43  ;;  %11818 = vtanh.f32 %v5246_v39 }
 0x4e2   : > { %v11797_v34 = vpop.eup %11796  ;;  %v5447_v28 = vadd.f32 %v14770_v25, %v5446_v58  ;;  %10258 = vmatprep.mubr.bf16.mxu0 %v5633_v33  ;;  %11820 = vtanh.f32 %v5455_v21  ;;  %v10144_v60 = vpop.f32.mrb[36].mxu0 }
 0x4e3   : > { %v11799_v26 = vpop.eup %11798  ;;  %10306 = vmatprep.mubr.bf16.mxu1 %v5896_v24  ;;  %10259 = vmatmul.mubr.bf16.gmra.mrb[88].mxu0 %v5634_v32  ;;  %11822 = vtanh.f32 %v5238_v59  ;;  %v5259_v9 = vadd.f32 %v10144_v60, %v14770_v25  ;;  %v10192_v35 = vpop.f32.mrb[36].mxu1 }
 0x4e4   : > { %v11801_v18 = vpop.eup %11800  ;;  %10307 = vmatmul.mubr.bf16.gmra.mrb[88].mxu1 %v5897_v12  ;;  %v5250_v53 = vpop.f32.mrb[37].mxu0  ;;  %11824 = vtanh.f32 %v5447_v28  ;;  %v5468_v37 = vadd.f32 %v10192_v35, %v14770_v25 }
 0x4e5   : > { %v11803_v10 = vpop.eup %11802  ;;  %v5251_v5 = vadd.f32 %v14770_v25, %v5250_v53  ;;  %v5459_v8 = vpop.f32.mrb[37].mxu1  ;;  %11826 = vtanh.f32 %v5259_v9 }
 0x4e6   : > { %v11805_v43 = vpop.eup %11804  ;;  %v5636_v57 = vpack.c.bf16 %v11803_v10, %v11795_v30  ;;  %v10145_v50 = vpop.f32.mrb[38].mxu0  ;;  %v5460_v48 = vadd.f32 %v14770_v25, %v5459_v8  ;;  %11828 = vtanh.f32 %v5468_v37 }
 0x4e7   : > { %v11807_v32 = vpop.eup %11806  ;;  %v5899_v2 = vpack.c.bf16 %v11805_v43, %v11797_v34  ;;  %v5262_v44 = vadd.f32 %v10145_v50, %v14770_v25  ;;  %v10193_v12 = vpop.f32.mrb[38].mxu1  ;;  %11830 = vtanh.f32 %v5251_v5 }
 0x4e8   : > { %v5253_v17 = vpop.f32.mrb[39].mxu0  ;;  %v11809_v39 = vpop.eup %11808  ;;  %v5471_v23 = vadd.f32 %v10193_v12, %v14770_v25  ;;  %v5635_v47 = vpack.c.bf16 %v11807_v32, %v11799_v26  ;;  %11832 = vtanh.f32 %v5460_v48 }
 0x4e9   : > { %v5462_v61 = vpop.f32.mrb[39].mxu1  ;;  %v11811_v21 = vpop.eup %11810  ;;  %v5254_v58 = vadd.f32 %v14770_v25, %v5253_v17  ;;  %v5898_v33 = vpack.c.bf16 %v11809_v39, %v11801_v18  ;;  %11834 = vtanh.f32 %v5262_v44 }
 0x4ea   : > { %v11813_v30 = vpop.eup %11812  ;;  %v5463_v59 = vadd.f32 %v14770_v25, %v5462_v61  ;;  %10262 = vmatprep.mubr.bf16.mxu0 %v5635_v47  ;;  %11836 = vtanh.f32 %v5471_v23  ;;  %v10148_v28 = vpop.f32.mrb[40].mxu0 }
 0x4eb   : > { %v11815_v24 = vpop.eup %11814  ;;  %10310 = vmatprep.mubr.bf16.mxu1 %v5898_v33  ;;  %10263 = vmatmul.mubr.bf16.gmra.mrb[92].mxu0 %v5636_v57  ;;  %11838 = vtanh.f32 %v5254_v58  ;;  %v5275_v26 = vadd.f32 %v10148_v28, %v14770_v25  ;;  %v10196_v10 = vpop.f32.mrb[40].mxu1 }
 0x4ec   : > { %v11817_v34 = vpop.eup %11816  ;;  %10311 = vmatmul.mubr.bf16.gmra.mrb[92].mxu1 %v5899_v2  ;;  %v5266_v9 = vpop.f32.mrb[41].mxu0  ;;  %11840 = vtanh.f32 %v5463_v59  ;;  %v5484_v53 = vadd.f32 %v10196_v10, %v14770_v25  ;;  %v14912_v10 = vld [vmem:[%s16310_s3 + $0x150] sm:$0xff]  }
 0x4ed   : > { %v11819_v60 = vpop.eup %11818  ;;  %v5267_v43 = vadd.f32 %v14770_v25, %v5266_v9  ;;  %v5475_v37 = vpop.f32.mrb[41].mxu1  ;;  %11842 = vtanh.f32 %v5275_v26 }
 0x4ee   : > { %v11821_v18 = vpop.eup %11820  ;;  %v6094_v35 = vpack.c.bf16 %v11819_v60, %v11811_v21  ;;  %v10149_v5 = vpop.f32.mrb[42].mxu0  ;;  %v5476_v50 = vadd.f32 %v14770_v25, %v5475_v37  ;;  %11844 = vtanh.f32 %v5484_v53  ;;  %v14902_v21 = vld [vmem:[%s16310_s3 + $0x148] sm:$0xff]  }
 0x4ef   : > { %v11823_v57 = vpop.eup %11822  ;;  %v6303_v8 = vpack.c.bf16 %v11821_v18, %v11813_v30  ;;  %v5278_v32 = vadd.f32 %v10149_v5, %v14770_v25  ;;  %v10197_v2 = vpop.f32.mrb[42].mxu1  ;;  %11846 = vtanh.f32 %v5267_v43 }
 0x4f0   : > { %v5269_v48 = vpop.f32.mrb[43].mxu0  ;;  %v11825_v44 = vpop.eup %11824  ;;  %v5487_v12 = vadd.f32 %v10197_v2, %v14770_v25  ;;  %v6093_v39 = vpack.c.bf16 %v11823_v57, %v11815_v24  ;;  %11848 = vtanh.f32 %v5476_v50 }
 0x4f1   : > { %v5478_v17 = vpop.f32.mrb[43].mxu1  ;;  %v11827_v23 = vpop.eup %11826  ;;  %v5270_v61 = vadd.f32 %v14770_v25, %v5269_v48  ;;  %v6302_v47 = vpack.c.bf16 %v11825_v44, %v11817_v34  ;;  %11850 = vtanh.f32 %v5278_v32 }
 0x4f2   : > { %v11829_v58 = vpop.eup %11828  ;;  %v5479_v33 = vadd.f32 %v14770_v25, %v5478_v17  ;;  %10330 = vmatprep.mubr.bf16.mxu0 %v6093_v39  ;;  %11852 = vtanh.f32 %v5487_v12  ;;  %v10152_v24 = vpop.f32.mrb[44].mxu0 }
 0x4f3   : > { %v11831_v30 = vpop.eup %11830  ;;  %10378 = vmatprep.mubr.bf16.mxu1 %v6302_v47  ;;  %10331 = vmatmul.mubr.bf16.vlgmr.msra.gmra.mrb[96].mxu0 %v6094_v35  ;;  %11854 = vtanh.f32 %v5270_v61  ;;  %v5291_v28 = vadd.f32 %v10152_v24, %v14770_v25  ;;  %v10200_v60 = vpop.f32.mrb[44].mxu1  ;;  %v14929_v47 = vld [vmem:[%s16310_s3 + $0x158] sm:$0xff]  }
 0x4f4   : > { %v11833_v59 = vpop.eup %11832  ;;  %10379 = vmatmul.mubr.bf16.vlgmr.msra.gmra.mrb[96].mxu1 %v6303_v8  ;;  %10411 = vmatpush3.bf16.msra.mxu0 %v14853_v22  ;;  %v5282_v26 = vpop.f32.mrb[45].mxu0  ;;  %11856 = vtanh.f32 %v5479_v33  ;;  %v5500_v35 = vadd.f32 %v10200_v60, %v14770_v25 }
 0x4f5   : > { %v11835_v34 = vpop.eup %11834  ;;  %10459 = vmatpush3.bf16.msra.mxu1 %v14853_v22  ;;  %10412 = vmatprep.subr.bf16.mxu0 %v14902_v21  ;;  %v5283_v53 = vadd.f32 %v14770_v25, %v5282_v26  ;;  %v5491_v43 = vpop.f32.mrb[45].mxu1  ;;  %11858 = vtanh.f32 %v5291_v28 }
 0x4f6   : > { %v11837_v9 = vpop.eup %11836  ;;  %v6096_v18 = vpack.c.bf16 %v11835_v34, %v11827_v23  ;;  %v10153_v37 = vpop.f32.mrb[46].mxu0  ;;  %10460 = vmatprep.subr.bf16.mxu1 %v14902_v21  ;;  %v5492_v8 = vadd.f32 %v14770_v25, %v5491_v43  ;;  %11860 = vtanh.f32 %v5500_v35 }
 0x4f7   : > { %v11839_v5 = vpop.eup %11838  ;;  %v6305_v57 = vpack.c.bf16 %v11837_v9, %v11829_v58  ;;  %v5294_v50 = vadd.f32 %v10153_v37, %v14770_v25  ;;  %v10201_v32 = vpop.f32.mrb[46].mxu1  ;;  %11862 = vtanh.f32 %v5283_v53  ;;  %v14940_v9 = vld [vmem:[%s16310_s3 + $0x160] sm:$0xff]  }
 0x4f8   : > { %v5285_v2 = vpop.f32.mrb[47].mxu0  ;;  %v11841_v48 = vpop.eup %11840  ;;  %v5503_v44 = vadd.f32 %v10201_v32, %v14770_v25  ;;  %v6095_v17 = vpack.c.bf16 %v11839_v5, %v11831_v30  ;;  %10413 = vmatpush3.bf16.msra.mxu0 %v14902_v21  ;;  %11864 = vtanh.f32 %v5492_v8 }
 0x4f9   : > { %v5494_v12 = vpop.f32.mrb[47].mxu1  ;;  %v14921_v39 = vpop.eup %11842  ;;  %v5286_v23 = vadd.f32 %v14770_v25, %v5285_v2  ;;  %v6304_v61 = vpack.c.bf16 %v11841_v48, %v11833_v59  ;;  %10461 = vmatpush3.bf16.msra.mxu1 %v14902_v21  ;;  %10414 = vmatprep.subr.bf16.mxu0 %v14912_v10  ;;  %11866 = vtanh.f32 %v5294_v50  ;;  %v14949_v50 = vld [vmem:[%s16311_s4 + $0x3] ss:$0 sm:$0xff] }
 0x4fa   : > { %v11845_v58 = vpop.eup %11844  ;;  %v5495_v33 = vadd.f32 %v14770_v25, %v5494_v12  ;;  %10334 = vmatprep.mubr.bf16.mxu0 %v6095_v17  ;;  %10462 = vmatprep.subr.bf16.mxu1 %v14912_v10  ;;  %11868 = vtanh.f32 %v5503_v44  ;;  %v10156_v24 = vpop.f32.mrb[48].mxu0 }
 0x4fb   : > { %v11847_v30 = vpop.eup %11846  ;;  %10382 = vmatprep.mubr.bf16.mxu1 %v6304_v61  ;;  %10335 = vmatmul.mubr.bf16.gmra.mrb[100].mxu0 %v6096_v18  ;;  %11870 = vtanh.f32 %v5286_v23  ;;  %v5307_v28 = vadd.f32 %v10156_v24, %v14770_v25  ;;  %v10204_v60 = vpop.f32.mrb[48].mxu1 }
 0x4fc   : > { %v11849_v59 = vpop.eup %11848  ;;  %10383 = vmatmul.mubr.bf16.gmra.mrb[100].mxu1 %v6305_v57  ;;  %10415 = vmatpush3.bf16.msra.mxu0 %v14912_v10  ;;  %v5298_v26 = vpop.f32.mrb[49].mxu0  ;;  %11872 = vtanh.f32 %v5495_v33  ;;  %v5516_v53 = vadd.f32 %v10204_v60, %v14770_v25  ;;  %v14961_v33 = vld [vmem:[%s16310_s3 + $0x168] sm:$0xff]  }
 0x4fd   : > { %v11851_v34 = vpop.eup %11850  ;;  %10463 = vmatpush3.bf16.msra.mxu1 %v14912_v10  ;;  %10416 = vmatprep.subr.bf16.mxu0 %v14929_v47  ;;  %v5299_v43 = vadd.f32 %v14770_v25, %v5298_v26  ;;  %v5507_v37 = vpop.f32.mrb[49].mxu1  ;;  %11874 = vtanh.f32 %v5307_v28 }
 0x4fe   : > { %v11853_v18 = vpop.eup %11852  ;;  %v6098_v35 = vpack.c.bf16 %v11851_v34, %v14921_v39  ;;  %v10157_v5 = vpop.f32.mrb[50].mxu0  ;;  %10464 = vmatprep.subr.bf16.mxu1 %v14929_v47  ;;  %v5508_v32 = vadd.f32 %v14949_v50, %v5507_v37  ;;  %11876 = vtanh.f32 %v5516_v53 }
 0x4ff   : > { %v11855_v57 = vpop.eup %11854  ;;  %v6307_v8 = vpack.c.bf16 %v11853_v18, %v11845_v58  ;;  %v5310_v2 = vadd.f32 %v14949_v50, %v10157_v5  ;;  %v10205_v48 = vpop.f32.mrb[50].mxu1  ;;  %11878 = vtanh.f32 %v5299_v43 }
 0x500   : > { %v5301_v44 = vpop.f32.mrb[51].mxu0  ;;  %v11857_v12 = vpop.eup %11856  ;;  %v5519_v25 = vadd.f32 %v14949_v50, %v10205_v48  ;;  %v6097_v39 = vpack.c.bf16 %v11855_v57, %v11847_v30  ;;  %10417 = vmatpush3.bf16.msra.mxu0 %v14929_v47  ;;  %11880 = vtanh.f32 %v5508_v32 }
 0x501   : > { %v5510_v17 = vpop.f32.mrb[51].mxu1  ;;  %v11859_v23 = vpop.eup %11858  ;;  %v5302_v61 = vadd.f32 %v14949_v50, %v5301_v44  ;;  %v6306_v58 = vpack.c.bf16 %v11857_v12, %v11849_v59  ;;  %10465 = vmatpush3.bf16.msra.mxu1 %v14929_v47  ;;  %10418 = vmatprep.subr.bf16.mxu0 %v14940_v9  ;;  %11882 = vtanh.f32 %v5310_v2 }
 0x502   : > { %v11861_v24 = vpop.eup %11860  ;;  %v5511_v30 = vadd.f32 %v14949_v50, %v5510_v17  ;;  %10338 = vmatprep.mubr.bf16.mxu0 %v6097_v39  ;;  %10466 = vmatprep.subr.bf16.mxu1 %v14940_v9  ;;  %11884 = vtanh.f32 %v5519_v25  ;;  %v10160_v28 = vpop.f32.mrb[52].mxu0 }
 0x503   : > { %v11863_v34 = vpop.eup %11862  ;;  %10386 = vmatprep.mubr.bf16.mxu1 %v6306_v58  ;;  %10339 = vmatmul.mubr.bf16.gmra.mrb[104].mxu0 %v6098_v35  ;;  %11886 = vtanh.f32 %v5302_v61  ;;  %v5323_v26 = vadd.f32 %v14949_v50, %v10160_v28  ;;  %v10208_v18 = vpop.f32.mrb[52].mxu1 }
 0x504   : > { %v11865_v59 = vpop.eup %11864  ;;  %10387 = vmatmul.mubr.bf16.gmra.mrb[104].mxu1 %v6307_v8  ;;  %10419 = vmatpush3.bf16.msra.mxu0 %v14940_v9  ;;  %v5314_v53 = vpop.f32.mrb[53].mxu0  ;;  %11888 = vtanh.f32 %v5511_v30  ;;  %v5532_v35 = vadd.f32 %v14949_v50, %v10208_v18 }
 0x505   : > { %v11867_v60 = vpop.eup %11866  ;;  %10467 = vmatpush3.bf16.msra.mxu1 %v14940_v9  ;;  %10420 = vmatprep.subr.bf16.mxu0 %v14961_v33  ;;  %v5315_v5 = vadd.f32 %v14949_v50, %v5314_v53  ;;  %v5523_v57 = vpop.f32.mrb[53].mxu1  ;;  %11890 = vtanh.f32 %v5323_v26 }
 0x506   : > { %v11869_v43 = vpop.eup %11868  ;;  %v6100_v37 = vpack.c.bf16 %v11867_v60, %v11859_v23  ;;  %v10161_v8 = vpop.f32.mrb[54].mxu0  ;;  %10468 = vmatprep.subr.bf16.mxu1 %v14961_v33  ;;  %v5524_v48 = vadd.f32 %v14949_v50, %v5523_v57  ;;  %11892 = vtanh.f32 %v5532_v35 }
 0x507   : > { %v11871_v32 = vpop.eup %11870  ;;  %v6309_v2 = vpack.c.bf16 %v11869_v43, %v11861_v24  ;;  %v5326_v44 = vadd.f32 %v14949_v50, %v10161_v8  ;;  %v10209_v12 = vpop.f32.mrb[54].mxu1  ;;  %11894 = vtanh.f32 %v5315_v5 }
 0x508   : > { %v5317_v25 = vpop.f32.mrb[55].mxu0  ;;  %v11873_v17 = vpop.eup %11872  ;;  %v5535_v39 = vadd.f32 %v14949_v50, %v10209_v12  ;;  %v6099_v61 = vpack.c.bf16 %v11871_v32, %v11863_v34  ;;  %10421 = vmatpush3.bf16.msra.mxu0 %v14961_v33  ;;  %11896 = vtanh.f32 %v5524_v48 }
 0x509   : > { %v5526_v23 = vpop.f32.mrb[55].mxu1  ;;  %v11875_v58 = vpop.eup %11874  ;;  %v5318_v30 = vadd.f32 %v14949_v50, %v5317_v25  ;;  %v6308_v24 = vpack.c.bf16 %v11873_v17, %v11865_v59  ;;  %10469 = vmatpush3.bf16.msra.mxu1 %v14961_v33  ;;  %11898 = vtanh.f32 %v5326_v44 }
 0x50a   : > { %v11877_v28 = vpop.eup %11876  ;;  %v5527_v60 = vadd.f32 %v14949_v50, %v5526_v23  ;;  %10342 = vmatprep.mubr.bf16.mxu0 %v6099_v61  ;;  %11900 = vtanh.f32 %v5535_v39  ;;  %v10164_v34 = vpop.f32.mrb[56].mxu0 }
 0x50b   : > { %v11879_v26 = vpop.eup %11878  ;;  %10390 = vmatprep.mubr.bf16.mxu1 %v6308_v24  ;;  %10343 = vmatmul.mubr.bf16.gmra.mrb[108].mxu0 %v6100_v37  ;;  %11902 = vtanh.f32 %v5318_v30  ;;  %v5339_v43 = vadd.f32 %v14949_v50, %v10164_v34  ;;  %v10212_v59 = vpop.f32.mrb[56].mxu1 }
 0x50c   : > { %v11881_v18 = vpop.eup %11880  ;;  %10391 = vmatmul.mubr.bf16.gmra.mrb[108].mxu1 %v6309_v2  ;;  %v5330_v35 = vpop.f32.mrb[57].mxu0  ;;  %11904 = vtanh.f32 %v5527_v60  ;;  %v5548_v8 = vadd.f32 %v14949_v50, %v10212_v59 }
 0x50d   : > { %v11883_v53 = vpop.eup %11882  ;;  %v5331_v32 = vadd.f32 %v14949_v50, %v5330_v35  ;;  %v5539_v48 = vpop.f32.mrb[57].mxu1  ;;  %11906 = vtanh.f32 %v5339_v43 }
 0x50e   : > { %v11885_v5 = vpop.eup %11884  ;;  %v6102_v57 = vpack.c.bf16 %v11883_v53, %v11875_v58  ;;  %v10165_v44 = vpop.f32.mrb[58].mxu0  ;;  %v5540_v2 = vadd.f32 %v14949_v50, %v5539_v48  ;;  %11908 = vtanh.f32 %v5548_v8 }
 0x50f   : > { %v11887_v37 = vpop.eup %11886  ;;  %v6311_v12 = vpack.c.bf16 %v11885_v5, %v11877_v28  ;;  %v5342_v25 = vadd.f32 %v14949_v50, %v10165_v44  ;;  %v10213_v17 = vpop.f32.mrb[58].mxu1  ;;  %11910 = vtanh.f32 %v5331_v32 }
 0x510   : > { %v5333_v39 = vpop.f32.mrb[59].mxu0  ;;  %v11889_v23 = vpop.eup %11888  ;;  %v5551_v61 = vadd.f32 %v14949_v50, %v10213_v17  ;;  %v6101_v30 = vpack.c.bf16 %v11887_v37, %v11879_v26  ;;  %11912 = vtanh.f32 %v5540_v2  ;;  %v14990_v26 = vld [vmem:[%s16310_s3 + $0x170] sm:$0xff]  }
 0x511   : > { %v5542_v58 = vpop.f32.mrb[59].mxu1  ;;  %v11891_v24 = vpop.eup %11890  ;;  %v5334_v60 = vadd.f32 %v14949_v50, %v5333_v39  ;;  %v6310_v34 = vpack.c.bf16 %v11889_v23, %v11881_v18  ;;  %11914 = vtanh.f32 %v5342_v25  ;;  %10422 = vmatprep.subr.bf16.mxu0 %v14990_v26  ;;  %10470 = vmatprep.subr.bf16.mxu1 %v14990_v26 }
 0x512   : > { %v11893_v53 = vpop.eup %11892  ;;  %v5543_v28 = vadd.f32 %v14949_v50, %v5542_v58  ;;  %10346 = vmatprep.mubr.bf16.mxu0 %v6101_v30  ;;  %11916 = vtanh.f32 %v5551_v61  ;;  %v10168_v35 = vpop.f32.mrb[60].mxu0  ;;  %10423 = vmatpush3.bf16.msra.mxu0 %v14990_v26 }
 0x513   : > { %v11895_v43 = vpop.eup %11894  ;;  %10394 = vmatprep.mubr.bf16.mxu1 %v6310_v34  ;;  %10347 = vmatmul.mubr.bf16.gmra.mrb[112].mxu0 %v6102_v57  ;;  %11918 = vtanh.f32 %v5334_v60  ;;  %v5355_v18 = vadd.f32 %v14949_v50, %v10168_v35  ;;  %v10216_v8 = vpop.f32.mrb[60].mxu1 }
 0x514   : > { %v11897_v59 = vpop.eup %11896  ;;  %10395 = vmatmul.mubr.bf16.gmra.mrb[112].mxu1 %v6311_v12  ;;  %v5346_v32 = vpop.f32.mrb[61].mxu0  ;;  %11920 = vtanh.f32 %v5543_v28  ;;  %v5564_v57 = vadd.f32 %v14949_v50, %v10216_v8 }
 0x515   : > { %v11899_v5 = vpop.eup %11898  ;;  %v5347_v37 = vadd.f32 %v14949_v50, %v5346_v32  ;;  %v5555_v12 = vpop.f32.mrb[61].mxu1  ;;  %11922 = vtanh.f32 %v5355_v18  ;;  %10471 = vmatpush3.bf16.msra.mxu1 %v14990_v26 }
 0x516   : > { %v11901_v48 = vpop.eup %11900  ;;  %v6104_v44 = vpack.c.bf16 %v11899_v5, %v11891_v24  ;;  %v10169_v2 = vpop.f32.mrb[62].mxu0  ;;  %v5556_v39 = vadd.f32 %v14949_v50, %v5555_v12  ;;  %11924 = vtanh.f32 %v5564_v57 }
 0x517   : > { %v11903_v25 = vpop.eup %11902  ;;  %v6313_v17 = vpack.c.bf16 %v11901_v48, %v11893_v53  ;;  %v5358_v23 = vadd.f32 %v14949_v50, %v10169_v2  ;;  %v10217_v61 = vpop.f32.mrb[62].mxu1  ;;  %v15005_v53 = vld [vmem:[%s16310_s3 + $0x178] sm:$0xff]   ;;  %11926 = vtanh.f32 %v5347_v37 }
 0x518   : > { %v5349_v58 = vpop.f32.mrb[63].mxu0  ;;  %v11905_v30 = vpop.eup %11904  ;;  %v5567_v24 = vadd.f32 %v14949_v50, %v10217_v61  ;;  %v6103_v34 = vpack.c.bf16 %v11903_v25, %v11895_v43  ;;  %11928 = vtanh.f32 %v5556_v39  ;;  %10424 = vmatprep.subr.bf16.mxu0 %v15005_v53  ;;  %10472 = vmatprep.subr.bf16.mxu1 %v15005_v53 }
 0x519   : > { %v5558_v60 = vpop.f32.mrb[63].mxu1  ;;  %v11907_v28 = vpop.eup %11906  ;;  %v5350_v35 = vadd.f32 %v14949_v50, %v5349_v58  ;;  %v6312_v5 = vpack.c.bf16 %v11905_v30, %v11897_v59  ;;  %11930 = vtanh.f32 %v5358_v23  ;;  %10425 = vmatpush3.bf16.msra.mxu0 %v15005_v53  ;;  %10473 = vmatpush3.bf16.msra.mxu1 %v15005_v53 }
 0x51a   : > { %v11909_v18 = vpop.eup %11908  ;;  %v5559_v8 = vadd.f32 %v14949_v50, %v5558_v60  ;;  %10350 = vmatprep.mubr.bf16.mxu0 %v6103_v34  ;;  %11932 = vtanh.f32 %v5567_v24  ;;  %10506 = vmatprep.subr.bf16.mxu0 %v14853_v22 }
 0x51b   : > { %v11911_v32 = vpop.eup %11910  ;;  %10398 = vmatprep.mubr.bf16.mxu1 %v6312_v5  ;;  %10351 = vmatmul.mubr.bf16.gmra.mrb[116].mxu0 %v6104_v44  ;;  %11934 = vtanh.f32 %v5350_v35  ;;  %v15018_v35 = vld [vmem:[%s16311_s4 + $0x4] ss:$0 sm:$0xff] }
 0x51c   : > { %v11913_v43 = vpop.eup %11912  ;;  %10399 = vmatmul.mubr.bf16.gmra.mrb[116].mxu1 %v6313_v17  ;;  %11936 = vtanh.f32 %v5559_v8  ;;  %10554 = vmatprep.subr.bf16.mxu1 %v14853_v22 }
 0x51d   : > { %v11915_v48 = vpop.eup %11914 }
 0x51e   : > { %v11917_v59 = vpop.eup %11916  ;;  %v6106_v50 = vpack.c.bf16 %v11915_v48, %v11907_v28 }
 0x51f   : > { %v11919_v57 = vpop.eup %11918  ;;  %v6315_v44 = vpack.c.bf16 %v11917_v59, %v11909_v18 }
 0x520   : > { %v11921_v37 = vpop.eup %11920  ;;  %v6105_v12 = vpack.c.bf16 %v11919_v57, %v11911_v32 }
 0x521   : > { %v11923_v2 = vpop.eup %11922  ;;  %v6314_v25 = vpack.c.bf16 %v11921_v37, %v11913_v43 }
 0x522   : > { %v11925_v17 = vpop.eup %11924  ;;  %10354 = vmatprep.mubr.bf16.mxu0 %v6105_v12 }
 0x523   : > { %v11927_v39 = vpop.eup %11926  ;;  %10402 = vmatprep.mubr.bf16.mxu1 %v6314_v25  ;;  %10355 = vmatmul.mubr.bf16.gmra.mrb[120].mxu0 %v6106_v50 }
 0x524   : > { %v11929_v23 = vpop.eup %11928  ;;  %10403 = vmatmul.mubr.bf16.gmra.mrb[120].mxu1 %v6315_v44 }
 0x525   : > { %v11931_v61 = vpop.eup %11930 }
 0x526   : > { %v11933_v58 = vpop.eup %11932  ;;  %v6108_v30 = vpack.c.bf16 %v11931_v61, %v11923_v2 }
 0x527   : > { %v11935_v24 = vpop.eup %11934  ;;  %v6317_v60 = vpack.c.bf16 %v11933_v58, %v11925_v17 }
 0x528   : > { %v11937_v34 = vpop.eup %11936  ;;  %v6107_v22 = vpack.c.bf16 %v11935_v24, %v11927_v39 }
 0x529   : > { %v6316_v28 = vpack.c.bf16 %v11937_v34, %v11929_v23 }
 0x52a   : > { %10358 = vmatprep.mubr.bf16.mxu0 %v6107_v22 }
 0x52b   : > { %10406 = vmatprep.mubr.bf16.mxu1 %v6316_v28  ;;  %10359 = vmatmul.mubr.bf16.gmra.mrb[124].mxu0 %v6108_v30 }
 0x52c   : > { %10407 = vmatmul.mubr.bf16.gmra.mrb[124].mxu1 %v6317_v60 }
 0x584   : > { %v10236_v5 = vpop.f32.mrb[64].mxu0 }
 0x585   : > { %v5734_v18 = vadd.f32 %v10236_v5, %v15018_v35  ;;  %v5725_v32 = vpop.f32.mrb[65].mxu0 }
 0x586   : > { %v10284_v8 = vpop.f32.mrb[64].mxu1  ;;  %v5726_v48 = vadd.f32 %v15018_v35, %v5725_v32  ;;  %v10237_v50 = vpop.f32.mrb[66].mxu0 }
 0x587   : > { %v5943_v43 = vadd.f32 %v10284_v8, %v15018_v35  ;;  %v5934_v59 = vpop.f32.mrb[65].mxu1  ;;  %11938 = vtanh.f32 %v5734_v18  ;;  %v5737_v44 = vadd.f32 %v10237_v50, %v15018_v35  ;;  %v5728_v12 = vpop.f32.mrb[67].mxu0 }
 0x588   : > { %v5935_v57 = vadd.f32 %v15018_v35, %v5934_v59  ;;  %v10285_v37 = vpop.f32.mrb[66].mxu1  ;;  %v5729_v17 = vadd.f32 %v15018_v35, %v5728_v12 }
 0x589   : > { %11940 = vtanh.f32 %v5943_v43  ;;  %v5946_v2 = vadd.f32 %v10285_v37, %v15018_v35  ;;  %v5937_v25 = vpop.f32.mrb[67].mxu1 }
 0x58a   : > { %11942 = vtanh.f32 %v5726_v48  ;;  %v5938_v39 = vadd.f32 %v15018_v35, %v5937_v25 }
 0x58b   : > { %11944 = vtanh.f32 %v5935_v57 }
 0x58c   : > { %11946 = vtanh.f32 %v5737_v44 }
 0x58d   : > { %11948 = vtanh.f32 %v5946_v2  ;;  %v10240_v23 = vpop.f32.mrb[68].mxu0 }
 0x58e   : > { %11950 = vtanh.f32 %v5729_v17  ;;  %v5750_v61 = vadd.f32 %v10240_v23, %v15018_v35  ;;  %v5741_v30 = vpop.f32.mrb[69].mxu0 }
 0x58f   : > { %v10288_v58 = vpop.f32.mrb[68].mxu1  ;;  %11952 = vtanh.f32 %v5938_v39  ;;  %v5742_v60 = vadd.f32 %v15018_v35, %v5741_v30  ;;  %v10241_v22 = vpop.f32.mrb[70].mxu0 }
 0x590   : > { %v5959_v24 = vadd.f32 %v10288_v58, %v15018_v35  ;;  %v5950_v34 = vpop.f32.mrb[69].mxu1  ;;  %11954 = vtanh.f32 %v5750_v61  ;;  %v5753_v5 = vadd.f32 %v10241_v22, %v15018_v35  ;;  %v5744_v8 = vpop.f32.mrb[71].mxu0 }
 0x591   : > { %v5951_v28 = vadd.f32 %v15018_v35, %v5950_v34  ;;  %v10289_v18 = vpop.f32.mrb[70].mxu1  ;;  %v11939_v48 = vpop.eup %11938  ;;  %v5745_v59 = vadd.f32 %v15018_v35, %v5744_v8 }
 0x592   : > { %11956 = vtanh.f32 %v5959_v24  ;;  %v5962_v32 = vadd.f32 %v10289_v18, %v15018_v35  ;;  %v5953_v43 = vpop.f32.mrb[71].mxu1 }
 0x593   : > { %11958 = vtanh.f32 %v5742_v60  ;;  %v11941_v50 = vpop.eup %11940  ;;  %v5954_v57 = vadd.f32 %v15018_v35, %v5953_v43 }
 0x594   : > { %11960 = vtanh.f32 %v5951_v28  ;;  %v11943_v44 = vpop.eup %11942 }
 0x595   : > { %11962 = vtanh.f32 %v5753_v5  ;;  %v11945_v37 = vpop.eup %11944 }
 0x596   : > { %11964 = vtanh.f32 %v5962_v32  ;;  %v10244_v12 = vpop.f32.mrb[72].mxu0  ;;  %v11947_v2 = vpop.eup %11946 }
 0x597   : > { %11966 = vtanh.f32 %v5745_v59  ;;  %v5766_v25 = vadd.f32 %v10244_v12, %v15018_v35  ;;  %v10292_v17 = vpop.f32.mrb[72].mxu1  ;;  %v5757_v39 = vpop.f32.mrb[73].mxu0  ;;  %v6531_v61 = vpack.c.bf16 %v11947_v2, %v11939_v48 }
 0x598   : > { %v11949_v23 = vpop.eup %11948  ;;  %11968 = vtanh.f32 %v5954_v57  ;;  %v5975_v58 = vadd.f32 %v10292_v17, %v15018_v35  ;;  %v5758_v30 = vadd.f32 %v15018_v35, %v5757_v39  ;;  %v5966_v24 = vpop.f32.mrb[73].mxu1 }
 0x599   : > { %v10245_v60 = vpop.f32.mrb[74].mxu0  ;;  %v11951_v34 = vpop.eup %11950  ;;  %v6794_v22 = vpack.c.bf16 %v11949_v23, %v11941_v50  ;;  %11970 = vtanh.f32 %v5766_v25  ;;  %v5967_v28 = vadd.f32 %v15018_v35, %v5966_v24 }
 0x59a   : > { %v5769_v5 = vadd.f32 %v10245_v60, %v15018_v35  ;;  %v10293_v18 = vpop.f32.mrb[74].mxu1  ;;  %v5760_v8 = vpop.f32.mrb[75].mxu0  ;;  %11972 = vtanh.f32 %v5975_v58  ;;  %v6530_v59 = vpack.c.bf16 %v11951_v34, %v11943_v44  ;;  %v12459_v44 = vld [vmem:[%s16310_s3 + $0x140] sm:$0xff]  }
 0x59b   : > { %v11953_v32 = vpop.eup %11952  ;;  %v5978_v43 = vadd.f32 %v10293_v18, %v15018_v35  ;;  %v5969_v48 = vpop.f32.mrb[75].mxu1  ;;  %11974 = vtanh.f32 %v5758_v30  ;;  %v5761_v12 = vadd.f32 %v15018_v35, %v5760_v8 }
 0x59c   : > { %v11955_v57 = vpop.eup %11954  ;;  %v6793_v2 = vpack.c.bf16 %v11953_v32, %v11945_v37  ;;  %11976 = vtanh.f32 %v5967_v28  ;;  %v5970_v50 = vadd.f32 %v15018_v35, %v5969_v48  ;;  %10426 = vmatprep.mubr.bf16.mxu0 %v6530_v59 }
 0x59d   : > { %v11957_v17 = vpop.eup %11956  ;;  %11978 = vtanh.f32 %v5769_v5  ;;  %10427 = vmatmul.mubr.bf16.vlgmr.msra.gmra.mrb[128].mxu0 %v6531_v61 }
 0x59e   : > { %v11959_v25 = vpop.eup %11958  ;;  %10474 = vmatprep.mubr.bf16.mxu1 %v6793_v2  ;;  %11980 = vtanh.f32 %v5978_v43  ;;  %v10248_v23 = vpop.f32.mrb[76].mxu0  ;;  %10507 = vmatpush3.bf16.msra.mxu0 %v12459_v44 }
 0x59f   : > { %v11961_v39 = vpop.eup %11960  ;;  %10475 = vmatmul.mubr.bf16.vlgmr.msra.gmra.mrb[128].mxu1 %v6794_v22  ;;  %11982 = vtanh.f32 %v5761_v12  ;;  %v5782_v37 = vadd.f32 %v10248_v23, %v15018_v35  ;;  %v10296_v30 = vpop.f32.mrb[76].mxu1  ;;  %10508 = vmatprep.subr.bf16.mxu0 %v14902_v21 }
 0x5a0   : > { %v11963_v58 = vpop.eup %11962  ;;  %v5773_v24 = vpop.f32.mrb[77].mxu0  ;;  %10555 = vmatpush3.bf16.msra.mxu1 %v12459_v44  ;;  %11984 = vtanh.f32 %v5970_v50  ;;  %v5991_v34 = vadd.f32 %v10296_v30, %v15018_v35 }
 0x5a1   : > { %v11965_v60 = vpop.eup %11964  ;;  %v6533_v61 = vpack.c.bf16 %v11963_v58, %v11955_v57  ;;  %v5774_v22 = vadd.f32 %v15018_v35, %v5773_v24  ;;  %v5982_v28 = vpop.f32.mrb[77].mxu1  ;;  %10556 = vmatprep.subr.bf16.mxu1 %v14902_v21  ;;  %11986 = vtanh.f32 %v5782_v37 }
 0x5a2   : > { %v10249_v5 = vpop.f32.mrb[78].mxu0  ;;  %v11967_v18 = vpop.eup %11966  ;;  %v6796_v8 = vpack.c.bf16 %v11965_v60, %v11957_v17  ;;  %v5983_v32 = vadd.f32 %v15018_v35, %v5982_v28  ;;  %11988 = vtanh.f32 %v5991_v34  ;;  %10509 = vmatpush3.bf16.msra.mxu0 %v14902_v21 }
 0x5a3   : > { %v5785_v43 = vadd.f32 %v10249_v5, %v15018_v35  ;;  %v10297_v48 = vpop.f32.mrb[78].mxu1  ;;  %v5776_v59 = vpop.f32.mrb[79].mxu0  ;;  %v6532_v50 = vpack.c.bf16 %v11967_v18, %v11959_v25  ;;  %11990 = vtanh.f32 %v5774_v22  ;;  %10510 = vmatprep.subr.bf16.mxu0 %v14912_v10 }
 0x5a4   : > { %v11969_v12 = vpop.eup %11968  ;;  %v5994_v57 = vadd.f32 %v10297_v48, %v15018_v35  ;;  %v5985_v2 = vpop.f32.mrb[79].mxu1  ;;  %v5777_v44 = vadd.f32 %v15018_v35, %v5776_v59  ;;  %10557 = vmatpush3.bf16.msra.mxu1 %v14902_v21  ;;  %11992 = vtanh.f32 %v5983_v32 }
 0x5a5   : > { %v11971_v23 = vpop.eup %11970  ;;  %v6795_v17 = vpack.c.bf16 %v11969_v12, %v11961_v39  ;;  %v5986_v37 = vadd.f32 %v15018_v35, %v5985_v2  ;;  %10430 = vmatprep.mubr.bf16.mxu0 %v6532_v50  ;;  %10558 = vmatprep.subr.bf16.mxu1 %v14912_v10  ;;  %11994 = vtanh.f32 %v5785_v43 }
 0x5a6   : > { %v11973_v58 = vpop.eup %11972  ;;  %10431 = vmatmul.mubr.bf16.gmra.mrb[132].mxu0 %v6533_v61  ;;  %11996 = vtanh.f32 %v5994_v57  ;;  %v10252_v24 = vpop.f32.mrb[80].mxu0 }
 0x5a7   : > { %v11975_v30 = vpop.eup %11974  ;;  %10478 = vmatprep.mubr.bf16.mxu1 %v6795_v17  ;;  %10511 = vmatpush3.bf16.msra.mxu0 %v14912_v10  ;;  %11998 = vtanh.f32 %v5777_v44  ;;  %v5798_v39 = vadd.f32 %v10252_v24, %v15018_v35  ;;  %v10300_v60 = vpop.f32.mrb[80].mxu1 }
 0x5a8   : > { %v11977_v25 = vpop.eup %11976  ;;  %10479 = vmatmul.mubr.bf16.gmra.mrb[132].mxu1 %v6796_v8  ;;  %v5789_v34 = vpop.f32.mrb[81].mxu0  ;;  %10512 = vmatprep.subr.bf16.mxu0 %v14929_v47  ;;  %12000 = vtanh.f32 %v5986_v37  ;;  %v6007_v61 = vadd.f32 %v10300_v60, %v15018_v35 }
 0x5a9   : > { %v11979_v21 = vpop.eup %11978  ;;  %10559 = vmatpush3.bf16.msra.mxu1 %v14912_v10  ;;  %v5790_v5 = vadd.f32 %v15018_v35, %v5789_v34  ;;  %v5998_v18 = vpop.f32.mrb[81].mxu1  ;;  %12002 = vtanh.f32 %v5798_v39 }
 0x5aa   : > { %v11981_v22 = vpop.eup %11980  ;;  %v6535_v28 = vpack.c.bf16 %v11979_v21, %v11971_v23  ;;  %v10253_v8 = vpop.f32.mrb[82].mxu0  ;;  %10560 = vmatprep.subr.bf16.mxu1 %v14929_v47  ;;  %v5999_v48 = vadd.f32 %v15018_v35, %v5998_v18  ;;  %12004 = vtanh.f32 %v6007_v61 }
 0x5ab   : > { %v11983_v32 = vpop.eup %11982  ;;  %v6798_v43 = vpack.c.bf16 %v11981_v22, %v11973_v58  ;;  %v5801_v10 = vadd.f32 %v10253_v8, %v15018_v35  ;;  %v10301_v59 = vpop.f32.mrb[82].mxu1  ;;  %10513 = vmatpush3.bf16.msra.mxu0 %v14929_v47  ;;  %12006 = vtanh.f32 %v5790_v5 }
 0x5ac   : > { %v5792_v12 = vpop.f32.mrb[83].mxu0  ;;  %v11985_v57 = vpop.eup %11984  ;;  %v6010_v2 = vadd.f32 %v10301_v59, %v15018_v35  ;;  %v6534_v23 = vpack.c.bf16 %v11983_v32, %v11975_v30  ;;  %10514 = vmatprep.subr.bf16.mxu0 %v14940_v9  ;;  %12008 = vtanh.f32 %v5999_v48 }
 0x5ad   : > { %v6001_v50 = vpop.f32.mrb[83].mxu1  ;;  %v11987_v44 = vpop.eup %11986  ;;  %v5793_v17 = vadd.f32 %v15018_v35, %v5792_v12  ;;  %v6797_v58 = vpack.c.bf16 %v11985_v57, %v11977_v25  ;;  %10561 = vmatpush3.bf16.msra.mxu1 %v14929_v47  ;;  %12010 = vtanh.f32 %v5801_v10 }
 0x5ae   : > { %v11989_v37 = vpop.eup %11988  ;;  %v6002_v24 = vadd.f32 %v15018_v35, %v6001_v50  ;;  %10434 = vmatprep.mubr.bf16.mxu0 %v6534_v23  ;;  %10562 = vmatprep.subr.bf16.mxu1 %v14940_v9  ;;  %12012 = vtanh.f32 %v6010_v2  ;;  %v10256_v39 = vpop.f32.mrb[84].mxu0 }
 0x5af   : > { %v11991_v21 = vpop.eup %11990  ;;  %10482 = vmatprep.mubr.bf16.mxu1 %v6797_v58  ;;  %10435 = vmatmul.mubr.bf16.gmra.mrb[136].mxu0 %v6535_v28  ;;  %12014 = vtanh.f32 %v5793_v17  ;;  %v5814_v25 = vadd.f32 %v10256_v39, %v15018_v35  ;;  %v10304_v60 = vpop.f32.mrb[84].mxu1 }
 0x5b0   : > { %v11993_v30 = vpop.eup %11992  ;;  %10483 = vmatmul.mubr.bf16.gmra.mrb[136].mxu1 %v6798_v43  ;;  %10515 = vmatpush3.bf16.msra.mxu0 %v14940_v9  ;;  %v5805_v34 = vpop.f32.mrb[85].mxu0  ;;  %12016 = vtanh.f32 %v6002_v24  ;;  %v6023_v28 = vadd.f32 %v10304_v60, %v15018_v35 }
 0x5b1   : > { %v11995_v47 = vpop.eup %11994  ;;  %10563 = vmatpush3.bf16.msra.mxu1 %v14940_v9  ;;  %10516 = vmatprep.subr.bf16.mxu0 %v14961_v33  ;;  %v5806_v5 = vadd.f32 %v15018_v35, %v5805_v34  ;;  %v6014_v18 = vpop.f32.mrb[85].mxu1  ;;  %12018 = vtanh.f32 %v5814_v25 }
 0x5b2   : > { %v11997_v22 = vpop.eup %11996  ;;  %v6537_v61 = vpack.c.bf16 %v11995_v47, %v11987_v44  ;;  %v10257_v8 = vpop.f32.mrb[86].mxu0  ;;  %10564 = vmatprep.subr.bf16.mxu1 %v14961_v33  ;;  %v6015_v48 = vadd.f32 %v15018_v35, %v6014_v18  ;;  %12020 = vtanh.f32 %v6023_v28 }
 0x5b3   : > { %v11999_v32 = vpop.eup %11998  ;;  %v6800_v43 = vpack.c.bf16 %v11997_v22, %v11989_v37  ;;  %v5817_v9 = vadd.f32 %v10257_v8, %v15018_v35  ;;  %v10305_v10 = vpop.f32.mrb[86].mxu1  ;;  %12022 = vtanh.f32 %v5806_v5 }
 0x5b4   : > { %v5808_v59 = vpop.f32.mrb[87].mxu0  ;;  %v12001_v12 = vpop.eup %12000  ;;  %v6026_v57 = vadd.f32 %v10305_v10, %v15018_v35  ;;  %v6536_v50 = vpack.c.bf16 %v11999_v32, %v11991_v21  ;;  %10517 = vmatpush3.bf16.msra.mxu0 %v14961_v33  ;;  %12024 = vtanh.f32 %v6015_v48 }
 0x5b5   : > { %v6017_v2 = vpop.f32.mrb[87].mxu1  ;;  %v12003_v23 = vpop.eup %12002  ;;  %v5809_v44 = vadd.f32 %v15018_v35, %v5808_v59  ;;  %v6799_v17 = vpack.c.bf16 %v12001_v12, %v11993_v30  ;;  %10565 = vmatpush3.bf16.msra.mxu1 %v14961_v33  ;;  %10518 = vmatprep.subr.bf16.mxu0 %v14990_v26  ;;  %12026 = vtanh.f32 %v5817_v9 }
 0x5b6   : > { %v12005_v58 = vpop.eup %12004  ;;  %v6018_v37 = vadd.f32 %v15018_v35, %v6017_v2  ;;  %10438 = vmatprep.mubr.bf16.mxu0 %v6536_v50  ;;  %10566 = vmatprep.subr.bf16.mxu1 %v14990_v26  ;;  %12028 = vtanh.f32 %v6026_v57  ;;  %v10260_v39 = vpop.f32.mrb[88].mxu0 }
 0x5b7   : > { %v12007_v24 = vpop.eup %12006  ;;  %10486 = vmatprep.mubr.bf16.mxu1 %v6799_v17  ;;  %10439 = vmatmul.mubr.bf16.gmra.mrb[140].mxu0 %v6537_v61  ;;  %12030 = vtanh.f32 %v5809_v44  ;;  %v5830_v30 = vadd.f32 %v10260_v39, %v15018_v35  ;;  %v10308_v47 = vpop.f32.mrb[88].mxu1 }
 0x5b8   : > { %v12009_v21 = vpop.eup %12008  ;;  %10487 = vmatmul.mubr.bf16.gmra.mrb[140].mxu1 %v6800_v43  ;;  %10519 = vmatpush3.bf16.msra.mxu0 %v14990_v26  ;;  %v5821_v25 = vpop.f32.mrb[89].mxu0  ;;  %12032 = vtanh.f32 %v6018_v37  ;;  %v6039_v22 = vadd.f32 %v10308_v47, %v15018_v35 }
 0x5b9   : > { %v12011_v33 = vpop.eup %12010  ;;  %10567 = vmatpush3.bf16.msra.mxu1 %v14990_v26  ;;  %10520 = vmatprep.subr.bf16.mxu0 %v15005_v53  ;;  %v5822_v61 = vadd.f32 %v15018_v35, %v5821_v25  ;;  %v6030_v28 = vpop.f32.mrb[89].mxu1  ;;  %12034 = vtanh.f32 %v5830_v30 }
 0x5ba   : > { %v12013_v60 = vpop.eup %12012  ;;  %v6539_v34 = vpack.c.bf16 %v12011_v33, %v12003_v23  ;;  %v10261_v5 = vpop.f32.mrb[90].mxu0  ;;  %10568 = vmatprep.subr.bf16.mxu1 %v15005_v53  ;;  %v6031_v32 = vadd.f32 %v15018_v35, %v6030_v28  ;;  %12036 = vtanh.f32 %v6039_v22 }
 0x5bb   : > { %v12015_v18 = vpop.eup %12014  ;;  %v6802_v8 = vpack.c.bf16 %v12013_v60, %v12005_v58  ;;  %v5833_v26 = vadd.f32 %v10261_v5, %v15018_v35  ;;  %v10309_v43 = vpop.f32.mrb[90].mxu1  ;;  %12038 = vtanh.f32 %v5822_v61 }
 0x5bc   : > { %v5824_v48 = vpop.f32.mrb[91].mxu0  ;;  %v12017_v9 = vpop.eup %12016  ;;  %v6042_v10 = vadd.f32 %v10309_v43, %v15018_v35  ;;  %v6538_v12 = vpack.c.bf16 %v12015_v18, %v12007_v24  ;;  %10521 = vmatpush3.bf16.msra.mxu0 %v15005_v53  ;;  %12040 = vtanh.f32 %v6031_v32 }
 0x5bd   : > { %v6033_v59 = vpop.f32.mrb[91].mxu1  ;;  %v12019_v57 = vpop.eup %12018  ;;  %v5825_v2 = vadd.f32 %v15018_v35, %v5824_v48  ;;  %v6801_v50 = vpack.c.bf16 %v12017_v9, %v12009_v21  ;;  %10569 = vmatpush3.bf16.msra.mxu1 %v15005_v53  ;;  %12042 = vtanh.f32 %v5833_v26 }
 0x5be   : > { %v12021_v23 = vpop.eup %12020  ;;  %v6034_v44 = vadd.f32 %v15018_v35, %v6033_v59  ;;  %10442 = vmatprep.mubr.bf16.mxu0 %v6538_v12  ;;  %12044 = vtanh.f32 %v6042_v10  ;;  %v10264_v37 = vpop.f32.mrb[92].mxu0 }
 0x5bf   : > { %v12023_v17 = vpop.eup %12022  ;;  %10490 = vmatprep.mubr.bf16.mxu1 %v6801_v50  ;;  %10443 = vmatmul.mubr.bf16.gmra.mrb[144].mxu0 %v6539_v34  ;;  %12046 = vtanh.f32 %v5825_v2  ;;  %v5846_v39 = vadd.f32 %v10264_v37, %v15018_v35  ;;  %v10312_v21 = vpop.f32.mrb[92].mxu1 }
 0x5c0   : > { %v12025_v58 = vpop.eup %12024  ;;  %10491 = vmatmul.mubr.bf16.gmra.mrb[144].mxu1 %v6802_v8  ;;  %v5837_v33 = vpop.f32.mrb[93].mxu0  ;;  %12048 = vtanh.f32 %v6034_v44  ;;  %v6055_v47 = vadd.f32 %v10312_v21, %v15018_v35 }
 0x5c1   : > { %v12027_v24 = vpop.eup %12026  ;;  %v5838_v25 = vadd.f32 %v15018_v35, %v5837_v33  ;;  %v6046_v60 = vpop.f32.mrb[93].mxu1  ;;  %12050 = vtanh.f32 %v5846_v39 }
 0x5c2   : > { %v12029_v53 = vpop.eup %12028  ;;  %v6541_v30 = vpack.c.bf16 %v12027_v24, %v12019_v57  ;;  %v10265_v22 = vpop.f32.mrb[94].mxu0  ;;  %v6047_v28 = vadd.f32 %v15018_v35, %v6046_v60  ;;  %12052 = vtanh.f32 %v6055_v47 }
 0x5c3   : > { %v12031_v34 = vpop.eup %12030  ;;  %v6804_v61 = vpack.c.bf16 %v12029_v53, %v12021_v23  ;;  %v5849_v5 = vadd.f32 %v10265_v22, %v15018_v35  ;;  %v10313_v18 = vpop.f32.mrb[94].mxu1  ;;  %12054 = vtanh.f32 %v5838_v25 }
 0x5c4   : > { %v5840_v8 = vpop.f32.mrb[95].mxu0  ;;  %v12033_v32 = vpop.eup %12032  ;;  %v6058_v26 = vadd.f32 %v10313_v18, %v15018_v35  ;;  %v6540_v48 = vpack.c.bf16 %v12031_v34, %v12023_v17  ;;  %12056 = vtanh.f32 %v6047_v28 }
 0x5c5   : > { %v6049_v43 = vpop.f32.mrb[95].mxu1  ;;  %v12035_v9 = vpop.eup %12034  ;;  %v5841_v10 = vadd.f32 %v15018_v35, %v5840_v8  ;;  %v6803_v59 = vpack.c.bf16 %v12033_v32, %v12025_v58  ;;  %12058 = vtanh.f32 %v5849_v5 }
 0x5c6   : > { %v12037_v12 = vpop.eup %12036  ;;  %v6050_v57 = vadd.f32 %v15018_v35, %v6049_v43  ;;  %10446 = vmatprep.mubr.bf16.mxu0 %v6540_v48  ;;  %12060 = vtanh.f32 %v6058_v26  ;;  %v10332_v23 = vpop.f32.mrb[96].mxu0 }
 0x5c7   : > { %v12039_v2 = vpop.eup %12038  ;;  %10494 = vmatprep.mubr.bf16.mxu1 %v6803_v59  ;;  %10447 = vmatmul.mubr.bf16.gmra.mrb[148].mxu0 %v6541_v30  ;;  %12062 = vtanh.f32 %v5841_v10  ;;  %v6152_v17 = vadd.f32 %v10332_v23, %v15018_v35  ;;  %v10380_v37 = vpop.f32.mrb[96].mxu1 }
 0x5c8   : > { %v12041_v50 = vpop.eup %12040  ;;  %10495 = vmatmul.mubr.bf16.gmra.mrb[148].mxu1 %v6804_v61  ;;  %v6143_v24 = vpop.f32.mrb[97].mxu0  ;;  %12064 = vtanh.f32 %v6050_v57  ;;  %v6361_v21 = vadd.f32 %v10380_v37, %v15018_v35 }
 0x5c9   : > { %v12043_v44 = vpop.eup %12042  ;;  %v6144_v33 = vadd.f32 %v15018_v35, %v6143_v24  ;;  %v6352_v53 = vpop.f32.mrb[97].mxu1  ;;  %12066 = vtanh.f32 %v6152_v17 }
 0x5ca   : > { %v12045_v58 = vpop.eup %12044  ;;  %v6543_v39 = vpack.c.bf16 %v12043_v44, %v12035_v9  ;;  %v10333_v47 = vpop.f32.mrb[98].mxu0  ;;  %v6353_v60 = vadd.f32 %v15018_v35, %v6352_v53  ;;  %12068 = vtanh.f32 %v6361_v21 }
 0x5cb   : > { %v12047_v30 = vpop.eup %12046  ;;  %v6806_v25 = vpack.c.bf16 %v12045_v58, %v12037_v12  ;;  %v6155_v22 = vadd.f32 %v10333_v47, %v15018_v35  ;;  %v10381_v34 = vpop.f32.mrb[98].mxu1  ;;  %12070 = vtanh.f32 %v6144_v33 }
 0x5cc   : > { %v6146_v61 = vpop.f32.mrb[99].mxu0  ;;  %v12049_v28 = vpop.eup %12048  ;;  %v6364_v5 = vadd.f32 %v10381_v34, %v15018_v35  ;;  %v6542_v8 = vpack.c.bf16 %v12047_v30, %v12039_v2  ;;  %12072 = vtanh.f32 %v6353_v60 }
 0x5cd   : > { %v6355_v18 = vpop.f32.mrb[99].mxu1  ;;  %v12051_v32 = vpop.eup %12050  ;;  %v6147_v26 = vadd.f32 %v15018_v35, %v6146_v61  ;;  %v6805_v43 = vpack.c.bf16 %v12049_v28, %v12041_v50  ;;  %12074 = vtanh.f32 %v6155_v22 }
 0x5ce   : > { %v12053_v48 = vpop.eup %12052  ;;  %v6356_v9 = vadd.f32 %v15018_v35, %v6355_v18  ;;  %10450 = vmatprep.mubr.bf16.mxu0 %v6542_v8  ;;  %12076 = vtanh.f32 %v6364_v5  ;;  %v10336_v12 = vpop.f32.mrb[100].mxu0 }
 0x5cf   : > { %v12055_v10 = vpop.eup %12054  ;;  %10498 = vmatprep.mubr.bf16.mxu1 %v6805_v43  ;;  %10451 = vmatmul.mubr.bf16.gmra.mrb[152].mxu0 %v6543_v39  ;;  %12078 = vtanh.f32 %v6147_v26  ;;  %v6168_v2 = vadd.f32 %v10336_v12, %v15018_v35  ;;  %v10384_v23 = vpop.f32.mrb[100].mxu1 }
 0x5d0   : > { %v12057_v59 = vpop.eup %12056  ;;  %10499 = vmatmul.mubr.bf16.gmra.mrb[152].mxu1 %v6806_v25  ;;  %v6159_v44 = vpop.f32.mrb[101].mxu0  ;;  %12080 = vtanh.f32 %v6356_v9  ;;  %v6377_v37 = vadd.f32 %v10384_v23, %v15018_v35 }
 0x5d1   : > { %v12059_v57 = vpop.eup %12058  ;;  %v6160_v24 = vadd.f32 %v15018_v35, %v6159_v44  ;;  %v6368_v58 = vpop.f32.mrb[101].mxu1  ;;  %12082 = vtanh.f32 %v6168_v2 }
 0x5d2   : > { %v12061_v50 = vpop.eup %12060  ;;  %v6545_v17 = vpack.c.bf16 %v12059_v57, %v12051_v32  ;;  %v10337_v21 = vpop.f32.mrb[102].mxu0  ;;  %v6369_v53 = vadd.f32 %v15018_v35, %v6368_v58  ;;  %12084 = vtanh.f32 %v6377_v37 }
 0x5d3   : > { %v12063_v39 = vpop.eup %12062  ;;  %v6808_v33 = vpack.c.bf16 %v12061_v50, %v12053_v48  ;;  %v6171_v47 = vadd.f32 %v10337_v21, %v15018_v35  ;;  %v10385_v30 = vpop.f32.mrb[102].mxu1  ;;  %12086 = vtanh.f32 %v6160_v24 }
 0x5d4   : > { %v6162_v25 = vpop.f32.mrb[103].mxu0  ;;  %v12065_v60 = vpop.eup %12064  ;;  %v6380_v22 = vadd.f32 %v10385_v30, %v15018_v35  ;;  %v6544_v61 = vpack.c.bf16 %v12063_v39, %v12055_v10  ;;  %12088 = vtanh.f32 %v6369_v53 }
 0x5d5   : > { %v6371_v34 = vpop.f32.mrb[103].mxu1  ;;  %v12067_v28 = vpop.eup %12066  ;;  %v6163_v5 = vadd.f32 %v15018_v35, %v6162_v25  ;;  %v6807_v18 = vpack.c.bf16 %v12065_v60, %v12057_v59  ;;  %12090 = vtanh.f32 %v6171_v47 }
 0x5d6   : > { %v12069_v8 = vpop.eup %12068  ;;  %v6372_v32 = vadd.f32 %v15018_v35, %v6371_v34  ;;  %10454 = vmatprep.mubr.bf16.mxu0 %v6544_v61  ;;  %12092 = vtanh.f32 %v6380_v22  ;;  %v10340_v48 = vpop.f32.mrb[104].mxu0 }
 0x5d7   : > { %v12071_v26 = vpop.eup %12070  ;;  %10502 = vmatprep.mubr.bf16.mxu1 %v6807_v18  ;;  %10455 = vmatmul.mubr.bf16.gmra.mrb[156].mxu0 %v6545_v17  ;;  %12094 = vtanh.f32 %v6163_v5  ;;  %v6184_v10 = vadd.f32 %v10340_v48, %v15018_v35  ;;  %v10388_v12 = vpop.f32.mrb[104].mxu1 }
 0x5d8   : > { %v12073_v43 = vpop.eup %12072  ;;  %10503 = vmatmul.mubr.bf16.gmra.mrb[156].mxu1 %v6808_v33  ;;  %v6175_v57 = vpop.f32.mrb[105].mxu0  ;;  %12096 = vtanh.f32 %v6372_v32  ;;  %v6393_v23 = vadd.f32 %v10388_v12, %v15018_v35 }
 0x5d9   : > { %v12075_v9 = vpop.eup %12074  ;;  %v6176_v44 = vadd.f32 %v15018_v35, %v6175_v57  ;;  %v6384_v50 = vpop.f32.mrb[105].mxu1  ;;  %12098 = vtanh.f32 %v6184_v10 }
 0x5da   : > { %v12077_v59 = vpop.eup %12076  ;;  %v7003_v2 = vpack.c.bf16 %v12075_v9, %v12067_v28  ;;  %v10341_v37 = vpop.f32.mrb[106].mxu0  ;;  %v6385_v58 = vadd.f32 %v15018_v35, %v6384_v50  ;;  %12100 = vtanh.f32 %v6393_v23 }
 0x5db   : > { %v12079_v17 = vpop.eup %12078  ;;  %v7212_v24 = vpack.c.bf16 %v12077_v59, %v12069_v8  ;;  %v6187_v21 = vadd.f32 %v10341_v37, %v15018_v35  ;;  %v10389_v39 = vpop.f32.mrb[106].mxu1  ;;  %12102 = vtanh.f32 %v6176_v44 }
 0x5dc   : > { %v6178_v33 = vpop.f32.mrb[107].mxu0  ;;  %v12081_v53 = vpop.eup %12080  ;;  %v6396_v47 = vadd.f32 %v10389_v39, %v15018_v35  ;;  %v7002_v25 = vpack.c.bf16 %v12079_v17, %v12071_v26  ;;  %12104 = vtanh.f32 %v6385_v58 }
 0x5dd   : > { %v6387_v30 = vpop.f32.mrb[107].mxu1  ;;  %v12083_v60 = vpop.eup %12082  ;;  %v6179_v22 = vadd.f32 %v15018_v35, %v6178_v33  ;;  %v7211_v34 = vpack.c.bf16 %v12081_v53, %v12073_v43  ;;  %12106 = vtanh.f32 %v6187_v21 }
 0x5de   : > { %v12085_v61 = vpop.eup %12084  ;;  %v6388_v28 = vadd.f32 %v15018_v35, %v6387_v30  ;;  %10522 = vmatprep.mubr.bf16.mxu0 %v7002_v25  ;;  %12108 = vtanh.f32 %v6396_v47  ;;  %v10344_v8 = vpop.f32.mrb[108].mxu0 }
 0x5df   : > { %v12087_v5 = vpop.eup %12086  ;;  %10570 = vmatprep.mubr.bf16.mxu1 %v7211_v34  ;;  %10523 = vmatmul.mubr.bf16.vlgmr.msra.gmra.mrb[160].mxu0 %v7003_v2  ;;  %12110 = vtanh.f32 %v6179_v22  ;;  %v6200_v26 = vadd.f32 %v10344_v8, %v15018_v35  ;;  %v10392_v48 = vpop.f32.mrb[108].mxu1 }
 0x5e0   : > { %v12089_v18 = vpop.eup %12088  ;;  %10571 = vmatmul.mubr.bf16.vlgmr.msra.gmra.mrb[160].mxu1 %v7212_v24  ;;  %v6191_v9 = vpop.f32.mrb[109].mxu0  ;;  %12112 = vtanh.f32 %v6388_v28  ;;  %v6409_v12 = vadd.f32 %v10392_v48, %v15018_v35 }
 0x5e1   : > { %v12091_v32 = vpop.eup %12090  ;;  %v6192_v57 = vadd.f32 %v15018_v35, %v6191_v9  ;;  %v6400_v59 = vpop.f32.mrb[109].mxu1  ;;  %12114 = vtanh.f32 %v6200_v26 }
 0x5e2   : > { %v12093_v43 = vpop.eup %12092  ;;  %v7005_v10 = vpack.c.bf16 %v12091_v32, %v12083_v60  ;;  %v10345_v23 = vpop.f32.mrb[110].mxu0  ;;  %v6401_v50 = vadd.f32 %v15018_v35, %v6400_v59  ;;  %12116 = vtanh.f32 %v6409_v12 }
 0x5e3   : > { %v12095_v2 = vpop.eup %12094  ;;  %v7214_v44 = vpack.c.bf16 %v12093_v43, %v12085_v61  ;;  %v6203_v37 = vadd.f32 %v10345_v23, %v15018_v35  ;;  %v10393_v17 = vpop.f32.mrb[110].mxu1  ;;  %12118 = vtanh.f32 %v6192_v57 }
 0x5e4   : > { %v6194_v24 = vpop.f32.mrb[111].mxu0  ;;  %v12097_v58 = vpop.eup %12096  ;;  %v6412_v21 = vadd.f32 %v10393_v17, %v15018_v35  ;;  %v7004_v33 = vpack.c.bf16 %v12095_v2, %v12087_v5  ;;  %12120 = vtanh.f32 %v6401_v50 }
 0x5e5   : > { %v6403_v39 = vpop.f32.mrb[111].mxu1  ;;  %v12099_v53 = vpop.eup %12098  ;;  %v6195_v47 = vadd.f32 %v15018_v35, %v6194_v24  ;;  %v7213_v30 = vpack.c.bf16 %v12097_v58, %v12089_v18  ;;  %12122 = vtanh.f32 %v6203_v37 }
 0x5e6   : > { %v12101_v25 = vpop.eup %12100  ;;  %v6404_v60 = vadd.f32 %v15018_v35, %v6403_v39  ;;  %10526 = vmatprep.mubr.bf16.mxu0 %v7004_v33  ;;  %12124 = vtanh.f32 %v6412_v21  ;;  %v10348_v61 = vpop.f32.mrb[112].mxu0 }
 0x5e7   : > { %v12103_v22 = vpop.eup %12102  ;;  %10574 = vmatprep.mubr.bf16.mxu1 %v7213_v30  ;;  %10527 = vmatmul.mubr.bf16.gmra.mrb[164].mxu0 %v7005_v10  ;;  %12126 = vtanh.f32 %v6195_v47  ;;  %v6216_v5 = vadd.f32 %v10348_v61, %v15018_v35  ;;  %v10396_v8 = vpop.f32.mrb[112].mxu1 }
 0x5e8   : > { %v12105_v34 = vpop.eup %12104  ;;  %10575 = vmatmul.mubr.bf16.gmra.mrb[164].mxu1 %v7214_v44  ;;  %v6207_v32 = vpop.f32.mrb[113].mxu0  ;;  %12128 = vtanh.f32 %v6404_v60  ;;  %v6425_v48 = vadd.f32 %v10396_v8, %v15018_v35 }
 0x5e9   : > { %v12107_v28 = vpop.eup %12106  ;;  %v6208_v9 = vadd.f32 %v15018_v35, %v6207_v32  ;;  %v6416_v43 = vpop.f32.mrb[113].mxu1  ;;  %12130 = vtanh.f32 %v6216_v5 }
 0x5ea   : > { %v12109_v18 = vpop.eup %12108  ;;  %v7007_v26 = vpack.c.bf16 %v12107_v28, %v12099_v53  ;;  %v10349_v12 = vpop.f32.mrb[114].mxu0  ;;  %v6417_v59 = vadd.f32 %v15018_v35, %v6416_v43  ;;  %12132 = vtanh.f32 %v6425_v48  ;;  %v15157_v53 = vld [vmem:[%s16311_s4 + $0x4] ss:$0 sm:$0xff] }
 0x5eb   : > { %v12111_v10 = vpop.eup %12110  ;;  %v7216_v57 = vpack.c.bf16 %v12109_v18, %v12101_v25  ;;  %v6219_v23 = vadd.f32 %v10349_v12, %v15018_v35  ;;  %v10397_v2 = vpop.f32.mrb[114].mxu1  ;;  %12134 = vtanh.f32 %v6208_v9 }
 0x5ec   : > { %v6210_v44 = vpop.f32.mrb[115].mxu0  ;;  %v12113_v50 = vpop.eup %12112  ;;  %v6428_v37 = vadd.f32 %v10397_v2, %v15018_v35  ;;  %v7006_v24 = vpack.c.bf16 %v12111_v10, %v12103_v22  ;;  %12136 = vtanh.f32 %v6417_v59 }
 0x5ed   : > { %v6419_v17 = vpop.f32.mrb[115].mxu1  ;;  %v12115_v58 = vpop.eup %12114  ;;  %v6211_v21 = vadd.f32 %v15018_v35, %v6210_v44  ;;  %v7215_v39 = vpack.c.bf16 %v12113_v50, %v12105_v34  ;;  %12138 = vtanh.f32 %v6219_v23 }
 0x5ee   : > { %v12117_v33 = vpop.eup %12116  ;;  %v6420_v47 = vadd.f32 %v15157_v53, %v6419_v17  ;;  %10530 = vmatprep.mubr.bf16.mxu0 %v7006_v24  ;;  %12140 = vtanh.f32 %v6428_v37  ;;  %v10352_v60 = vpop.f32.mrb[116].mxu0 }
 0x5ef   : > { %v12119_v30 = vpop.eup %12118  ;;  %10578 = vmatprep.mubr.bf16.mxu1 %v7215_v39  ;;  %10531 = vmatmul.mubr.bf16.gmra.mrb[168].mxu0 %v7007_v26  ;;  %12142 = vtanh.f32 %v6211_v21  ;;  %v6232_v22 = vadd.f32 %v15157_v53, %v10352_v60  ;;  %v10400_v34 = vpop.f32.mrb[116].mxu1 }
 0x5f0   : > { %v12121_v25 = vpop.eup %12120  ;;  %10579 = vmatmul.mubr.bf16.gmra.mrb[168].mxu1 %v7216_v57  ;;  %v6223_v61 = vpop.f32.mrb[117].mxu0  ;;  %12144 = vtanh.f32 %v6420_v47  ;;  %v6441_v8 = vadd.f32 %v15157_v53, %v10400_v34 }
 0x5f1   : > { %v12123_v35 = vpop.eup %12122  ;;  %v6224_v32 = vadd.f32 %v15157_v53, %v6223_v61  ;;  %v6432_v18 = vpop.f32.mrb[117].mxu1  ;;  %12146 = vtanh.f32 %v6232_v22 }
 0x5f2   : > { %v12125_v28 = vpop.eup %12124  ;;  %v7009_v5 = vpack.c.bf16 %v12123_v35, %v12115_v58  ;;  %v10353_v48 = vpop.f32.mrb[118].mxu0  ;;  %v6433_v43 = vadd.f32 %v15157_v53, %v6432_v18  ;;  %12148 = vtanh.f32 %v6441_v8 }
 0x5f3   : > { %v12127_v26 = vpop.eup %12126  ;;  %v7218_v9 = vpack.c.bf16 %v12125_v28, %v12117_v33  ;;  %v6235_v12 = vadd.f32 %v15157_v53, %v10353_v48  ;;  %v10401_v10 = vpop.f32.mrb[118].mxu1  ;;  %12150 = vtanh.f32 %v6224_v32 }
 0x5f4   : > { %v6226_v57 = vpop.f32.mrb[119].mxu0  ;;  %v12129_v59 = vpop.eup %12128  ;;  %v6444_v23 = vadd.f32 %v15157_v53, %v10401_v10  ;;  %v7008_v44 = vpack.c.bf16 %v12127_v26, %v12119_v30  ;;  %12152 = vtanh.f32 %v6433_v43 }
 0x5f5   : > { %v6435_v2 = vpop.f32.mrb[119].mxu1  ;;  %v12131_v50 = vpop.eup %12130  ;;  %v6227_v37 = vadd.f32 %v15157_v53, %v6226_v57  ;;  %v7217_v17 = vpack.c.bf16 %v12129_v59, %v12121_v25  ;;  %12154 = vtanh.f32 %v6235_v12 }
 0x5f6   : > { %v12133_v24 = vpop.eup %12132  ;;  %v6436_v58 = vadd.f32 %v15157_v53, %v6435_v2  ;;  %10534 = vmatprep.mubr.bf16.mxu0 %v7008_v44  ;;  %12156 = vtanh.f32 %v6444_v23  ;;  %v10356_v33 = vpop.f32.mrb[120].mxu0 }
 0x5f7   : > { %v12135_v21 = vpop.eup %12134  ;;  %10582 = vmatprep.mubr.bf16.mxu1 %v7217_v17  ;;  %10535 = vmatmul.mubr.bf16.gmra.mrb[172].mxu0 %v7009_v5  ;;  %12158 = vtanh.f32 %v6227_v37  ;;  %v6248_v30 = vadd.f32 %v15157_v53, %v10356_v33  ;;  %v10404_v60 = vpop.f32.mrb[120].mxu1 }
 0x5f8   : > { %v12137_v39 = vpop.eup %12136  ;;  %10583 = vmatmul.mubr.bf16.gmra.mrb[172].mxu1 %v7218_v9  ;;  %v6239_v35 = vpop.f32.mrb[121].mxu0  ;;  %12160 = vtanh.f32 %v6436_v58  ;;  %v6457_v34 = vadd.f32 %v15157_v53, %v10404_v60 }
 0x5f9   : > { %v12139_v47 = vpop.eup %12138  ;;  %v6240_v61 = vadd.f32 %v15157_v53, %v6239_v35  ;;  %v6448_v28 = vpop.f32.mrb[121].mxu1  ;;  %12162 = vtanh.f32 %v6248_v30 }
 0x5fa   : > { %v12141_v25 = vpop.eup %12140  ;;  %v7011_v22 = vpack.c.bf16 %v12139_v47, %v12131_v50  ;;  %v10357_v8 = vpop.f32.mrb[122].mxu0  ;;  %v6449_v18 = vadd.f32 %v15157_v53, %v6448_v28  ;;  %12164 = vtanh.f32 %v6457_v34 }
 0x5fb   : > { %v12143_v5 = vpop.eup %12142  ;;  %v7220_v32 = vpack.c.bf16 %v12141_v25, %v12133_v24  ;;  %v6251_v48 = vadd.f32 %v15157_v53, %v10357_v8  ;;  %v10405_v26 = vpop.f32.mrb[122].mxu1  ;;  %12166 = vtanh.f32 %v6240_v61 }
 0x5fc   : > { %v6242_v9 = vpop.f32.mrb[123].mxu0  ;;  %v12145_v43 = vpop.eup %12144  ;;  %v6460_v12 = vadd.f32 %v15157_v53, %v10405_v26  ;;  %v7010_v57 = vpack.c.bf16 %v12143_v5, %v12135_v21  ;;  %12168 = vtanh.f32 %v6449_v18 }
 0x5fd   : > { %v6451_v10 = vpop.f32.mrb[123].mxu1  ;;  %v12147_v59 = vpop.eup %12146  ;;  %v6243_v23 = vadd.f32 %v15157_v53, %v6242_v9  ;;  %v7219_v2 = vpack.c.bf16 %v12145_v43, %v12137_v39  ;;  %12170 = vtanh.f32 %v6251_v48 }
 0x5fe   : > { %v12149_v44 = vpop.eup %12148  ;;  %v6452_v50 = vadd.f32 %v15157_v53, %v6451_v10  ;;  %10538 = vmatprep.mubr.bf16.mxu0 %v7010_v57  ;;  %12172 = vtanh.f32 %v6460_v12  ;;  %v10360_v24 = vpop.f32.mrb[124].mxu0 }
 0x5ff   : > { %v12151_v37 = vpop.eup %12150  ;;  %10586 = vmatprep.mubr.bf16.mxu1 %v7219_v2  ;;  %10539 = vmatmul.mubr.bf16.gmra.mrb[176].mxu0 %v7011_v22  ;;  %12174 = vtanh.f32 %v6243_v23  ;;  %v6264_v21 = vadd.f32 %v15157_v53, %v10360_v24  ;;  %v10408_v33 = vpop.f32.mrb[124].mxu1 }
 0x600   : > { %v12153_v17 = vpop.eup %12152  ;;  %10587 = vmatmul.mubr.bf16.gmra.mrb[176].mxu1 %v7220_v32  ;;  %v6255_v47 = vpop.f32.mrb[125].mxu0  ;;  %12176 = vtanh.f32 %v6452_v50  ;;  %v6473_v60 = vadd.f32 %v15157_v53, %v10408_v33 }
 0x601   : > { %v12155_v58 = vpop.eup %12154  ;;  %v6256_v35 = vadd.f32 %v15157_v53, %v6255_v47  ;;  %v6464_v25 = vpop.f32.mrb[125].mxu1  ;;  %12178 = vtanh.f32 %v6264_v21 }
 0x602   : > { %v12157_v39 = vpop.eup %12156  ;;  %v7013_v30 = vpack.c.bf16 %v12155_v58, %v12147_v59  ;;  %v10361_v34 = vpop.f32.mrb[126].mxu0  ;;  %v6465_v28 = vadd.f32 %v15157_v53, %v6464_v25  ;;  %12180 = vtanh.f32 %v6473_v60 }
 0x603   : > { %v12159_v22 = vpop.eup %12158  ;;  %v7222_v61 = vpack.c.bf16 %v12157_v39, %v12149_v44  ;;  %v6267_v8 = vadd.f32 %v15157_v53, %v10361_v34  ;;  %v10409_v5 = vpop.f32.mrb[126].mxu1  ;;  %12182 = vtanh.f32 %v6256_v35 }
 0x604   : > { %v6258_v32 = vpop.f32.mrb[127].mxu0  ;;  %v12161_v18 = vpop.eup %12160  ;;  %v6476_v48 = vadd.f32 %v15157_v53, %v10409_v5  ;;  %v7012_v9 = vpack.c.bf16 %v12159_v22, %v12151_v37  ;;  %12184 = vtanh.f32 %v6465_v28  ;;  %v15187_v5 = vld [vmem:[%s16311_s4 + $0x5] ss:$0 sm:$0xff] }
 0x605   : > { %v6467_v26 = vpop.f32.mrb[127].mxu1  ;;  %v12163_v43 = vpop.eup %12162  ;;  %v6259_v12 = vadd.f32 %v15157_v53, %v6258_v32  ;;  %v7221_v10 = vpack.c.bf16 %v12161_v18, %v12153_v17  ;;  %12186 = vtanh.f32 %v6267_v8 }
 0x606   : > { %v12165_v57 = vpop.eup %12164  ;;  %v6468_v59 = vadd.f32 %v15157_v53, %v6467_v26  ;;  %10542 = vmatprep.mubr.bf16.mxu0 %v7012_v9  ;;  %12188 = vtanh.f32 %v6476_v48 }
 0x607   : > { %v12167_v23 = vpop.eup %12166  ;;  %10590 = vmatprep.mubr.bf16.mxu1 %v7221_v10  ;;  %10543 = vmatmul.mubr.bf16.gmra.mrb[180].mxu0 %v7013_v30  ;;  %12190 = vtanh.f32 %v6259_v12 }
 0x608   : > { %v12169_v2 = vpop.eup %12168  ;;  %10591 = vmatmul.mubr.bf16.gmra.mrb[180].mxu1 %v7222_v61  ;;  %12192 = vtanh.f32 %v6468_v59 }
 0x609   : > { %v12171_v44 = vpop.eup %12170 }
 0x60a   : > { %v12173_v50 = vpop.eup %12172  ;;  %v7015_v37 = vpack.c.bf16 %v12171_v44, %v12163_v43 }
 0x60b   : > { %v12175_v24 = vpop.eup %12174  ;;  %v7224_v58 = vpack.c.bf16 %v12173_v50, %v12165_v57 }
 0x60c   : > { %v12177_v17 = vpop.eup %12176  ;;  %v7014_v21 = vpack.c.bf16 %v12175_v24, %v12167_v23 }
 0x60d   : > { %v12179_v33 = vpop.eup %12178  ;;  %v7223_v47 = vpack.c.bf16 %v12177_v17, %v12169_v2 }
 0x60e   : > { %v12181_v53 = vpop.eup %12180  ;;  %10546 = vmatprep.mubr.bf16.mxu0 %v7014_v21 }
 0x60f   : > { %v12183_v39 = vpop.eup %12182  ;;  %10594 = vmatprep.mubr.bf16.mxu1 %v7223_v47  ;;  %10547 = vmatmul.mubr.bf16.gmra.mrb[184].mxu0 %v7015_v37 }
 0x610   : > { %v12185_v30 = vpop.eup %12184  ;;  %10595 = vmatmul.mubr.bf16.gmra.mrb[184].mxu1 %v7224_v58 }
 0x611   : > { %v12187_v60 = vpop.eup %12186 }
 0x612   : > { %v12189_v35 = vpop.eup %12188  ;;  %v7017_v25 = vpack.c.bf16 %v12187_v60, %v12179_v33 }
 0x613   : > { %v12191_v34 = vpop.eup %12190  ;;  %v7226_v22 = vpack.c.bf16 %v12189_v35, %v12181_v53 }
 0x614   : > { %v12193_v61 = vpop.eup %12192  ;;  %v7016_v28 = vpack.c.bf16 %v12191_v34, %v12183_v39  ;;  %v15202_v34 = vld [vmem:[%s16312_s5] ss:$0 sm:$0xff] }
 0x615   : > { %v7225_v8 = vpack.c.bf16 %v12193_v61, %v12185_v30 }
 0x616   : > { %10550 = vmatprep.mubr.bf16.mxu0 %v7016_v28 }
 0x617   : > { %10598 = vmatprep.mubr.bf16.mxu1 %v7225_v8  ;;  %10551 = vmatmul.mubr.bf16.gmra.mrb[188].mxu0 %v7017_v25 }
 0x618   : > { %10599 = vmatmul.mubr.bf16.gmra.mrb[188].mxu1 %v7226_v22 }
 0x670   : > { %v10428_v32 = vpop.f32.mrb[128].mxu0 }
 0x671   : > { %v6643_v18 = vadd.f32 %v10428_v32, %v15187_v5  ;;  %v6634_v26 = vpop.f32.mrb[129].mxu0 }
 0x672   : > { %v10476_v48 = vpop.f32.mrb[128].mxu1  ;;  %v6635_v43 = vadd.f32 %v15187_v5, %v6634_v26  ;;  %v10429_v10 = vpop.f32.mrb[130].mxu0 }
 0x673   : > { %v6852_v9 = vadd.f32 %v10476_v48, %v15187_v5  ;;  %v6843_v12 = vpop.f32.mrb[129].mxu1  ;;  %12194 = vtanh.f32 %v6643_v18  ;;  %v6646_v59 = vadd.f32 %v10429_v10, %v15187_v5  ;;  %v6637_v2 = vpop.f32.mrb[131].mxu0 }
 0x674   : > { %v6844_v57 = vadd.f32 %v15187_v5, %v6843_v12  ;;  %v10477_v23 = vpop.f32.mrb[130].mxu1  ;;  %v6638_v24 = vadd.f32 %v15187_v5, %v6637_v2 }
 0x675   : > { %12196 = vtanh.f32 %v6852_v9  ;;  %v6855_v44 = vadd.f32 %v10477_v23, %v15187_v5  ;;  %v6846_v50 = vpop.f32.mrb[131].mxu1 }
 0x676   : > { %12198 = vtanh.f32 %v6635_v43  ;;  %v6847_v37 = vadd.f32 %v15187_v5, %v6846_v50 }
 0x677   : > { %12200 = vtanh.f32 %v6844_v57 }
 0x678   : > { %12202 = vtanh.f32 %v6646_v59 }
 0x679   : > { %12204 = vtanh.f32 %v6855_v44  ;;  %v10432_v58 = vpop.f32.mrb[132].mxu0 }
 0x67a   : > { %v6650_v21 = vpop.f32.mrb[133].mxu0  ;;  %12206 = vtanh.f32 %v6847_v37  ;;  %v6659_v60 = vadd.f32 %v10432_v58, %v15187_v5 }
 0x67b   : > { %v10480_v17 = vpop.f32.mrb[132].mxu1  ;;  %v10433_v47 = vpop.f32.mrb[134].mxu0  ;;  %12208 = vtanh.f32 %v6638_v24  ;;  %v6651_v24 = vadd.f32 %v15187_v5, %v6650_v21 }
 0x67c   : > { %v6859_v33 = vpop.f32.mrb[133].mxu1  ;;  %v6662_v53 = vadd.f32 %v10433_v47, %v15187_v5  ;;  %v6653_v30 = vpop.f32.mrb[135].mxu0  ;;  %v6868_v48 = vadd.f32 %v10480_v17, %v15187_v5 }
 0x67d   : > { %v10481_v39 = vpop.f32.mrb[134].mxu1  ;;  %v12195_v25 = vpop.eup %12194  ;;  %v6654_v44 = vadd.f32 %v15187_v5, %v6653_v30  ;;  %v6860_v21 = vadd.f32 %v15187_v5, %v6859_v33 }
 0x67e   : > { %v6862_v35 = vpop.f32.mrb[135].mxu1  ;;  %v7422_v61 = vadd.f32 %v12195_v25, %v14023_v15  ;;  %12210 = vtanh.f32 %v6662_v53  ;;  %v6871_v8 = vadd.f32 %v10481_v39, %v15187_v5 }
 0x67f   : > { %v12197_v22 = vpop.eup %12196  ;;  %12212 = vtanh.f32 %v6659_v60  ;;  %v6863_v30 = vadd.f32 %v15187_v5, %v6862_v35 }
 0x680   : > { %v12199_v28 = vpop.eup %12198  ;;  %v7454_v32 = vadd.f32 %v12197_v22, %v14049_v1  ;;  %v7556_v9 = vmul.f32 %v15202_v34, %v7422_v61  ;;  %12214 = vtanh.f32 %v6871_v8 }
 0x681   : > { %v12201_v18 = vpop.eup %12200  ;;  %v7420_v15 = vadd.f32 %v12199_v28, %v14032_v27  ;;  %12216 = vtanh.f32 %v6868_v48 }
 0x682   : > { %v10436_v26 = vpop.f32.mrb[136].mxu0  ;;  %v12203_v43 = vpop.eup %12202  ;;  %v7723_v57 = vmul.f32 %v15202_v34, %v7454_v32  ;;  %7590 = vadd.xlane.f32.xlu1 %v7556_v9  ;;  %12218 = vtanh.f32 %v6654_v44 }
 0x683   : > { %v10484_v12 = vpop.f32.mrb[136].mxu1  ;;  %v15209_v10 = vpop.f32.mrb[137].mxu0  ;;  %v7423_v2 = vadd.f32 %v12203_v43, %v14028_v52  ;;  %v7554_v47 = vmul.f32 %v15202_v34, %v7420_v15  ;;  %v7452_v52 = vadd.f32 %v12201_v18, %v14043_v40  ;;  %12220 = vtanh.f32 %v6651_v24 }
 0x684   : > { %v12205_v59 = vpop.eup %12204  ;;  %v15213_v23 = vpop.f32.mrb[137].mxu1  ;;  %7757 = vadd.xlane.f32.xlu0 %v7723_v57  ;;  %12222 = vtanh.f32 %v6863_v30  ;;  %v6675_v9 = vadd.f32 %v10436_v26, %v15187_v5  ;;  %v6884_v26 = vadd.f32 %v10484_v12, %v15187_v5 }
 0x685   : > { %v10437_v1 = vpop.f32.mrb[138].mxu0  ;;  %v10485_v50 = vpop.f32.mrb[138].mxu1  ;;  %v7557_v27 = vmul.f32 %v15202_v34, %v7423_v2  ;;  %v7455_v53 = vadd.f32 %v12205_v59, %v14035_v56  ;;  %v7721_v40 = vmul.f32 %v15202_v34, %v7452_v52  ;;  %12224 = vtanh.f32 %v6860_v21 }
 0x686   : > { %v6669_v37 = vpop.f32.mrb[139].mxu0  ;;  %v15218_v58 = vpop.f32.mrb[139].mxu1  ;;  %v6678_v18 = vadd.f32 %v10437_v1, %v15187_v5  ;;  %v6887_v44 = vadd.f32 %v10485_v50, %v15187_v5 }
 0x687   : > { %v12207_v17 = vpop.eup %12206  ;;  %7592 = vadd.xlane.f32.xlu1 %v7557_v27  ;;  %v7724_v25 = vmul.f32 %v15202_v34, %v7455_v53  ;;  %v6670_v30 = vadd.f32 %v15187_v5, %v6669_v37 }
 0x688   : > { %v12209_v39 = vpop.eup %12208  ;;  %7586 = vadd.xlane.f32.xlu0 %v7554_v47  ;;  %v7453_v22 = vadd.f32 %v12207_v17, %v14046_v54  ;;  %12226 = vtanh.f32 %v6678_v18  ;;  %v6879_v18 = vadd.f32 %v15187_v5, %v15218_v58 }
 0x689   : > { %v12211_v61 = vpop.eup %12210  ;;  %v7421_v8 = vadd.f32 %v12209_v39, %v14039_v51  ;;  %12228 = vtanh.f32 %v6675_v9 }
 0x68a   : > { %v15226_v60 = vpop.f32.mrb[140].mxu0  ;;  %v12213_v35 = vpop.eup %12212  ;;  %v7722_v51 = vmul.f32 %v15202_v34, %v7453_v22  ;;  %v7427_v57 = vadd.f32 %v12211_v61, %v14071_v55  ;;  %12230 = vtanh.f32 %v6887_v44 }
 0x68b   : > { %v15230_v28 = vpop.f32.mrb[140].mxu1  ;;  %v15232_v56 = vpop.f32.mrb[141].mxu0  ;;  %7759 = vadd.xlane.f32.xlu1 %v7724_v25  ;;  %v7555_v59 = vmul.f32 %v15202_v34, %v7421_v8  ;;  %v7426_v2 = vadd.f32 %v12213_v35, %v14063_v13  ;;  %12232 = vtanh.f32 %v6884_v26  ;;  %v6667_v25 = vadd.f32 %v15187_v5, %v15209_v10 }
 0x68c   : > { %v15236_v32 = vpop.f32.mrb[141].mxu1  ;;  %v15238_v33 = vpop.f32.mrb[142].mxu0  ;;  %7753 = vadd.xlane.f32.xlu0 %v7721_v40  ;;  %v7561_v27 = vmul.f32 %v15202_v34, %v7427_v57  ;;  %12234 = vtanh.f32 %v6670_v30  ;;  %v6876_v10 = vadd.f32 %v15187_v5, %v15213_v23 }
 0x68d   : > { %v15241_v48 = vpop.f32.mrb[142].mxu1  ;;  %v15243_v54 = vpop.f32.mrb[143].mxu0  ;;  %v7560_v13 = vmul.f32 %v15202_v34, %v7426_v2  ;;  %12236 = vtanh.f32 %v6667_v25  ;;  %v6694_v23 = vadd.f32 %v15238_v33, %v15187_v5 }
 0x68e   : > { %v15246_v43 = vpop.f32.mrb[143].mxu1  ;;  %v12215_v15 = vpop.eup %12214  ;;  %12238 = vtanh.f32 %v6879_v18  ;;  %v6903_v30 = vadd.f32 %v15241_v48, %v15187_v5 }
 0x68f   : > { %v12217_v1 = vpop.eup %12216  ;;  %7755 = vadd.xlane.f32.xlu1 %v7722_v51  ;;  %v7459_v55 = vadd.f32 %v12215_v15, %v14079_v6  ;;  %12240 = vtanh.f32 %v6876_v10 }
 0x690   : > { %7588 = vadd.xlane.f32.xlu0 %v7555_v59  ;;  %v12219_v17 = vpop.eup %12218  ;;  %v7458_v50 = vadd.f32 %v12217_v1, %v14094_v49  ;;  %12242 = vtanh.f32 %v6694_v23  ;;  %v6895_v23 = vadd.f32 %v15187_v5, %v15246_v43 }
 0x691   : > { %v12221_v52 = vpop.eup %12220  ;;  %v7728_v49 = vmul.f32 %v15202_v34, %v7459_v55  ;;  %v7425_v61 = vadd.f32 %v12219_v17, %v14083_v29 }
 0x692   : > { %v15254_v24 = vpop.f32.mrb[144].mxu0  ;;  %v12223_v40 = vpop.eup %12222  ;;  %v7727_v8 = vmul.f32 %v15202_v34, %v7458_v50  ;;  %v7424_v37 = vadd.f32 %v12221_v52, %v14075_v0 }
 0x693   : > { %v15258_v47 = vpop.f32.mrb[144].mxu1  ;;  %v15260_v53 = vpop.f32.mrb[145].mxu0  ;;  %7600 = vadd.xlane.f32.xlu1 %v7561_v27  ;;  %v7559_v29 = vmul.f32 %v15202_v34, %v7425_v61  ;;  %v7457_v51 = vadd.f32 %v12223_v40, %v14091_v7  ;;  %v6691_v27 = vadd.f32 %v15226_v60, %v15187_v5  ;;  %v6900_v60 = vadd.f32 %v15230_v28, %v15187_v5 }
 0x694   : > { %v15264_v39 = vpop.f32.mrb[145].mxu1  ;;  %v15266_v12 = vpop.f32.mrb[146].mxu0  ;;  %7598 = vadd.xlane.f32.xlu0 %v7560_v13  ;;  %v7558_v59 = vmul.f32 %v15202_v34, %v7424_v37  ;;  %v6686_v28 = vadd.f32 %v15187_v5, %v15243_v54 }
 0x695   : > { %v15269_v21 = vpop.f32.mrb[146].mxu1  ;;  %v15271_v6 = vpop.f32.mrb[147].mxu0  ;;  %v7726_v55 = vmul.f32 %v15202_v34, %v7457_v51  ;;  %12244 = vtanh.f32 %v6691_v27 }
 0x696   : > { %v15275_v22 = vpop.f32.mrb[147].mxu1  ;;  %v12225_v35 = vpop.eup %12224  ;;  %12246 = vtanh.f32 %v6903_v30 }
 0x697   : > { %7767 = vadd.xlane.f32.xlu1 %v7728_v49  ;;  %v12227_v57 = vpop.eup %12226  ;;  %v7456_v58 = vadd.f32 %v12225_v35, %v14088_v31  ;;  %12248 = vtanh.f32 %v6900_v60 }
 0x698   : > { %7765 = vadd.xlane.f32.xlu0 %v7727_v8  ;;  %v12229_v2 = vpop.eup %12228  ;;  %v7431_v17 = vadd.f32 %v12227_v57, %v14118_v11  ;;  %12250 = vtanh.f32 %v6686_v28  ;;  %v6919_v28 = vadd.f32 %v15269_v21, %v15187_v5 }
 0x699   : > { %v12231_v13 = vpop.eup %12230  ;;  %v7725_v50 = vmul.f32 %v15202_v34, %v7456_v58  ;;  %v7430_v33 = vadd.f32 %v12229_v2, %v14112_v4 }
 0x69a   : > { %v15285_v9 = vpop.f32.mrb[148].mxu0  ;;  %v12233_v52 = vpop.eup %12232  ;;  %v7565_v11 = vmul.f32 %v15202_v34, %v7431_v17  ;;  %v7463_v49 = vadd.f32 %v12231_v13, %v14127_v19 }
 0x69b   : > { %v15289_v15 = vpop.f32.mrb[148].mxu1  ;;  %v15291_v0 = vpop.f32.mrb[149].mxu0  ;;  %7596 = vadd.xlane.f32.xlu1 %v7559_v29  ;;  %v7564_v8 = vmul.f32 %v15202_v34, %v7430_v33  ;;  %v7462_v48 = vadd.f32 %v12233_v52, %v14142_v45  ;;  %v6683_v29 = vadd.f32 %v15187_v5, %v15232_v56  ;;  %v6892_v56 = vadd.f32 %v15187_v5, %v15236_v32 }
 0x69c   : > { %v15295_v1 = vpop.f32.mrb[149].mxu1  ;;  %v15297_v44 = vpop.f32.mrb[150].mxu0  ;;  %7594 = vadd.xlane.f32.xlu0 %v7558_v59  ;;  %v7732_v51 = vmul.f32 %v15202_v34, %v7463_v49  ;;  %v6710_v32 = vadd.f32 %v15266_v12, %v15187_v5 }
 0x69d   : > { %v15301_v7 = vpop.f32.mrb[150].mxu1  ;;  %v15303_v26 = vpop.f32.mrb[151].mxu0  ;;  %v7731_v58 = vmul.f32 %v15202_v34, %v7462_v48  ;;  %12252 = vtanh.f32 %v6683_v29 }
 0x69e   : > { %v15307_v31 = vpop.f32.mrb[151].mxu1  ;;  %v12235_v61 = vpop.eup %12234  ;;  %12254 = vtanh.f32 %v6895_v23 }
 0x69f   : > { %7763 = vadd.xlane.f32.xlu1 %v7726_v55  ;;  %v12237_v37 = vpop.eup %12236  ;;  %v7429_v57 = vadd.f32 %v12235_v61, %v14131_v63  ;;  %12256 = vtanh.f32 %v6892_v56 }
 0x6a0   : > { %7761 = vadd.xlane.f32.xlu0 %v7725_v50  ;;  %v12239_v59 = vpop.eup %12238  ;;  %v7428_v54 = vadd.f32 %v12237_v37, %v14122_v14  ;;  %12258 = vtanh.f32 %v6710_v32 }
 0x6a1   : > { %v12241_v2 = vpop.eup %12240  ;;  %v7563_v63 = vmul.f32 %v15202_v34, %v7429_v57  ;;  %v7461_v55 = vadd.f32 %v12239_v59, %v14139_v36 }
 0x6a2   : > { %v15317_v25 = vpop.f32.mrb[152].mxu0  ;;  %v12243_v17 = vpop.eup %12242  ;;  %v7562_v50 = vmul.f32 %v15202_v34, %v7428_v54  ;;  %v7460_v43 = vadd.f32 %v12241_v2, %v14136_v62 }
 0x6a3   : > { %v15321_v40 = vpop.f32.mrb[152].mxu1  ;;  %v15323_v4 = vpop.f32.mrb[153].mxu0  ;;  %7608 = vadd.xlane.f32.xlu1 %v7565_v11  ;;  %v6707_v11 = vadd.f32 %v15254_v24, %v15187_v5  ;;  %v7730_v49 = vmul.f32 %v15202_v34, %v7461_v55  ;;  %v7435_v61 = vadd.f32 %v12243_v17, %v14166_v46  ;;  %v6916_v24 = vadd.f32 %v15258_v47, %v15187_v5 }
 0x6a4   : > { %v15327_v35 = vpop.f32.mrb[153].mxu1  ;;  %v15329_v18 = vpop.f32.mrb[154].mxu0  ;;  %7606 = vadd.xlane.f32.xlu0 %v7564_v8  ;;  %v7729_v48 = vmul.f32 %v15202_v34, %v7460_v43  ;;  %v6702_v47 = vadd.f32 %v15187_v5, %v15271_v6 }
 0x6a5   : > { %v15333_v19 = vpop.f32.mrb[154].mxu1  ;;  %v15335_v10 = vpop.f32.mrb[155].mxu0  ;;  %12260 = vtanh.f32 %v6707_v11  ;;  %v7569_v46 = vmul.f32 %v15202_v34, %v7435_v61  ;;  %v6911_v11 = vadd.f32 %v15187_v5, %v15275_v22  ;;  %v16802_v61 = vld [vmem:[#allocation101_spill] sm:$0xff] }
 0x6a6   : > { %v15339_v45 = vpop.f32.mrb[155].mxu1  ;;  %v12245_v33 = vpop.eup %12244  ;;  %12262 = vtanh.f32 %v6919_v28 }
 0x6a7   : > { %7775 = vadd.xlane.f32.xlu1 %v7732_v51  ;;  %v12247_v8 = vpop.eup %12246  ;;  %v7434_v12 = vadd.f32 %v12245_v33, %v14160_v38  ;;  %12264 = vtanh.f32 %v6916_v24  ;;  %v16801_v33 = vld [vmem:[#allocation99_spill] sm:$0xff]  ;;  %v16803_v24 = vld [vmem:[#allocation100_spill] sm:$0xff] }
 0x6a8   : > { %7773 = vadd.xlane.f32.xlu0 %v7731_v58  ;;  %v12249_v37 = vpop.eup %12248  ;;  %v7467_v51 = vadd.f32 %v12247_v8, %v14175_v20  ;;  %12266 = vtanh.f32 %v6702_v47 }
 0x6a9   : > { %v12251_v57 = vpop.eup %12250  ;;  %v7568_v58 = vmul.f32 %v15202_v34, %v7434_v12  ;;  %v7466_v21 = vadd.f32 %v12249_v37, %v14192_v16 }
 0x6aa   : > { %v15349_v27 = vpop.f32.mrb[156].mxu0  ;;  %v12253_v54 = vpop.eup %12252  ;;  %v7736_v55 = vmul.f32 %v15202_v34, %v7467_v51  ;;  %v7433_v17 = vadd.f32 %v12251_v57, %v14179_v42 }
 0x6ab   : > { %v15353_v13 = vpop.f32.mrb[156].mxu1  ;;  %v15355_v14 = vpop.f32.mrb[157].mxu0  ;;  %7604 = vadd.xlane.f32.xlu1 %v7563_v63  ;;  %v6699_v63 = vadd.f32 %v15187_v5, %v15260_v53  ;;  %v7735_v43 = vmul.f32 %v15202_v34, %v7466_v21  ;;  %v7432_v6 = vadd.f32 %v12253_v54, %v16801_v33  ;;  %v6908_v53 = vadd.f32 %v15187_v5, %v15264_v39  ;;  %v16805_v33 = vld [vmem:[#allocation9_spill] sm:$0xff] }
 0x6ac   : > { %v15359_v52 = vpop.f32.mrb[157].mxu1  ;;  %v15361_v30 = vpop.f32.mrb[158].mxu0  ;;  %7602 = vadd.xlane.f32.xlu0 %v7562_v50  ;;  %v7567_v42 = vmul.f32 %v15202_v34, %v7433_v17  ;;  %v6726_v39 = vadd.f32 %v15297_v44, %v15187_v5  ;;  %v6723_v54 = vadd.f32 %v15285_v9, %v15187_v5  ;;  %v6932_v9 = vadd.f32 %v15289_v15, %v15187_v5 }
 0x6ad   : > { %v15365_v36 = vpop.f32.mrb[158].mxu1  ;;  %v15367_v60 = vpop.f32.mrb[159].mxu0  ;;  %12268 = vtanh.f32 %v6699_v63  ;;  %v7566_v28 = vmul.f32 %v15202_v34, %v7432_v6  ;;  %v6718_v15 = vadd.f32 %v15187_v5, %v15303_v26 }
 0x6ae   : > { %v15371_v62 = vpop.f32.mrb[159].mxu1  ;;  %v12255_v50 = vpop.eup %12254  ;;  %12270 = vtanh.f32 %v6911_v11 }
 0x6af   : > { %7771 = vadd.xlane.f32.xlu1 %v7730_v49  ;;  %v12257_v32 = vpop.eup %12256  ;;  %v7465_v8 = vadd.f32 %v12255_v50, %v16802_v61  ;;  %12272 = vtanh.f32 %v6908_v53 }
 0x6b0   : > { %7769 = vadd.xlane.f32.xlu0 %v7729_v48  ;;  %v12259_v48 = vpop.eup %12258  ;;  %v7464_v22 = vadd.f32 %v12257_v32, %v16803_v24  ;;  %12274 = vtanh.f32 %v6726_v39  ;;  %v6935_v32 = vadd.f32 %v15301_v7, %v15187_v5 }
 0x6b1   : > { %v7734_v63 = vmul.f32 %v15202_v34, %v7465_v8  ;;  %12276 = vtanh.f32 %v6723_v54 }
 0x6b2   : > { %v15381_v29 = vpop.f32.mrb[160].mxu0  ;;  %12278 = vtanh.f32 %v6935_v32 }
 0x6b3   : > { %v15385_v59 = vpop.f32.mrb[160].mxu1  ;;  %v15387_v38 = vpop.f32.mrb[161].mxu0  ;;  %7616 = vadd.xlane.f32.xlu1 %v7569_v46  ;;  %12280 = vtanh.f32 %v6932_v9  ;;  %v6927_v9 = vadd.f32 %v15187_v5, %v15307_v31 }
 0x6b4   : > { %v15391_v2 = vpop.f32.mrb[161].mxu1  ;;  %v15393_v23 = vpop.f32.mrb[162].mxu0  ;;  %7614 = vadd.xlane.f32.xlu0 %v7568_v58  ;;  %12282 = vtanh.f32 %v6718_v15 }
 0x6b5   : > { %v15397_v20 = vpop.f32.mrb[162].mxu1  ;;  %v15399_v56 = vpop.f32.mrb[163].mxu0 }
 0x6b6   : > { %v15403_v16 = vpop.f32.mrb[163].mxu1  ;;  %v12261_v46 = vpop.eup %12260 }
 0x6b7   : > { %7783 = vadd.xlane.f32.xlu1 %v7736_v55  ;;  %v16804_v55 = vld [vmem:[#allocation7_spill] sm:$0xff]  ;;  %v12263_v50 = vpop.eup %12262  ;;  %v7438_v44 = vadd.f32 %v12261_v46, %v16805_v33 }
 0x6b8   : > { %7781 = vadd.xlane.f32.xlu0 %v7735_v43  ;;  %v7439_v17 = vadd.f32 %v12259_v48, %v16804_v55  ;;  %v7733_v43 = vmul.f32 %v15202_v34, %v7464_v22  ;;  %v12265_v6 = vpop.eup %12264  ;;  %v16807_v22 = vld [vmem:[#allocation10_spill] sm:$0xff]  ;;  %v16808_v33 = vld [vmem:[#allocation3_spill] sm:$0xff] }
 0x6b9   : > { %v12267_v8 = vpop.eup %12266  ;;  %v7572_v24 = vmul.f32 %v15202_v34, %v7438_v44  ;;  %v7470_v7 = vadd.f32 %v12265_v6, %v16807_v22 }
 0x6ba   : > { %v15413_v49 = vpop.f32.mrb[164].mxu0  ;;  %v7573_v53 = vmul.f32 %v15202_v34, %v7439_v17  ;;  %v12269_v46 = vpop.eup %12268  ;;  %v6715_v17 = vadd.f32 %v15187_v5, %v15291_v0  ;;  %v7437_v44 = vadd.f32 %v12267_v8, %v16808_v33  ;;  %v6924_v0 = vadd.f32 %v15187_v5, %v15295_v1  ;;  %v16810_v8 = vld [vmem:[#allocation4_spill] sm:$0xff] }
 0x6bb   : > { %v15417_v12 = vpop.f32.mrb[164].mxu1  ;;  %v15419_v37 = vpop.f32.mrb[165].mxu0  ;;  %7612 = vadd.xlane.f32.xlu1 %v7567_v42  ;;  %v16806_v42 = vld [vmem:[#allocation8_spill] sm:$0xff]  ;;  %v7739_v32 = vmul.f32 %v15202_v34, %v7470_v7  ;;  %v6742_v1 = vadd.f32 %v15329_v18, %v15187_v5 }
 0x6bc   : > { %v15423_v51 = vpop.f32.mrb[165].mxu1  ;;  %v15425_v57 = vpop.f32.mrb[166].mxu0  ;;  %7610 = vadd.xlane.f32.xlu0 %v7566_v28  ;;  %v7471_v61 = vadd.f32 %v12263_v50, %v16806_v42  ;;  %12284 = vtanh.f32 %v6715_v17 }
 0x6bd   : > { %v15429_v58 = vpop.f32.mrb[166].mxu1  ;;  %v15431_v21 = vpop.f32.mrb[167].mxu0  ;;  %12286 = vtanh.f32 %v6927_v9 }
 0x6be   : > { %v15435_v47 = vpop.f32.mrb[167].mxu1  ;;  %v12271_v6 = vpop.eup %12270  ;;  %12288 = vtanh.f32 %v6924_v0  ;;  %v6951_v0 = vadd.f32 %v15333_v19, %v15187_v5 }
 0x6bf   : > { %7779 = vadd.xlane.f32.xlu1 %v7734_v63  ;;  %v12273_v42 = vpop.eup %12272  ;;  %v7469_v22 = vadd.f32 %v12271_v6, %v16810_v8  ;;  %12290 = vtanh.f32 %v6742_v1  ;;  %v16819_v1 = vld [vmem:[#allocation18_spill] sm:$0xff] }
 0x6c0   : > { %7777 = vadd.xlane.f32.xlu0 %v7733_v43  ;;  %v7740_v43 = vmul.f32 %v15202_v34, %v7471_v61  ;;  %v7571_v61 = vmul.f32 %v15202_v34, %v7437_v44  ;;  %v12275_v7 = vpop.eup %12274 }
 0x6c1   : > { %v7738_v8 = vmul.f32 %v15202_v34, %v7469_v22 }
 0x6c2   : > { %v15445_v11 = vpop.f32.mrb[168].mxu0 }
 0x6c3   : > { %v15449_v48 = vpop.f32.mrb[168].mxu1  ;;  %v15451_v28 = vpop.f32.mrb[169].mxu0  ;;  %7624 = vadd.xlane.f32.xlu1 %v7573_v53  ;;  %v16809_v53 = vld [vmem:[#allocation5_spill] sm:$0xff] }
 0x6c4   : > { %v15455_v39 = vpop.f32.mrb[169].mxu1  ;;  %v15457_v54 = vpop.f32.mrb[170].mxu0  ;;  %7622 = vadd.xlane.f32.xlu0 %v7572_v24  ;;  %v7436_v26 = vadd.f32 %v12269_v46, %v16809_v53 }
 0x6c5   : > { %v15461_v63 = vpop.f32.mrb[170].mxu1  ;;  %v15463_v55 = vpop.f32.mrb[171].mxu0 }
 0x6c6   : > { %v15467_v50 = vpop.f32.mrb[171].mxu1  ;;  %v7570_v15 = vmul.f32 %v15202_v34, %v7436_v26  ;;  %v6739_v26 = vadd.f32 %v15317_v25, %v15187_v5  ;;  %v6948_v25 = vadd.f32 %v15321_v40, %v15187_v5 }
 0x6c7   : > { %7791 = vadd.xlane.f32.xlu1 %v7740_v43  ;;  %v16811_v43 = vld [vmem:[#allocation6_spill] sm:$0xff] }
 0x6c8   : > { %7789 = vadd.xlane.f32.xlu0 %v7739_v32  ;;  %v7468_v31 = vadd.f32 %v12273_v42, %v16811_v43  ;;  %v12277_v32 = vpop.eup %12276  ;;  %v16814_v43 = vld [vmem:[#allocation15_spill] sm:$0xff]  ;;  %12292 = vtanh.f32 %v6739_v26 }
 0x6c9   : > { %v7443_v41 = vadd.f32 %v12275_v7, %v16814_v43  ;;  %v7442_v18 = vadd.f32 %v12277_v32, %v16815_v3  ;;  %v16816_v7 = vld [vmem:[#allocation16_spill] sm:$0xff]  ;;  %12294 = vtanh.f32 %v6951_v0 }
 0x6ca   : > { %v15477_v24 = vpop.f32.mrb[172].mxu0  ;;  %v7737_v9 = vmul.f32 %v15202_v34, %v7468_v31  ;;  %12296 = vtanh.f32 %v6948_v25  ;;  %v6943_v25 = vadd.f32 %v15187_v5, %v15339_v45 }
 0x6cb   : > { %v15481_v33 = vpop.f32.mrb[172].mxu1  ;;  %v15483_v46 = vpop.f32.mrb[173].mxu0  ;;  %7620 = vadd.xlane.f32.xlu1 %v7571_v61  ;;  %v7577_v22 = vmul.f32 %v15202_v34, %v7443_v41  ;;  %v7576_v32 = vmul.f32 %v15202_v34, %v7442_v18  ;;  %v6734_v41 = vadd.f32 %v15187_v5, %v15335_v10  ;;  %v6731_v18 = vadd.f32 %v15187_v5, %v15323_v4 }
 0x6cc   : > { %v15487_v17 = vpop.f32.mrb[173].mxu1  ;;  %v15489_v53 = vpop.f32.mrb[174].mxu0  ;;  %7618 = vadd.xlane.f32.xlu0 %v7570_v15  ;;  %v6940_v4 = vadd.f32 %v15187_v5, %v15327_v35  ;;  %v6758_v35 = vadd.f32 %v15361_v30, %v15187_v5 }
 0x6cd   : > { %16812 = vst [vmem:[#allocation99_spill] sm:$0xff] %v15487_v17  ;;  %v15493_v44 = vpop.f32.mrb[174].mxu1  ;;  %v15495_v6 = vpop.f32.mrb[175].mxu0  ;;  %12298 = vtanh.f32 %v6734_v41  ;;  %v16827_v41 = vld [vmem:[#allocation14_spill] sm:$0xff] }
 0x6ce   : > { %v15499_v42 = vpop.f32.mrb[175].mxu1  ;;  %v12279_v61 = vpop.eup %12278  ;;  %12300 = vtanh.f32 %v6731_v18 }
 0x6cf   : > { %16813 = vst [vmem:[#allocation101_spill] sm:$0xff] %v15499_v42  ;;  %v12281_v17 = vpop.eup %12280  ;;  %7787 = vadd.xlane.f32.xlu1 %v7738_v8  ;;  %v7475_v43 = vadd.f32 %v12279_v61, %v16816_v7  ;;  %12302 = vtanh.f32 %v6943_v25 }
 0x6d0   : > { %7785 = vadd.xlane.f32.xlu0 %v7737_v9  ;;  %v12283_v31 = vpop.eup %12282  ;;  %v7474_v19 = vadd.f32 %v12281_v17, %v16819_v1  ;;  %v16822_v1 = vld [vmem:[#allocation11_spill] sm:$0xff]  ;;  %12304 = vtanh.f32 %v6940_v4  ;;  %v6967_v4 = vadd.f32 %v15365_v36, %v15187_v5 }
 0x6d1   : > { %v12285_v8 = vpop.eup %12284  ;;  %v7744_v7 = vmul.f32 %v15202_v34, %v7475_v43  ;;  %12306 = vtanh.f32 %v6758_v35  ;;  %v16835_v35 = vld [vmem:[#allocation26_spill] sm:$0xff] }
 0x6d2   : > { %v15509_v15 = vpop.f32.mrb[176].mxu0  ;;  %v7743_v0 = vmul.f32 %v15202_v34, %v7474_v19 }
 0x6d3   : > { %v15513_v42 = vpop.f32.mrb[176].mxu1  ;;  %v15515_v3 = vpop.f32.mrb[177].mxu0  ;;  %7632 = vadd.xlane.f32.xlu1 %v7577_v22 }
 0x6d4   : > { %16817 = vst [vmem:[#allocation100_spill] sm:$0xff] %v15513_v42  ;;  %16818 = vst [vmem:[#allocation7_spill] sm:$0xff] %v15515_v3  ;;  %v15519_v26 = vpop.f32.mrb[177].mxu1  ;;  %v15521_v9 = vpop.f32.mrb[178].mxu0  ;;  %7630 = vadd.xlane.f32.xlu0 %v7576_v32  ;;  %v16823_v3 = vld [vmem:[#allocation13_spill] sm:$0xff] }
 0x6d5   : > { %16820 = vst [vmem:[#allocation9_spill] sm:$0xff] %v15519_v26  ;;  %v15525_v40 = vpop.f32.mrb[178].mxu1  ;;  %v15527_v61 = vpop.f32.mrb[179].mxu0  ;;  %v7441_v26 = vadd.f32 %v12283_v31, %v16822_v1  ;;  %v7440_v10 = vadd.f32 %v12285_v8, %v16823_v3  ;;  %v16824_v31 = vld [vmem:[#allocation12_spill] sm:$0xff] }
 0x6d6   : > { %v15531_v17 = vpop.f32.mrb[179].mxu1  ;;  %v12287_v22 = vpop.eup %12286 }
 0x6d7   : > { %16821 = vst [vmem:[#allocation8_spill] sm:$0xff] %v15531_v17  ;;  %v12289_v42 = vpop.eup %12288  ;;  %7799 = vadd.xlane.f32.xlu1 %v7744_v7  ;;  %v7575_v43 = vmul.f32 %v15202_v34, %v7441_v26  ;;  %v7473_v1 = vadd.f32 %v12287_v22, %v16824_v31  ;;  %v7574_v8 = vmul.f32 %v15202_v34, %v7440_v10 }
 0x6d8   : > { %7797 = vadd.xlane.f32.xlu0 %v7743_v0  ;;  %v12291_v19 = vpop.eup %12290  ;;  %v7472_v45 = vadd.f32 %v12289_v42, %v16827_v41  ;;  %v6755_v10 = vadd.f32 %v15349_v27, %v15187_v5  ;;  %v16830_v41 = vld [vmem:[#allocation23_spill] sm:$0xff]  ;;  %v6964_v27 = vadd.f32 %v15353_v13, %v15187_v5  ;;  %v6750_v13 = vadd.f32 %v15187_v5, %v15367_v60 }
 0x6d9   : > { %v12293_v7 = vpop.eup %12292  ;;  %v7742_v31 = vmul.f32 %v15202_v34, %v7473_v1 }
 0x6da   : > { %v15541_v32 = vpop.f32.mrb[180].mxu0  ;;  %v7741_v25 = vmul.f32 %v15202_v34, %v7472_v45  ;;  %12308 = vtanh.f32 %v6755_v10 }
 0x6db   : > { %v15545_v17 = vpop.f32.mrb[180].mxu1  ;;  %v15547_v3 = vpop.f32.mrb[181].mxu0  ;;  %7628 = vadd.xlane.f32.xlu1 %v7575_v43  ;;  %12310 = vtanh.f32 %v6967_v4 }
 0x6dc   : > { %16825 = vst [vmem:[#allocation10_spill] sm:$0xff] %v15545_v17  ;;  %16826 = vst [vmem:[#allocation3_spill] sm:$0xff] %v15547_v3  ;;  %v15551_v18 = vpop.f32.mrb[181].mxu1  ;;  %v15553_v0 = vpop.f32.mrb[182].mxu0  ;;  %7626 = vadd.xlane.f32.xlu0 %v7574_v8  ;;  %v16831_v3 = vld [vmem:[#allocation25_spill] sm:$0xff]  ;;  %12312 = vtanh.f32 %v6964_v27  ;;  %v6959_v27 = vadd.f32 %v15187_v5, %v15371_v62 }
 0x6dd   : > { %16828 = vst [vmem:[#allocation5_spill] sm:$0xff] %v15551_v18  ;;  %v15557_v26 = vpop.f32.mrb[182].mxu1  ;;  %v15559_v22 = vpop.f32.mrb[183].mxu0  ;;  %v7447_v18 = vadd.f32 %v12291_v19, %v16830_v41  ;;  %v7446_v30 = vadd.f32 %v12293_v7, %v16831_v3  ;;  %v16832_v19 = vld [vmem:[#allocation24_spill] sm:$0xff]  ;;  %12314 = vtanh.f32 %v6750_v13  ;;  %v16843_v13 = vld [vmem:[#allocation22_spill] sm:$0xff] }
 0x6de   : > { %v15563_v42 = vpop.f32.mrb[183].mxu1  ;;  %v12295_v43 = vpop.eup %12294 }
 0x6df   : > { %16829 = vst [vmem:[#allocation4_spill] sm:$0xff] %v15563_v42  ;;  %v12297_v17 = vpop.eup %12296  ;;  %7795 = vadd.xlane.f32.xlu1 %v7742_v31  ;;  %v7581_v1 = vmul.f32 %v15202_v34, %v7447_v18  ;;  %v7479_v41 = vadd.f32 %v12295_v43, %v16832_v19  ;;  %v7580_v7 = vmul.f32 %v15202_v34, %v7446_v30 }
 0x6e0   : > { %7793 = vadd.xlane.f32.xlu0 %v7741_v25  ;;  %v12299_v45 = vpop.eup %12298  ;;  %v7478_v36 = vadd.f32 %v12297_v17, %v16835_v35  ;;  %v6747_v30 = vadd.f32 %v15187_v5, %v15355_v14  ;;  %v16838_v35 = vld [vmem:[#allocation19_spill] sm:$0xff]  ;;  %v6956_v14 = vadd.f32 %v15187_v5, %v15359_v52  ;;  %v7064_v52 = vadd.f32 %v15393_v23, %v15187_v5 }
 0x6e1   : > { %v12301_v31 = vpop.eup %12300  ;;  %v7748_v19 = vmul.f32 %v15202_v34, %v7479_v41 }
 0x6e2   : > { %v15573_v8 = vpop.f32.mrb[184].mxu0  ;;  %v7747_v4 = vmul.f32 %v15202_v34, %v7478_v36  ;;  %12316 = vtanh.f32 %v6747_v30 }
 0x6e3   : > { %v15577_v42 = vpop.f32.mrb[184].mxu1  ;;  %v15579_v3 = vpop.f32.mrb[185].mxu0  ;;  %7640 = vadd.xlane.f32.xlu1 %v7581_v1  ;;  %12318 = vtanh.f32 %v6959_v27 }
 0x6e4   : > { %16833 = vst [vmem:[#allocation6_spill] sm:$0xff] %v15577_v42  ;;  %16834 = vst [vmem:[#allocation15_spill] sm:$0xff] %v15579_v3  ;;  %v15583_v10 = vpop.f32.mrb[185].mxu1  ;;  %v15585_v25 = vpop.f32.mrb[186].mxu0  ;;  %7638 = vadd.xlane.f32.xlu0 %v7580_v7  ;;  %v16839_v3 = vld [vmem:[#allocation21_spill] sm:$0xff]  ;;  %12320 = vtanh.f32 %v6956_v14  ;;  %v7273_v14 = vadd.f32 %v15397_v20, %v15187_v5  ;;  %v7056_v20 = vadd.f32 %v15187_v5, %v15399_v56 }
 0x6e5   : > { %16836 = vst [vmem:[#allocation17_spill] sm:$0xff] %v15583_v10  ;;  %v15589_v18 = vpop.f32.mrb[186].mxu1  ;;  %v15591_v43 = vpop.f32.mrb[187].mxu0  ;;  %v7445_v10 = vadd.f32 %v12299_v45, %v16838_v35  ;;  %v7444_v60 = vadd.f32 %v12301_v31, %v16839_v3  ;;  %v16840_v45 = vld [vmem:[#allocation20_spill] sm:$0xff]  ;;  %12322 = vtanh.f32 %v7064_v52  ;;  %v16850_v52 = vld [vmem:[#allocation27_spill] sm:$0xff] }
 0x6e6   : > { %v15595_v17 = vpop.f32.mrb[187].mxu1  ;;  %v12303_v1 = vpop.eup %12302  ;;  %v15652_v56 = vld [vmem:[%s16311_s4 + $0x5] ss:$0 sm:$0xff] }
 0x6e7   : > { %16837 = vst [vmem:[#allocation16_spill] sm:$0xff] %v15595_v17  ;;  %v12305_v42 = vpop.eup %12304  ;;  %7807 = vadd.xlane.f32.xlu1 %v7748_v19  ;;  %v7579_v41 = vmul.f32 %v15202_v34, %v7445_v10  ;;  %v7477_v35 = vadd.f32 %v12303_v1, %v16840_v45  ;;  %v7578_v31 = vmul.f32 %v15202_v34, %v7444_v60 }
 0x6e8   : > { %7805 = vadd.xlane.f32.xlu0 %v7747_v4  ;;  %v12307_v36 = vpop.eup %12306  ;;  %v7476_v62 = vadd.f32 %v12305_v42, %v16843_v13  ;;  %v7061_v60 = vadd.f32 %v15381_v29, %v15187_v5  ;;  %v16846_v13 = vld [vmem:[#allocation31_spill] sm:$0xff]  ;;  %v7270_v29 = vadd.f32 %v15385_v59, %v15187_v5  ;;  %v7053_v59 = vadd.f32 %v15187_v5, %v15387_v38 }
 0x6e9   : > { %v12309_v19 = vpop.eup %12308  ;;  %v7746_v45 = vmul.f32 %v15202_v34, %v7477_v35  ;;  %v7265_v5 = vadd.f32 %v15652_v56, %v15403_v16  ;;  %v7262_v38 = vadd.f32 %v15652_v56, %v15391_v2  ;;  %v7080_v16 = vadd.f32 %v15652_v56, %v15425_v57 }
 0x6ea   : > { %v15605_v7 = vpop.f32.mrb[188].mxu0  ;;  %v7745_v27 = vmul.f32 %v15202_v34, %v7476_v62  ;;  %12324 = vtanh.f32 %v7061_v60  ;;  %v7077_v2 = vadd.f32 %v15652_v56, %v15413_v49  ;;  %v7289_v57 = vadd.f32 %v15652_v56, %v15429_v58 }
 0x6eb   : > { %v15609_v17 = vpop.f32.mrb[188].mxu1  ;;  %v15611_v3 = vpop.f32.mrb[189].mxu0  ;;  %7636 = vadd.xlane.f32.xlu1 %v7579_v41  ;;  %12326 = vtanh.f32 %v7273_v14  ;;  %v16852_v14 = vld [vmem:[#allocation28_spill] sm:$0xff]  ;;  %v7286_v49 = vadd.f32 %v15652_v56, %v15417_v12  ;;  %v7072_v58 = vadd.f32 %v15652_v56, %v15431_v21  ;;  %v7069_v12 = vadd.f32 %v15652_v56, %v15419_v37 }
 0x6ec   : > { %16841 = vst [vmem:[#allocation18_spill] sm:$0xff] %v15609_v17  ;;  %16842 = vst [vmem:[#allocation11_spill] sm:$0xff] %v15611_v3  ;;  %v15615_v30 = vpop.f32.mrb[189].mxu1  ;;  %v15617_v4 = vpop.f32.mrb[190].mxu0  ;;  %7634 = vadd.xlane.f32.xlu0 %v7578_v31  ;;  %v7451_v17 = vadd.f32 %v12307_v36, %v16846_v13  ;;  %v16848_v31 = vld [vmem:[#allocation32_spill] sm:$0xff]  ;;  %12328 = vtanh.f32 %v7270_v29  ;;  %v7281_v37 = vadd.f32 %v15652_v56, %v15435_v47 }
 0x6ed   : > { %16844 = vst [vmem:[#allocation13_spill] sm:$0xff] %v15615_v30  ;;  %v15621_v10 = vpop.f32.mrb[190].mxu1  ;;  %v15623_v1 = vpop.f32.mrb[191].mxu0  ;;  %v16847_v30 = vld [vmem:[#allocation33_spill] sm:$0xff]  ;;  %12330 = vtanh.f32 %v7056_v20  ;;  %v7096_v47 = vadd.f32 %v15652_v56, %v15457_v54  ;;  %v7305_v54 = vadd.f32 %v15652_v56, %v15461_v63 }
 0x6ee   : > { %16845 = vst [vmem:[#allocation12_spill] sm:$0xff] %v15621_v10  ;;  %v15627_v42 = vpop.f32.mrb[191].mxu1  ;;  %v12311_v41 = vpop.eup %12310  ;;  %v7450_v23 = vadd.f32 %v12309_v19, %v16847_v30  ;;  %v7585_v35 = vmul.f32 %v15202_v34, %v7451_v17  ;;  %v16849_v10 = vld [vmem:[#allocation34_spill] sm:$0xff]  ;;  %12332 = vtanh.f32 %v7053_v59 }
 0x6ef   : > { %v12313_v3 = vpop.eup %12312  ;;  %7803 = vadd.xlane.f32.xlu1 %v7746_v45  ;;  %v7483_v36 = vadd.f32 %v12311_v41, %v16848_v31  ;;  %12334 = vtanh.f32 %v7265_v5 }
 0x6f0   : > { %7801 = vadd.xlane.f32.xlu0 %v7745_v27  ;;  %v12315_v13 = vpop.eup %12314  ;;  %v7584_v62 = vmul.f32 %v15202_v34, %v7450_v23  ;;  %v7482_v19 = vadd.f32 %v12313_v3, %v16849_v10  ;;  %v16851_v27 = vld [vmem:[#allocation29_spill] sm:$0xff]  ;;  %12336 = vtanh.f32 %v7262_v38  ;;  %v16857_v38 = vld [vmem:[#allocation42_spill] sm:$0xff] }
 0x6f1   : > { %v12317_v30 = vpop.eup %12316  ;;  %v7752_v17 = vmul.f32 %v15202_v34, %v7483_v36  ;;  %v7449_v60 = vadd.f32 %v12315_v13, %v16850_v52  ;;  %v16853_v36 = vld [vmem:[#allocation30_spill] sm:$0xff]  ;;  %v16855_v52 = vld [vmem:[#allocation41_spill] sm:$0xff]  ;;  %12338 = vtanh.f32 %v7080_v16 }
 0x6f2   : > { %v12319_v45 = vpop.eup %12318  ;;  %v7751_v41 = vmul.f32 %v15202_v34, %v7482_v19  ;;  %v7448_v3 = vadd.f32 %v12317_v30, %v16851_v27  ;;  %v16854_v30 = vld [vmem:[#allocation39_spill] sm:$0xff]  ;;  %12340 = vtanh.f32 %v7077_v2  ;;  %v16856_v27 = vld [vmem:[#allocation40_spill] sm:$0xff]  ;;  %v7278_v2 = vadd.f32 %v15652_v56, %v15423_v51 }
 0x6f3   : > { %7648 = vadd.xlane.f32.xlu1 %v7585_v35  ;;  %v12321_v10 = vpop.eup %12320  ;;  %v7583_v23 = vmul.f32 %v15202_v34, %v7449_v60  ;;  %v7481_v29 = vadd.f32 %v12319_v45, %v16852_v14  ;;  %12342 = vtanh.f32 %v7289_v57  ;;  %v7093_v51 = vadd.f32 %v15652_v56, %v15445_v11 }
 0x6f4   : > { %7646 = vadd.xlane.f32.xlu0 %v7584_v62  ;;  %v12323_v35 = vpop.eup %12322  ;;  %v7582_v31 = vmul.f32 %v15202_v34, %v7448_v3  ;;  %v7480_v13 = vadd.f32 %v12321_v10, %v16853_v36  ;;  %12344 = vtanh.f32 %v7286_v49  ;;  %v16862_v49 = vld [vmem:[#allocation47_spill] sm:$0xff]  ;;  %v7302_v11 = vadd.f32 %v15652_v56, %v15449_v48 }
 0x6f5   : > { %v12325_v62 = vpop.eup %12324  ;;  %v7750_v19 = vmul.f32 %v15202_v34, %v7481_v29  ;;  %v7487_v20 = vadd.f32 %v12323_v35, %v16854_v30  ;;  %v15685_v29 = vld [vmem:[%s16312_s5] ss:$0 sm:$0xff]  ;;  %v16858_v35 = vld [vmem:[#allocation35_spill] sm:$0xff]  ;;  %12346 = vtanh.f32 %v7072_v58  ;;  %v16860_v30 = vld [vmem:[#allocation36_spill] sm:$0xff] }
 0x6f6   : > { %v12327_v59 = vpop.eup %12326  ;;  %v7486_v60 = vadd.f32 %v12325_v62, %v16855_v52  ;;  %v16859_v62 = vld [vmem:[#allocation37_spill] sm:$0xff]  ;;  %12348 = vtanh.f32 %v7069_v12  ;;  %v16861_v52 = vld [vmem:[#allocation38_spill] sm:$0xff] }
 0x6f7   : > { %7815 = vadd.xlane.f32.xlu1 %v7752_v17  ;;  %v7749_v17 = vmul.f32 %v15202_v34, %v7480_v13  ;;  %v12329_v45 = vpop.eup %12328  ;;  %v7519_v3 = vadd.f32 %v12327_v59, %v16856_v27  ;;  %12350 = vtanh.f32 %v7281_v37  ;;  %v7088_v37 = vadd.f32 %v15652_v56, %v15463_v55 }
 0x6f8   : > { %7813 = vadd.xlane.f32.xlu0 %v7751_v41  ;;  %v7884_v41 = vmul.f32 %v15202_v34, %v7487_v20  ;;  %v12331_v10 = vpop.eup %12330  ;;  %v7883_v5 = vmul.f32 %v15202_v34, %v7486_v60  ;;  %12352 = vtanh.f32 %v7278_v2 }
 0x6f9   : > { %v12333_v14 = vpop.eup %12332  ;;  %v8044_v34 = vmul.f32 %v15685_v29, %v7519_v3  ;;  %12354 = vtanh.f32 %v7096_v47 }
 0x6fa   : > { %v12335_v36 = vpop.eup %12334  ;;  %v7484_v16 = vadd.f32 %v12333_v14, %v16859_v62  ;;  %12356 = vtanh.f32 %v7093_v51  ;;  %v16865_v62 = vld [vmem:[#allocation50_spill] sm:$0xff]  ;;  %v7294_v51 = vadd.f32 %v15652_v56, %v15455_v39  ;;  %v16868_v39 = vld [vmem:[#allocation44_spill] sm:$0xff] }
 0x6fb   : > { %7644 = vadd.xlane.f32.xlu1 %v7583_v23  ;;  %v7518_v23 = vadd.f32 %v12329_v45, %v16857_v38  ;;  %v12337_v21 = vpop.eup %12336  ;;  %v7517_v20 = vadd.f32 %v12335_v36, %v16860_v30  ;;  %12358 = vtanh.f32 %v7305_v54  ;;  %v16869_v54 = vld [vmem:[#allocation46_spill] sm:$0xff] }
 0x6fc   : > { %7642 = vadd.xlane.f32.xlu0 %v7582_v31  ;;  %v7485_v31 = vadd.f32 %v12331_v10, %v16858_v35  ;;  %v12339_v59 = vpop.eup %12338  ;;  %v7516_v60 = vadd.f32 %v12337_v21, %v16861_v52  ;;  %v15706_v10 = vld [vmem:[#allocation2] ss:$0 sm:$0xff]  ;;  %v16864_v35 = vld [vmem:[#allocation48_spill] sm:$0xff]  ;;  %v7085_v21 = vadd.f32 %v15652_v56, %v15451_v28  ;;  %12360 = vtanh.f32 %v7302_v11 }
 0x6fd   : > { %v8043_v13 = vmul.f32 %v15685_v29, %v7518_v23  ;;  %v12341_v45 = vpop.eup %12340  ;;  %v8042_v57 = vmul.f32 %v15685_v29, %v7517_v20  ;;  %12362 = vtanh.f32 %v7088_v37 }
 0x6fe   : > { %v12343_v27 = vpop.eup %12342  ;;  %v8041_v3 = vmul.f32 %v15685_v29, %v7516_v60  ;;  %12364 = vtanh.f32 %v7085_v21 }
 0x6ff   : > { %7811 = vadd.xlane.f32.xlu1 %v7750_v19  ;;  %v7882_v19 = vmul.f32 %v15685_v29, %v7485_v31  ;;  %v12345_v23 = vpop.eup %12344  ;;  %v7523_v31 = vadd.f32 %v12343_v27, %v16864_v35  ;;  %12366 = vtanh.f32 %v7294_v51  ;;  %v7104_v51 = vadd.f32 %v15652_v56, %v15495_v6  ;;  %v16875_v6 = vld [vmem:[#allocation53_spill] sm:$0xff] }
 0x700   : > { %7809 = vadd.xlane.f32.xlu0 %v7749_v17  ;;  %v7881_v17 = vmul.f32 %v15685_v29, %v7484_v16  ;;  %v12347_v36 = vpop.eup %12346  ;;  %v7522_v16 = vadd.f32 %v12345_v23, %v16865_v62 }
 0x701   : > { %v12349_v63 = vpop.eup %12348  ;;  %v8048_v20 = vmul.f32 %v15685_v29, %v7523_v31 }
 0x702   : > { %v12351_v52 = vpop.eup %12350  ;;  %v8047_v60 = vmul.f32 %v15685_v29, %v7522_v16 }
 0x703   : > { %7919 = vadd.xlane.f32.xlu1 %v7884_v41  ;;  %v7491_v41 = vadd.f32 %v12339_v59, %v16862_v49  ;;  %v16866_v59 = vld [vmem:[#allocation43_spill] sm:$0xff]  ;;  %v12353_v47 = vpop.eup %12352 }
 0x704   : > { %7917 = vadd.xlane.f32.xlu0 %v7883_v5  ;;  %v16863_v5 = vld [vmem:[#allocation49_spill] sm:$0xff] }
 0x705   : > { %v7490_v38 = vadd.f32 %v12341_v45, %v16863_v5  ;;  %v16867_v45 = vld [vmem:[#allocation45_spill] sm:$0xff]  ;;  %v7521_v5 = vadd.f32 %v12351_v52, %v16868_v39  ;;  %v16874_v39 = vld [vmem:[#allocation51_spill] sm:$0xff] }
 0x706   : > { %v7488_v55 = vadd.f32 %v12349_v63, %v16867_v45  ;;  %v16871_v63 = vld [vmem:[#allocation57_spill] sm:$0xff]  ;;  %v16873_v45 = vld [vmem:[#allocation58_spill] sm:$0xff] }
 0x707   : > { %8079 = vadd.xlane.f32.xlu1 %v8044_v34  ;;  %v7888_v34 = vmul.f32 %v15685_v29, %v7491_v41 }
 0x708   : > { %8077 = vadd.xlane.f32.xlu0 %v8043_v13  ;;  %v7887_v13 = vmul.f32 %v15685_v29, %v7490_v38  ;;  %v12355_v38 = vpop.eup %12354  ;;  %v7885_v11 = vmul.f32 %v15685_v29, %v7488_v55 }
 0x70b   : > { %7915 = vadd.xlane.f32.xlu1 %v7882_v19 }
 0x70c   : > { %7913 = vadd.xlane.f32.xlu0 %v7881_v17  ;;  %v7489_v17 = vadd.f32 %v12347_v36, %v16866_v59  ;;  %v8046_v36 = vmul.f32 %v15685_v29, %v7521_v5 }
 0x70f   : > { %8075 = vadd.xlane.f32.xlu1 %v8042_v57  ;;  %v7591_v14 = vpop.xlane.xlu1 %7590  ;;  %v7297_v57 = vadd.f32 %v15652_v56, %v15467_v50  ;;  %v7520_v50 = vadd.f32 %v12353_v47, %v16869_v54  ;;  %v7101_v47 = vadd.f32 %v15652_v56, %v15483_v46  ;;  %v16876_v54 = vld [vmem:[#allocation99_spill] sm:$0xff] }
 0x710   : > { %8073 = vadd.xlane.f32.xlu0 %v8041_v3  ;;  %v7658_v12 = vadd.f32 %v15706_v10, %v7591_v14  ;;  %v7886_v3 = vmul.f32 %v15685_v29, %v7489_v17  ;;  %v12357_v14 = vpop.eup %12356  ;;  %v16872_v17 = vld [vmem:[#allocation56_spill] sm:$0xff] }
 0x711   : > { %v7758_v58 = vpop.xlane.xlu0 %7757  ;;  %12368 = vtanh.f32 %v7297_v57  ;;  %v12359_v62 = vpop.eup %12358  ;;  %v7494_v21 = vadd.f32 %v12357_v14, %v16871_v63  ;;  %v16877_v14 = vld [vmem:[#allocation101_spill] sm:$0xff] }
 0x712   : > { %v7819_v48 = vadd.f32 %v15706_v10, %v7758_v58  ;;  %7691 = vst.msk [vmem:[%s15714_s25 + $0x10] sm:$0xff] %vm7688_vm2, %v7658_v12  ;;  %v7112_v58 = vadd.f32 %v15652_v56, %v15489_v53  ;;  %v8045_v53 = vmul.f32 %v15685_v29, %v7520_v50  ;;  %v12361_v37 = vpop.eup %12360  ;;  %v7527_v52 = vadd.f32 %v12359_v62, %v16872_v17 }
 0x713   : > { %7927 = vadd.xlane.f32.xlu1 %v7888_v34  ;;  %v7109_v34 = vadd.f32 %v15652_v56, %v15477_v24  ;;  %v7318_v24 = vadd.f32 %v15652_v56, %v15481_v33  ;;  %v7310_v50 = vadd.f32 %v15652_v56, %v16876_v54 }
 0x714   : > { %7851 = vst.msk [vmem:[%s15714_s25 + $0x110] sm:$0xff] %vm7688_vm2, %v7819_v48  ;;  %7925 = vadd.xlane.f32.xlu0 %v7887_v13  ;;  %v7593_v2 = vpop.xlane.xlu1 %7592  ;;  %v16870_v48 = vld [vmem:[#allocation55_spill] sm:$0xff]  ;;  %12370 = vtanh.f32 %v7112_v58  ;;  %v7313_v58 = vadd.f32 %v15652_v56, %v16877_v14 }
 0x715   : > { %v7659_v19 = vadd.f32 %v15706_v10, %v7593_v2  ;;  %v7587_v30 = vpop.xlane.xlu0 %7586  ;;  %v7495_v13 = vadd.f32 %v12355_v38, %v16870_v48  ;;  %v7321_v2 = vadd.f32 %v15652_v56, %v15493_v44  ;;  %12372 = vtanh.f32 %v7109_v34 }
 0x716   : > { %v7656_v28 = vadd.f32 %v15706_v10, %v7587_v30  ;;  %v7526_v44 = vadd.f32 %v12361_v37, %v16873_v45  ;;  %v7128_v37 = vadd.f32 %v15652_v56, %v15521_v9 }
 0x717   : > { %7692 = vst.msk [vmem:[%s15714_s25 + $0x18] sm:$0xff] %vm7688_vm2, %v7659_v19  ;;  %8087 = vadd.xlane.f32.xlu1 %v8048_v20  ;;  %v7892_v59 = vmul.f32 %v15685_v29, %v7495_v13  ;;  %12374 = vtanh.f32 %v7321_v2  ;;  %v7125_v2 = vadd.f32 %v15652_v56, %v15509_v15 }
 0x718   : > { %7689 = vst.msk [vmem:[%s15714_s25] sm:$0xff] %vm7688_vm2, %v7656_v28  ;;  %8085 = vadd.xlane.f32.xlu0 %v8047_v60  ;;  %v7760_v49 = vpop.xlane.xlu1 %7759  ;;  %v12363_v28 = vpop.eup %12362  ;;  %v7891_v60 = vmul.f32 %v15685_v29, %v7494_v21  ;;  %12376 = vtanh.f32 %v7318_v24 }
 0x719   : > { %v7820_v41 = vadd.f32 %v15706_v10, %v7760_v49  ;;  %v7754_v27 = vpop.xlane.xlu0 %7753  ;;  %v12365_v55 = vpop.eup %12364  ;;  %v7493_v5 = vadd.f32 %v12363_v28, %v16874_v39  ;;  %12378 = vtanh.f32 %v7104_v51 }
 0x71a   : > { %v7817_v23 = vadd.f32 %v15706_v10, %v7754_v27  ;;  %v12367_v49 = vpop.eup %12366  ;;  %12380 = vtanh.f32 %v7101_v47 }
 0x71b   : > { %7852 = vst.msk [vmem:[%s15714_s25 + $0x118] sm:$0xff] %vm7688_vm2, %v7820_v41  ;;  %7923 = vadd.xlane.f32.xlu1 %v7886_v3  ;;  %v8052_v3 = vmul.f32 %v15685_v29, %v7527_v52  ;;  %v12369_v46 = vpop.eup %12368  ;;  %12382 = vtanh.f32 %v7310_v50 }
 0x71c   : > { %7849 = vst.msk [vmem:[%s15714_s25 + $0x100] sm:$0xff] %vm7688_vm2, %v7817_v23  ;;  %7921 = vadd.xlane.f32.xlu0 %v7885_v11  ;;  %v7756_v12 = vpop.xlane.xlu1 %7755  ;;  %v8051_v23 = vmul.f32 %v15685_v29, %v7526_v44  ;;  %v7492_v11 = vadd.f32 %v12365_v55, %v16875_v6  ;;  %12384 = vtanh.f32 %v7313_v58  ;;  %v16882_v44 = vld [vmem:[#allocation100_spill] sm:$0xff]  ;;  %v7337_v55 = vadd.f32 %v15652_v56, %v15525_v40 }
 0x71d   : > { %v7818_v35 = vadd.f32 %v15706_v10, %v7756_v12  ;;  %v7589_v31 = vpop.xlane.xlu0 %7588  ;;  %v7334_v15 = vadd.f32 %v15652_v56, %v16882_v44  ;;  %12386 = vtanh.f32 %v7128_v37 }
 0x71e   : > { %v7657_v16 = vadd.f32 %v15706_v10, %v7589_v31  ;;  %v7890_v31 = vmul.f32 %v15685_v29, %v7493_v5  ;;  %v12371_v13 = vpop.eup %12370  ;;  %12388 = vtanh.f32 %v7125_v2 }
 0x71f   : > { %7850 = vst.msk [vmem:[%s15714_s25 + $0x108] sm:$0xff] %vm7688_vm2, %v7818_v35  ;;  %8083 = vadd.xlane.f32.xlu1 %v8046_v36  ;;  %v16878_v36 = vld [vmem:[#allocation52_spill] sm:$0xff]  ;;  %v12373_v21 = vpop.eup %12372  ;;  %12390 = vtanh.f32 %v7337_v55 }
 0x720   : > { %7690 = vst.msk [vmem:[%s15714_s25 + $0x8] sm:$0xff] %vm7688_vm2, %v7657_v16  ;;  %8081 = vadd.xlane.f32.xlu0 %v8045_v53  ;;  %v7601_v19 = vpop.xlane.xlu1 %7600  ;;  %v7525_v48 = vadd.f32 %v12369_v46, %v16878_v36  ;;  %v7889_v16 = vmul.f32 %v15685_v29, %v7492_v11  ;;  %v16879_v53 = vld [vmem:[#allocation54_spill] sm:$0xff]  ;;  %v7120_v11 = vadd.f32 %v15652_v56, %v15527_v61  ;;  %12392 = vtanh.f32 %v7334_v15  ;;  %v16887_v61 = vld [vmem:[#allocation61_spill] sm:$0xff] }
 0x721   : > { %v7663_v30 = vadd.f32 %v15706_v10, %v7601_v19  ;;  %v7599_v20 = vpop.xlane.xlu0 %7598  ;;  %v7524_v63 = vadd.f32 %v12367_v49, %v16879_v53  ;;  %v12375_v52 = vpop.eup %12374  ;;  %v16884_v46 = vld [vmem:[#allocation66_spill] sm:$0xff]  ;;  %v16889_v53 = vld [vmem:[#allocation8_spill] sm:$0xff] }
 0x722   : > { %v7662_v33 = vadd.f32 %v15706_v10, %v7599_v20  ;;  %v8050_v20 = vmul.f32 %v15685_v29, %v7525_v48  ;;  %v12377_v45 = vpop.eup %12376  ;;  %12394 = vtanh.f32 %v7120_v11 }
 0x723   : > { %7696 = vst.msk [vmem:[%s15714_s25 + $0x38] sm:$0xff] %vm7688_vm2, %v7663_v30  ;;  %7935 = vadd.xlane.f32.xlu1 %v7892_v59  ;;  %v16880_v59 = vld [vmem:[#allocation63_spill] sm:$0xff]  ;;  %v8049_v9 = vmul.f32 %v15685_v29, %v7524_v63  ;;  %v7530_v40 = vadd.f32 %v12377_v45, %v16884_v46  ;;  %v7329_v63 = vadd.f32 %v15652_v56, %v16889_v53 }
 0x724   : > { %7695 = vst.msk [vmem:[%s15714_s25 + $0x30] sm:$0xff] %vm7688_vm2, %v7662_v33  ;;  %7933 = vadd.xlane.f32.xlu0 %v7891_v60  ;;  %v7768_v57 = vpop.xlane.xlu1 %7767  ;;  %v7499_v17 = vadd.f32 %v12371_v13, %v16880_v59  ;;  %v16881_v33 = vld [vmem:[#allocation65_spill] sm:$0xff]  ;;  %v7141_v45 = vadd.f32 %v15652_v56, %v15541_v32 }
 0x725   : > { %v7824_v41 = vadd.f32 %v15706_v10, %v7768_v57  ;;  %v7766_v27 = vpop.xlane.xlu0 %7765  ;;  %v7498_v60 = vadd.f32 %v12373_v21, %v16881_v33  ;;  %v8055_v48 = vmul.f32 %v15685_v29, %v7530_v40  ;;  %v7144_v33 = vadd.f32 %v15652_v56, %v15553_v0 }
 0x726   : > { %v7823_v38 = vadd.f32 %v15706_v10, %v7766_v27  ;;  %v7896_v49 = vmul.f32 %v15685_v29, %v7499_v17 }
 0x727   : > { %7856 = vst.msk [vmem:[%s15714_s25 + $0x138] sm:$0xff] %vm7688_vm2, %v7824_v41  ;;  %8095 = vadd.xlane.f32.xlu1 %v8052_v3  ;;  %v16883_v41 = vld [vmem:[#allocation64_spill] sm:$0xff]  ;;  %v12379_v3 = vpop.eup %12378  ;;  %v7895_v5 = vmul.f32 %v15685_v29, %v7498_v60 }
 0x728   : > { %7855 = vst.msk [vmem:[%s15714_s25 + $0x130] sm:$0xff] %vm7688_vm2, %v7823_v38  ;;  %8093 = vadd.xlane.f32.xlu0 %v8051_v23  ;;  %v7597_v12 = vpop.xlane.xlu1 %7596  ;;  %v7531_v27 = vadd.f32 %v12375_v52, %v16883_v41  ;;  %v12381_v38 = vpop.eup %12380  ;;  %v16885_v23 = vld [vmem:[#allocation7_spill] sm:$0xff]  ;;  %v16891_v52 = vld [vmem:[#allocation62_spill] sm:$0xff]  ;;  %v16893_v41 = vld [vmem:[#allocation73_spill] sm:$0xff] }
 0x729   : > { %v7661_v34 = vadd.f32 %v15706_v10, %v7597_v12  ;;  %v7595_v35 = vpop.xlane.xlu0 %7594  ;;  %v7117_v6 = vadd.f32 %v15652_v56, %v16885_v23  ;;  %v12383_v50 = vpop.eup %12382  ;;  %v7496_v13 = vadd.f32 %v12381_v38, %v16887_v61 }
 0x72a   : > { %v7660_v62 = vadd.f32 %v15706_v10, %v7595_v35  ;;  %v8056_v12 = vmul.f32 %v15685_v29, %v7531_v27 }
 0x72b   : > { %7694 = vst.msk [vmem:[%s15714_s25 + $0x28] sm:$0xff] %vm7688_vm2, %v7661_v34  ;;  %7931 = vadd.xlane.f32.xlu1 %v7890_v31  ;;  %v16886_v34 = vld [vmem:[#allocation59_spill] sm:$0xff]  ;;  %v12385_v31 = vpop.eup %12384  ;;  %12396 = vtanh.f32 %v7117_v6  ;;  %v7893_v17 = vmul.f32 %v15685_v29, %v7496_v13  ;;  %v16895_v6 = vld [vmem:[#allocation72_spill] sm:$0xff] }
 0x72c   : > { %7693 = vst.msk [vmem:[%s15714_s25 + $0x20] sm:$0xff] %vm7688_vm2, %v7660_v62  ;;  %7929 = vadd.xlane.f32.xlu0 %v7889_v16  ;;  %v7764_v24 = vpop.xlane.xlu1 %7763  ;;  %v7497_v35 = vadd.f32 %v12379_v3, %v16886_v34  ;;  %v16888_v62 = vld [vmem:[#allocation9_spill] sm:$0xff]  ;;  %v16897_v34 = vld [vmem:[#allocation3_spill] sm:$0xff] }
 0x72d   : > { %v7822_v19 = vadd.f32 %v15706_v10, %v7764_v24  ;;  %v7762_v30 = vpop.xlane.xlu0 %7761  ;;  %v7326_v16 = vadd.f32 %v15652_v56, %v16888_v62 }
 0x72e   : > { %v7821_v28 = vadd.f32 %v15706_v10, %v7762_v30  ;;  %v7894_v2 = vmul.f32 %v15685_v29, %v7497_v35  ;;  %v7133_v35 = vadd.f32 %v15652_v56, %v16897_v34 }
 0x72f   : > { %7854 = vst.msk [vmem:[%s15714_s25 + $0x128] sm:$0xff] %vm7688_vm2, %v7822_v19  ;;  %8091 = vadd.xlane.f32.xlu1 %v8050_v20  ;;  %v16890_v19 = vld [vmem:[#allocation60_spill] sm:$0xff]  ;;  %v12387_v20 = vpop.eup %12386  ;;  %12398 = vtanh.f32 %v7326_v16  ;;  %v16898_v16 = vld [vmem:[#allocation67_spill] sm:$0xff] }
 0x730   : > { %7853 = vst.msk [vmem:[%s15714_s25 + $0x120] sm:$0xff] %vm7688_vm2, %v7821_v28  ;;  %8089 = vadd.xlane.f32.xlu0 %v8049_v9  ;;  %v7609_v47 = vpop.xlane.xlu1 %7608  ;;  %v7529_v30 = vadd.f32 %v12385_v31, %v16890_v19  ;;  %v7528_v28 = vadd.f32 %v12383_v50, %v16891_v52  ;;  %v12389_v9 = vpop.eup %12388  ;;  %12400 = vtanh.f32 %v7329_v63  ;;  %v7136_v31 = vadd.f32 %v15652_v56, %v15559_v22  ;;  %v16899_v22 = vld [vmem:[#allocation69_spill] sm:$0xff] }
 0x731   : > { %v7667_v51 = vadd.f32 %v15706_v10, %v7609_v47  ;;  %v7607_v57 = vpop.xlane.xlu0 %7606  ;;  %v16892_v47 = vld [vmem:[#allocation71_spill] sm:$0xff]  ;;  %v7502_v27 = vadd.f32 %v12389_v9, %v16893_v41  ;;  %12402 = vtanh.f32 %v7144_v33  ;;  %v16902_v9 = vld [vmem:[#allocation68_spill] sm:$0xff] }
 0x732   : > { %v7666_v39 = vadd.f32 %v15706_v10, %v7607_v57  ;;  %v8054_v55 = vmul.f32 %v15685_v29, %v7529_v30  ;;  %v12391_v57 = vpop.eup %12390  ;;  %v8053_v0 = vmul.f32 %v15685_v29, %v7528_v28  ;;  %12404 = vtanh.f32 %v7141_v45  ;;  %v16901_v30 = vld [vmem:[#allocation4_spill] sm:$0xff] }
 0x733   : > { %7700 = vst.msk [vmem:[%s15714_s25 + $0x58] sm:$0xff] %vm7688_vm2, %v7667_v51  ;;  %7943 = vadd.xlane.f32.xlu1 %v7896_v49  ;;  %v7503_v51 = vadd.f32 %v12387_v20, %v16892_v47  ;;  %v12393_v3 = vpop.eup %12392  ;;  %v7535_v11 = vadd.f32 %v12391_v57, %v16895_v6  ;;  %v7345_v20 = vadd.f32 %v15652_v56, %v16901_v30 }
 0x734   : > { %7699 = vst.msk [vmem:[%s15714_s25 + $0x50] sm:$0xff] %vm7688_vm2, %v7666_v39  ;;  %7941 = vadd.xlane.f32.xlu0 %v7895_v5  ;;  %v7776_v54 = vpop.xlane.xlu1 %7775  ;;  %v16894_v39 = vld [vmem:[#allocation10_spill] sm:$0xff]  ;;  %v7353_v5 = vadd.f32 %v15652_v56, %v15557_v26  ;;  %v7369_v6 = vadd.f32 %v15652_v56, %v15589_v18 }
 0x735   : > { %v7828_v14 = vadd.f32 %v15706_v10, %v7776_v54  ;;  %v7774_v58 = vpop.xlane.xlu0 %7773  ;;  %v7350_v32 = vadd.f32 %v15652_v56, %v16894_v39  ;;  %v7900_v23 = vmul.f32 %v15685_v29, %v7503_v51  ;;  %v12395_v54 = vpop.eup %12394  ;;  %v8060_v62 = vmul.f32 %v15685_v29, %v7535_v11 }
 0x736   : > { %v7827_v36 = vadd.f32 %v15706_v10, %v7774_v58  ;;  %v16896_v58 = vld [vmem:[#allocation74_spill] sm:$0xff]  ;;  %12406 = vtanh.f32 %v7353_v5  ;;  %v7501_v53 = vadd.f32 %v12395_v54, %v16898_v16  ;;  %v7160_v51 = vadd.f32 %v15652_v56, %v15585_v25 }
 0x737   : > { %7860 = vst.msk [vmem:[%s15714_s25 + $0x158] sm:$0xff] %vm7688_vm2, %v7828_v14  ;;  %8103 = vadd.xlane.f32.xlu1 %v8056_v12  ;;  %v7899_v14 = vmul.f32 %v15685_v29, %v7502_v27  ;;  %v7534_v26 = vadd.f32 %v12393_v3, %v16896_v58  ;;  %v12397_v12 = vpop.eup %12396  ;;  %12408 = vtanh.f32 %v7350_v32  ;;  %v16904_v3 = vld [vmem:[#allocation79_spill] sm:$0xff]  ;;  %v16907_v58 = vld [vmem:[#allocation80_spill] sm:$0xff] }
 0x738   : > { %7859 = vst.msk [vmem:[%s15714_s25 + $0x150] sm:$0xff] %vm7688_vm2, %v7827_v36  ;;  %8101 = vadd.xlane.f32.xlu0 %v8055_v48  ;;  %v7605_v21 = vpop.xlane.xlu1 %7604  ;;  %12410 = vtanh.f32 %v7136_v31  ;;  %v7898_v28 = vmul.f32 %v15685_v29, %v7501_v53  ;;  %v16908_v31 = vld [vmem:[#allocation82_spill] sm:$0xff] }
 0x739   : > { %v7665_v37 = vadd.f32 %v15706_v10, %v7605_v21  ;;  %v7603_v24 = vpop.xlane.xlu0 %7602  ;;  %v12399_v48 = vpop.eup %12398  ;;  %12412 = vtanh.f32 %v7133_v35 }
 0x73a   : > { %v7664_v59 = vadd.f32 %v15706_v10, %v7603_v24  ;;  %v12401_v63 = vpop.eup %12400  ;;  %v7500_v24 = vadd.f32 %v12397_v12, %v16899_v22 }
 0x73b   : > { %7698 = vst.msk [vmem:[%s15714_s25 + $0x48] sm:$0xff] %vm7688_vm2, %v7665_v37  ;;  %7939 = vadd.xlane.f32.xlu1 %v7894_v2  ;;  %v8059_v37 = vmul.f32 %v15685_v29, %v7534_v26  ;;  %v16900_v2 = vld [vmem:[#allocation5_spill] sm:$0xff]  ;;  %v7533_v33 = vadd.f32 %v12401_v63, %v16902_v9 }
 0x73c   : > { %7697 = vst.msk [vmem:[%s15714_s25 + $0x40] sm:$0xff] %vm7688_vm2, %v7664_v59  ;;  %7937 = vadd.xlane.f32.xlu0 %v7893_v17  ;;  %v7772_v60 = vpop.xlane.xlu1 %7771  ;;  %v7342_v19 = vadd.f32 %v15652_v56, %v16900_v2 }
 0x73d   : > { %v7826_v44 = vadd.f32 %v15706_v10, %v7772_v60  ;;  %v7770_v15 = vpop.xlane.xlu0 %7769  ;;  %v12403_v60 = vpop.eup %12402  ;;  %v8058_v27 = vmul.f32 %v15685_v29, %v7533_v33 }
 0x73e   : > { %v7825_v49 = vadd.f32 %v15706_v10, %v7770_v15  ;;  %v16903_v15 = vld [vmem:[#allocation70_spill] sm:$0xff]  ;;  %v12405_v47 = vpop.eup %12404  ;;  %12414 = vtanh.f32 %v7342_v19  ;;  %v7507_v39 = vadd.f32 %v12403_v60, %v16904_v3 }
 0x73f   : > { %7858 = vst.msk [vmem:[%s15714_s25 + $0x148] sm:$0xff] %vm7688_vm2, %v7826_v44  ;;  %8099 = vadd.xlane.f32.xlu1 %v8054_v55  ;;  %v7897_v44 = vmul.f32 %v15685_v29, %v7500_v24  ;;  %v7532_v55 = vadd.f32 %v12399_v48, %v16903_v15  ;;  %12416 = vtanh.f32 %v7345_v20  ;;  %v16909_v48 = vld [vmem:[#allocation15_spill] sm:$0xff]  ;;  %v16912_v20 = vld [vmem:[#allocation17_spill] sm:$0xff] }
 0x740   : > { %7857 = vst.msk [vmem:[%s15714_s25 + $0x140] sm:$0xff] %vm7688_vm2, %v7825_v49  ;;  %8097 = vadd.xlane.f32.xlu0 %v8053_v0  ;;  %v7617_v46 = vpop.xlane.xlu1 %7616  ;;  %v7157_v49 = vadd.f32 %v15652_v56, %v15573_v8  ;;  %v12407_v32 = vpop.eup %12406  ;;  %12418 = vtanh.f32 %v7160_v51  ;;  %v16915_v51 = vld [vmem:[#allocation78_spill] sm:$0xff] }
 0x741   : > { %v7671_v40 = vadd.f32 %v15706_v10, %v7617_v46  ;;  %v7615_v38 = vpop.xlane.xlu0 %7614  ;;  %v8057_v25 = vmul.f32 %v15685_v29, %v7532_v55  ;;  %v16905_v46 = vld [vmem:[#allocation81_spill] sm:$0xff]  ;;  %v7539_v26 = vadd.f32 %v12407_v32, %v16907_v58 }
 0x742   : > { %v7670_v50 = vadd.f32 %v15706_v10, %v7615_v38  ;;  %v12409_v38 = vpop.eup %12408  ;;  %12420 = vtanh.f32 %v7157_v49 }
 0x743   : > { %7704 = vst.msk [vmem:[%s15714_s25 + $0x78] sm:$0xff] %vm7688_vm2, %v7671_v40  ;;  %7951 = vadd.xlane.f32.xlu1 %v7900_v23  ;;  %v7506_v40 = vadd.f32 %v12405_v47, %v16905_v46  ;;  %v16906_v23 = vld [vmem:[#allocation6_spill] sm:$0xff]  ;;  %v12411_v12 = vpop.eup %12410  ;;  %v7538_v18 = vadd.f32 %v12409_v38, %v16908_v31  ;;  %12422 = vtanh.f32 %v7369_v6  ;;  %v16917_v38 = vld [vmem:[#allocation89_spill] sm:$0xff]  ;;  %v16918_v6 = vld [vmem:[#allocation11_spill] sm:$0xff] }
 0x744   : > { %7703 = vst.msk [vmem:[%s15714_s25 + $0x70] sm:$0xff] %vm7688_vm2, %v7670_v50  ;;  %7949 = vadd.xlane.f32.xlu0 %v7899_v14  ;;  %v7784_v36 = vpop.xlane.xlu1 %7783  ;;  %v7366_v8 = vadd.f32 %v15652_v56, %v16906_v23  ;;  %v7904_v14 = vmul.f32 %v15685_v29, %v7507_v39 }
 0x745   : > { %v7832_v61 = vadd.f32 %v15706_v10, %v7784_v36  ;;  %v7782_v13 = vpop.xlane.xlu0 %7781  ;;  %v7903_v35 = vmul.f32 %v15685_v29, %v7506_v40  ;;  %v12413_v36 = vpop.eup %12412  ;;  %v8063_v19 = vmul.f32 %v15685_v29, %v7538_v18  ;;  %v16920_v18 = vld [vmem:[#allocation90_spill] sm:$0xff] }
 0x746   : > { %v7831_v21 = vadd.f32 %v15706_v10, %v7782_v13  ;;  %v7152_v13 = vadd.f32 %v15652_v56, %v15591_v43  ;;  %12424 = vtanh.f32 %v7366_v8  ;;  %v16911_v43 = vld [vmem:[#allocation77_spill] sm:$0xff] }
 0x747   : > { %7864 = vst.msk [vmem:[%s15714_s25 + $0x178] sm:$0xff] %vm7688_vm2, %v7832_v61  ;;  %8111 = vadd.xlane.f32.xlu1 %v8060_v62  ;;  %v7149_v61 = vadd.f32 %v15652_v56, %v16909_v48  ;;  %v7504_v30 = vadd.f32 %v12413_v36, %v16911_v43  ;;  %v16921_v48 = vld [vmem:[#allocation13_spill] sm:$0xff] }
 0x748   : > { %7863 = vst.msk [vmem:[%s15714_s25 + $0x170] sm:$0xff] %vm7688_vm2, %v7831_v21  ;;  %8109 = vadd.xlane.f32.xlu0 %v8059_v37  ;;  %v7613_v59 = vpop.xlane.xlu1 %7612  ;;  %v12415_v16 = vpop.eup %12414  ;;  %v8064_v21 = vmul.f32 %v15685_v29, %v7539_v26  ;;  %v16910_v37 = vld [vmem:[#allocation75_spill] sm:$0xff]  ;;  %12426 = vtanh.f32 %v7152_v13  ;;  %v16919_v26 = vld [vmem:[#allocation88_spill] sm:$0xff]  ;;  %v7377_v13 = vadd.f32 %v15652_v56, %v15627_v42  ;;  %v16923_v42 = vld [vmem:[#allocation85_spill] sm:$0xff] }
 0x749   : > { %v7669_v17 = vadd.f32 %v15706_v10, %v7613_v59  ;;  %v7611_v52 = vpop.xlane.xlu0 %7610  ;;  %v7505_v22 = vadd.f32 %v12411_v12, %v16910_v37  ;;  %v12417_v24 = vpop.eup %12416  ;;  %v7358_v59 = vadd.f32 %v15652_v56, %v16912_v20  ;;  %12428 = vtanh.f32 %v7149_v61  ;;  %v16922_v37 = vld [vmem:[#allocation83_spill] sm:$0xff] }
 0x74a   : > { %v7668_v45 = vadd.f32 %v15706_v10, %v7611_v52  ;;  %v12419_v15 = vpop.eup %12418  ;;  %v7901_v47 = vmul.f32 %v15685_v29, %v7504_v30  ;;  %v7374_v61 = vadd.f32 %v15652_v56, %v16921_v48  ;;  %v16924_v30 = vld [vmem:[#allocation18_spill] sm:$0xff] }
 0x74b   : > { %7702 = vst.msk [vmem:[%s15714_s25 + $0x68] sm:$0xff] %vm7688_vm2, %v7669_v17  ;;  %7947 = vadd.xlane.f32.xlu1 %v7898_v28  ;;  %v16913_v17 = vld [vmem:[#allocation16_spill] sm:$0xff]  ;;  %v7902_v60 = vmul.f32 %v15685_v29, %v7505_v22  ;;  %12430 = vtanh.f32 %v7358_v59  ;;  %v7382_v20 = vadd.f32 %v15652_v56, %v16924_v30 }
 0x74c   : > { %7701 = vst.msk [vmem:[%s15714_s25 + $0x60] sm:$0xff] %vm7688_vm2, %v7668_v45  ;;  %7945 = vadd.xlane.f32.xlu0 %v7897_v44  ;;  %v7780_v57 = vpop.xlane.xlu1 %7779  ;;  %v7361_v52 = vadd.f32 %v15652_v56, %v16913_v17  ;;  %v16914_v45 = vld [vmem:[#allocation76_spill] sm:$0xff]  ;;  %v12421_v49 = vpop.eup %12420 }
 0x74d   : > { %v7830_v0 = vadd.f32 %v15706_v10, %v7780_v57  ;;  %v7778_v41 = vpop.xlane.xlu0 %7777  ;;  %v7537_v44 = vadd.f32 %v12417_v24, %v16914_v45  ;;  %v7536_v57 = vadd.f32 %v12415_v16, %v16915_v51  ;;  %v12423_v46 = vpop.eup %12422  ;;  %v7510_v23 = vadd.f32 %v12421_v49, %v16917_v38  ;;  %v16925_v59 = vld [vmem:[#allocation12_spill] sm:$0xff] }
 0x74e   : > { %v7829_v5 = vadd.f32 %v15706_v10, %v7778_v41  ;;  %12432 = vtanh.f32 %v7361_v52  ;;  %v7543_v12 = vadd.f32 %v12423_v46, %v16919_v26  ;;  %v7385_v17 = vadd.f32 %v15652_v56, %v16925_v59 }
 0x74f   : > { %7862 = vst.msk [vmem:[%s15714_s25 + $0x168] sm:$0xff] %vm7688_vm2, %v7830_v0  ;;  %8107 = vadd.xlane.f32.xlu1 %v8058_v27  ;;  %v7176_v0 = vadd.f32 %v15652_v56, %v15617_v4  ;;  %v7173_v27 = vadd.f32 %v15652_v56, %v15605_v7  ;;  %v8062_v32 = vmul.f32 %v15685_v29, %v7537_v44 }
 0x750   : > { %7861 = vst.msk [vmem:[%s15714_s25 + $0x160] sm:$0xff] %vm7688_vm2, %v7829_v5  ;;  %8105 = vadd.xlane.f32.xlu0 %v8057_v25  ;;  %v7625_v11 = vpop.xlane.xlu1 %7624  ;;  %v16916_v5 = vld [vmem:[#allocation87_spill] sm:$0xff]  ;;  %v8061_v4 = vmul.f32 %v15685_v29, %v7536_v57  ;;  %v12425_v8 = vpop.eup %12424  ;;  %v7165_v7 = vadd.f32 %v15652_v56, %v16918_v6  ;;  %v7907_v31 = vmul.f32 %v15685_v29, %v7510_v23 }
 0x751   : > { %v7675_v54 = vadd.f32 %v15706_v10, %v7625_v11  ;;  %v7623_v50 = vpop.xlane.xlu0 %7622  ;;  %v7511_v25 = vadd.f32 %v12419_v15, %v16916_v5  ;;  %12434 = vtanh.f32 %v7176_v0  ;;  %v7168_v11 = vadd.f32 %v15652_v56, %v15623_v1  ;;  %v16927_v56 = vld [vmem:[#allocation86_spill] sm:$0xff]  ;;  %v16930_v6 = vld [vmem:[#allocation91_spill] sm:$0xff] }
 0x752   : > { %v7674_v34 = vadd.f32 %v15706_v10, %v7623_v50  ;;  %12436 = vtanh.f32 %v7173_v27  ;;  %v7542_v1 = vadd.f32 %v12425_v8, %v16920_v18  ;;  %v16928_v27 = vld [vmem:[#allocation95_spill] sm:$0xff]  ;;  %v16932_v18 = vld [vmem:[#allocation92_spill] sm:$0xff] }
 0x753   : > { %7708 = vst.msk [vmem:[%s15714_s25 + $0x98] sm:$0xff] %vm7688_vm2, %v7675_v54  ;;  %7959 = vadd.xlane.f32.xlu1 %v7904_v14  ;;  %v7908_v58 = vmul.f32 %v15685_v29, %v7511_v25  ;;  %12438 = vtanh.f32 %v7168_v11  ;;  %v16929_v25 = vld [vmem:[#allocation97_spill] sm:$0xff] }
 0x754   : > { %7707 = vst.msk [vmem:[%s15714_s25 + $0x90] sm:$0xff] %vm7688_vm2, %v7674_v34  ;;  %7957 = vadd.xlane.f32.xlu0 %v7903_v35  ;;  %v7792_v62 = vpop.xlane.xlu1 %7791  ;;  %v12427_v34 = vpop.eup %12426  ;;  %12440 = vtanh.f32 %v7165_v7 }
 0x755   : > { %v7836_v53 = vadd.f32 %v15706_v10, %v7792_v62  ;;  %v7790_v63 = vpop.xlane.xlu0 %7789  ;;  %v12429_v36 = vpop.eup %12428  ;;  %v7509_v22 = vadd.f32 %v12427_v34, %v16922_v37  ;;  %12442 = vtanh.f32 %v7377_v13  ;;  %v16933_v13 = vld [vmem:[#allocation94_spill] sm:$0xff] }
 0x756   : > { %v7835_v2 = vadd.f32 %v15706_v10, %v7790_v63  ;;  %v12431_v16 = vpop.eup %12430  ;;  %v7508_v43 = vadd.f32 %v12429_v36, %v16923_v42  ;;  %12444 = vtanh.f32 %v7374_v61  ;;  %v16935_v42 = vld [vmem:[#allocation98_spill] sm:$0xff] }
 0x757   : > { %7868 = vst.msk [vmem:[%s15714_s25 + $0x198] sm:$0xff] %vm7688_vm2, %v7836_v53  ;;  %8119 = vadd.xlane.f32.xlu1 %v8064_v21  ;;  %v8068_v21 = vmul.f32 %v15685_v29, %v7543_v12  ;;  %12446 = vtanh.f32 %v7385_v17 }
 0x758   : > { %7867 = vst.msk [vmem:[%s15714_s25 + $0x190] sm:$0xff] %vm7688_vm2, %v7835_v2  ;;  %8117 = vadd.xlane.f32.xlu0 %v8063_v19  ;;  %v7621_v28 = vpop.xlane.xlu1 %7620  ;;  %v12433_v24 = vpop.eup %12432  ;;  %v8067_v19 = vmul.f32 %v15685_v29, %v7542_v1  ;;  %12448 = vtanh.f32 %v7382_v20 }
 0x759   : > { %v7673_v9 = vadd.f32 %v15706_v10, %v7621_v28  ;;  %v7619_v33 = vpop.xlane.xlu0 %7618 }
 0x75a   : > { %v7672_v55 = vadd.f32 %v15706_v10, %v7619_v33  ;;  %v7906_v33 = vmul.f32 %v15685_v29, %v7509_v22  ;;  %v16934_v22 = vld [vmem:[#allocation96_spill] sm:$0xff] }
 0x75b   : > { %7706 = vst.msk [vmem:[%s15714_s25 + $0x88] sm:$0xff] %vm7688_vm2, %v7673_v9  ;;  %7955 = vadd.xlane.f32.xlu1 %v7902_v60  ;;  %v16926_v60 = vld [vmem:[#allocation84_spill] sm:$0xff]  ;;  %v12435_v44 = vpop.eup %12434 }
 0x75c   : > { %7705 = vst.msk [vmem:[%s15714_s25 + $0x80] sm:$0xff] %vm7688_vm2, %v7672_v55  ;;  %7953 = vadd.xlane.f32.xlu0 %v7901_v47  ;;  %v7788_v41 = vpop.xlane.xlu1 %7787  ;;  %v7541_v45 = vadd.f32 %v12433_v24, %v16926_v60  ;;  %v7905_v55 = vmul.f32 %v15685_v29, %v7508_v43  ;;  %v7540_v47 = vadd.f32 %v12431_v16, %v16927_v56  ;;  %v12437_v51 = vpop.eup %12436 }
 0x75d   : > { %v7834_v3 = vadd.f32 %v15706_v10, %v7788_v41  ;;  %v7786_v39 = vpop.xlane.xlu0 %7785  ;;  %v7514_v46 = vadd.f32 %v12437_v51, %v16929_v25 }
 0x75e   : > { %v7833_v40 = vadd.f32 %v15706_v10, %v7786_v39  ;;  %v8066_v41 = vmul.f32 %v15685_v29, %v7541_v45  ;;  %v12439_v39 = vpop.eup %12438  ;;  %v8065_v5 = vmul.f32 %v15685_v29, %v7540_v47 }
 0x75f   : > { %7866 = vst.msk [vmem:[%s15714_s25 + $0x188] sm:$0xff] %vm7688_vm2, %v7834_v3  ;;  %8115 = vadd.xlane.f32.xlu1 %v8062_v32  ;;  %v7515_v3 = vadd.f32 %v12435_v44, %v16928_v27  ;;  %v7513_v7 = vadd.f32 %v12439_v39, %v16930_v6  ;;  %v16110_v39 = vld [vmem:[#allocation2] ss:$0 sm:$0xff] }
 0x760   : > { %7865 = vst.msk [vmem:[%s15714_s25 + $0x180] sm:$0xff] %vm7688_vm2, %v7833_v40  ;;  %8113 = vadd.xlane.f32.xlu0 %v8061_v4  ;;  %v7633_v54 = vpop.xlane.xlu1 %7632  ;;  %v12441_v40 = vpop.eup %12440 }
 0x761   : > { %v7679_v50 = vadd.f32 %v15706_v10, %v7633_v54  ;;  %v7631_v14 = vpop.xlane.xlu0 %7630  ;;  %v7912_v8 = vmul.f32 %v15685_v29, %v7515_v3  ;;  %v12443_v11 = vpop.eup %12442 }
 0x762   : > { %v7678_v35 = vadd.f32 %v15706_v10, %v7631_v14  ;;  %v16931_v14 = vld [vmem:[#allocation93_spill] sm:$0xff]  ;;  %v12445_v26 = vpop.eup %12444  ;;  %v7545_v1 = vadd.f32 %v12443_v11, %v16932_v18 }
 0x763   : > { %7712 = vst.msk [vmem:[%s15714_s25 + $0xb8] sm:$0xff] %vm7688_vm2, %v7679_v50  ;;  %7967 = vadd.xlane.f32.xlu1 %v7908_v58  ;;  %v7911_v50 = vmul.f32 %v15685_v29, %v7514_v46  ;;  %v7512_v58 = vadd.f32 %v12441_v40, %v16931_v14  ;;  %v12447_v36 = vpop.eup %12446 }
 0x764   : > { %7711 = vst.msk [vmem:[%s15714_s25 + $0xb0] sm:$0xff] %vm7688_vm2, %v7678_v35  ;;  %7965 = vadd.xlane.f32.xlu0 %v7907_v31  ;;  %v7800_v62 = vpop.xlane.xlu1 %7799  ;;  %v7910_v31 = vmul.f32 %v15685_v29, %v7513_v7  ;;  %v12449_v16 = vpop.eup %12448  ;;  %v8070_v37 = vmul.f32 %v15685_v29, %v7545_v1  ;;  %v7547_v24 = vadd.f32 %v12447_v36, %v16934_v22 }
 0x765   : > { %v7840_v53 = vadd.f32 %v15706_v10, %v7800_v62  ;;  %v7798_v63 = vpop.xlane.xlu0 %7797  ;;  %v7909_v61 = vmul.f32 %v15685_v29, %v7512_v58  ;;  %v7544_v62 = vadd.f32 %v12445_v26, %v16933_v13  ;;  %v7546_v43 = vadd.f32 %v12449_v16, %v16935_v42 }
 0x766   : > { %v7839_v2 = vadd.f32 %v15706_v10, %v7798_v63  ;;  %v8072_v17 = vmul.f32 %v15685_v29, %v7547_v24 }
 0x767   : > { %7872 = vst.msk [vmem:[%s15714_s25 + $0x1b8] sm:$0xff] %vm7688_vm2, %v7840_v53  ;;  %8127 = vadd.xlane.f32.xlu1 %v8068_v21 }
 0x768   : > { %7871 = vst.msk [vmem:[%s15714_s25 + $0x1b0] sm:$0xff] %vm7688_vm2, %v7839_v2  ;;  %8125 = vadd.xlane.f32.xlu0 %v8067_v19  ;;  %v7629_v52 = vpop.xlane.xlu1 %7628  ;;  %v8069_v19 = vmul.f32 %v15685_v29, %v7544_v62 }
 0x769   : > { %v7677_v28 = vadd.f32 %v15706_v10, %v7629_v52  ;;  %v7627_v9 = vpop.xlane.xlu0 %7626 }
 0x76a   : > { %v7676_v15 = vadd.f32 %v15706_v10, %v7627_v9 }
 0x76b   : > { %7710 = vst.msk [vmem:[%s15714_s25 + $0xa8] sm:$0xff] %vm7688_vm2, %v7677_v28  ;;  %7963 = vadd.xlane.f32.xlu1 %v7906_v33  ;;  %v8071_v28 = vmul.f32 %v15685_v29, %v7546_v43 }
 0x76c   : > { %7709 = vst.msk [vmem:[%s15714_s25 + $0xa0] sm:$0xff] %vm7688_vm2, %v7676_v15  ;;  %7961 = vadd.xlane.f32.xlu0 %v7905_v55  ;;  %v7796_v57 = vpop.xlane.xlu1 %7795 }
 0x76d   : > { %v7838_v49 = vadd.f32 %v15706_v10, %v7796_v57  ;;  %v7794_v0 = vpop.xlane.xlu0 %7793 }
 0x76e   : > { %v7837_v32 = vadd.f32 %v15706_v10, %v7794_v0 }
 0x76f   : > { %7870 = vst.msk [vmem:[%s15714_s25 + $0x1a8] sm:$0xff] %vm7688_vm2, %v7838_v49  ;;  %8123 = vadd.xlane.f32.xlu1 %v8066_v41 }
 0x770   : > { %7869 = vst.msk [vmem:[%s15714_s25 + $0x1a0] sm:$0xff] %vm7688_vm2, %v7837_v32  ;;  %8121 = vadd.xlane.f32.xlu0 %v8065_v5  ;;  %v7641_v4 = vpop.xlane.xlu1 %7640 }
 0x771   : > { %v7683_v38 = vadd.f32 %v15706_v10, %v7641_v4  ;;  %v7639_v23 = vpop.xlane.xlu0 %7638 }
 0x772   : > { %v7682_v54 = vadd.f32 %v15706_v10, %v7639_v23 }
 0x773   : > { %7716 = vst.msk [vmem:[%s15714_s25 + $0xd8] sm:$0xff] %vm7688_vm2, %v7683_v38  ;;  %7975 = vadd.xlane.f32.xlu1 %v7912_v8 }
 0x774   : > { %7715 = vst.msk [vmem:[%s15714_s25 + $0xd0] sm:$0xff] %vm7688_vm2, %v7682_v54  ;;  %7973 = vadd.xlane.f32.xlu0 %v7911_v50  ;;  %v7808_v12 = vpop.xlane.xlu1 %7807 }
 0x775   : > { %v7844_v34 = vadd.f32 %v15706_v10, %v7808_v12  ;;  %v7806_v35 = vpop.xlane.xlu0 %7805 }
 0x776   : > { %v7843_v48 = vadd.f32 %v15706_v10, %v7806_v35 }
 0x777   : > { %7876 = vst.msk [vmem:[%s15714_s25 + $0x1d8] sm:$0xff] %vm7688_vm2, %v7844_v34  ;;  %7971 = vadd.xlane.f32.xlu1 %v7910_v31 }
 0x778   : > { %7875 = vst.msk [vmem:[%s15714_s25 + $0x1d0] sm:$0xff] %vm7688_vm2, %v7843_v48  ;;  %7969 = vadd.xlane.f32.xlu0 %v7909_v61  ;;  %v7637_v53 = vpop.xlane.xlu1 %7636 }
 0x779   : > { %v7681_v63 = vadd.f32 %v15706_v10, %v7637_v53  ;;  %v7635_v21 = vpop.xlane.xlu0 %7634 }
 0x77a   : > { %v7680_v2 = vadd.f32 %v15706_v10, %v7635_v21 }
 0x77b   : > { %7714 = vst.msk [vmem:[%s15714_s25 + $0xc8] sm:$0xff] %vm7688_vm2, %v7681_v63  ;;  %8131 = vadd.xlane.f32.xlu1 %v8070_v37 }
 0x77c   : > { %7713 = vst.msk [vmem:[%s15714_s25 + $0xc0] sm:$0xff] %vm7688_vm2, %v7680_v2  ;;  %8129 = vadd.xlane.f32.xlu0 %v8069_v19  ;;  %v7804_v30 = vpop.xlane.xlu1 %7803 }
 0x77d   : > { %v7842_v20 = vadd.f32 %v15706_v10, %v7804_v30  ;;  %v7802_v59 = vpop.xlane.xlu0 %7801 }
 0x77e   : > { %v7841_v52 = vadd.f32 %v15706_v10, %v7802_v59 }
 0x77f   : > { %7874 = vst.msk [vmem:[%s15714_s25 + $0x1c8] sm:$0xff] %vm7688_vm2, %v7842_v20  ;;  %8135 = vadd.xlane.f32.xlu1 %v8072_v17 }
 0x780   : > { %7873 = vst.msk [vmem:[%s15714_s25 + $0x1c0] sm:$0xff] %vm7688_vm2, %v7841_v52  ;;  %8133 = vadd.xlane.f32.xlu0 %v8071_v28  ;;  %v7649_v9 = vpop.xlane.xlu1 %7648 }
 0x781   : > { %v7687_v33 = vadd.f32 %v15706_v10, %v7649_v9  ;;  %v7647_v60 = vpop.xlane.xlu0 %7646 }
 0x782   : > { %v7686_v45 = vadd.f32 %v15706_v10, %v7647_v60 }
 0x783   : > { %7720 = vst.msk [vmem:[%s15714_s25 + $0xf8] sm:$0xff] %vm7688_vm2, %v7687_v33 }
 0x784   : > { %7719 = vst.msk [vmem:[%s15714_s25 + $0xf0] sm:$0xff] %vm7688_vm2, %v7686_v45  ;;  %v7816_v29 = vpop.xlane.xlu1 %7815 }
 0x785   : > { %v7848_v44 = vadd.f32 %v15706_v10, %v7816_v29  ;;  %v7814_v15 = vpop.xlane.xlu0 %7813 }
 0x786   : > { %v7847_v55 = vadd.f32 %v15706_v10, %v7814_v15 }
 0x787   : > { %7880 = vst.msk [vmem:[%s15714_s25 + $0x1f8] sm:$0xff] %vm7688_vm2, %v7848_v44 }
 0x788   : > { %7879 = vst.msk [vmem:[%s15714_s25 + $0x1f0] sm:$0xff] %vm7688_vm2, %v7847_v55  ;;  %v7645_v56 = vpop.xlane.xlu1 %7644 }
 0x789   : > { %v7685_v47 = vadd.f32 %v15706_v10, %v7645_v56  ;;  %v7643_v51 = vpop.xlane.xlu0 %7642 }
 0x78a   : > { %v7684_v57 = vadd.f32 %v15706_v10, %v7643_v51 }
 0x78b   : > { %7718 = vst.msk [vmem:[%s15714_s25 + $0xe8] sm:$0xff] %vm7688_vm2, %v7685_v47 }
 0x78c   : > { %7717 = vst.msk [vmem:[%s15714_s25 + $0xe0] sm:$0xff] %vm7688_vm2, %v7684_v57  ;;  %v7812_v49 = vpop.xlane.xlu1 %7811 }
 0x78d   : > { %v7846_v0 = vadd.f32 %v15706_v10, %v7812_v49  ;;  %v7810_v41 = vpop.xlane.xlu0 %7809 }
 0x78e   : > { %v7845_v27 = vadd.f32 %v15706_v10, %v7810_v41 }
 0x78f   : > { %7878 = vst.msk [vmem:[%s15714_s25 + $0x1e8] sm:$0xff] %vm7688_vm2, %v7846_v0 }
 0x790   : > { %7877 = vst.msk [vmem:[%s15714_s25 + $0x1e0] sm:$0xff] %vm7688_vm2, %v7845_v27  ;;  %v7920_v3 = vpop.xlane.xlu1 %7919 }
 0x791   : > { %v7980_v32 = vadd.f32 %v16110_v39, %v7920_v3  ;;  %v7918_v5 = vpop.xlane.xlu0 %7917 }
 0x792   : > { %v7979_v25 = vadd.f32 %v16110_v39, %v7918_v5 }
 0x793   : > { %8012 = vst.msk [vmem:[%s15714_s25 + $0x218] sm:$0xff] %vm7688_vm2, %v7980_v32 }
 0x794   : > { %8011 = vst.msk [vmem:[%s15714_s25 + $0x210] sm:$0xff] %vm7688_vm2, %v7979_v25  ;;  %v8080_v46 = vpop.xlane.xlu1 %8079 }
 0x795   : > { %v8140_v10 = vadd.f32 %v16110_v39, %v8080_v46  ;;  %v8078_v40 = vpop.xlane.xlu0 %8077 }
 0x796   : > { %v8139_v4 = vadd.f32 %v16110_v39, %v8078_v40 }
 0x797   : > { %8172 = vst.msk [vmem:[%s15714_s25 + $0x318] sm:$0xff] %vm7688_vm2, %v8140_v10 }
 0x798   : > { %8171 = vst.msk [vmem:[%s15714_s25 + $0x310] sm:$0xff] %vm7688_vm2, %v8139_v4  ;;  %v7916_v38 = vpop.xlane.xlu1 %7915 }
 0x799   : > { %v7978_v23 = vadd.f32 %v16110_v39, %v7916_v38  ;;  %v7914_v8 = vpop.xlane.xlu0 %7913 }
 0x79a   : > { %v7977_v6 = vadd.f32 %v16110_v39, %v7914_v8 }
 0x79b   : > { %8010 = vst.msk [vmem:[%s15714_s25 + $0x208] sm:$0xff] %vm7688_vm2, %v7978_v23 }
 0x79c   : > { %8009 = vst.msk [vmem:[%s15714_s25 + $0x200] sm:$0xff] %vm7688_vm2, %v7977_v6  ;;  %v8076_v7 = vpop.xlane.xlu1 %8075 }
 0x79d   : > { %v8138_v11 = vadd.f32 %v16110_v39, %v8076_v7  ;;  %v8074_v54 = vpop.xlane.xlu0 %8073 }
 0x79e   : > { %v8137_v50 = vadd.f32 %v16110_v39, %v8074_v54 }
 0x79f   : > { %8170 = vst.msk [vmem:[%s15714_s25 + $0x308] sm:$0xff] %vm7688_vm2, %v8138_v11 }
 0x7a0   : > { %8169 = vst.msk [vmem:[%s15714_s25 + $0x300] sm:$0xff] %vm7688_vm2, %v8137_v50  ;;  %v7928_v14 = vpop.xlane.xlu1 %7927 }
 0x7a1   : > { %v7984_v58 = vadd.f32 %v16110_v39, %v7928_v14  ;;  %v7926_v26 = vpop.xlane.xlu0 %7925 }
 0x7a2   : > { %v7983_v12 = vadd.f32 %v16110_v39, %v7926_v26 }
 0x7a3   : > { %8016 = vst.msk [vmem:[%s15714_s25 + $0x238] sm:$0xff] %vm7688_vm2, %v7984_v58 }
 0x7a4   : > { %8015 = vst.msk [vmem:[%s15714_s25 + $0x230] sm:$0xff] %vm7688_vm2, %v7983_v12  ;;  %v8088_v34 = vpop.xlane.xlu1 %8087 }
 0x7a5   : > { %v8144_v35 = vadd.f32 %v16110_v39, %v8088_v34  ;;  %v8086_v31 = vpop.xlane.xlu0 %8085 }
 0x7a6   : > { %v8143_v18 = vadd.f32 %v16110_v39, %v8086_v31 }
 0x7a7   : > { %8176 = vst.msk [vmem:[%s15714_s25 + $0x338] sm:$0xff] %vm7688_vm2, %v8144_v35 }
 0x7a8   : > { %8175 = vst.msk [vmem:[%s15714_s25 + $0x330] sm:$0xff] %vm7688_vm2, %v8143_v18  ;;  %v7924_v1 = vpop.xlane.xlu1 %7923 }
 0x7a9   : > { %v7982_v36 = vadd.f32 %v16110_v39, %v7924_v1  ;;  %v7922_v48 = vpop.xlane.xlu0 %7921 }
 0x7aa   : > { %v7981_v61 = vadd.f32 %v16110_v39, %v7922_v48 }
 0x7ab   : > { %8014 = vst.msk [vmem:[%s15714_s25 + $0x228] sm:$0xff] %vm7688_vm2, %v7982_v36 }
 0x7ac   : > { %8013 = vst.msk [vmem:[%s15714_s25 + $0x220] sm:$0xff] %vm7688_vm2, %v7981_v61  ;;  %v8084_v13 = vpop.xlane.xlu1 %8083 }
 0x7ad   : > { %v8142_v62 = vadd.f32 %v16110_v39, %v8084_v13  ;;  %v8082_v16 = vpop.xlane.xlu0 %8081 }
 0x7ae   : > { %v8141_v53 = vadd.f32 %v16110_v39, %v8082_v16 }
 0x7af   : > { %8174 = vst.msk [vmem:[%s15714_s25 + $0x328] sm:$0xff] %vm7688_vm2, %v8142_v62 }
 0x7b0   : > { %8173 = vst.msk [vmem:[%s15714_s25 + $0x320] sm:$0xff] %vm7688_vm2, %v8141_v53  ;;  %v7936_v63 = vpop.xlane.xlu1 %7935 }
 0x7b1   : > { %v7988_v21 = vadd.f32 %v16110_v39, %v7936_v63  ;;  %v7934_v37 = vpop.xlane.xlu0 %7933 }
 0x7b2   : > { %v7987_v22 = vadd.f32 %v16110_v39, %v7934_v37 }
 0x7b3   : > { %8020 = vst.msk [vmem:[%s15714_s25 + $0x258] sm:$0xff] %vm7688_vm2, %v7988_v21 }
 0x7b4   : > { %8019 = vst.msk [vmem:[%s15714_s25 + $0x250] sm:$0xff] %vm7688_vm2, %v7987_v22  ;;  %v8096_v24 = vpop.xlane.xlu1 %8095 }
 0x7b5   : > { %v8148_v2 = vadd.f32 %v16110_v39, %v8096_v24  ;;  %v8094_v19 = vpop.xlane.xlu0 %8093 }
 0x7b6   : > { %v8147_v42 = vadd.f32 %v16110_v39, %v8094_v19 }
 0x7b7   : > { %8180 = vst.msk [vmem:[%s15714_s25 + $0x358] sm:$0xff] %vm7688_vm2, %v8148_v2 }
 0x7b8   : > { %8179 = vst.msk [vmem:[%s15714_s25 + $0x350] sm:$0xff] %vm7688_vm2, %v8147_v42  ;;  %v7932_v43 = vpop.xlane.xlu1 %7931 }
 0x7b9   : > { %v7986_v30 = vadd.f32 %v16110_v39, %v7932_v43  ;;  %v7930_v20 = vpop.xlane.xlu0 %7929 }
 0x7ba   : > { %v7985_v59 = vadd.f32 %v16110_v39, %v7930_v20 }
 0x7bb   : > { %8018 = vst.msk [vmem:[%s15714_s25 + $0x248] sm:$0xff] %vm7688_vm2, %v7986_v30 }
 0x7bc   : > { %8017 = vst.msk [vmem:[%s15714_s25 + $0x240] sm:$0xff] %vm7688_vm2, %v7985_v59  ;;  %v8092_v17 = vpop.xlane.xlu1 %8091 }
 0x7bd   : > { %v8146_v52 = vadd.f32 %v16110_v39, %v8092_v17  ;;  %v8090_v28 = vpop.xlane.xlu0 %8089 }
 0x7be   : > { %v8145_v9 = vadd.f32 %v16110_v39, %v8090_v28 }
 0x7bf   : > { %8178 = vst.msk [vmem:[%s15714_s25 + $0x348] sm:$0xff] %vm7688_vm2, %v8146_v52 }
 0x7c0   : > { %8177 = vst.msk [vmem:[%s15714_s25 + $0x340] sm:$0xff] %vm7688_vm2, %v8145_v9  ;;  %v7944_v33 = vpop.xlane.xlu1 %7943 }
 0x7c1   : > { %v7992_v60 = vadd.f32 %v16110_v39, %v7944_v33  ;;  %v7942_v45 = vpop.xlane.xlu0 %7941 }
 0x7c2   : > { %v7991_v29 = vadd.f32 %v16110_v39, %v7942_v45 }
 0x7c3   : > { %8024 = vst.msk [vmem:[%s15714_s25 + $0x278] sm:$0xff] %vm7688_vm2, %v7992_v60 }
 0x7c4   : > { %8023 = vst.msk [vmem:[%s15714_s25 + $0x270] sm:$0xff] %vm7688_vm2, %v7991_v29  ;;  %v8104_v44 = vpop.xlane.xlu1 %8103 }
 0x7c5   : > { %v8152_v15 = vadd.f32 %v16110_v39, %v8104_v44  ;;  %v8102_v55 = vpop.xlane.xlu0 %8101 }
 0x7c6   : > { %v8151_v56 = vadd.f32 %v16110_v39, %v8102_v55 }
 0x7c7   : > { %8184 = vst.msk [vmem:[%s15714_s25 + $0x378] sm:$0xff] %vm7688_vm2, %v8152_v15 }
 0x7c8   : > { %8183 = vst.msk [vmem:[%s15714_s25 + $0x370] sm:$0xff] %vm7688_vm2, %v8151_v56  ;;  %v7940_v47 = vpop.xlane.xlu1 %7939 }
 0x7c9   : > { %v7990_v51 = vadd.f32 %v16110_v39, %v7940_v47  ;;  %v7938_v57 = vpop.xlane.xlu0 %7937 }
 0x7ca   : > { %v7989_v49 = vadd.f32 %v16110_v39, %v7938_v57 }
 0x7cb   : > { %8022 = vst.msk [vmem:[%s15714_s25 + $0x268] sm:$0xff] %vm7688_vm2, %v7990_v51 }
 0x7cc   : > { %8021 = vst.msk [vmem:[%s15714_s25 + $0x260] sm:$0xff] %vm7688_vm2, %v7989_v49  ;;  %v8100_v0 = vpop.xlane.xlu1 %8099 }
 0x7cd   : > { %v8150_v41 = vadd.f32 %v16110_v39, %v8100_v0  ;;  %v8098_v27 = vpop.xlane.xlu0 %8097 }
 0x7ce   : > { %v8149_v3 = vadd.f32 %v16110_v39, %v8098_v27 }
 0x7cf   : > { %8182 = vst.msk [vmem:[%s15714_s25 + $0x368] sm:$0xff] %vm7688_vm2, %v8150_v41 }
 0x7d0   : > { %8181 = vst.msk [vmem:[%s15714_s25 + $0x360] sm:$0xff] %vm7688_vm2, %v8149_v3  ;;  %v7952_v32 = vpop.xlane.xlu1 %7951 }
 0x7d1   : > { %v7996_v5 = vadd.f32 %v16110_v39, %v7952_v32  ;;  %v7950_v25 = vpop.xlane.xlu0 %7949 }
 0x7d2   : > { %v7995_v46 = vadd.f32 %v16110_v39, %v7950_v25 }
 0x7d3   : > { %8028 = vst.msk [vmem:[%s15714_s25 + $0x298] sm:$0xff] %vm7688_vm2, %v7996_v5 }
 0x7d4   : > { %8027 = vst.msk [vmem:[%s15714_s25 + $0x290] sm:$0xff] %vm7688_vm2, %v7995_v46  ;;  %v8112_v10 = vpop.xlane.xlu1 %8111 }
 0x7d5   : > { %v8156_v40 = vadd.f32 %v16110_v39, %v8112_v10  ;;  %v8110_v4 = vpop.xlane.xlu0 %8109 }
 0x7d6   : > { %v8155_v38 = vadd.f32 %v16110_v39, %v8110_v4 }
 0x7d7   : > { %8188 = vst.msk [vmem:[%s15714_s25 + $0x398] sm:$0xff] %vm7688_vm2, %v8156_v40 }
 0x7d8   : > { %8187 = vst.msk [vmem:[%s15714_s25 + $0x390] sm:$0xff] %vm7688_vm2, %v8155_v38  ;;  %v7948_v23 = vpop.xlane.xlu1 %7947 }
 0x7d9   : > { %v7994_v8 = vadd.f32 %v16110_v39, %v7948_v23  ;;  %v7946_v6 = vpop.xlane.xlu0 %7945 }
 0x7da   : > { %v7993_v7 = vadd.f32 %v16110_v39, %v7946_v6 }
 0x7db   : > { %8026 = vst.msk [vmem:[%s15714_s25 + $0x288] sm:$0xff] %vm7688_vm2, %v7994_v8 }
 0x7dc   : > { %8025 = vst.msk [vmem:[%s15714_s25 + $0x280] sm:$0xff] %vm7688_vm2, %v7993_v7  ;;  %v8108_v11 = vpop.xlane.xlu1 %8107 }
 0x7dd   : > { %v8154_v54 = vadd.f32 %v16110_v39, %v8108_v11  ;;  %v8106_v50 = vpop.xlane.xlu0 %8105 }
 0x7de   : > { %v8153_v14 = vadd.f32 %v16110_v39, %v8106_v50 }
 0x7df   : > { %8186 = vst.msk [vmem:[%s15714_s25 + $0x388] sm:$0xff] %vm7688_vm2, %v8154_v54 }
 0x7e0   : > { %8185 = vst.msk [vmem:[%s15714_s25 + $0x380] sm:$0xff] %vm7688_vm2, %v8153_v14  ;;  %v7960_v58 = vpop.xlane.xlu1 %7959 }
 0x7e1   : > { %v8000_v26 = vadd.f32 %v16110_v39, %v7960_v58  ;;  %v7958_v12 = vpop.xlane.xlu0 %7957 }
 0x7e2   : > { %v7999_v34 = vadd.f32 %v16110_v39, %v7958_v12 }
 0x7e3   : > { %8032 = vst.msk [vmem:[%s15714_s25 + $0x2b8] sm:$0xff] %vm7688_vm2, %v8000_v26 }
 0x7e4   : > { %8031 = vst.msk [vmem:[%s15714_s25 + $0x2b0] sm:$0xff] %vm7688_vm2, %v7999_v34  ;;  %v8120_v35 = vpop.xlane.xlu1 %8119 }
 0x7e5   : > { %v8160_v31 = vadd.f32 %v16110_v39, %v8120_v35  ;;  %v8118_v18 = vpop.xlane.xlu0 %8117 }
 0x7e6   : > { %v8159_v1 = vadd.f32 %v16110_v39, %v8118_v18 }
 0x7e7   : > { %8192 = vst.msk [vmem:[%s15714_s25 + $0x3b8] sm:$0xff] %vm7688_vm2, %v8160_v31 }
 0x7e8   : > { %8191 = vst.msk [vmem:[%s15714_s25 + $0x3b0] sm:$0xff] %vm7688_vm2, %v8159_v1  ;;  %v7956_v36 = vpop.xlane.xlu1 %7955 }
 0x7e9   : > { %v7998_v48 = vadd.f32 %v16110_v39, %v7956_v36  ;;  %v7954_v61 = vpop.xlane.xlu0 %7953 }
 0x7ea   : > { %v7997_v13 = vadd.f32 %v16110_v39, %v7954_v61 }
 0x7eb   : > { %8030 = vst.msk [vmem:[%s15714_s25 + $0x2a8] sm:$0xff] %vm7688_vm2, %v7998_v48 }
 0x7ec   : > { %8029 = vst.msk [vmem:[%s15714_s25 + $0x2a0] sm:$0xff] %vm7688_vm2, %v7997_v13  ;;  %v8116_v62 = vpop.xlane.xlu1 %8115 }
 0x7ed   : > { %v8158_v16 = vadd.f32 %v16110_v39, %v8116_v62  ;;  %v8114_v53 = vpop.xlane.xlu0 %8113 }
 0x7ee   : > { %v8157_v63 = vadd.f32 %v16110_v39, %v8114_v53 }
 0x7ef   : > { %8190 = vst.msk [vmem:[%s15714_s25 + $0x3a8] sm:$0xff] %vm7688_vm2, %v8158_v16 }
 0x7f0   : > { %8189 = vst.msk [vmem:[%s15714_s25 + $0x3a0] sm:$0xff] %vm7688_vm2, %v8157_v63  ;;  %v7968_v21 = vpop.xlane.xlu1 %7967 }
 0x7f1   : > { %v8004_v37 = vadd.f32 %v16110_v39, %v7968_v21  ;;  %v7966_v22 = vpop.xlane.xlu0 %7965 }
 0x7f2   : > { %v8003_v24 = vadd.f32 %v16110_v39, %v7966_v22 }
 0x7f3   : > { %8036 = vst.msk [vmem:[%s15714_s25 + $0x2d8] sm:$0xff] %vm7688_vm2, %v8004_v37 }
 0x7f4   : > { %8035 = vst.msk [vmem:[%s15714_s25 + $0x2d0] sm:$0xff] %vm7688_vm2, %v8003_v24  ;;  %v8128_v2 = vpop.xlane.xlu1 %8127 }
 0x7f5   : > { %v8164_v19 = vadd.f32 %v16110_v39, %v8128_v2  ;;  %v8126_v42 = vpop.xlane.xlu0 %8125 }
 0x7f6   : > { %v8163_v43 = vadd.f32 %v16110_v39, %v8126_v42 }
 0x7f7   : > { %8196 = vst.msk [vmem:[%s15714_s25 + $0x3d8] sm:$0xff] %vm7688_vm2, %v8164_v19 }
 0x7f8   : > { %8195 = vst.msk [vmem:[%s15714_s25 + $0x3d0] sm:$0xff] %vm7688_vm2, %v8163_v43  ;;  %v7964_v30 = vpop.xlane.xlu1 %7963 }
 0x7f9   : > { %v8002_v20 = vadd.f32 %v16110_v39, %v7964_v30  ;;  %v7962_v59 = vpop.xlane.xlu0 %7961 }
 0x7fa   : > { %v8001_v17 = vadd.f32 %v16110_v39, %v7962_v59 }
 0x7fb   : > { %8034 = vst.msk [vmem:[%s15714_s25 + $0x2c8] sm:$0xff] %vm7688_vm2, %v8002_v20 }
 0x7fc   : > { %8033 = vst.msk [vmem:[%s15714_s25 + $0x2c0] sm:$0xff] %vm7688_vm2, %v8001_v17  ;;  %v8124_v52 = vpop.xlane.xlu1 %8123 }
 0x7fd   : > { %v8162_v28 = vadd.f32 %v16110_v39, %v8124_v52  ;;  %v8122_v9 = vpop.xlane.xlu0 %8121 }
 0x7fe   : > { %v8161_v33 = vadd.f32 %v16110_v39, %v8122_v9 }
 0x7ff   : > { %8194 = vst.msk [vmem:[%s15714_s25 + $0x3c8] sm:$0xff] %vm7688_vm2, %v8162_v28 }
 0x800   : > { %8193 = vst.msk [vmem:[%s15714_s25 + $0x3c0] sm:$0xff] %vm7688_vm2, %v8161_v33  ;;  %v7976_v60 = vpop.xlane.xlu1 %7975 }
 0x801   : > { %v8008_v45 = vadd.f32 %v16110_v39, %v7976_v60  ;;  %v7974_v29 = vpop.xlane.xlu0 %7973 }
 0x802   : > { %v8007_v44 = vadd.f32 %v16110_v39, %v7974_v29 }
 0x803   : > { %8040 = vst.msk [vmem:[%s15714_s25 + $0x2f8] sm:$0xff] %vm7688_vm2, %v8008_v45 }
 0x804   : > { %8039 = vst.msk [vmem:[%s15714_s25 + $0x2f0] sm:$0xff] %vm7688_vm2, %v8007_v44  ;;  %v7972_v15 = vpop.xlane.xlu1 %7971 }
 0x805   : > { %v8006_v55 = vadd.f32 %v16110_v39, %v7972_v15  ;;  %v7970_v56 = vpop.xlane.xlu0 %7969 }
 0x806   : > { %v8005_v47 = vadd.f32 %v16110_v39, %v7970_v56 }
 0x807   : > { %8038 = vst.msk [vmem:[%s15714_s25 + $0x2e8] sm:$0xff] %vm7688_vm2, %v8006_v55 }
 0x808   : > { %8037 = vst.msk [vmem:[%s15714_s25 + $0x2e0] sm:$0xff] %vm7688_vm2, %v8005_v47  ;;  %v8132_v51 = vpop.xlane.xlu1 %8131 }
 0x809   : > { %v8166_v57 = vadd.f32 %v16110_v39, %v8132_v51  ;;  %v8130_v49 = vpop.xlane.xlu0 %8129 }
 0x80a   : > { %v8165_v0 = vadd.f32 %v16110_v39, %v8130_v49 }
 0x80b   : > { %8198 = vst.msk [vmem:[%s15714_s25 + $0x3e8] sm:$0xff] %vm7688_vm2, %v8166_v57 }
 0x80c   : > { %8197 = vst.msk [vmem:[%s15714_s25 + $0x3e0] sm:$0xff] %vm7688_vm2, %v8165_v0  ;;  %v8136_v41 = vpop.xlane.xlu1 %8135 }
 0x80d   : > { %v8168_v27 = vadd.f32 %v16110_v39, %v8136_v41  ;;  %v8134_v3 = vpop.xlane.xlu0 %8133 }
 0x80e   : > { %v8167_v32 = vadd.f32 %v16110_v39, %v8134_v3 }
 0x80f   : > { %8200 = vst.msk [vmem:[%s15714_s25 + $0x3f8] sm:$0xff] %vm7688_vm2, %v8168_v27 }
 0x810   : > { %8199 = vst.msk [vmem:[%s15714_s25 + $0x3f0] sm:$0xff] %vm7688_vm2, %v8167_v32 }
 0x811 PF: > { %s19_s26 = sadd.s32 1, %s12470_s26  }
 0x812   : > { %p16_p4 = scmp.ge.s32.totalorder %s19_s26, 4  }
 0x814   :  { %18 = sbr.rel (!%p16_p4) target bundleno = 3 (0x3), region = 88 }

</bundles_post_ra>
